<compile_context>
chip_gen: v7x
topology: tpu7x:2x2x1
jax: 0.10.0
libtpu: 0.0.40
codegen_flags: <defaults>
</compile_context>

<pallas_src>
import functools

import jax
import jax.numpy as jnp
import numpy as np
from jax import lax
from jax.experimental import pallas as pl
from jax.experimental.pallas import tpu as pltpu


# --------------------------------------------------------------------------- #
# Fused Pallas kernel (one image per grid step, layout = (channels, H*W))
# --------------------------------------------------------------------------- #
def _lsk_block_kernel(x_ref, xpos_ref,
                      w0_ref, b0_ref, ws_ref, bs_ref,
                      w1_ref, b1_ref, w2_ref, b2_ref,
                      wqa_ref, wqm_ref, bq_ref,
                      wc_ref, bc_ref,
                      o_ref,
                      pad0_ref, pads_ref, padq_ref,
                      *, H, W, C):
    f32 = jnp.float32
    HW = H * W
    x = x_ref[0]                        # (C, HW)
    xpos = xpos_ref[...]                # (1, HW) int32: x coordinate of each lane

    def lane_mask(ox):
        """1.0 where the horizontally-shifted tap stays inside its image row."""
        xo = xpos + ox
        return jnp.where((xo >= 0) & (xo < W), 1.0, 0.0)      # (1, HW) f32

    def spatial_conv(inp, w, pad_ref, K, dil, p):
        """'same' KxK conv with per-row (per-channel) filters on the flattened
        spatial axis.  inp: (rows, HW); w: (rows, K*K);
        pad_ref: VMEM scratch (rows, HW + 2*pad) with pad = p*W + p.

        With the horizontal lane mask applied, every vertically out-of-image
        tap lands inside the zero halos, so no vertical mask is needed."""
        rows = inp.shape[0]
        pad = p * W + p
        # Halos re-zeroed per step (cheap vs. K*K tap loads; keeps the grid
        # axis megacore-"parallel" safe -- no cross-iteration scratch state).
        pad_ref[:, 0:pad] = jnp.zeros((rows, pad), f32)
        pad_ref[:, pad + HW:pad + HW + pad] = jnp.zeros((rows, pad), f32)
        pad_ref[:, pad:pad + HW] = inp
        acc = jnp.zeros((rows, HW), f32)
        for kx in range(K):
            ox = kx * dil - p
            inner = jnp.zeros((rows, HW), f32)
            for ky in range(K):
                oy = ky * dil - p
                s = oy * W + ox
                t = ky * K + kx
                patch = pad_ref[:, pad + s:pad + s + HW]        # (rows, HW)
                inner = inner + patch * w[:, t:t + 1]
            if ox == 0:
                acc = acc + inner                               # mask is all-ones
            else:
                acc = acc + inner * lane_mask(ox)               # hoisted per column
        return acc

    # conv0: depthwise 5x5, padding 2
    attn1 = spatial_conv(x, w0_ref[...], pad0_ref, K=5, dil=1, p=2) + b0_ref[...]
    # conv_spatial: depthwise 7x7, dilation 3, padding 9
    attn2 = spatial_conv(attn1, ws_ref[...], pads_ref, K=7, dil=3, p=9) + bs_ref[...]

    # conv1 / conv2: 1x1 projections C -> C//2 on the MXU (spatial stays on lanes).
    p1 = jnp.dot(w1_ref[...], attn1, preferred_element_type=f32) + b1_ref[...]
    p2 = jnp.dot(w2_ref[...], attn2, preferred_element_type=f32) + b2_ref[...]

    # Channel mean / max over concat([p1, p2]) (= C channels total), sublane reduce.
    avg = (jnp.sum(p1, axis=0, keepdims=True) +
           jnp.sum(p2, axis=0, keepdims=True)) * (1.0 / C)
    mx = jnp.maximum(jnp.max(p1, axis=0, keepdims=True),
                     jnp.max(p2, axis=0, keepdims=True))

    # conv_squeeze: dense 7x7 conv, 2 -> 2 channels, padding 3, then sigmoid.
    Kq, pq = 7, 3
    padq = pq * W + pq
    padq_ref[:, 0:padq] = jnp.zeros((2, padq), f32)
    padq_ref[:, padq + HW:padq + HW + padq] = jnp.zeros((2, padq), f32)
    padq_ref[0:1, padq:padq + HW] = avg
    padq_ref[1:2, padq:padq + HW] = mx
    wqa = wqa_ref[...]                  # (2, 49): coefficients applied to the avg row
    wqm = wqm_ref[...]                  # (2, 49): coefficients applied to the max row
    accq = jnp.zeros((2, HW), f32)
    for kx in range(Kq):
        ox = kx - pq
        inner = jnp.zeros((2, HW), f32)
        for ky in range(Kq):
            s = (ky - pq) * W + ox
            t = ky * Kq + kx
            patch = padq_ref[:, padq + s:padq + s + HW]         # (2, HW)
            inner = (inner
                     + patch[0:1, :] * wqa[:, t:t + 1]
                     + patch[1:2, :] * wqm[:, t:t + 1])
        if ox == 0:
            accq = accq + inner
        else:
            accq = accq + inner * lane_mask(ox)
    sig = jax.nn.sigmoid(accq + bq_ref[...])                    # (2, HW)

    # Gated mix + final 1x1 conv (C//2 -> C, MXU) + residual multiply with x.
    attn = p1 * sig[0:1, :] + p2 * sig[1:2, :]                  # (C//2, HW)
    attn = jnp.dot(wc_ref[...], attn, preferred_element_type=f32) + bc_ref[...]
    o_ref[0] = x * attn


# --------------------------------------------------------------------------- #
# Wrapper
# --------------------------------------------------------------------------- #
def lsk_forward_pallas(x_nchw, kp):
    """x_nchw: (N, C, H, W) float32; kp: dict of kernel-layout parameters."""
    N, C, H, W = x_nchw.shape
    HW = H * W
    xf = x_nchw.reshape(N, C, HW)                       # trailing-dims merge (free)
    xpos = (jnp.arange(HW, dtype=jnp.int32) % W).reshape(1, HW)

    def full2(arr):                                     # whole (2-D) array per step
        return pl.BlockSpec(arr.shape, lambda n: (0, 0))

    img = pl.BlockSpec((1, C, HW), lambda n: (n, 0, 0))

    args = (xf, xpos,
            kp["w0"], kp["b0"], kp["ws"], kp["bs"],
            kp["w1"], kp["b1"], kp["w2"], kp["b2"],
            kp["wqa"], kp["wqm"], kp["bq"],
            kp["wc"], kp["bc"])
    in_specs = [img] + [full2(a) for a in args[1:]]

    pad0 = 2 * W + 2            # conv0:        5x5, pad 2
    pads = 9 * W + 9            # conv_spatial: 7x7 dil 3, pad 9
    padq = 3 * W + 3            # conv_squeeze: 7x7, pad 3

    out = pl.pallas_call(
        functools.partial(_lsk_block_kernel, H=H, W=W, C=C),
        out_shape=jax.ShapeDtypeStruct((N, C, HW), jnp.float32),
        grid=(N,),
        in_specs=in_specs,
        out_specs=img,
        scratch_shapes=[
            pltpu.VMEM((C, HW + 2 * pad0), jnp.float32),
            pltpu.VMEM((C, HW + 2 * pads), jnp.float32),
            pltpu.VMEM((2, HW + 2 * padq), jnp.float32),
        ],
        compiler_params=pltpu.CompilerParams(
            dimension_semantics=("parallel",),
            vmem_limit_bytes=48 * 1024 * 1024,
        ),
    )(*args)
    return out.reshape(N, C, H, W)


def prepare_kernel_params(raw):
    """Flatten PyTorch-layout conv weights into the kernel's 2-D layouts."""
    C = raw["w0"].shape[0]
    Ch = raw["w1"].shape[0]
    return dict(
        w0=raw["w0"].reshape(C, 25), b0=raw["b0"].reshape(C, 1),
        ws=raw["ws"].reshape(C, 49), bs=raw["bs"].reshape(C, 1),
        w1=raw["w1"].reshape(Ch, C), b1=raw["b1"].reshape(Ch, 1),
        w2=raw["w2"].reshape(Ch, C), b2=raw["b2"].reshape(Ch, 1),
        wqa=raw["wq"][:, 0, :, :].reshape(2, 49),
        wqm=raw["wq"][:, 1, :, :].reshape(2, 49),
        bq=raw["bq"].reshape(2, 1),
        wc=raw["wc"].reshape(C, Ch), bc=raw["bc"].reshape(C, 1),
    )


# --------------------------------------------------------------------------- #
# Pure-JAX reference (NCHW), for the correctness check
# --------------------------------------------------------------------------- #
def _conv_ref(x, w, b, *, padding, groups=1, dilation=1):
    dn = lax.conv_dimension_numbers(x.shape, w.shape, ("NCHW", "OIHW", "NCHW"))
    y = lax.conv_general_dilated(
        x, w, window_strides=(1, 1),
        padding=[(padding, padding), (padding, padding)],
        rhs_dilation=(dilation, dilation),
        dimension_numbers=dn, feature_group_count=groups)
    return y + b.reshape(1, -1, 1, 1)


def lsk_forward_ref(x, raw):
    C = x.shape[1]
    a1 = _conv_ref(x, raw["w0"], raw["b0"], padding=2, groups=C)
    a2 = _conv_ref(a1, raw["ws"], raw["bs"], padding=9, groups=C, dilation=3)
    p1 = _conv_ref(a1, raw["w1"], raw["b1"], padding=0)
    p2 = _conv_ref(a2, raw["w2"], raw["b2"], padding=0)
    attn = jnp.concatenate([p1, p2], axis=1)
    avg = jnp.mean(attn, axis=1, keepdims=True)
    mx = jnp.max(attn, axis=1, keepdims=True)
    agg = jnp.concatenate([avg, mx], axis=1)
    sig = jax.nn.sigmoid(_conv_ref(agg, raw["wq"], raw["bq"], padding=3))
    attn = p1 * sig[:, 0:1] + p2 * sig[:, 1:2]
    attn = _conv_ref(attn, raw["wc"], raw["bc"], padding=0)
    return x * attn


# --------------------------------------------------------------------------- #
if __name__ == "__main__":
    N, C, H, W = 2, 4, 16, 16          # dim = 4  ->  dim // 2 = 2
    Ch = C // 2
    keys = jax.random.split(jax.random.PRNGKey(0), 13)
    s = 0.1
    nrm = jax.random.normal

    x = nrm(keys[0], (N, C, H, W), jnp.float32)          # PyTorch NCHW input

    # PyTorch-layout parameters (shapes follow the nn.Module __init__).
    raw = dict(
        w0=s * nrm(keys[1], (C, 1, 5, 5), jnp.float32),      # conv0 (depthwise)
        b0=s * nrm(keys[2], (C,), jnp.float32),
        ws=s * nrm(keys[3], (C, 1, 7, 7), jnp.float32),      # conv_spatial (dw, dil 3)
        bs=s * nrm(keys[4], (C,), jnp.float32),
        w1=s * nrm(keys[5], (Ch, C, 1, 1), jnp.float32),     # conv1 (1x1)
        b1=s * nrm(keys[6], (Ch,), jnp.float32),
        w2=s * nrm(keys[7], (Ch, C, 1, 1), jnp.float32),     # conv2 (1x1)
        b2=s * nrm(keys[8], (Ch,), jnp.float32),
        wq=s * nrm(keys[9], (2, 2, 7, 7), jnp.float32),      # conv_squeeze
        bq=s * nrm(keys[10], (2,), jnp.float32),
        wc=s * nrm(keys[11], (C, Ch, 1, 1), jnp.float32),    # conv (1x1)
        bc=s * nrm(keys[12], (C,), jnp.float32),
    )
    kp = prepare_kernel_params(raw)

    out = jax.jit(lsk_forward_pallas)(x, kp)
    out = jax.block_until_ready(out)

    ref = lsk_forward_ref(x, raw)
    np.testing.assert_allclose(np.asarray(out), np.asarray(ref),
                               atol=3e-3, rtol=3e-3)

    print("KERNEL_OK")
</pallas_src>

<mosaic_0001>
module attributes {stable_mosaic.version = 11 : i64} {
  func.func @_lsk_block_kernel(%arg0: i32, %arg1: memref<1x4x256xf32, #tpu.memory_space<vmem>>, %arg2: memref<1x256xi32, #tpu.memory_space<vmem>>, %arg3: memref<4x25xf32, #tpu.memory_space<vmem>>, %arg4: memref<4x1xf32, #tpu.memory_space<vmem>>, %arg5: memref<4x49xf32, #tpu.memory_space<vmem>>, %arg6: memref<4x1xf32, #tpu.memory_space<vmem>>, %arg7: memref<2x4xf32, #tpu.memory_space<vmem>>, %arg8: memref<2x1xf32, #tpu.memory_space<vmem>>, %arg9: memref<2x4xf32, #tpu.memory_space<vmem>>, %arg10: memref<2x1xf32, #tpu.memory_space<vmem>>, %arg11: memref<2x49xf32, #tpu.memory_space<vmem>>, %arg12: memref<2x49xf32, #tpu.memory_space<vmem>>, %arg13: memref<2x1xf32, #tpu.memory_space<vmem>>, %arg14: memref<4x2xf32, #tpu.memory_space<vmem>>, %arg15: memref<4x1xf32, #tpu.memory_space<vmem>>, %arg16: memref<1x4x256xf32, #tpu.memory_space<vmem>>, %arg17: memref<4x324xf32, #tpu.memory_space<vmem>>, %arg18: memref<4x562xf32, #tpu.memory_space<vmem>>, %arg19: memref<2x358xf32, #tpu.memory_space<vmem>>) attributes {dimension_semantics = [#tpu.dimension_semantics<parallel>], iteration_bounds = array<i64: 2>, scalar_prefetch = 0 : i64, scratch_operands = 3 : i64, tpu.core_type = #tpu.core_type<tc>, window_params = [{transform_indices = @transform_0, window_bounds = array<i64: 1, 4, 256>}, {pipeline_mode = #tpu.pipeline_mode<synchronous>, transform_indices = @transform_1, window_bounds = array<i64: 1, 256>}, {pipeline_mode = #tpu.pipeline_mode<synchronous>, transform_indices = @transform_2, window_bounds = array<i64: 4, 25>}, {pipeline_mode = #tpu.pipeline_mode<synchronous>, transform_indices = @transform_3, window_bounds = array<i64: 4, 1>}, {pipeline_mode = #tpu.pipeline_mode<synchronous>, transform_indices = @transform_4, window_bounds = array<i64: 4, 49>}, {pipeline_mode = #tpu.pipeline_mode<synchronous>, transform_indices = @transform_5, window_bounds = array<i64: 4, 1>}, {pipeline_mode = #tpu.pipeline_mode<synchronous>, transform_indices = @transform_6, window_bounds = array<i64: 2, 4>}, {pipeline_mode = #tpu.pipeline_mode<synchronous>, transform_indices = @transform_7, window_bounds = array<i64: 2, 1>}, {pipeline_mode = #tpu.pipeline_mode<synchronous>, transform_indices = @transform_8, window_bounds = array<i64: 2, 4>}, {pipeline_mode = #tpu.pipeline_mode<synchronous>, transform_indices = @transform_9, window_bounds = array<i64: 2, 1>}, {pipeline_mode = #tpu.pipeline_mode<synchronous>, transform_indices = @transform_10, window_bounds = array<i64: 2, 49>}, {pipeline_mode = #tpu.pipeline_mode<synchronous>, transform_indices = @transform_11, window_bounds = array<i64: 2, 49>}, {pipeline_mode = #tpu.pipeline_mode<synchronous>, transform_indices = @transform_12, window_bounds = array<i64: 2, 1>}, {pipeline_mode = #tpu.pipeline_mode<synchronous>, transform_indices = @transform_13, window_bounds = array<i64: 4, 2>}, {pipeline_mode = #tpu.pipeline_mode<synchronous>, transform_indices = @transform_14, window_bounds = array<i64: 4, 1>}, {transform_indices = @transform_15, window_bounds = array<i64: 1, 4, 256>}]} {
    %c0 = arith.constant 0 : index
    %c0_0 = arith.constant 0 : index
    %c0_1 = arith.constant 0 : index
    %0 = vector.load %arg1[%c0, %c0_0, %c0_1] : memref<1x4x256xf32, #tpu.memory_space<vmem>>, vector<1x4x256xf32>
    %1 = vector.shape_cast %0 : vector<1x4x256xf32> to vector<4x256xf32>
    %c0_2 = arith.constant 0 : index
    %c0_3 = arith.constant 0 : index
    %2 = vector.load %arg2[%c0_2, %c0_3] : memref<1x256xi32, #tpu.memory_space<vmem>>, vector<1x256xi32>
    %c0_4 = arith.constant 0 : index
    %c0_5 = arith.constant 0 : index
    %3 = vector.load %arg3[%c0_4, %c0_5] : memref<4x25xf32, #tpu.memory_space<vmem>>, vector<4x25xf32>
    %cst = arith.constant 0.000000e+00 : f32
    %4 = vector.broadcast %cst : f32 to vector<4x34xf32>
    %c0_6 = arith.constant 0 : index
    %c0_7 = arith.constant 0 : index
    %5 = vector.load %arg17[%c0_6, %c0_7] : memref<4x324xf32, #tpu.memory_space<vmem>>, vector<4x34xf32>
    tpu.vector_store %arg17[%c0_6, %c0_7], %4 {strides = array<i32>} : memref<4x324xf32, #tpu.memory_space<vmem>>, vector<4x34xf32>,
    %cst_8 = arith.constant 0.000000e+00 : f32
    %6 = vector.broadcast %cst_8 : f32 to vector<4x34xf32>
    %c0_9 = arith.constant 0 : index
    %c290 = arith.constant 290 : index
    %7 = vector.load %arg17[%c0_9, %c290] : memref<4x324xf32, #tpu.memory_space<vmem>>, vector<4x34xf32>
    tpu.vector_store %arg17[%c0_9, %c290], %6 {strides = array<i32>} : memref<4x324xf32, #tpu.memory_space<vmem>>, vector<4x34xf32>,
    %c0_10 = arith.constant 0 : index
    %c34 = arith.constant 34 : index
    %8 = vector.load %arg17[%c0_10, %c34] : memref<4x324xf32, #tpu.memory_space<vmem>>, vector<4x256xf32>
    tpu.vector_store %arg17[%c0_10, %c34], %1 {strides = array<i32>} : memref<4x324xf32, #tpu.memory_space<vmem>>, vector<4x256xf32>,
    %cst_11 = arith.constant 0.000000e+00 : f32
    %9 = vector.broadcast %cst_11 : f32 to vector<4x256xf32>
    %cst_12 = arith.constant 0.000000e+00 : f32
    %10 = vector.broadcast %cst_12 : f32 to vector<4x256xf32>
    %c0_13 = arith.constant 0 : index
    %c0_14 = arith.constant 0 : index
    %11 = vector.load %arg17[%c0_13, %c0_14] : memref<4x324xf32, #tpu.memory_space<vmem>>, vector<4x256xf32>
    %12 = vector.extract_strided_slice %3 {offsets = [0, 0], sizes = [4, 1], strides = [1, 1]} : vector<4x25xf32> to vector<4x1xf32>
    %13 = vector.broadcast %12 : vector<4x1xf32> to vector<4x256xf32>
    %14 = arith.mulf %11, %13 : vector<4x256xf32>
    %15 = arith.addf %10, %14 : vector<4x256xf32>
    %c0_15 = arith.constant 0 : index
    %c16 = arith.constant 16 : index
    %16 = vector.load %arg17[%c0_15, %c16] : memref<4x324xf32, #tpu.memory_space<vmem>>, vector<4x256xf32>
    %17 = vector.extract_strided_slice %3 {offsets = [0, 5], sizes = [4, 1], strides = [1, 1]} : vector<4x25xf32> to vector<4x1xf32>
    %18 = vector.broadcast %17 : vector<4x1xf32> to vector<4x256xf32>
    %19 = arith.mulf %16, %18 : vector<4x256xf32>
    %20 = arith.addf %15, %19 : vector<4x256xf32>
    %c0_16 = arith.constant 0 : index
    %c32 = arith.constant 32 : index
    %21 = vector.load %arg17[%c0_16, %c32] : memref<4x324xf32, #tpu.memory_space<vmem>>, vector<4x256xf32>
    %22 = vector.extract_strided_slice %3 {offsets = [0, 10], sizes = [4, 1], strides = [1, 1]} : vector<4x25xf32> to vector<4x1xf32>
    %23 = vector.broadcast %22 : vector<4x1xf32> to vector<4x256xf32>
    %24 = arith.mulf %21, %23 : vector<4x256xf32>
    %25 = arith.addf %20, %24 : vector<4x256xf32>
    %c0_17 = arith.constant 0 : index
    %c48 = arith.constant 48 : index
    %26 = vector.load %arg17[%c0_17, %c48] : memref<4x324xf32, #tpu.memory_space<vmem>>, vector<4x256xf32>
    %27 = vector.extract_strided_slice %3 {offsets = [0, 15], sizes = [4, 1], strides = [1, 1]} : vector<4x25xf32> to vector<4x1xf32>
    %28 = vector.broadcast %27 : vector<4x1xf32> to vector<4x256xf32>
    %29 = arith.mulf %26, %28 : vector<4x256xf32>
    %30 = arith.addf %25, %29 : vector<4x256xf32>
    %c0_18 = arith.constant 0 : index
    %c64 = arith.constant 64 : index
    %31 = vector.load %arg17[%c0_18, %c64] : memref<4x324xf32, #tpu.memory_space<vmem>>, vector<4x256xf32>
    %32 = vector.extract_strided_slice %3 {offsets = [0, 20], sizes = [4, 1], strides = [1, 1]} : vector<4x25xf32> to vector<4x1xf32>
    %33 = vector.broadcast %32 : vector<4x1xf32> to vector<4x256xf32>
    %34 = arith.mulf %31, %33 : vector<4x256xf32>
    %35 = arith.addf %30, %34 : vector<4x256xf32>
    %c-2_i32 = arith.constant -2 : i32
    %36 = vector.broadcast %c-2_i32 : i32 to vector<1x256xi32>
    %37 = arith.addi %2, %36 : vector<1x256xi32>
    %c0_i32 = arith.constant 0 : i32
    %38 = vector.broadcast %c0_i32 : i32 to vector<1x256xi32>
    %39 = arith.cmpi sge, %37, %38 : vector<1x256xi32>
    %c16_i32 = arith.constant 16 : i32
    %40 = vector.broadcast %c16_i32 : i32 to vector<1x256xi32>
    %41 = arith.cmpi slt, %37, %40 : vector<1x256xi32>
    %42 = arith.andi %39, %41 : vector<1x256xi1>
    %cst_19 = arith.constant 1.000000e+00 : f32
    %cst_20 = arith.constant 0.000000e+00 : f32
    %43 = vector.broadcast %cst_19 : f32 to vector<1x256xf32>
    %44 = vector.broadcast %cst_20 : f32 to vector<1x256xf32>
    %45 = arith.select %42, %43, %44 : vector<1x256xi1>, vector<1x256xf32>
    %46 = vector.broadcast %45 : vector<1x256xf32> to vector<4x256xf32>
    %47 = arith.mulf %35, %46 : vector<4x256xf32>
    %48 = arith.addf %9, %47 : vector<4x256xf32>
    %cst_21 = arith.constant 0.000000e+00 : f32
    %49 = vector.broadcast %cst_21 : f32 to vector<4x256xf32>
    %c0_22 = arith.constant 0 : index
    %c1 = arith.constant 1 : index
    %50 = vector.load %arg17[%c0_22, %c1] : memref<4x324xf32, #tpu.memory_space<vmem>>, vector<4x256xf32>
    %51 = vector.extract_strided_slice %3 {offsets = [0, 1], sizes = [4, 1], strides = [1, 1]} : vector<4x25xf32> to vector<4x1xf32>
    %52 = vector.broadcast %51 : vector<4x1xf32> to vector<4x256xf32>
    %53 = arith.mulf %50, %52 : vector<4x256xf32>
    %54 = arith.addf %49, %53 : vector<4x256xf32>
    %c0_23 = arith.constant 0 : index
    %c17 = arith.constant 17 : index
    %55 = vector.load %arg17[%c0_23, %c17] : memref<4x324xf32, #tpu.memory_space<vmem>>, vector<4x256xf32>
    %56 = vector.extract_strided_slice %3 {offsets = [0, 6], sizes = [4, 1], strides = [1, 1]} : vector<4x25xf32> to vector<4x1xf32>
    %57 = vector.broadcast %56 : vector<4x1xf32> to vector<4x256xf32>
    %58 = arith.mulf %55, %57 : vector<4x256xf32>
    %59 = arith.addf %54, %58 : vector<4x256xf32>
    %c0_24 = arith.constant 0 : index
    %c33 = arith.constant 33 : index
    %60 = vector.load %arg17[%c0_24, %c33] : memref<4x324xf32, #tpu.memory_space<vmem>>, vector<4x256xf32>
    %61 = vector.extract_strided_slice %3 {offsets = [0, 11], sizes = [4, 1], strides = [1, 1]} : vector<4x25xf32> to vector<4x1xf32>
    %62 = vector.broadcast %61 : vector<4x1xf32> to vector<4x256xf32>
    %63 = arith.mulf %60, %62 : vector<4x256xf32>
    %64 = arith.addf %59, %63 : vector<4x256xf32>
    %c0_25 = arith.constant 0 : index
    %c49 = arith.constant 49 : index
    %65 = vector.load %arg17[%c0_25, %c49] : memref<4x324xf32, #tpu.memory_space<vmem>>, vector<4x256xf32>
    %66 = vector.extract_strided_slice %3 {offsets = [0, 16], sizes = [4, 1], strides = [1, 1]} : vector<4x25xf32> to vector<4x1xf32>
    %67 = vector.broadcast %66 : vector<4x1xf32> to vector<4x256xf32>
    %68 = arith.mulf %65, %67 : vector<4x256xf32>
    %69 = arith.addf %64, %68 : vector<4x256xf32>
    %c0_26 = arith.constant 0 : index
    %c65 = arith.constant 65 : index
    %70 = vector.load %arg17[%c0_26, %c65] : memref<4x324xf32, #tpu.memory_space<vmem>>, vector<4x256xf32>
    %71 = vector.extract_strided_slice %3 {offsets = [0, 21], sizes = [4, 1], strides = [1, 1]} : vector<4x25xf32> to vector<4x1xf32>
    %72 = vector.broadcast %71 : vector<4x1xf32> to vector<4x256xf32>
    %73 = arith.mulf %70, %72 : vector<4x256xf32>
    %74 = arith.addf %69, %73 : vector<4x256xf32>
    %c-1_i32 = arith.constant -1 : i32
    %75 = vector.broadcast %c-1_i32 : i32 to vector<1x256xi32>
    %76 = arith.addi %2, %75 : vector<1x256xi32>
    %c0_i32_27 = arith.constant 0 : i32
    %77 = vector.broadcast %c0_i32_27 : i32 to vector<1x256xi32>
    %78 = arith.cmpi sge, %76, %77 : vector<1x256xi32>
    %c16_i32_28 = arith.constant 16 : i32
    %79 = vector.broadcast %c16_i32_28 : i32 to vector<1x256xi32>
    %80 = arith.cmpi slt, %76, %79 : vector<1x256xi32>
    %81 = arith.andi %78, %80 : vector<1x256xi1>
    %cst_29 = arith.constant 1.000000e+00 : f32
    %cst_30 = arith.constant 0.000000e+00 : f32
    %82 = vector.broadcast %cst_29 : f32 to vector<1x256xf32>
    %83 = vector.broadcast %cst_30 : f32 to vector<1x256xf32>
    %84 = arith.select %81, %82, %83 : vector<1x256xi1>, vector<1x256xf32>
    %85 = vector.broadcast %84 : vector<1x256xf32> to vector<4x256xf32>
    %86 = arith.mulf %74, %85 : vector<4x256xf32>
    %87 = arith.addf %48, %86 : vector<4x256xf32>
    %cst_31 = arith.constant 0.000000e+00 : f32
    %88 = vector.broadcast %cst_31 : f32 to vector<4x256xf32>
    %c0_32 = arith.constant 0 : index
    %c2 = arith.constant 2 : index
    %89 = vector.load %arg17[%c0_32, %c2] : memref<4x324xf32, #tpu.memory_space<vmem>>, vector<4x256xf32>
    %90 = vector.extract_strided_slice %3 {offsets = [0, 2], sizes = [4, 1], strides = [1, 1]} : vector<4x25xf32> to vector<4x1xf32>
    %91 = vector.broadcast %90 : vector<4x1xf32> to vector<4x256xf32>
    %92 = arith.mulf %89, %91 : vector<4x256xf32>
    %93 = arith.addf %88, %92 : vector<4x256xf32>
    %c0_33 = arith.constant 0 : index
    %c18 = arith.constant 18 : index
    %94 = vector.load %arg17[%c0_33, %c18] : memref<4x324xf32, #tpu.memory_space<vmem>>, vector<4x256xf32>
    %95 = vector.extract_strided_slice %3 {offsets = [0, 7], sizes = [4, 1], strides = [1, 1]} : vector<4x25xf32> to vector<4x1xf32>
    %96 = vector.broadcast %95 : vector<4x1xf32> to vector<4x256xf32>
    %97 = arith.mulf %94, %96 : vector<4x256xf32>
    %98 = arith.addf %93, %97 : vector<4x256xf32>
    %c0_34 = arith.constant 0 : index
    %c34_35 = arith.constant 34 : index
    %99 = vector.load %arg17[%c0_34, %c34_35] : memref<4x324xf32, #tpu.memory_space<vmem>>, vector<4x256xf32>
    %100 = vector.extract_strided_slice %3 {offsets = [0, 12], sizes = [4, 1], strides = [1, 1]} : vector<4x25xf32> to vector<4x1xf32>
    %101 = vector.broadcast %100 : vector<4x1xf32> to vector<4x256xf32>
    %102 = arith.mulf %99, %101 : vector<4x256xf32>
    %103 = arith.addf %98, %102 : vector<4x256xf32>
    %c0_36 = arith.constant 0 : index
    %c50 = arith.constant 50 : index
    %104 = vector.load %arg17[%c0_36, %c50] : memref<4x324xf32, #tpu.memory_space<vmem>>, vector<4x256xf32>
    %105 = vector.extract_strided_slice %3 {offsets = [0, 17], sizes = [4, 1], strides = [1, 1]} : vector<4x25xf32> to vector<4x1xf32>
    %106 = vector.broadcast %105 : vector<4x1xf32> to vector<4x256xf32>
    %107 = arith.mulf %104, %106 : vector<4x256xf32>
    %108 = arith.addf %103, %107 : vector<4x256xf32>
    %c0_37 = arith.constant 0 : index
    %c66 = arith.constant 66 : index
    %109 = vector.load %arg17[%c0_37, %c66] : memref<4x324xf32, #tpu.memory_space<vmem>>, vector<4x256xf32>
    %110 = vector.extract_strided_slice %3 {offsets = [0, 22], sizes = [4, 1], strides = [1, 1]} : vector<4x25xf32> to vector<4x1xf32>
    %111 = vector.broadcast %110 : vector<4x1xf32> to vector<4x256xf32>
    %112 = arith.mulf %109, %111 : vector<4x256xf32>
    %113 = arith.addf %108, %112 : vector<4x256xf32>
    %114 = arith.addf %87, %113 : vector<4x256xf32>
    %cst_38 = arith.constant 0.000000e+00 : f32
    %115 = vector.broadcast %cst_38 : f32 to vector<4x256xf32>
    %c0_39 = arith.constant 0 : index
    %c3 = arith.constant 3 : index
    %116 = vector.load %arg17[%c0_39, %c3] : memref<4x324xf32, #tpu.memory_space<vmem>>, vector<4x256xf32>
    %117 = vector.extract_strided_slice %3 {offsets = [0, 3], sizes = [4, 1], strides = [1, 1]} : vector<4x25xf32> to vector<4x1xf32>
    %118 = vector.broadcast %117 : vector<4x1xf32> to vector<4x256xf32>
    %119 = arith.mulf %116, %118 : vector<4x256xf32>
    %120 = arith.addf %115, %119 : vector<4x256xf32>
    %c0_40 = arith.constant 0 : index
    %c19 = arith.constant 19 : index
    %121 = vector.load %arg17[%c0_40, %c19] : memref<4x324xf32, #tpu.memory_space<vmem>>, vector<4x256xf32>
    %122 = vector.extract_strided_slice %3 {offsets = [0, 8], sizes = [4, 1], strides = [1, 1]} : vector<4x25xf32> to vector<4x1xf32>
    %123 = vector.broadcast %122 : vector<4x1xf32> to vector<4x256xf32>
    %124 = arith.mulf %121, %123 : vector<4x256xf32>
    %125 = arith.addf %120, %124 : vector<4x256xf32>
    %c0_41 = arith.constant 0 : index
    %c35 = arith.constant 35 : index
    %126 = vector.load %arg17[%c0_41, %c35] : memref<4x324xf32, #tpu.memory_space<vmem>>, vector<4x256xf32>
    %127 = vector.extract_strided_slice %3 {offsets = [0, 13], sizes = [4, 1], strides = [1, 1]} : vector<4x25xf32> to vector<4x1xf32>
    %128 = vector.broadcast %127 : vector<4x1xf32> to vector<4x256xf32>
    %129 = arith.mulf %126, %128 : vector<4x256xf32>
    %130 = arith.addf %125, %129 : vector<4x256xf32>
    %c0_42 = arith.constant 0 : index
    %c51 = arith.constant 51 : index
    %131 = vector.load %arg17[%c0_42, %c51] : memref<4x324xf32, #tpu.memory_space<vmem>>, vector<4x256xf32>
    %132 = vector.extract_strided_slice %3 {offsets = [0, 18], sizes = [4, 1], strides = [1, 1]} : vector<4x25xf32> to vector<4x1xf32>
    %133 = vector.broadcast %132 : vector<4x1xf32> to vector<4x256xf32>
    %134 = arith.mulf %131, %133 : vector<4x256xf32>
    %135 = arith.addf %130, %134 : vector<4x256xf32>
    %c0_43 = arith.constant 0 : index
    %c67 = arith.constant 67 : index
    %136 = vector.load %arg17[%c0_43, %c67] : memref<4x324xf32, #tpu.memory_space<vmem>>, vector<4x256xf32>
    %137 = vector.extract_strided_slice %3 {offsets = [0, 23], sizes = [4, 1], strides = [1, 1]} : vector<4x25xf32> to vector<4x1xf32>
    %138 = vector.broadcast %137 : vector<4x1xf32> to vector<4x256xf32>
    %139 = arith.mulf %136, %138 : vector<4x256xf32>
    %140 = arith.addf %135, %139 : vector<4x256xf32>
    %c1_i32 = arith.constant 1 : i32
    %141 = vector.broadcast %c1_i32 : i32 to vector<1x256xi32>
    %142 = arith.addi %2, %141 : vector<1x256xi32>
    %c0_i32_44 = arith.constant 0 : i32
    %143 = vector.broadcast %c0_i32_44 : i32 to vector<1x256xi32>
    %144 = arith.cmpi sge, %142, %143 : vector<1x256xi32>
    %c16_i32_45 = arith.constant 16 : i32
    %145 = vector.broadcast %c16_i32_45 : i32 to vector<1x256xi32>
    %146 = arith.cmpi slt, %142, %145 : vector<1x256xi32>
    %147 = arith.andi %144, %146 : vector<1x256xi1>
    %cst_46 = arith.constant 1.000000e+00 : f32
    %cst_47 = arith.constant 0.000000e+00 : f32
    %148 = vector.broadcast %cst_46 : f32 to vector<1x256xf32>
    %149 = vector.broadcast %cst_47 : f32 to vector<1x256xf32>
    %150 = arith.select %147, %148, %149 : vector<1x256xi1>, vector<1x256xf32>
    %151 = vector.broadcast %150 : vector<1x256xf32> to vector<4x256xf32>
    %152 = arith.mulf %140, %151 : vector<4x256xf32>
    %153 = arith.addf %114, %152 : vector<4x256xf32>
    %cst_48 = arith.constant 0.000000e+00 : f32
    %154 = vector.broadcast %cst_48 : f32 to vector<4x256xf32>
    %c0_49 = arith.constant 0 : index
    %c4 = arith.constant 4 : index
    %155 = vector.load %arg17[%c0_49, %c4] : memref<4x324xf32, #tpu.memory_space<vmem>>, vector<4x256xf32>
    %156 = vector.extract_strided_slice %3 {offsets = [0, 4], sizes = [4, 1], strides = [1, 1]} : vector<4x25xf32> to vector<4x1xf32>
    %157 = vector.broadcast %156 : vector<4x1xf32> to vector<4x256xf32>
    %158 = arith.mulf %155, %157 : vector<4x256xf32>
    %159 = arith.addf %154, %158 : vector<4x256xf32>
    %c0_50 = arith.constant 0 : index
    %c20 = arith.constant 20 : index
    %160 = vector.load %arg17[%c0_50, %c20] : memref<4x324xf32, #tpu.memory_space<vmem>>, vector<4x256xf32>
    %161 = vector.extract_strided_slice %3 {offsets = [0, 9], sizes = [4, 1], strides = [1, 1]} : vector<4x25xf32> to vector<4x1xf32>
    %162 = vector.broadcast %161 : vector<4x1xf32> to vector<4x256xf32>
    %163 = arith.mulf %160, %162 : vector<4x256xf32>
    %164 = arith.addf %159, %163 : vector<4x256xf32>
    %c0_51 = arith.constant 0 : index
    %c36 = arith.constant 36 : index
    %165 = vector.load %arg17[%c0_51, %c36] : memref<4x324xf32, #tpu.memory_space<vmem>>, vector<4x256xf32>
    %166 = vector.extract_strided_slice %3 {offsets = [0, 14], sizes = [4, 1], strides = [1, 1]} : vector<4x25xf32> to vector<4x1xf32>
    %167 = vector.broadcast %166 : vector<4x1xf32> to vector<4x256xf32>
    %168 = arith.mulf %165, %167 : vector<4x256xf32>
    %169 = arith.addf %164, %168 : vector<4x256xf32>
    %c0_52 = arith.constant 0 : index
    %c52 = arith.constant 52 : index
    %170 = vector.load %arg17[%c0_52, %c52] : memref<4x324xf32, #tpu.memory_space<vmem>>, vector<4x256xf32>
    %171 = vector.extract_strided_slice %3 {offsets = [0, 19], sizes = [4, 1], strides = [1, 1]} : vector<4x25xf32> to vector<4x1xf32>
    %172 = vector.broadcast %171 : vector<4x1xf32> to vector<4x256xf32>
    %173 = arith.mulf %170, %172 : vector<4x256xf32>
    %174 = arith.addf %169, %173 : vector<4x256xf32>
    %c0_53 = arith.constant 0 : index
    %c68 = arith.constant 68 : index
    %175 = vector.load %arg17[%c0_53, %c68] : memref<4x324xf32, #tpu.memory_space<vmem>>, vector<4x256xf32>
    %176 = vector.extract_strided_slice %3 {offsets = [0, 24], sizes = [4, 1], strides = [1, 1]} : vector<4x25xf32> to vector<4x1xf32>
    %177 = vector.broadcast %176 : vector<4x1xf32> to vector<4x256xf32>
    %178 = arith.mulf %175, %177 : vector<4x256xf32>
    %179 = arith.addf %174, %178 : vector<4x256xf32>
    %c2_i32 = arith.constant 2 : i32
    %180 = vector.broadcast %c2_i32 : i32 to vector<1x256xi32>
    %181 = arith.addi %2, %180 : vector<1x256xi32>
    %c0_i32_54 = arith.constant 0 : i32
    %182 = vector.broadcast %c0_i32_54 : i32 to vector<1x256xi32>
    %183 = arith.cmpi sge, %181, %182 : vector<1x256xi32>
    %c16_i32_55 = arith.constant 16 : i32
    %184 = vector.broadcast %c16_i32_55 : i32 to vector<1x256xi32>
    %185 = arith.cmpi slt, %181, %184 : vector<1x256xi32>
    %186 = arith.andi %183, %185 : vector<1x256xi1>
    %cst_56 = arith.constant 1.000000e+00 : f32
    %cst_57 = arith.constant 0.000000e+00 : f32
    %187 = vector.broadcast %cst_56 : f32 to vector<1x256xf32>
    %188 = vector.broadcast %cst_57 : f32 to vector<1x256xf32>
    %189 = arith.select %186, %187, %188 : vector<1x256xi1>, vector<1x256xf32>
    %190 = vector.broadcast %189 : vector<1x256xf32> to vector<4x256xf32>
    %191 = arith.mulf %179, %190 : vector<4x256xf32>
    %192 = arith.addf %153, %191 : vector<4x256xf32>
    %c0_58 = arith.constant 0 : index
    %c0_59 = arith.constant 0 : index
    %193 = vector.load %arg4[%c0_58, %c0_59] : memref<4x1xf32, #tpu.memory_space<vmem>>, vector<4x1xf32>
    %194 = vector.broadcast %193 : vector<4x1xf32> to vector<4x256xf32>
    %195 = arith.addf %192, %194 : vector<4x256xf32>
    %c0_60 = arith.constant 0 : index
    %c0_61 = arith.constant 0 : index
    %196 = vector.load %arg5[%c0_60, %c0_61] : memref<4x49xf32, #tpu.memory_space<vmem>>, vector<4x49xf32>
    %cst_62 = arith.constant 0.000000e+00 : f32
    %197 = vector.broadcast %cst_62 : f32 to vector<4x153xf32>
    %c0_63 = arith.constant 0 : index
    %c0_64 = arith.constant 0 : index
    %198 = vector.load %arg18[%c0_63, %c0_64] : memref<4x562xf32, #tpu.memory_space<vmem>>, vector<4x153xf32>
    tpu.vector_store %arg18[%c0_63, %c0_64], %197 {strides = array<i32>} : memref<4x562xf32, #tpu.memory_space<vmem>>, vector<4x153xf32>,
    %cst_65 = arith.constant 0.000000e+00 : f32
    %199 = vector.broadcast %cst_65 : f32 to vector<4x153xf32>
    %c0_66 = arith.constant 0 : index
    %c409 = arith.constant 409 : index
    %200 = vector.load %arg18[%c0_66, %c409] : memref<4x562xf32, #tpu.memory_space<vmem>>, vector<4x153xf32>
    tpu.vector_store %arg18[%c0_66, %c409], %199 {strides = array<i32>} : memref<4x562xf32, #tpu.memory_space<vmem>>, vector<4x153xf32>,
    %c0_67 = arith.constant 0 : index
    %c153 = arith.constant 153 : index
    %201 = vector.load %arg18[%c0_67, %c153] : memref<4x562xf32, #tpu.memory_space<vmem>>, vector<4x256xf32>
    tpu.vector_store %arg18[%c0_67, %c153], %195 {strides = array<i32>} : memref<4x562xf32, #tpu.memory_space<vmem>>, vector<4x256xf32>,
    %cst_68 = arith.constant 0.000000e+00 : f32
    %202 = vector.broadcast %cst_68 : f32 to vector<4x256xf32>
    %cst_69 = arith.constant 0.000000e+00 : f32
    %203 = vector.broadcast %cst_69 : f32 to vector<4x256xf32>
    %c0_70 = arith.constant 0 : index
    %c0_71 = arith.constant 0 : index
    %204 = vector.load %arg18[%c0_70, %c0_71] : memref<4x562xf32, #tpu.memory_space<vmem>>, vector<4x256xf32>
    %205 = vector.extract_strided_slice %196 {offsets = [0, 0], sizes = [4, 1], strides = [1, 1]} : vector<4x49xf32> to vector<4x1xf32>
    %206 = vector.broadcast %205 : vector<4x1xf32> to vector<4x256xf32>
    %207 = arith.mulf %204, %206 : vector<4x256xf32>
    %208 = arith.addf %203, %207 : vector<4x256xf32>
    %c0_72 = arith.constant 0 : index
    %c48_73 = arith.constant 48 : index
    %209 = vector.load %arg18[%c0_72, %c48_73] : memref<4x562xf32, #tpu.memory_space<vmem>>, vector<4x256xf32>
    %210 = vector.extract_strided_slice %196 {offsets = [0, 7], sizes = [4, 1], strides = [1, 1]} : vector<4x49xf32> to vector<4x1xf32>
    %211 = vector.broadcast %210 : vector<4x1xf32> to vector<4x256xf32>
    %212 = arith.mulf %209, %211 : vector<4x256xf32>
    %213 = arith.addf %208, %212 : vector<4x256xf32>
    %c0_74 = arith.constant 0 : index
    %c96 = arith.constant 96 : index
    %214 = vector.load %arg18[%c0_74, %c96] : memref<4x562xf32, #tpu.memory_space<vmem>>, vector<4x256xf32>
    %215 = vector.extract_strided_slice %196 {offsets = [0, 14], sizes = [4, 1], strides = [1, 1]} : vector<4x49xf32> to vector<4x1xf32>
    %216 = vector.broadcast %215 : vector<4x1xf32> to vector<4x256xf32>
    %217 = arith.mulf %214, %216 : vector<4x256xf32>
    %218 = arith.addf %213, %217 : vector<4x256xf32>
    %c0_75 = arith.constant 0 : index
    %c144 = arith.constant 144 : index
    %219 = vector.load %arg18[%c0_75, %c144] : memref<4x562xf32, #tpu.memory_space<vmem>>, vector<4x256xf32>
    %220 = vector.extract_strided_slice %196 {offsets = [0, 21], sizes = [4, 1], strides = [1, 1]} : vector<4x49xf32> to vector<4x1xf32>
    %221 = vector.broadcast %220 : vector<4x1xf32> to vector<4x256xf32>
    %222 = arith.mulf %219, %221 : vector<4x256xf32>
    %223 = arith.addf %218, %222 : vector<4x256xf32>
    %c0_76 = arith.constant 0 : index
    %c192 = arith.constant 192 : index
    %224 = vector.load %arg18[%c0_76, %c192] : memref<4x562xf32, #tpu.memory_space<vmem>>, vector<4x256xf32>
    %225 = vector.extract_strided_slice %196 {offsets = [0, 28], sizes = [4, 1], strides = [1, 1]} : vector<4x49xf32> to vector<4x1xf32>
    %226 = vector.broadcast %225 : vector<4x1xf32> to vector<4x256xf32>
    %227 = arith.mulf %224, %226 : vector<4x256xf32>
    %228 = arith.addf %223, %227 : vector<4x256xf32>
    %c0_77 = arith.constant 0 : index
    %c240 = arith.constant 240 : index
    %229 = vector.load %arg18[%c0_77, %c240] : memref<4x562xf32, #tpu.memory_space<vmem>>, vector<4x256xf32>
    %230 = vector.extract_strided_slice %196 {offsets = [0, 35], sizes = [4, 1], strides = [1, 1]} : vector<4x49xf32> to vector<4x1xf32>
    %231 = vector.broadcast %230 : vector<4x1xf32> to vector<4x256xf32>
    %232 = arith.mulf %229, %231 : vector<4x256xf32>
    %233 = arith.addf %228, %232 : vector<4x256xf32>
    %c0_78 = arith.constant 0 : index
    %c288 = arith.constant 288 : index
    %234 = vector.load %arg18[%c0_78, %c288] : memref<4x562xf32, #tpu.memory_space<vmem>>, vector<4x256xf32>
    %235 = vector.extract_strided_slice %196 {offsets = [0, 42], sizes = [4, 1], strides = [1, 1]} : vector<4x49xf32> to vector<4x1xf32>
    %236 = vector.broadcast %235 : vector<4x1xf32> to vector<4x256xf32>
    %237 = arith.mulf %234, %236 : vector<4x256xf32>
    %238 = arith.addf %233, %237 : vector<4x256xf32>
    %c-9_i32 = arith.constant -9 : i32
    %239 = vector.broadcast %c-9_i32 : i32 to vector<1x256xi32>
    %240 = arith.addi %2, %239 : vector<1x256xi32>
    %c0_i32_79 = arith.constant 0 : i32
    %241 = vector.broadcast %c0_i32_79 : i32 to vector<1x256xi32>
    %242 = arith.cmpi sge, %240, %241 : vector<1x256xi32>
    %c16_i32_80 = arith.constant 16 : i32
    %243 = vector.broadcast %c16_i32_80 : i32 to vector<1x256xi32>
    %244 = arith.cmpi slt, %240, %243 : vector<1x256xi32>
    %245 = arith.andi %242, %244 : vector<1x256xi1>
    %cst_81 = arith.constant 1.000000e+00 : f32
    %cst_82 = arith.constant 0.000000e+00 : f32
    %246 = vector.broadcast %cst_81 : f32 to vector<1x256xf32>
    %247 = vector.broadcast %cst_82 : f32 to vector<1x256xf32>
    %248 = arith.select %245, %246, %247 : vector<1x256xi1>, vector<1x256xf32>
    %249 = vector.broadcast %248 : vector<1x256xf32> to vector<4x256xf32>
    %250 = arith.mulf %238, %249 : vector<4x256xf32>
    %251 = arith.addf %202, %250 : vector<4x256xf32>
    %cst_83 = arith.constant 0.000000e+00 : f32
    %252 = vector.broadcast %cst_83 : f32 to vector<4x256xf32>
    %c0_84 = arith.constant 0 : index
    %c3_85 = arith.constant 3 : index
    %253 = vector.load %arg18[%c0_84, %c3_85] : memref<4x562xf32, #tpu.memory_space<vmem>>, vector<4x256xf32>
    %254 = vector.extract_strided_slice %196 {offsets = [0, 1], sizes = [4, 1], strides = [1, 1]} : vector<4x49xf32> to vector<4x1xf32>
    %255 = vector.broadcast %254 : vector<4x1xf32> to vector<4x256xf32>
    %256 = arith.mulf %253, %255 : vector<4x256xf32>
    %257 = arith.addf %252, %256 : vector<4x256xf32>
    %c0_86 = arith.constant 0 : index
    %c51_87 = arith.constant 51 : index
    %258 = vector.load %arg18[%c0_86, %c51_87] : memref<4x562xf32, #tpu.memory_space<vmem>>, vector<4x256xf32>
    %259 = vector.extract_strided_slice %196 {offsets = [0, 8], sizes = [4, 1], strides = [1, 1]} : vector<4x49xf32> to vector<4x1xf32>
    %260 = vector.broadcast %259 : vector<4x1xf32> to vector<4x256xf32>
    %261 = arith.mulf %258, %260 : vector<4x256xf32>
    %262 = arith.addf %257, %261 : vector<4x256xf32>
    %c0_88 = arith.constant 0 : index
    %c99 = arith.constant 99 : index
    %263 = vector.load %arg18[%c0_88, %c99] : memref<4x562xf32, #tpu.memory_space<vmem>>, vector<4x256xf32>
    %264 = vector.extract_strided_slice %196 {offsets = [0, 15], sizes = [4, 1], strides = [1, 1]} : vector<4x49xf32> to vector<4x1xf32>
    %265 = vector.broadcast %264 : vector<4x1xf32> to vector<4x256xf32>
    %266 = arith.mulf %263, %265 : vector<4x256xf32>
    %267 = arith.addf %262, %266 : vector<4x256xf32>
    %c0_89 = arith.constant 0 : index
    %c147 = arith.constant 147 : index
    %268 = vector.load %arg18[%c0_89, %c147] : memref<4x562xf32, #tpu.memory_space<vmem>>, vector<4x256xf32>
    %269 = vector.extract_strided_slice %196 {offsets = [0, 22], sizes = [4, 1], strides = [1, 1]} : vector<4x49xf32> to vector<4x1xf32>
    %270 = vector.broadcast %269 : vector<4x1xf32> to vector<4x256xf32>
    %271 = arith.mulf %268, %270 : vector<4x256xf32>
    %272 = arith.addf %267, %271 : vector<4x256xf32>
    %c0_90 = arith.constant 0 : index
    %c195 = arith.constant 195 : index
    %273 = vector.load %arg18[%c0_90, %c195] : memref<4x562xf32, #tpu.memory_space<vmem>>, vector<4x256xf32>
    %274 = vector.extract_strided_slice %196 {offsets = [0, 29], sizes = [4, 1], strides = [1, 1]} : vector<4x49xf32> to vector<4x1xf32>
    %275 = vector.broadcast %274 : vector<4x1xf32> to vector<4x256xf32>
    %276 = arith.mulf %273, %275 : vector<4x256xf32>
    %277 = arith.addf %272, %276 : vector<4x256xf32>
    %c0_91 = arith.constant 0 : index
    %c243 = arith.constant 243 : index
    %278 = vector.load %arg18[%c0_91, %c243] : memref<4x562xf32, #tpu.memory_space<vmem>>, vector<4x256xf32>
    %279 = vector.extract_strided_slice %196 {offsets = [0, 36], sizes = [4, 1], strides = [1, 1]} : vector<4x49xf32> to vector<4x1xf32>
    %280 = vector.broadcast %279 : vector<4x1xf32> to vector<4x256xf32>
    %281 = arith.mulf %278, %280 : vector<4x256xf32>
    %282 = arith.addf %277, %281 : vector<4x256xf32>
    %c0_92 = arith.constant 0 : index
    %c291 = arith.constant 291 : index
    %283 = vector.load %arg18[%c0_92, %c291] : memref<4x562xf32, #tpu.memory_space<vmem>>, vector<4x256xf32>
    %284 = vector.extract_strided_slice %196 {offsets = [0, 43], sizes = [4, 1], strides = [1, 1]} : vector<4x49xf32> to vector<4x1xf32>
    %285 = vector.broadcast %284 : vector<4x1xf32> to vector<4x256xf32>
    %286 = arith.mulf %283, %285 : vector<4x256xf32>
    %287 = arith.addf %282, %286 : vector<4x256xf32>
    %c-6_i32 = arith.constant -6 : i32
    %288 = vector.broadcast %c-6_i32 : i32 to vector<1x256xi32>
    %289 = arith.addi %2, %288 : vector<1x256xi32>
    %c0_i32_93 = arith.constant 0 : i32
    %290 = vector.broadcast %c0_i32_93 : i32 to vector<1x256xi32>
    %291 = arith.cmpi sge, %289, %290 : vector<1x256xi32>
    %c16_i32_94 = arith.constant 16 : i32
    %292 = vector.broadcast %c16_i32_94 : i32 to vector<1x256xi32>
    %293 = arith.cmpi slt, %289, %292 : vector<1x256xi32>
    %294 = arith.andi %291, %293 : vector<1x256xi1>
    %cst_95 = arith.constant 1.000000e+00 : f32
    %cst_96 = arith.constant 0.000000e+00 : f32
    %295 = vector.broadcast %cst_95 : f32 to vector<1x256xf32>
    %296 = vector.broadcast %cst_96 : f32 to vector<1x256xf32>
    %297 = arith.select %294, %295, %296 : vector<1x256xi1>, vector<1x256xf32>
    %298 = vector.broadcast %297 : vector<1x256xf32> to vector<4x256xf32>
    %299 = arith.mulf %287, %298 : vector<4x256xf32>
    %300 = arith.addf %251, %299 : vector<4x256xf32>
    %cst_97 = arith.constant 0.000000e+00 : f32
    %301 = vector.broadcast %cst_97 : f32 to vector<4x256xf32>
    %c0_98 = arith.constant 0 : index
    %c6 = arith.constant 6 : index
    %302 = vector.load %arg18[%c0_98, %c6] : memref<4x562xf32, #tpu.memory_space<vmem>>, vector<4x256xf32>
    %303 = vector.extract_strided_slice %196 {offsets = [0, 2], sizes = [4, 1], strides = [1, 1]} : vector<4x49xf32> to vector<4x1xf32>
    %304 = vector.broadcast %303 : vector<4x1xf32> to vector<4x256xf32>
    %305 = arith.mulf %302, %304 : vector<4x256xf32>
    %306 = arith.addf %301, %305 : vector<4x256xf32>
    %c0_99 = arith.constant 0 : index
    %c54 = arith.constant 54 : index
    %307 = vector.load %arg18[%c0_99, %c54] : memref<4x562xf32, #tpu.memory_space<vmem>>, vector<4x256xf32>
    %308 = vector.extract_strided_slice %196 {offsets = [0, 9], sizes = [4, 1], strides = [1, 1]} : vector<4x49xf32> to vector<4x1xf32>
    %309 = vector.broadcast %308 : vector<4x1xf32> to vector<4x256xf32>
    %310 = arith.mulf %307, %309 : vector<4x256xf32>
    %311 = arith.addf %306, %310 : vector<4x256xf32>
    %c0_100 = arith.constant 0 : index
    %c102 = arith.constant 102 : index
    %312 = vector.load %arg18[%c0_100, %c102] : memref<4x562xf32, #tpu.memory_space<vmem>>, vector<4x256xf32>
    %313 = vector.extract_strided_slice %196 {offsets = [0, 16], sizes = [4, 1], strides = [1, 1]} : vector<4x49xf32> to vector<4x1xf32>
    %314 = vector.broadcast %313 : vector<4x1xf32> to vector<4x256xf32>
    %315 = arith.mulf %312, %314 : vector<4x256xf32>
    %316 = arith.addf %311, %315 : vector<4x256xf32>
    %c0_101 = arith.constant 0 : index
    %c150 = arith.constant 150 : index
    %317 = vector.load %arg18[%c0_101, %c150] : memref<4x562xf32, #tpu.memory_space<vmem>>, vector<4x256xf32>
    %318 = vector.extract_strided_slice %196 {offsets = [0, 23], sizes = [4, 1], strides = [1, 1]} : vector<4x49xf32> to vector<4x1xf32>
    %319 = vector.broadcast %318 : vector<4x1xf32> to vector<4x256xf32>
    %320 = arith.mulf %317, %319 : vector<4x256xf32>
    %321 = arith.addf %316, %320 : vector<4x256xf32>
    %c0_102 = arith.constant 0 : index
    %c198 = arith.constant 198 : index
    %322 = vector.load %arg18[%c0_102, %c198] : memref<4x562xf32, #tpu.memory_space<vmem>>, vector<4x256xf32>
    %323 = vector.extract_strided_slice %196 {offsets = [0, 30], sizes = [4, 1], strides = [1, 1]} : vector<4x49xf32> to vector<4x1xf32>
    %324 = vector.broadcast %323 : vector<4x1xf32> to vector<4x256xf32>
    %325 = arith.mulf %322, %324 : vector<4x256xf32>
    %326 = arith.addf %321, %325 : vector<4x256xf32>
    %c0_103 = arith.constant 0 : index
    %c246 = arith.constant 246 : index
    %327 = vector.load %arg18[%c0_103, %c246] : memref<4x562xf32, #tpu.memory_space<vmem>>, vector<4x256xf32>
    %328 = vector.extract_strided_slice %196 {offsets = [0, 37], sizes = [4, 1], strides = [1, 1]} : vector<4x49xf32> to vector<4x1xf32>
    %329 = vector.broadcast %328 : vector<4x1xf32> to vector<4x256xf32>
    %330 = arith.mulf %327, %329 : vector<4x256xf32>
    %331 = arith.addf %326, %330 : vector<4x256xf32>
    %c0_104 = arith.constant 0 : index
    %c294 = arith.constant 294 : index
    %332 = vector.load %arg18[%c0_104, %c294] : memref<4x562xf32, #tpu.memory_space<vmem>>, vector<4x256xf32>
    %333 = vector.extract_strided_slice %196 {offsets = [0, 44], sizes = [4, 1], strides = [1, 1]} : vector<4x49xf32> to vector<4x1xf32>
    %334 = vector.broadcast %333 : vector<4x1xf32> to vector<4x256xf32>
    %335 = arith.mulf %332, %334 : vector<4x256xf32>
    %336 = arith.addf %331, %335 : vector<4x256xf32>
    %c-3_i32 = arith.constant -3 : i32
    %337 = vector.broadcast %c-3_i32 : i32 to vector<1x256xi32>
    %338 = arith.addi %2, %337 : vector<1x256xi32>
    %c0_i32_105 = arith.constant 0 : i32
    %339 = vector.broadcast %c0_i32_105 : i32 to vector<1x256xi32>
    %340 = arith.cmpi sge, %338, %339 : vector<1x256xi32>
    %c16_i32_106 = arith.constant 16 : i32
    %341 = vector.broadcast %c16_i32_106 : i32 to vector<1x256xi32>
    %342 = arith.cmpi slt, %338, %341 : vector<1x256xi32>
    %343 = arith.andi %340, %342 : vector<1x256xi1>
    %cst_107 = arith.constant 1.000000e+00 : f32
    %cst_108 = arith.constant 0.000000e+00 : f32
    %344 = vector.broadcast %cst_107 : f32 to vector<1x256xf32>
    %345 = vector.broadcast %cst_108 : f32 to vector<1x256xf32>
    %346 = arith.select %343, %344, %345 : vector<1x256xi1>, vector<1x256xf32>
    %347 = vector.broadcast %346 : vector<1x256xf32> to vector<4x256xf32>
    %348 = arith.mulf %336, %347 : vector<4x256xf32>
    %349 = arith.addf %300, %348 : vector<4x256xf32>
    %cst_109 = arith.constant 0.000000e+00 : f32
    %350 = vector.broadcast %cst_109 : f32 to vector<4x256xf32>
    %c0_110 = arith.constant 0 : index
    %c9 = arith.constant 9 : index
    %351 = vector.load %arg18[%c0_110, %c9] : memref<4x562xf32, #tpu.memory_space<vmem>>, vector<4x256xf32>
    %352 = vector.extract_strided_slice %196 {offsets = [0, 3], sizes = [4, 1], strides = [1, 1]} : vector<4x49xf32> to vector<4x1xf32>
    %353 = vector.broadcast %352 : vector<4x1xf32> to vector<4x256xf32>
    %354 = arith.mulf %351, %353 : vector<4x256xf32>
    %355 = arith.addf %350, %354 : vector<4x256xf32>
    %c0_111 = arith.constant 0 : index
    %c57 = arith.constant 57 : index
    %356 = vector.load %arg18[%c0_111, %c57] : memref<4x562xf32, #tpu.memory_space<vmem>>, vector<4x256xf32>
    %357 = vector.extract_strided_slice %196 {offsets = [0, 10], sizes = [4, 1], strides = [1, 1]} : vector<4x49xf32> to vector<4x1xf32>
    %358 = vector.broadcast %357 : vector<4x1xf32> to vector<4x256xf32>
    %359 = arith.mulf %356, %358 : vector<4x256xf32>
    %360 = arith.addf %355, %359 : vector<4x256xf32>
    %c0_112 = arith.constant 0 : index
    %c105 = arith.constant 105 : index
    %361 = vector.load %arg18[%c0_112, %c105] : memref<4x562xf32, #tpu.memory_space<vmem>>, vector<4x256xf32>
    %362 = vector.extract_strided_slice %196 {offsets = [0, 17], sizes = [4, 1], strides = [1, 1]} : vector<4x49xf32> to vector<4x1xf32>
    %363 = vector.broadcast %362 : vector<4x1xf32> to vector<4x256xf32>
    %364 = arith.mulf %361, %363 : vector<4x256xf32>
    %365 = arith.addf %360, %364 : vector<4x256xf32>
    %c0_113 = arith.constant 0 : index
    %c153_114 = arith.constant 153 : index
    %366 = vector.load %arg18[%c0_113, %c153_114] : memref<4x562xf32, #tpu.memory_space<vmem>>, vector<4x256xf32>
    %367 = vector.extract_strided_slice %196 {offsets = [0, 24], sizes = [4, 1], strides = [1, 1]} : vector<4x49xf32> to vector<4x1xf32>
    %368 = vector.broadcast %367 : vector<4x1xf32> to vector<4x256xf32>
    %369 = arith.mulf %366, %368 : vector<4x256xf32>
    %370 = arith.addf %365, %369 : vector<4x256xf32>
    %c0_115 = arith.constant 0 : index
    %c201 = arith.constant 201 : index
    %371 = vector.load %arg18[%c0_115, %c201] : memref<4x562xf32, #tpu.memory_space<vmem>>, vector<4x256xf32>
    %372 = vector.extract_strided_slice %196 {offsets = [0, 31], sizes = [4, 1], strides = [1, 1]} : vector<4x49xf32> to vector<4x1xf32>
    %373 = vector.broadcast %372 : vector<4x1xf32> to vector<4x256xf32>
    %374 = arith.mulf %371, %373 : vector<4x256xf32>
    %375 = arith.addf %370, %374 : vector<4x256xf32>
    %c0_116 = arith.constant 0 : index
    %c249 = arith.constant 249 : index
    %376 = vector.load %arg18[%c0_116, %c249] : memref<4x562xf32, #tpu.memory_space<vmem>>, vector<4x256xf32>
    %377 = vector.extract_strided_slice %196 {offsets = [0, 38], sizes = [4, 1], strides = [1, 1]} : vector<4x49xf32> to vector<4x1xf32>
    %378 = vector.broadcast %377 : vector<4x1xf32> to vector<4x256xf32>
    %379 = arith.mulf %376, %378 : vector<4x256xf32>
    %380 = arith.addf %375, %379 : vector<4x256xf32>
    %c0_117 = arith.constant 0 : index
    %c297 = arith.constant 297 : index
    %381 = vector.load %arg18[%c0_117, %c297] : memref<4x562xf32, #tpu.memory_space<vmem>>, vector<4x256xf32>
    %382 = vector.extract_strided_slice %196 {offsets = [0, 45], sizes = [4, 1], strides = [1, 1]} : vector<4x49xf32> to vector<4x1xf32>
    %383 = vector.broadcast %382 : vector<4x1xf32> to vector<4x256xf32>
    %384 = arith.mulf %381, %383 : vector<4x256xf32>
    %385 = arith.addf %380, %384 : vector<4x256xf32>
    %386 = arith.addf %349, %385 : vector<4x256xf32>
    %cst_118 = arith.constant 0.000000e+00 : f32
    %387 = vector.broadcast %cst_118 : f32 to vector<4x256xf32>
    %c0_119 = arith.constant 0 : index
    %c12 = arith.constant 12 : index
    %388 = vector.load %arg18[%c0_119, %c12] : memref<4x562xf32, #tpu.memory_space<vmem>>, vector<4x256xf32>
    %389 = vector.extract_strided_slice %196 {offsets = [0, 4], sizes = [4, 1], strides = [1, 1]} : vector<4x49xf32> to vector<4x1xf32>
    %390 = vector.broadcast %389 : vector<4x1xf32> to vector<4x256xf32>
    %391 = arith.mulf %388, %390 : vector<4x256xf32>
    %392 = arith.addf %387, %391 : vector<4x256xf32>
    %c0_120 = arith.constant 0 : index
    %c60 = arith.constant 60 : index
    %393 = vector.load %arg18[%c0_120, %c60] : memref<4x562xf32, #tpu.memory_space<vmem>>, vector<4x256xf32>
    %394 = vector.extract_strided_slice %196 {offsets = [0, 11], sizes = [4, 1], strides = [1, 1]} : vector<4x49xf32> to vector<4x1xf32>
    %395 = vector.broadcast %394 : vector<4x1xf32> to vector<4x256xf32>
    %396 = arith.mulf %393, %395 : vector<4x256xf32>
    %397 = arith.addf %392, %396 : vector<4x256xf32>
    %c0_121 = arith.constant 0 : index
    %c108 = arith.constant 108 : index
    %398 = vector.load %arg18[%c0_121, %c108] : memref<4x562xf32, #tpu.memory_space<vmem>>, vector<4x256xf32>
    %399 = vector.extract_strided_slice %196 {offsets = [0, 18], sizes = [4, 1], strides = [1, 1]} : vector<4x49xf32> to vector<4x1xf32>
    %400 = vector.broadcast %399 : vector<4x1xf32> to vector<4x256xf32>
    %401 = arith.mulf %398, %400 : vector<4x256xf32>
    %402 = arith.addf %397, %401 : vector<4x256xf32>
    %c0_122 = arith.constant 0 : index
    %c156 = arith.constant 156 : index
    %403 = vector.load %arg18[%c0_122, %c156] : memref<4x562xf32, #tpu.memory_space<vmem>>, vector<4x256xf32>
    %404 = vector.extract_strided_slice %196 {offsets = [0, 25], sizes = [4, 1], strides = [1, 1]} : vector<4x49xf32> to vector<4x1xf32>
    %405 = vector.broadcast %404 : vector<4x1xf32> to vector<4x256xf32>
    %406 = arith.mulf %403, %405 : vector<4x256xf32>
    %407 = arith.addf %402, %406 : vector<4x256xf32>
    %c0_123 = arith.constant 0 : index
    %c204 = arith.constant 204 : index
    %408 = vector.load %arg18[%c0_123, %c204] : memref<4x562xf32, #tpu.memory_space<vmem>>, vector<4x256xf32>
    %409 = vector.extract_strided_slice %196 {offsets = [0, 32], sizes = [4, 1], strides = [1, 1]} : vector<4x49xf32> to vector<4x1xf32>
    %410 = vector.broadcast %409 : vector<4x1xf32> to vector<4x256xf32>
    %411 = arith.mulf %408, %410 : vector<4x256xf32>
    %412 = arith.addf %407, %411 : vector<4x256xf32>
    %c0_124 = arith.constant 0 : index
    %c252 = arith.constant 252 : index
    %413 = vector.load %arg18[%c0_124, %c252] : memref<4x562xf32, #tpu.memory_space<vmem>>, vector<4x256xf32>
    %414 = vector.extract_strided_slice %196 {offsets = [0, 39], sizes = [4, 1], strides = [1, 1]} : vector<4x49xf32> to vector<4x1xf32>
    %415 = vector.broadcast %414 : vector<4x1xf32> to vector<4x256xf32>
    %416 = arith.mulf %413, %415 : vector<4x256xf32>
    %417 = arith.addf %412, %416 : vector<4x256xf32>
    %c0_125 = arith.constant 0 : index
    %c300 = arith.constant 300 : index
    %418 = vector.load %arg18[%c0_125, %c300] : memref<4x562xf32, #tpu.memory_space<vmem>>, vector<4x256xf32>
    %419 = vector.extract_strided_slice %196 {offsets = [0, 46], sizes = [4, 1], strides = [1, 1]} : vector<4x49xf32> to vector<4x1xf32>
    %420 = vector.broadcast %419 : vector<4x1xf32> to vector<4x256xf32>
    %421 = arith.mulf %418, %420 : vector<4x256xf32>
    %422 = arith.addf %417, %421 : vector<4x256xf32>
    %c3_i32 = arith.constant 3 : i32
    %423 = vector.broadcast %c3_i32 : i32 to vector<1x256xi32>
    %424 = arith.addi %2, %423 : vector<1x256xi32>
    %c0_i32_126 = arith.constant 0 : i32
    %425 = vector.broadcast %c0_i32_126 : i32 to vector<1x256xi32>
    %426 = arith.cmpi sge, %424, %425 : vector<1x256xi32>
    %c16_i32_127 = arith.constant 16 : i32
    %427 = vector.broadcast %c16_i32_127 : i32 to vector<1x256xi32>
    %428 = arith.cmpi slt, %424, %427 : vector<1x256xi32>
    %429 = arith.andi %426, %428 : vector<1x256xi1>
    %cst_128 = arith.constant 1.000000e+00 : f32
    %cst_129 = arith.constant 0.000000e+00 : f32
    %430 = vector.broadcast %cst_128 : f32 to vector<1x256xf32>
    %431 = vector.broadcast %cst_129 : f32 to vector<1x256xf32>
    %432 = arith.select %429, %430, %431 : vector<1x256xi1>, vector<1x256xf32>
    %433 = vector.broadcast %432 : vector<1x256xf32> to vector<4x256xf32>
    %434 = arith.mulf %422, %433 : vector<4x256xf32>
    %435 = arith.addf %386, %434 : vector<4x256xf32>
    %cst_130 = arith.constant 0.000000e+00 : f32
    %436 = vector.broadcast %cst_130 : f32 to vector<4x256xf32>
    %c0_131 = arith.constant 0 : index
    %c15 = arith.constant 15 : index
    %437 = vector.load %arg18[%c0_131, %c15] : memref<4x562xf32, #tpu.memory_space<vmem>>, vector<4x256xf32>
    %438 = vector.extract_strided_slice %196 {offsets = [0, 5], sizes = [4, 1], strides = [1, 1]} : vector<4x49xf32> to vector<4x1xf32>
    %439 = vector.broadcast %438 : vector<4x1xf32> to vector<4x256xf32>
    %440 = arith.mulf %437, %439 : vector<4x256xf32>
    %441 = arith.addf %436, %440 : vector<4x256xf32>
    %c0_132 = arith.constant 0 : index
    %c63 = arith.constant 63 : index
    %442 = vector.load %arg18[%c0_132, %c63] : memref<4x562xf32, #tpu.memory_space<vmem>>, vector<4x256xf32>
    %443 = vector.extract_strided_slice %196 {offsets = [0, 12], sizes = [4, 1], strides = [1, 1]} : vector<4x49xf32> to vector<4x1xf32>
    %444 = vector.broadcast %443 : vector<4x1xf32> to vector<4x256xf32>
    %445 = arith.mulf %442, %444 : vector<4x256xf32>
    %446 = arith.addf %441, %445 : vector<4x256xf32>
    %c0_133 = arith.constant 0 : index
    %c111 = arith.constant 111 : index
    %447 = vector.load %arg18[%c0_133, %c111] : memref<4x562xf32, #tpu.memory_space<vmem>>, vector<4x256xf32>
    %448 = vector.extract_strided_slice %196 {offsets = [0, 19], sizes = [4, 1], strides = [1, 1]} : vector<4x49xf32> to vector<4x1xf32>
    %449 = vector.broadcast %448 : vector<4x1xf32> to vector<4x256xf32>
    %450 = arith.mulf %447, %449 : vector<4x256xf32>
    %451 = arith.addf %446, %450 : vector<4x256xf32>
    %c0_134 = arith.constant 0 : index
    %c159 = arith.constant 159 : index
    %452 = vector.load %arg18[%c0_134, %c159] : memref<4x562xf32, #tpu.memory_space<vmem>>, vector<4x256xf32>
    %453 = vector.extract_strided_slice %196 {offsets = [0, 26], sizes = [4, 1], strides = [1, 1]} : vector<4x49xf32> to vector<4x1xf32>
    %454 = vector.broadcast %453 : vector<4x1xf32> to vector<4x256xf32>
    %455 = arith.mulf %452, %454 : vector<4x256xf32>
    %456 = arith.addf %451, %455 : vector<4x256xf32>
    %c0_135 = arith.constant 0 : index
    %c207 = arith.constant 207 : index
    %457 = vector.load %arg18[%c0_135, %c207] : memref<4x562xf32, #tpu.memory_space<vmem>>, vector<4x256xf32>
    %458 = vector.extract_strided_slice %196 {offsets = [0, 33], sizes = [4, 1], strides = [1, 1]} : vector<4x49xf32> to vector<4x1xf32>
    %459 = vector.broadcast %458 : vector<4x1xf32> to vector<4x256xf32>
    %460 = arith.mulf %457, %459 : vector<4x256xf32>
    %461 = arith.addf %456, %460 : vector<4x256xf32>
    %c0_136 = arith.constant 0 : index
    %c255 = arith.constant 255 : index
    %462 = vector.load %arg18[%c0_136, %c255] : memref<4x562xf32, #tpu.memory_space<vmem>>, vector<4x256xf32>
    %463 = vector.extract_strided_slice %196 {offsets = [0, 40], sizes = [4, 1], strides = [1, 1]} : vector<4x49xf32> to vector<4x1xf32>
    %464 = vector.broadcast %463 : vector<4x1xf32> to vector<4x256xf32>
    %465 = arith.mulf %462, %464 : vector<4x256xf32>
    %466 = arith.addf %461, %465 : vector<4x256xf32>
    %c0_137 = arith.constant 0 : index
    %c303 = arith.constant 303 : index
    %467 = vector.load %arg18[%c0_137, %c303] : memref<4x562xf32, #tpu.memory_space<vmem>>, vector<4x256xf32>
    %468 = vector.extract_strided_slice %196 {offsets = [0, 47], sizes = [4, 1], strides = [1, 1]} : vector<4x49xf32> to vector<4x1xf32>
    %469 = vector.broadcast %468 : vector<4x1xf32> to vector<4x256xf32>
    %470 = arith.mulf %467, %469 : vector<4x256xf32>
    %471 = arith.addf %466, %470 : vector<4x256xf32>
    %c6_i32 = arith.constant 6 : i32
    %472 = vector.broadcast %c6_i32 : i32 to vector<1x256xi32>
    %473 = arith.addi %2, %472 : vector<1x256xi32>
    %c0_i32_138 = arith.constant 0 : i32
    %474 = vector.broadcast %c0_i32_138 : i32 to vector<1x256xi32>
    %475 = arith.cmpi sge, %473, %474 : vector<1x256xi32>
    %c16_i32_139 = arith.constant 16 : i32
    %476 = vector.broadcast %c16_i32_139 : i32 to vector<1x256xi32>
    %477 = arith.cmpi slt, %473, %476 : vector<1x256xi32>
    %478 = arith.andi %475, %477 : vector<1x256xi1>
    %cst_140 = arith.constant 1.000000e+00 : f32
    %cst_141 = arith.constant 0.000000e+00 : f32
    %479 = vector.broadcast %cst_140 : f32 to vector<1x256xf32>
    %480 = vector.broadcast %cst_141 : f32 to vector<1x256xf32>
    %481 = arith.select %478, %479, %480 : vector<1x256xi1>, vector<1x256xf32>
    %482 = vector.broadcast %481 : vector<1x256xf32> to vector<4x256xf32>
    %483 = arith.mulf %471, %482 : vector<4x256xf32>
    %484 = arith.addf %435, %483 : vector<4x256xf32>
    %cst_142 = arith.constant 0.000000e+00 : f32
    %485 = vector.broadcast %cst_142 : f32 to vector<4x256xf32>
    %c0_143 = arith.constant 0 : index
    %c18_144 = arith.constant 18 : index
    %486 = vector.load %arg18[%c0_143, %c18_144] : memref<4x562xf32, #tpu.memory_space<vmem>>, vector<4x256xf32>
    %487 = vector.extract_strided_slice %196 {offsets = [0, 6], sizes = [4, 1], strides = [1, 1]} : vector<4x49xf32> to vector<4x1xf32>
    %488 = vector.broadcast %487 : vector<4x1xf32> to vector<4x256xf32>
    %489 = arith.mulf %486, %488 : vector<4x256xf32>
    %490 = arith.addf %485, %489 : vector<4x256xf32>
    %c0_145 = arith.constant 0 : index
    %c66_146 = arith.constant 66 : index
    %491 = vector.load %arg18[%c0_145, %c66_146] : memref<4x562xf32, #tpu.memory_space<vmem>>, vector<4x256xf32>
    %492 = vector.extract_strided_slice %196 {offsets = [0, 13], sizes = [4, 1], strides = [1, 1]} : vector<4x49xf32> to vector<4x1xf32>
    %493 = vector.broadcast %492 : vector<4x1xf32> to vector<4x256xf32>
    %494 = arith.mulf %491, %493 : vector<4x256xf32>
    %495 = arith.addf %490, %494 : vector<4x256xf32>
    %c0_147 = arith.constant 0 : index
    %c114 = arith.constant 114 : index
    %496 = vector.load %arg18[%c0_147, %c114] : memref<4x562xf32, #tpu.memory_space<vmem>>, vector<4x256xf32>
    %497 = vector.extract_strided_slice %196 {offsets = [0, 20], sizes = [4, 1], strides = [1, 1]} : vector<4x49xf32> to vector<4x1xf32>
    %498 = vector.broadcast %497 : vector<4x1xf32> to vector<4x256xf32>
    %499 = arith.mulf %496, %498 : vector<4x256xf32>
    %500 = arith.addf %495, %499 : vector<4x256xf32>
    %c0_148 = arith.constant 0 : index
    %c162 = arith.constant 162 : index
    %501 = vector.load %arg18[%c0_148, %c162] : memref<4x562xf32, #tpu.memory_space<vmem>>, vector<4x256xf32>
    %502 = vector.extract_strided_slice %196 {offsets = [0, 27], sizes = [4, 1], strides = [1, 1]} : vector<4x49xf32> to vector<4x1xf32>
    %503 = vector.broadcast %502 : vector<4x1xf32> to vector<4x256xf32>
    %504 = arith.mulf %501, %503 : vector<4x256xf32>
    %505 = arith.addf %500, %504 : vector<4x256xf32>
    %c0_149 = arith.constant 0 : index
    %c210 = arith.constant 210 : index
    %506 = vector.load %arg18[%c0_149, %c210] : memref<4x562xf32, #tpu.memory_space<vmem>>, vector<4x256xf32>
    %507 = vector.extract_strided_slice %196 {offsets = [0, 34], sizes = [4, 1], strides = [1, 1]} : vector<4x49xf32> to vector<4x1xf32>
    %508 = vector.broadcast %507 : vector<4x1xf32> to vector<4x256xf32>
    %509 = arith.mulf %506, %508 : vector<4x256xf32>
    %510 = arith.addf %505, %509 : vector<4x256xf32>
    %c0_150 = arith.constant 0 : index
    %c258 = arith.constant 258 : index
    %511 = vector.load %arg18[%c0_150, %c258] : memref<4x562xf32, #tpu.memory_space<vmem>>, vector<4x256xf32>
    %512 = vector.extract_strided_slice %196 {offsets = [0, 41], sizes = [4, 1], strides = [1, 1]} : vector<4x49xf32> to vector<4x1xf32>
    %513 = vector.broadcast %512 : vector<4x1xf32> to vector<4x256xf32>
    %514 = arith.mulf %511, %513 : vector<4x256xf32>
    %515 = arith.addf %510, %514 : vector<4x256xf32>
    %c0_151 = arith.constant 0 : index
    %c306 = arith.constant 306 : index
    %516 = vector.load %arg18[%c0_151, %c306] : memref<4x562xf32, #tpu.memory_space<vmem>>, vector<4x256xf32>
    %517 = vector.extract_strided_slice %196 {offsets = [0, 48], sizes = [4, 1], strides = [1, 1]} : vector<4x49xf32> to vector<4x1xf32>
    %518 = vector.broadcast %517 : vector<4x1xf32> to vector<4x256xf32>
    %519 = arith.mulf %516, %518 : vector<4x256xf32>
    %520 = arith.addf %515, %519 : vector<4x256xf32>
    %c9_i32 = arith.constant 9 : i32
    %521 = vector.broadcast %c9_i32 : i32 to vector<1x256xi32>
    %522 = arith.addi %2, %521 : vector<1x256xi32>
    %c0_i32_152 = arith.constant 0 : i32
    %523 = vector.broadcast %c0_i32_152 : i32 to vector<1x256xi32>
    %524 = arith.cmpi sge, %522, %523 : vector<1x256xi32>
    %c16_i32_153 = arith.constant 16 : i32
    %525 = vector.broadcast %c16_i32_153 : i32 to vector<1x256xi32>
    %526 = arith.cmpi slt, %522, %525 : vector<1x256xi32>
    %527 = arith.andi %524, %526 : vector<1x256xi1>
    %cst_154 = arith.constant 1.000000e+00 : f32
    %cst_155 = arith.constant 0.000000e+00 : f32
    %528 = vector.broadcast %cst_154 : f32 to vector<1x256xf32>
    %529 = vector.broadcast %cst_155 : f32 to vector<1x256xf32>
    %530 = arith.select %527, %528, %529 : vector<1x256xi1>, vector<1x256xf32>
    %531 = vector.broadcast %530 : vector<1x256xf32> to vector<4x256xf32>
    %532 = arith.mulf %520, %531 : vector<4x256xf32>
    %533 = arith.addf %484, %532 : vector<4x256xf32>
    %c0_156 = arith.constant 0 : index
    %c0_157 = arith.constant 0 : index
    %534 = vector.load %arg6[%c0_156, %c0_157] : memref<4x1xf32, #tpu.memory_space<vmem>>, vector<4x1xf32>
    %535 = vector.broadcast %534 : vector<4x1xf32> to vector<4x256xf32>
    %536 = arith.addf %533, %535 : vector<4x256xf32>
    %c0_158 = arith.constant 0 : index
    %c0_159 = arith.constant 0 : index
    %537 = vector.load %arg7[%c0_158, %c0_159] : memref<2x4xf32, #tpu.memory_space<vmem>>, vector<2x4xf32>
    %cst_160 = arith.constant dense<0.000000e+00> : vector<2x256xf32>
    %538 = tpu.matmul %537, %195, %cst_160 {dimension_numbers = #tpu.dot_dimension_numbers<[1], [0], [0], [1], [0, 0, 1, 1], [], []>} : vector<2x4xf32>, vector<4x256xf32>, vector<2x256xf32> -> vector<2x256xf32>
    %c0_161 = arith.constant 0 : index
    %c0_162 = arith.constant 0 : index
    %539 = vector.load %arg8[%c0_161, %c0_162] : memref<2x1xf32, #tpu.memory_space<vmem>>, vector<2x1xf32>
    %540 = vector.broadcast %539 : vector<2x1xf32> to vector<2x256xf32>
    %541 = arith.addf %538, %540 : vector<2x256xf32>
    %c0_163 = arith.constant 0 : index
    %c0_164 = arith.constant 0 : index
    %542 = vector.load %arg9[%c0_163, %c0_164] : memref<2x4xf32, #tpu.memory_space<vmem>>, vector<2x4xf32>
    %cst_165 = arith.constant dense<0.000000e+00> : vector<2x256xf32>
    %543 = tpu.matmul %542, %536, %cst_165 {dimension_numbers = #tpu.dot_dimension_numbers<[1], [0], [0], [1], [0, 0, 1, 1], [], []>} : vector<2x4xf32>, vector<4x256xf32>, vector<2x256xf32> -> vector<2x256xf32>
    %c0_166 = arith.constant 0 : index
    %c0_167 = arith.constant 0 : index
    %544 = vector.load %arg10[%c0_166, %c0_167] : memref<2x1xf32, #tpu.memory_space<vmem>>, vector<2x1xf32>
    %545 = vector.broadcast %544 : vector<2x1xf32> to vector<2x256xf32>
    %546 = arith.addf %543, %545 : vector<2x256xf32>
    %cst_168 = arith.constant dense<0.000000e+00> : vector<256xf32>
    %547 = vector.multi_reduction <add>, %541, %cst_168 [0] : vector<2x256xf32> to vector<256xf32>
    %548 = vector.shape_cast %547 : vector<256xf32> to vector<1x256xf32>
    %cst_169 = arith.constant dense<0.000000e+00> : vector<256xf32>
    %549 = vector.multi_reduction <add>, %546, %cst_169 [0] : vector<2x256xf32> to vector<256xf32>
    %550 = vector.shape_cast %549 : vector<256xf32> to vector<1x256xf32>
    %551 = arith.addf %548, %550 : vector<1x256xf32>
    %cst_170 = arith.constant 2.500000e-01 : f32
    %552 = vector.broadcast %cst_170 : f32 to vector<1x256xf32>
    %553 = arith.mulf %551, %552 : vector<1x256xf32>
    %cst_171 = arith.constant dense<0xFF800000> : vector<256xf32>
    %554 = vector.multi_reduction <maximumf>, %541, %cst_171 [0] : vector<2x256xf32> to vector<256xf32>
    %555 = vector.shape_cast %554 : vector<256xf32> to vector<1x256xf32>
    %cst_172 = arith.constant dense<0xFF800000> : vector<256xf32>
    %556 = vector.multi_reduction <maximumf>, %546, %cst_172 [0] : vector<2x256xf32> to vector<256xf32>
    %557 = vector.shape_cast %556 : vector<256xf32> to vector<1x256xf32>
    %558 = arith.maximumf %555, %557 : vector<1x256xf32>
    %cst_173 = arith.constant 0.000000e+00 : f32
    %559 = vector.broadcast %cst_173 : f32 to vector<2x51xf32>
    %c0_174 = arith.constant 0 : index
    %c0_175 = arith.constant 0 : index
    %560 = vector.load %arg19[%c0_174, %c0_175] : memref<2x358xf32, #tpu.memory_space<vmem>>, vector<2x51xf32>
    tpu.vector_store %arg19[%c0_174, %c0_175], %559 {strides = array<i32>} : memref<2x358xf32, #tpu.memory_space<vmem>>, vector<2x51xf32>,
    %cst_176 = arith.constant 0.000000e+00 : f32
    %561 = vector.broadcast %cst_176 : f32 to vector<2x51xf32>
    %c0_177 = arith.constant 0 : index
    %c307 = arith.constant 307 : index
    %562 = vector.load %arg19[%c0_177, %c307] : memref<2x358xf32, #tpu.memory_space<vmem>>, vector<2x51xf32>
    tpu.vector_store %arg19[%c0_177, %c307], %561 {strides = array<i32>} : memref<2x358xf32, #tpu.memory_space<vmem>>, vector<2x51xf32>,
    %c0_178 = arith.constant 0 : index
    %c51_179 = arith.constant 51 : index
    %563 = vector.load %arg19[%c0_178, %c51_179] : memref<2x358xf32, #tpu.memory_space<vmem>>, vector<1x256xf32>
    tpu.vector_store %arg19[%c0_178, %c51_179], %553 {strides = array<i32>} : memref<2x358xf32, #tpu.memory_space<vmem>>, vector<1x256xf32>,
    %c1_180 = arith.constant 1 : index
    %c51_181 = arith.constant 51 : index
    %564 = vector.load %arg19[%c1_180, %c51_181] : memref<2x358xf32, #tpu.memory_space<vmem>>, vector<1x256xf32>
    tpu.vector_store %arg19[%c1_180, %c51_181], %558 {strides = array<i32>} : memref<2x358xf32, #tpu.memory_space<vmem>>, vector<1x256xf32>,
    %c0_182 = arith.constant 0 : index
    %c0_183 = arith.constant 0 : index
    %565 = vector.load %arg11[%c0_182, %c0_183] : memref<2x49xf32, #tpu.memory_space<vmem>>, vector<2x49xf32>
    %c0_184 = arith.constant 0 : index
    %c0_185 = arith.constant 0 : index
    %566 = vector.load %arg12[%c0_184, %c0_185] : memref<2x49xf32, #tpu.memory_space<vmem>>, vector<2x49xf32>
    %cst_186 = arith.constant 0.000000e+00 : f32
    %567 = vector.broadcast %cst_186 : f32 to vector<2x256xf32>
    %cst_187 = arith.constant 0.000000e+00 : f32
    %568 = vector.broadcast %cst_187 : f32 to vector<2x256xf32>
    %c0_188 = arith.constant 0 : index
    %c0_189 = arith.constant 0 : index
    %569 = vector.load %arg19[%c0_188, %c0_189] : memref<2x358xf32, #tpu.memory_space<vmem>>, vector<2x256xf32>
    %570 = vector.extract_strided_slice %569 {offsets = [0, 0], sizes = [1, 256], strides = [1, 1]} : vector<2x256xf32> to vector<1x256xf32>
    %571 = vector.extract_strided_slice %565 {offsets = [0, 0], sizes = [2, 1], strides = [1, 1]} : vector<2x49xf32> to vector<2x1xf32>
    %572 = vector.broadcast %570 : vector<1x256xf32> to vector<2x256xf32>
    %573 = vector.broadcast %571 : vector<2x1xf32> to vector<2x256xf32>
    %574 = arith.mulf %572, %573 : vector<2x256xf32>
    %575 = arith.addf %568, %574 : vector<2x256xf32>
    %576 = vector.extract_strided_slice %569 {offsets = [1, 0], sizes = [1, 256], strides = [1, 1]} : vector<2x256xf32> to vector<1x256xf32>
    %577 = vector.extract_strided_slice %566 {offsets = [0, 0], sizes = [2, 1], strides = [1, 1]} : vector<2x49xf32> to vector<2x1xf32>
    %578 = vector.broadcast %576 : vector<1x256xf32> to vector<2x256xf32>
    %579 = vector.broadcast %577 : vector<2x1xf32> to vector<2x256xf32>
    %580 = arith.mulf %578, %579 : vector<2x256xf32>
    %581 = arith.addf %575, %580 : vector<2x256xf32>
    %c0_190 = arith.constant 0 : index
    %c16_191 = arith.constant 16 : index
    %582 = vector.load %arg19[%c0_190, %c16_191] : memref<2x358xf32, #tpu.memory_space<vmem>>, vector<2x256xf32>
    %583 = vector.extract_strided_slice %582 {offsets = [0, 0], sizes = [1, 256], strides = [1, 1]} : vector<2x256xf32> to vector<1x256xf32>
    %584 = vector.extract_strided_slice %565 {offsets = [0, 7], sizes = [2, 1], strides = [1, 1]} : vector<2x49xf32> to vector<2x1xf32>
    %585 = vector.broadcast %583 : vector<1x256xf32> to vector<2x256xf32>
    %586 = vector.broadcast %584 : vector<2x1xf32> to vector<2x256xf32>
    %587 = arith.mulf %585, %586 : vector<2x256xf32>
    %588 = arith.addf %581, %587 : vector<2x256xf32>
    %589 = vector.extract_strided_slice %582 {offsets = [1, 0], sizes = [1, 256], strides = [1, 1]} : vector<2x256xf32> to vector<1x256xf32>
    %590 = vector.extract_strided_slice %566 {offsets = [0, 7], sizes = [2, 1], strides = [1, 1]} : vector<2x49xf32> to vector<2x1xf32>
    %591 = vector.broadcast %589 : vector<1x256xf32> to vector<2x256xf32>
    %592 = vector.broadcast %590 : vector<2x1xf32> to vector<2x256xf32>
    %593 = arith.mulf %591, %592 : vector<2x256xf32>
    %594 = arith.addf %588, %593 : vector<2x256xf32>
    %c0_192 = arith.constant 0 : index
    %c32_193 = arith.constant 32 : index
    %595 = vector.load %arg19[%c0_192, %c32_193] : memref<2x358xf32, #tpu.memory_space<vmem>>, vector<2x256xf32>
    %596 = vector.extract_strided_slice %595 {offsets = [0, 0], sizes = [1, 256], strides = [1, 1]} : vector<2x256xf32> to vector<1x256xf32>
    %597 = vector.extract_strided_slice %565 {offsets = [0, 14], sizes = [2, 1], strides = [1, 1]} : vector<2x49xf32> to vector<2x1xf32>
    %598 = vector.broadcast %596 : vector<1x256xf32> to vector<2x256xf32>
    %599 = vector.broadcast %597 : vector<2x1xf32> to vector<2x256xf32>
    %600 = arith.mulf %598, %599 : vector<2x256xf32>
    %601 = arith.addf %594, %600 : vector<2x256xf32>
    %602 = vector.extract_strided_slice %595 {offsets = [1, 0], sizes = [1, 256], strides = [1, 1]} : vector<2x256xf32> to vector<1x256xf32>
    %603 = vector.extract_strided_slice %566 {offsets = [0, 14], sizes = [2, 1], strides = [1, 1]} : vector<2x49xf32> to vector<2x1xf32>
    %604 = vector.broadcast %602 : vector<1x256xf32> to vector<2x256xf32>
    %605 = vector.broadcast %603 : vector<2x1xf32> to vector<2x256xf32>
    %606 = arith.mulf %604, %605 : vector<2x256xf32>
    %607 = arith.addf %601, %606 : vector<2x256xf32>
    %c0_194 = arith.constant 0 : index
    %c48_195 = arith.constant 48 : index
    %608 = vector.load %arg19[%c0_194, %c48_195] : memref<2x358xf32, #tpu.memory_space<vmem>>, vector<2x256xf32>
    %609 = vector.extract_strided_slice %608 {offsets = [0, 0], sizes = [1, 256], strides = [1, 1]} : vector<2x256xf32> to vector<1x256xf32>
    %610 = vector.extract_strided_slice %565 {offsets = [0, 21], sizes = [2, 1], strides = [1, 1]} : vector<2x49xf32> to vector<2x1xf32>
    %611 = vector.broadcast %609 : vector<1x256xf32> to vector<2x256xf32>
    %612 = vector.broadcast %610 : vector<2x1xf32> to vector<2x256xf32>
    %613 = arith.mulf %611, %612 : vector<2x256xf32>
    %614 = arith.addf %607, %613 : vector<2x256xf32>
    %615 = vector.extract_strided_slice %608 {offsets = [1, 0], sizes = [1, 256], strides = [1, 1]} : vector<2x256xf32> to vector<1x256xf32>
    %616 = vector.extract_strided_slice %566 {offsets = [0, 21], sizes = [2, 1], strides = [1, 1]} : vector<2x49xf32> to vector<2x1xf32>
    %617 = vector.broadcast %615 : vector<1x256xf32> to vector<2x256xf32>
    %618 = vector.broadcast %616 : vector<2x1xf32> to vector<2x256xf32>
    %619 = arith.mulf %617, %618 : vector<2x256xf32>
    %620 = arith.addf %614, %619 : vector<2x256xf32>
    %c0_196 = arith.constant 0 : index
    %c64_197 = arith.constant 64 : index
    %621 = vector.load %arg19[%c0_196, %c64_197] : memref<2x358xf32, #tpu.memory_space<vmem>>, vector<2x256xf32>
    %622 = vector.extract_strided_slice %621 {offsets = [0, 0], sizes = [1, 256], strides = [1, 1]} : vector<2x256xf32> to vector<1x256xf32>
    %623 = vector.extract_strided_slice %565 {offsets = [0, 28], sizes = [2, 1], strides = [1, 1]} : vector<2x49xf32> to vector<2x1xf32>
    %624 = vector.broadcast %622 : vector<1x256xf32> to vector<2x256xf32>
    %625 = vector.broadcast %623 : vector<2x1xf32> to vector<2x256xf32>
    %626 = arith.mulf %624, %625 : vector<2x256xf32>
    %627 = arith.addf %620, %626 : vector<2x256xf32>
    %628 = vector.extract_strided_slice %621 {offsets = [1, 0], sizes = [1, 256], strides = [1, 1]} : vector<2x256xf32> to vector<1x256xf32>
    %629 = vector.extract_strided_slice %566 {offsets = [0, 28], sizes = [2, 1], strides = [1, 1]} : vector<2x49xf32> to vector<2x1xf32>
    %630 = vector.broadcast %628 : vector<1x256xf32> to vector<2x256xf32>
    %631 = vector.broadcast %629 : vector<2x1xf32> to vector<2x256xf32>
    %632 = arith.mulf %630, %631 : vector<2x256xf32>
    %633 = arith.addf %627, %632 : vector<2x256xf32>
    %c0_198 = arith.constant 0 : index
    %c80 = arith.constant 80 : index
    %634 = vector.load %arg19[%c0_198, %c80] : memref<2x358xf32, #tpu.memory_space<vmem>>, vector<2x256xf32>
    %635 = vector.extract_strided_slice %634 {offsets = [0, 0], sizes = [1, 256], strides = [1, 1]} : vector<2x256xf32> to vector<1x256xf32>
    %636 = vector.extract_strided_slice %565 {offsets = [0, 35], sizes = [2, 1], strides = [1, 1]} : vector<2x49xf32> to vector<2x1xf32>
    %637 = vector.broadcast %635 : vector<1x256xf32> to vector<2x256xf32>
    %638 = vector.broadcast %636 : vector<2x1xf32> to vector<2x256xf32>
    %639 = arith.mulf %637, %638 : vector<2x256xf32>
    %640 = arith.addf %633, %639 : vector<2x256xf32>
    %641 = vector.extract_strided_slice %634 {offsets = [1, 0], sizes = [1, 256], strides = [1, 1]} : vector<2x256xf32> to vector<1x256xf32>
    %642 = vector.extract_strided_slice %566 {offsets = [0, 35], sizes = [2, 1], strides = [1, 1]} : vector<2x49xf32> to vector<2x1xf32>
    %643 = vector.broadcast %641 : vector<1x256xf32> to vector<2x256xf32>
    %644 = vector.broadcast %642 : vector<2x1xf32> to vector<2x256xf32>
    %645 = arith.mulf %643, %644 : vector<2x256xf32>
    %646 = arith.addf %640, %645 : vector<2x256xf32>
    %c0_199 = arith.constant 0 : index
    %c96_200 = arith.constant 96 : index
    %647 = vector.load %arg19[%c0_199, %c96_200] : memref<2x358xf32, #tpu.memory_space<vmem>>, vector<2x256xf32>
    %648 = vector.extract_strided_slice %647 {offsets = [0, 0], sizes = [1, 256], strides = [1, 1]} : vector<2x256xf32> to vector<1x256xf32>
    %649 = vector.extract_strided_slice %565 {offsets = [0, 42], sizes = [2, 1], strides = [1, 1]} : vector<2x49xf32> to vector<2x1xf32>
    %650 = vector.broadcast %648 : vector<1x256xf32> to vector<2x256xf32>
    %651 = vector.broadcast %649 : vector<2x1xf32> to vector<2x256xf32>
    %652 = arith.mulf %650, %651 : vector<2x256xf32>
    %653 = arith.addf %646, %652 : vector<2x256xf32>
    %654 = vector.extract_strided_slice %647 {offsets = [1, 0], sizes = [1, 256], strides = [1, 1]} : vector<2x256xf32> to vector<1x256xf32>
    %655 = vector.extract_strided_slice %566 {offsets = [0, 42], sizes = [2, 1], strides = [1, 1]} : vector<2x49xf32> to vector<2x1xf32>
    %656 = vector.broadcast %654 : vector<1x256xf32> to vector<2x256xf32>
    %657 = vector.broadcast %655 : vector<2x1xf32> to vector<2x256xf32>
    %658 = arith.mulf %656, %657 : vector<2x256xf32>
    %659 = arith.addf %653, %658 : vector<2x256xf32>
    %c-3_i32_201 = arith.constant -3 : i32
    %660 = vector.broadcast %c-3_i32_201 : i32 to vector<1x256xi32>
    %661 = arith.addi %2, %660 : vector<1x256xi32>
    %c0_i32_202 = arith.constant 0 : i32
    %662 = vector.broadcast %c0_i32_202 : i32 to vector<1x256xi32>
    %663 = arith.cmpi sge, %661, %662 : vector<1x256xi32>
    %c16_i32_203 = arith.constant 16 : i32
    %664 = vector.broadcast %c16_i32_203 : i32 to vector<1x256xi32>
    %665 = arith.cmpi slt, %661, %664 : vector<1x256xi32>
    %666 = arith.andi %663, %665 : vector<1x256xi1>
    %cst_204 = arith.constant 1.000000e+00 : f32
    %cst_205 = arith.constant 0.000000e+00 : f32
    %667 = vector.broadcast %cst_204 : f32 to vector<1x256xf32>
    %668 = vector.broadcast %cst_205 : f32 to vector<1x256xf32>
    %669 = arith.select %666, %667, %668 : vector<1x256xi1>, vector<1x256xf32>
    %670 = vector.broadcast %669 : vector<1x256xf32> to vector<2x256xf32>
    %671 = arith.mulf %659, %670 : vector<2x256xf32>
    %672 = arith.addf %567, %671 : vector<2x256xf32>
    %cst_206 = arith.constant 0.000000e+00 : f32
    %673 = vector.broadcast %cst_206 : f32 to vector<2x256xf32>
    %c0_207 = arith.constant 0 : index
    %c1_208 = arith.constant 1 : index
    %674 = vector.load %arg19[%c0_207, %c1_208] : memref<2x358xf32, #tpu.memory_space<vmem>>, vector<2x256xf32>
    %675 = vector.extract_strided_slice %674 {offsets = [0, 0], sizes = [1, 256], strides = [1, 1]} : vector<2x256xf32> to vector<1x256xf32>
    %676 = vector.extract_strided_slice %565 {offsets = [0, 1], sizes = [2, 1], strides = [1, 1]} : vector<2x49xf32> to vector<2x1xf32>
    %677 = vector.broadcast %675 : vector<1x256xf32> to vector<2x256xf32>
    %678 = vector.broadcast %676 : vector<2x1xf32> to vector<2x256xf32>
    %679 = arith.mulf %677, %678 : vector<2x256xf32>
    %680 = arith.addf %673, %679 : vector<2x256xf32>
    %681 = vector.extract_strided_slice %674 {offsets = [1, 0], sizes = [1, 256], strides = [1, 1]} : vector<2x256xf32> to vector<1x256xf32>
    %682 = vector.extract_strided_slice %566 {offsets = [0, 1], sizes = [2, 1], strides = [1, 1]} : vector<2x49xf32> to vector<2x1xf32>
    %683 = vector.broadcast %681 : vector<1x256xf32> to vector<2x256xf32>
    %684 = vector.broadcast %682 : vector<2x1xf32> to vector<2x256xf32>
    %685 = arith.mulf %683, %684 : vector<2x256xf32>
    %686 = arith.addf %680, %685 : vector<2x256xf32>
    %c0_209 = arith.constant 0 : index
    %c17_210 = arith.constant 17 : index
    %687 = vector.load %arg19[%c0_209, %c17_210] : memref<2x358xf32, #tpu.memory_space<vmem>>, vector<2x256xf32>
    %688 = vector.extract_strided_slice %687 {offsets = [0, 0], sizes = [1, 256], strides = [1, 1]} : vector<2x256xf32> to vector<1x256xf32>
    %689 = vector.extract_strided_slice %565 {offsets = [0, 8], sizes = [2, 1], strides = [1, 1]} : vector<2x49xf32> to vector<2x1xf32>
    %690 = vector.broadcast %688 : vector<1x256xf32> to vector<2x256xf32>
    %691 = vector.broadcast %689 : vector<2x1xf32> to vector<2x256xf32>
    %692 = arith.mulf %690, %691 : vector<2x256xf32>
    %693 = arith.addf %686, %692 : vector<2x256xf32>
    %694 = vector.extract_strided_slice %687 {offsets = [1, 0], sizes = [1, 256], strides = [1, 1]} : vector<2x256xf32> to vector<1x256xf32>
    %695 = vector.extract_strided_slice %566 {offsets = [0, 8], sizes = [2, 1], strides = [1, 1]} : vector<2x49xf32> to vector<2x1xf32>
    %696 = vector.broadcast %694 : vector<1x256xf32> to vector<2x256xf32>
    %697 = vector.broadcast %695 : vector<2x1xf32> to vector<2x256xf32>
    %698 = arith.mulf %696, %697 : vector<2x256xf32>
    %699 = arith.addf %693, %698 : vector<2x256xf32>
    %c0_211 = arith.constant 0 : index
    %c33_212 = arith.constant 33 : index
    %700 = vector.load %arg19[%c0_211, %c33_212] : memref<2x358xf32, #tpu.memory_space<vmem>>, vector<2x256xf32>
    %701 = vector.extract_strided_slice %700 {offsets = [0, 0], sizes = [1, 256], strides = [1, 1]} : vector<2x256xf32> to vector<1x256xf32>
    %702 = vector.extract_strided_slice %565 {offsets = [0, 15], sizes = [2, 1], strides = [1, 1]} : vector<2x49xf32> to vector<2x1xf32>
    %703 = vector.broadcast %701 : vector<1x256xf32> to vector<2x256xf32>
    %704 = vector.broadcast %702 : vector<2x1xf32> to vector<2x256xf32>
    %705 = arith.mulf %703, %704 : vector<2x256xf32>
    %706 = arith.addf %699, %705 : vector<2x256xf32>
    %707 = vector.extract_strided_slice %700 {offsets = [1, 0], sizes = [1, 256], strides = [1, 1]} : vector<2x256xf32> to vector<1x256xf32>
    %708 = vector.extract_strided_slice %566 {offsets = [0, 15], sizes = [2, 1], strides = [1, 1]} : vector<2x49xf32> to vector<2x1xf32>
    %709 = vector.broadcast %707 : vector<1x256xf32> to vector<2x256xf32>
    %710 = vector.broadcast %708 : vector<2x1xf32> to vector<2x256xf32>
    %711 = arith.mulf %709, %710 : vector<2x256xf32>
    %712 = arith.addf %706, %711 : vector<2x256xf32>
    %c0_213 = arith.constant 0 : index
    %c49_214 = arith.constant 49 : index
    %713 = vector.load %arg19[%c0_213, %c49_214] : memref<2x358xf32, #tpu.memory_space<vmem>>, vector<2x256xf32>
    %714 = vector.extract_strided_slice %713 {offsets = [0, 0], sizes = [1, 256], strides = [1, 1]} : vector<2x256xf32> to vector<1x256xf32>
    %715 = vector.extract_strided_slice %565 {offsets = [0, 22], sizes = [2, 1], strides = [1, 1]} : vector<2x49xf32> to vector<2x1xf32>
    %716 = vector.broadcast %714 : vector<1x256xf32> to vector<2x256xf32>
    %717 = vector.broadcast %715 : vector<2x1xf32> to vector<2x256xf32>
    %718 = arith.mulf %716, %717 : vector<2x256xf32>
    %719 = arith.addf %712, %718 : vector<2x256xf32>
    %720 = vector.extract_strided_slice %713 {offsets = [1, 0], sizes = [1, 256], strides = [1, 1]} : vector<2x256xf32> to vector<1x256xf32>
    %721 = vector.extract_strided_slice %566 {offsets = [0, 22], sizes = [2, 1], strides = [1, 1]} : vector<2x49xf32> to vector<2x1xf32>
    %722 = vector.broadcast %720 : vector<1x256xf32> to vector<2x256xf32>
    %723 = vector.broadcast %721 : vector<2x1xf32> to vector<2x256xf32>
    %724 = arith.mulf %722, %723 : vector<2x256xf32>
    %725 = arith.addf %719, %724 : vector<2x256xf32>
    %c0_215 = arith.constant 0 : index
    %c65_216 = arith.constant 65 : index
    %726 = vector.load %arg19[%c0_215, %c65_216] : memref<2x358xf32, #tpu.memory_space<vmem>>, vector<2x256xf32>
    %727 = vector.extract_strided_slice %726 {offsets = [0, 0], sizes = [1, 256], strides = [1, 1]} : vector<2x256xf32> to vector<1x256xf32>
    %728 = vector.extract_strided_slice %565 {offsets = [0, 29], sizes = [2, 1], strides = [1, 1]} : vector<2x49xf32> to vector<2x1xf32>
    %729 = vector.broadcast %727 : vector<1x256xf32> to vector<2x256xf32>
    %730 = vector.broadcast %728 : vector<2x1xf32> to vector<2x256xf32>
    %731 = arith.mulf %729, %730 : vector<2x256xf32>
    %732 = arith.addf %725, %731 : vector<2x256xf32>
    %733 = vector.extract_strided_slice %726 {offsets = [1, 0], sizes = [1, 256], strides = [1, 1]} : vector<2x256xf32> to vector<1x256xf32>
    %734 = vector.extract_strided_slice %566 {offsets = [0, 29], sizes = [2, 1], strides = [1, 1]} : vector<2x49xf32> to vector<2x1xf32>
    %735 = vector.broadcast %733 : vector<1x256xf32> to vector<2x256xf32>
    %736 = vector.broadcast %734 : vector<2x1xf32> to vector<2x256xf32>
    %737 = arith.mulf %735, %736 : vector<2x256xf32>
    %738 = arith.addf %732, %737 : vector<2x256xf32>
    %c0_217 = arith.constant 0 : index
    %c81 = arith.constant 81 : index
    %739 = vector.load %arg19[%c0_217, %c81] : memref<2x358xf32, #tpu.memory_space<vmem>>, vector<2x256xf32>
    %740 = vector.extract_strided_slice %739 {offsets = [0, 0], sizes = [1, 256], strides = [1, 1]} : vector<2x256xf32> to vector<1x256xf32>
    %741 = vector.extract_strided_slice %565 {offsets = [0, 36], sizes = [2, 1], strides = [1, 1]} : vector<2x49xf32> to vector<2x1xf32>
    %742 = vector.broadcast %740 : vector<1x256xf32> to vector<2x256xf32>
    %743 = vector.broadcast %741 : vector<2x1xf32> to vector<2x256xf32>
    %744 = arith.mulf %742, %743 : vector<2x256xf32>
    %745 = arith.addf %738, %744 : vector<2x256xf32>
    %746 = vector.extract_strided_slice %739 {offsets = [1, 0], sizes = [1, 256], strides = [1, 1]} : vector<2x256xf32> to vector<1x256xf32>
    %747 = vector.extract_strided_slice %566 {offsets = [0, 36], sizes = [2, 1], strides = [1, 1]} : vector<2x49xf32> to vector<2x1xf32>
    %748 = vector.broadcast %746 : vector<1x256xf32> to vector<2x256xf32>
    %749 = vector.broadcast %747 : vector<2x1xf32> to vector<2x256xf32>
    %750 = arith.mulf %748, %749 : vector<2x256xf32>
    %751 = arith.addf %745, %750 : vector<2x256xf32>
    %c0_218 = arith.constant 0 : index
    %c97 = arith.constant 97 : index
    %752 = vector.load %arg19[%c0_218, %c97] : memref<2x358xf32, #tpu.memory_space<vmem>>, vector<2x256xf32>
    %753 = vector.extract_strided_slice %752 {offsets = [0, 0], sizes = [1, 256], strides = [1, 1]} : vector<2x256xf32> to vector<1x256xf32>
    %754 = vector.extract_strided_slice %565 {offsets = [0, 43], sizes = [2, 1], strides = [1, 1]} : vector<2x49xf32> to vector<2x1xf32>
    %755 = vector.broadcast %753 : vector<1x256xf32> to vector<2x256xf32>
    %756 = vector.broadcast %754 : vector<2x1xf32> to vector<2x256xf32>
    %757 = arith.mulf %755, %756 : vector<2x256xf32>
    %758 = arith.addf %751, %757 : vector<2x256xf32>
    %759 = vector.extract_strided_slice %752 {offsets = [1, 0], sizes = [1, 256], strides = [1, 1]} : vector<2x256xf32> to vector<1x256xf32>
    %760 = vector.extract_strided_slice %566 {offsets = [0, 43], sizes = [2, 1], strides = [1, 1]} : vector<2x49xf32> to vector<2x1xf32>
    %761 = vector.broadcast %759 : vector<1x256xf32> to vector<2x256xf32>
    %762 = vector.broadcast %760 : vector<2x1xf32> to vector<2x256xf32>
    %763 = arith.mulf %761, %762 : vector<2x256xf32>
    %764 = arith.addf %758, %763 : vector<2x256xf32>
    %c-2_i32_219 = arith.constant -2 : i32
    %765 = vector.broadcast %c-2_i32_219 : i32 to vector<1x256xi32>
    %766 = arith.addi %2, %765 : vector<1x256xi32>
    %c0_i32_220 = arith.constant 0 : i32
    %767 = vector.broadcast %c0_i32_220 : i32 to vector<1x256xi32>
    %768 = arith.cmpi sge, %766, %767 : vector<1x256xi32>
    %c16_i32_221 = arith.constant 16 : i32
    %769 = vector.broadcast %c16_i32_221 : i32 to vector<1x256xi32>
    %770 = arith.cmpi slt, %766, %769 : vector<1x256xi32>
    %771 = arith.andi %768, %770 : vector<1x256xi1>
    %cst_222 = arith.constant 1.000000e+00 : f32
    %cst_223 = arith.constant 0.000000e+00 : f32
    %772 = vector.broadcast %cst_222 : f32 to vector<1x256xf32>
    %773 = vector.broadcast %cst_223 : f32 to vector<1x256xf32>
    %774 = arith.select %771, %772, %773 : vector<1x256xi1>, vector<1x256xf32>
    %775 = vector.broadcast %774 : vector<1x256xf32> to vector<2x256xf32>
    %776 = arith.mulf %764, %775 : vector<2x256xf32>
    %777 = arith.addf %672, %776 : vector<2x256xf32>
    %cst_224 = arith.constant 0.000000e+00 : f32
    %778 = vector.broadcast %cst_224 : f32 to vector<2x256xf32>
    %c0_225 = arith.constant 0 : index
    %c2_226 = arith.constant 2 : index
    %779 = vector.load %arg19[%c0_225, %c2_226] : memref<2x358xf32, #tpu.memory_space<vmem>>, vector<2x256xf32>
    %780 = vector.extract_strided_slice %779 {offsets = [0, 0], sizes = [1, 256], strides = [1, 1]} : vector<2x256xf32> to vector<1x256xf32>
    %781 = vector.extract_strided_slice %565 {offsets = [0, 2], sizes = [2, 1], strides = [1, 1]} : vector<2x49xf32> to vector<2x1xf32>
    %782 = vector.broadcast %780 : vector<1x256xf32> to vector<2x256xf32>
    %783 = vector.broadcast %781 : vector<2x1xf32> to vector<2x256xf32>
    %784 = arith.mulf %782, %783 : vector<2x256xf32>
    %785 = arith.addf %778, %784 : vector<2x256xf32>
    %786 = vector.extract_strided_slice %779 {offsets = [1, 0], sizes = [1, 256], strides = [1, 1]} : vector<2x256xf32> to vector<1x256xf32>
    %787 = vector.extract_strided_slice %566 {offsets = [0, 2], sizes = [2, 1], strides = [1, 1]} : vector<2x49xf32> to vector<2x1xf32>
    %788 = vector.broadcast %786 : vector<1x256xf32> to vector<2x256xf32>
    %789 = vector.broadcast %787 : vector<2x1xf32> to vector<2x256xf32>
    %790 = arith.mulf %788, %789 : vector<2x256xf32>
    %791 = arith.addf %785, %790 : vector<2x256xf32>
    %c0_227 = arith.constant 0 : index
    %c18_228 = arith.constant 18 : index
    %792 = vector.load %arg19[%c0_227, %c18_228] : memref<2x358xf32, #tpu.memory_space<vmem>>, vector<2x256xf32>
    %793 = vector.extract_strided_slice %792 {offsets = [0, 0], sizes = [1, 256], strides = [1, 1]} : vector<2x256xf32> to vector<1x256xf32>
    %794 = vector.extract_strided_slice %565 {offsets = [0, 9], sizes = [2, 1], strides = [1, 1]} : vector<2x49xf32> to vector<2x1xf32>
    %795 = vector.broadcast %793 : vector<1x256xf32> to vector<2x256xf32>
    %796 = vector.broadcast %794 : vector<2x1xf32> to vector<2x256xf32>
    %797 = arith.mulf %795, %796 : vector<2x256xf32>
    %798 = arith.addf %791, %797 : vector<2x256xf32>
    %799 = vector.extract_strided_slice %792 {offsets = [1, 0], sizes = [1, 256], strides = [1, 1]} : vector<2x256xf32> to vector<1x256xf32>
    %800 = vector.extract_strided_slice %566 {offsets = [0, 9], sizes = [2, 1], strides = [1, 1]} : vector<2x49xf32> to vector<2x1xf32>
    %801 = vector.broadcast %799 : vector<1x256xf32> to vector<2x256xf32>
    %802 = vector.broadcast %800 : vector<2x1xf32> to vector<2x256xf32>
    %803 = arith.mulf %801, %802 : vector<2x256xf32>
    %804 = arith.addf %798, %803 : vector<2x256xf32>
    %c0_229 = arith.constant 0 : index
    %c34_230 = arith.constant 34 : index
    %805 = vector.load %arg19[%c0_229, %c34_230] : memref<2x358xf32, #tpu.memory_space<vmem>>, vector<2x256xf32>
    %806 = vector.extract_strided_slice %805 {offsets = [0, 0], sizes = [1, 256], strides = [1, 1]} : vector<2x256xf32> to vector<1x256xf32>
    %807 = vector.extract_strided_slice %565 {offsets = [0, 16], sizes = [2, 1], strides = [1, 1]} : vector<2x49xf32> to vector<2x1xf32>
    %808 = vector.broadcast %806 : vector<1x256xf32> to vector<2x256xf32>
    %809 = vector.broadcast %807 : vector<2x1xf32> to vector<2x256xf32>
    %810 = arith.mulf %808, %809 : vector<2x256xf32>
    %811 = arith.addf %804, %810 : vector<2x256xf32>
    %812 = vector.extract_strided_slice %805 {offsets = [1, 0], sizes = [1, 256], strides = [1, 1]} : vector<2x256xf32> to vector<1x256xf32>
    %813 = vector.extract_strided_slice %566 {offsets = [0, 16], sizes = [2, 1], strides = [1, 1]} : vector<2x49xf32> to vector<2x1xf32>
    %814 = vector.broadcast %812 : vector<1x256xf32> to vector<2x256xf32>
    %815 = vector.broadcast %813 : vector<2x1xf32> to vector<2x256xf32>
    %816 = arith.mulf %814, %815 : vector<2x256xf32>
    %817 = arith.addf %811, %816 : vector<2x256xf32>
    %c0_231 = arith.constant 0 : index
    %c50_232 = arith.constant 50 : index
    %818 = vector.load %arg19[%c0_231, %c50_232] : memref<2x358xf32, #tpu.memory_space<vmem>>, vector<2x256xf32>
    %819 = vector.extract_strided_slice %818 {offsets = [0, 0], sizes = [1, 256], strides = [1, 1]} : vector<2x256xf32> to vector<1x256xf32>
    %820 = vector.extract_strided_slice %565 {offsets = [0, 23], sizes = [2, 1], strides = [1, 1]} : vector<2x49xf32> to vector<2x1xf32>
    %821 = vector.broadcast %819 : vector<1x256xf32> to vector<2x256xf32>
    %822 = vector.broadcast %820 : vector<2x1xf32> to vector<2x256xf32>
    %823 = arith.mulf %821, %822 : vector<2x256xf32>
    %824 = arith.addf %817, %823 : vector<2x256xf32>
    %825 = vector.extract_strided_slice %818 {offsets = [1, 0], sizes = [1, 256], strides = [1, 1]} : vector<2x256xf32> to vector<1x256xf32>
    %826 = vector.extract_strided_slice %566 {offsets = [0, 23], sizes = [2, 1], strides = [1, 1]} : vector<2x49xf32> to vector<2x1xf32>
    %827 = vector.broadcast %825 : vector<1x256xf32> to vector<2x256xf32>
    %828 = vector.broadcast %826 : vector<2x1xf32> to vector<2x256xf32>
    %829 = arith.mulf %827, %828 : vector<2x256xf32>
    %830 = arith.addf %824, %829 : vector<2x256xf32>
    %c0_233 = arith.constant 0 : index
    %c66_234 = arith.constant 66 : index
    %831 = vector.load %arg19[%c0_233, %c66_234] : memref<2x358xf32, #tpu.memory_space<vmem>>, vector<2x256xf32>
    %832 = vector.extract_strided_slice %831 {offsets = [0, 0], sizes = [1, 256], strides = [1, 1]} : vector<2x256xf32> to vector<1x256xf32>
    %833 = vector.extract_strided_slice %565 {offsets = [0, 30], sizes = [2, 1], strides = [1, 1]} : vector<2x49xf32> to vector<2x1xf32>
    %834 = vector.broadcast %832 : vector<1x256xf32> to vector<2x256xf32>
    %835 = vector.broadcast %833 : vector<2x1xf32> to vector<2x256xf32>
    %836 = arith.mulf %834, %835 : vector<2x256xf32>
    %837 = arith.addf %830, %836 : vector<2x256xf32>
    %838 = vector.extract_strided_slice %831 {offsets = [1, 0], sizes = [1, 256], strides = [1, 1]} : vector<2x256xf32> to vector<1x256xf32>
    %839 = vector.extract_strided_slice %566 {offsets = [0, 30], sizes = [2, 1], strides = [1, 1]} : vector<2x49xf32> to vector<2x1xf32>
    %840 = vector.broadcast %838 : vector<1x256xf32> to vector<2x256xf32>
    %841 = vector.broadcast %839 : vector<2x1xf32> to vector<2x256xf32>
    %842 = arith.mulf %840, %841 : vector<2x256xf32>
    %843 = arith.addf %837, %842 : vector<2x256xf32>
    %c0_235 = arith.constant 0 : index
    %c82 = arith.constant 82 : index
    %844 = vector.load %arg19[%c0_235, %c82] : memref<2x358xf32, #tpu.memory_space<vmem>>, vector<2x256xf32>
    %845 = vector.extract_strided_slice %844 {offsets = [0, 0], sizes = [1, 256], strides = [1, 1]} : vector<2x256xf32> to vector<1x256xf32>
    %846 = vector.extract_strided_slice %565 {offsets = [0, 37], sizes = [2, 1], strides = [1, 1]} : vector<2x49xf32> to vector<2x1xf32>
    %847 = vector.broadcast %845 : vector<1x256xf32> to vector<2x256xf32>
    %848 = vector.broadcast %846 : vector<2x1xf32> to vector<2x256xf32>
    %849 = arith.mulf %847, %848 : vector<2x256xf32>
    %850 = arith.addf %843, %849 : vector<2x256xf32>
    %851 = vector.extract_strided_slice %844 {offsets = [1, 0], sizes = [1, 256], strides = [1, 1]} : vector<2x256xf32> to vector<1x256xf32>
    %852 = vector.extract_strided_slice %566 {offsets = [0, 37], sizes = [2, 1], strides = [1, 1]} : vector<2x49xf32> to vector<2x1xf32>
    %853 = vector.broadcast %851 : vector<1x256xf32> to vector<2x256xf32>
    %854 = vector.broadcast %852 : vector<2x1xf32> to vector<2x256xf32>
    %855 = arith.mulf %853, %854 : vector<2x256xf32>
    %856 = arith.addf %850, %855 : vector<2x256xf32>
    %c0_236 = arith.constant 0 : index
    %c98 = arith.constant 98 : index
    %857 = vector.load %arg19[%c0_236, %c98] : memref<2x358xf32, #tpu.memory_space<vmem>>, vector<2x256xf32>
    %858 = vector.extract_strided_slice %857 {offsets = [0, 0], sizes = [1, 256], strides = [1, 1]} : vector<2x256xf32> to vector<1x256xf32>
    %859 = vector.extract_strided_slice %565 {offsets = [0, 44], sizes = [2, 1], strides = [1, 1]} : vector<2x49xf32> to vector<2x1xf32>
    %860 = vector.broadcast %858 : vector<1x256xf32> to vector<2x256xf32>
    %861 = vector.broadcast %859 : vector<2x1xf32> to vector<2x256xf32>
    %862 = arith.mulf %860, %861 : vector<2x256xf32>
    %863 = arith.addf %856, %862 : vector<2x256xf32>
    %864 = vector.extract_strided_slice %857 {offsets = [1, 0], sizes = [1, 256], strides = [1, 1]} : vector<2x256xf32> to vector<1x256xf32>
    %865 = vector.extract_strided_slice %566 {offsets = [0, 44], sizes = [2, 1], strides = [1, 1]} : vector<2x49xf32> to vector<2x1xf32>
    %866 = vector.broadcast %864 : vector<1x256xf32> to vector<2x256xf32>
    %867 = vector.broadcast %865 : vector<2x1xf32> to vector<2x256xf32>
    %868 = arith.mulf %866, %867 : vector<2x256xf32>
    %869 = arith.addf %863, %868 : vector<2x256xf32>
    %c-1_i32_237 = arith.constant -1 : i32
    %870 = vector.broadcast %c-1_i32_237 : i32 to vector<1x256xi32>
    %871 = arith.addi %2, %870 : vector<1x256xi32>
    %c0_i32_238 = arith.constant 0 : i32
    %872 = vector.broadcast %c0_i32_238 : i32 to vector<1x256xi32>
    %873 = arith.cmpi sge, %871, %872 : vector<1x256xi32>
    %c16_i32_239 = arith.constant 16 : i32
    %874 = vector.broadcast %c16_i32_239 : i32 to vector<1x256xi32>
    %875 = arith.cmpi slt, %871, %874 : vector<1x256xi32>
    %876 = arith.andi %873, %875 : vector<1x256xi1>
    %cst_240 = arith.constant 1.000000e+00 : f32
    %cst_241 = arith.constant 0.000000e+00 : f32
    %877 = vector.broadcast %cst_240 : f32 to vector<1x256xf32>
    %878 = vector.broadcast %cst_241 : f32 to vector<1x256xf32>
    %879 = arith.select %876, %877, %878 : vector<1x256xi1>, vector<1x256xf32>
    %880 = vector.broadcast %879 : vector<1x256xf32> to vector<2x256xf32>
    %881 = arith.mulf %869, %880 : vector<2x256xf32>
    %882 = arith.addf %777, %881 : vector<2x256xf32>
    %cst_242 = arith.constant 0.000000e+00 : f32
    %883 = vector.broadcast %cst_242 : f32 to vector<2x256xf32>
    %c0_243 = arith.constant 0 : index
    %c3_244 = arith.constant 3 : index
    %884 = vector.load %arg19[%c0_243, %c3_244] : memref<2x358xf32, #tpu.memory_space<vmem>>, vector<2x256xf32>
    %885 = vector.extract_strided_slice %884 {offsets = [0, 0], sizes = [1, 256], strides = [1, 1]} : vector<2x256xf32> to vector<1x256xf32>
    %886 = vector.extract_strided_slice %565 {offsets = [0, 3], sizes = [2, 1], strides = [1, 1]} : vector<2x49xf32> to vector<2x1xf32>
    %887 = vector.broadcast %885 : vector<1x256xf32> to vector<2x256xf32>
    %888 = vector.broadcast %886 : vector<2x1xf32> to vector<2x256xf32>
    %889 = arith.mulf %887, %888 : vector<2x256xf32>
    %890 = arith.addf %883, %889 : vector<2x256xf32>
    %891 = vector.extract_strided_slice %884 {offsets = [1, 0], sizes = [1, 256], strides = [1, 1]} : vector<2x256xf32> to vector<1x256xf32>
    %892 = vector.extract_strided_slice %566 {offsets = [0, 3], sizes = [2, 1], strides = [1, 1]} : vector<2x49xf32> to vector<2x1xf32>
    %893 = vector.broadcast %891 : vector<1x256xf32> to vector<2x256xf32>
    %894 = vector.broadcast %892 : vector<2x1xf32> to vector<2x256xf32>
    %895 = arith.mulf %893, %894 : vector<2x256xf32>
    %896 = arith.addf %890, %895 : vector<2x256xf32>
    %c0_245 = arith.constant 0 : index
    %c19_246 = arith.constant 19 : index
    %897 = vector.load %arg19[%c0_245, %c19_246] : memref<2x358xf32, #tpu.memory_space<vmem>>, vector<2x256xf32>
    %898 = vector.extract_strided_slice %897 {offsets = [0, 0], sizes = [1, 256], strides = [1, 1]} : vector<2x256xf32> to vector<1x256xf32>
    %899 = vector.extract_strided_slice %565 {offsets = [0, 10], sizes = [2, 1], strides = [1, 1]} : vector<2x49xf32> to vector<2x1xf32>
    %900 = vector.broadcast %898 : vector<1x256xf32> to vector<2x256xf32>
    %901 = vector.broadcast %899 : vector<2x1xf32> to vector<2x256xf32>
    %902 = arith.mulf %900, %901 : vector<2x256xf32>
    %903 = arith.addf %896, %902 : vector<2x256xf32>
    %904 = vector.extract_strided_slice %897 {offsets = [1, 0], sizes = [1, 256], strides = [1, 1]} : vector<2x256xf32> to vector<1x256xf32>
    %905 = vector.extract_strided_slice %566 {offsets = [0, 10], sizes = [2, 1], strides = [1, 1]} : vector<2x49xf32> to vector<2x1xf32>
    %906 = vector.broadcast %904 : vector<1x256xf32> to vector<2x256xf32>
    %907 = vector.broadcast %905 : vector<2x1xf32> to vector<2x256xf32>
    %908 = arith.mulf %906, %907 : vector<2x256xf32>
    %909 = arith.addf %903, %908 : vector<2x256xf32>
    %c0_247 = arith.constant 0 : index
    %c35_248 = arith.constant 35 : index
    %910 = vector.load %arg19[%c0_247, %c35_248] : memref<2x358xf32, #tpu.memory_space<vmem>>, vector<2x256xf32>
    %911 = vector.extract_strided_slice %910 {offsets = [0, 0], sizes = [1, 256], strides = [1, 1]} : vector<2x256xf32> to vector<1x256xf32>
    %912 = vector.extract_strided_slice %565 {offsets = [0, 17], sizes = [2, 1], strides = [1, 1]} : vector<2x49xf32> to vector<2x1xf32>
    %913 = vector.broadcast %911 : vector<1x256xf32> to vector<2x256xf32>
    %914 = vector.broadcast %912 : vector<2x1xf32> to vector<2x256xf32>
    %915 = arith.mulf %913, %914 : vector<2x256xf32>
    %916 = arith.addf %909, %915 : vector<2x256xf32>
    %917 = vector.extract_strided_slice %910 {offsets = [1, 0], sizes = [1, 256], strides = [1, 1]} : vector<2x256xf32> to vector<1x256xf32>
    %918 = vector.extract_strided_slice %566 {offsets = [0, 17], sizes = [2, 1], strides = [1, 1]} : vector<2x49xf32> to vector<2x1xf32>
    %919 = vector.broadcast %917 : vector<1x256xf32> to vector<2x256xf32>
    %920 = vector.broadcast %918 : vector<2x1xf32> to vector<2x256xf32>
    %921 = arith.mulf %919, %920 : vector<2x256xf32>
    %922 = arith.addf %916, %921 : vector<2x256xf32>
    %c0_249 = arith.constant 0 : index
    %c51_250 = arith.constant 51 : index
    %923 = vector.load %arg19[%c0_249, %c51_250] : memref<2x358xf32, #tpu.memory_space<vmem>>, vector<2x256xf32>
    %924 = vector.extract_strided_slice %923 {offsets = [0, 0], sizes = [1, 256], strides = [1, 1]} : vector<2x256xf32> to vector<1x256xf32>
    %925 = vector.extract_strided_slice %565 {offsets = [0, 24], sizes = [2, 1], strides = [1, 1]} : vector<2x49xf32> to vector<2x1xf32>
    %926 = vector.broadcast %924 : vector<1x256xf32> to vector<2x256xf32>
    %927 = vector.broadcast %925 : vector<2x1xf32> to vector<2x256xf32>
    %928 = arith.mulf %926, %927 : vector<2x256xf32>
    %929 = arith.addf %922, %928 : vector<2x256xf32>
    %930 = vector.extract_strided_slice %923 {offsets = [1, 0], sizes = [1, 256], strides = [1, 1]} : vector<2x256xf32> to vector<1x256xf32>
    %931 = vector.extract_strided_slice %566 {offsets = [0, 24], sizes = [2, 1], strides = [1, 1]} : vector<2x49xf32> to vector<2x1xf32>
    %932 = vector.broadcast %930 : vector<1x256xf32> to vector<2x256xf32>
    %933 = vector.broadcast %931 : vector<2x1xf32> to vector<2x256xf32>
    %934 = arith.mulf %932, %933 : vector<2x256xf32>
    %935 = arith.addf %929, %934 : vector<2x256xf32>
    %c0_251 = arith.constant 0 : index
    %c67_252 = arith.constant 67 : index
    %936 = vector.load %arg19[%c0_251, %c67_252] : memref<2x358xf32, #tpu.memory_space<vmem>>, vector<2x256xf32>
    %937 = vector.extract_strided_slice %936 {offsets = [0, 0], sizes = [1, 256], strides = [1, 1]} : vector<2x256xf32> to vector<1x256xf32>
    %938 = vector.extract_strided_slice %565 {offsets = [0, 31], sizes = [2, 1], strides = [1, 1]} : vector<2x49xf32> to vector<2x1xf32>
    %939 = vector.broadcast %937 : vector<1x256xf32> to vector<2x256xf32>
    %940 = vector.broadcast %938 : vector<2x1xf32> to vector<2x256xf32>
    %941 = arith.mulf %939, %940 : vector<2x256xf32>
    %942 = arith.addf %935, %941 : vector<2x256xf32>
    %943 = vector.extract_strided_slice %936 {offsets = [1, 0], sizes = [1, 256], strides = [1, 1]} : vector<2x256xf32> to vector<1x256xf32>
    %944 = vector.extract_strided_slice %566 {offsets = [0, 31], sizes = [2, 1], strides = [1, 1]} : vector<2x49xf32> to vector<2x1xf32>
    %945 = vector.broadcast %943 : vector<1x256xf32> to vector<2x256xf32>
    %946 = vector.broadcast %944 : vector<2x1xf32> to vector<2x256xf32>
    %947 = arith.mulf %945, %946 : vector<2x256xf32>
    %948 = arith.addf %942, %947 : vector<2x256xf32>
    %c0_253 = arith.constant 0 : index
    %c83 = arith.constant 83 : index
    %949 = vector.load %arg19[%c0_253, %c83] : memref<2x358xf32, #tpu.memory_space<vmem>>, vector<2x256xf32>
    %950 = vector.extract_strided_slice %949 {offsets = [0, 0], sizes = [1, 256], strides = [1, 1]} : vector<2x256xf32> to vector<1x256xf32>
    %951 = vector.extract_strided_slice %565 {offsets = [0, 38], sizes = [2, 1], strides = [1, 1]} : vector<2x49xf32> to vector<2x1xf32>
    %952 = vector.broadcast %950 : vector<1x256xf32> to vector<2x256xf32>
    %953 = vector.broadcast %951 : vector<2x1xf32> to vector<2x256xf32>
    %954 = arith.mulf %952, %953 : vector<2x256xf32>
    %955 = arith.addf %948, %954 : vector<2x256xf32>
    %956 = vector.extract_strided_slice %949 {offsets = [1, 0], sizes = [1, 256], strides = [1, 1]} : vector<2x256xf32> to vector<1x256xf32>
    %957 = vector.extract_strided_slice %566 {offsets = [0, 38], sizes = [2, 1], strides = [1, 1]} : vector<2x49xf32> to vector<2x1xf32>
    %958 = vector.broadcast %956 : vector<1x256xf32> to vector<2x256xf32>
    %959 = vector.broadcast %957 : vector<2x1xf32> to vector<2x256xf32>
    %960 = arith.mulf %958, %959 : vector<2x256xf32>
    %961 = arith.addf %955, %960 : vector<2x256xf32>
    %c0_254 = arith.constant 0 : index
    %c99_255 = arith.constant 99 : index
    %962 = vector.load %arg19[%c0_254, %c99_255] : memref<2x358xf32, #tpu.memory_space<vmem>>, vector<2x256xf32>
    %963 = vector.extract_strided_slice %962 {offsets = [0, 0], sizes = [1, 256], strides = [1, 1]} : vector<2x256xf32> to vector<1x256xf32>
    %964 = vector.extract_strided_slice %565 {offsets = [0, 45], sizes = [2, 1], strides = [1, 1]} : vector<2x49xf32> to vector<2x1xf32>
    %965 = vector.broadcast %963 : vector<1x256xf32> to vector<2x256xf32>
    %966 = vector.broadcast %964 : vector<2x1xf32> to vector<2x256xf32>
    %967 = arith.mulf %965, %966 : vector<2x256xf32>
    %968 = arith.addf %961, %967 : vector<2x256xf32>
    %969 = vector.extract_strided_slice %962 {offsets = [1, 0], sizes = [1, 256], strides = [1, 1]} : vector<2x256xf32> to vector<1x256xf32>
    %970 = vector.extract_strided_slice %566 {offsets = [0, 45], sizes = [2, 1], strides = [1, 1]} : vector<2x49xf32> to vector<2x1xf32>
    %971 = vector.broadcast %969 : vector<1x256xf32> to vector<2x256xf32>
    %972 = vector.broadcast %970 : vector<2x1xf32> to vector<2x256xf32>
    %973 = arith.mulf %971, %972 : vector<2x256xf32>
    %974 = arith.addf %968, %973 : vector<2x256xf32>
    %975 = arith.addf %882, %974 : vector<2x256xf32>
    %cst_256 = arith.constant 0.000000e+00 : f32
    %976 = vector.broadcast %cst_256 : f32 to vector<2x256xf32>
    %c0_257 = arith.constant 0 : index
    %c4_258 = arith.constant 4 : index
    %977 = vector.load %arg19[%c0_257, %c4_258] : memref<2x358xf32, #tpu.memory_space<vmem>>, vector<2x256xf32>
    %978 = vector.extract_strided_slice %977 {offsets = [0, 0], sizes = [1, 256], strides = [1, 1]} : vector<2x256xf32> to vector<1x256xf32>
    %979 = vector.extract_strided_slice %565 {offsets = [0, 4], sizes = [2, 1], strides = [1, 1]} : vector<2x49xf32> to vector<2x1xf32>
    %980 = vector.broadcast %978 : vector<1x256xf32> to vector<2x256xf32>
    %981 = vector.broadcast %979 : vector<2x1xf32> to vector<2x256xf32>
    %982 = arith.mulf %980, %981 : vector<2x256xf32>
    %983 = arith.addf %976, %982 : vector<2x256xf32>
    %984 = vector.extract_strided_slice %977 {offsets = [1, 0], sizes = [1, 256], strides = [1, 1]} : vector<2x256xf32> to vector<1x256xf32>
    %985 = vector.extract_strided_slice %566 {offsets = [0, 4], sizes = [2, 1], strides = [1, 1]} : vector<2x49xf32> to vector<2x1xf32>
    %986 = vector.broadcast %984 : vector<1x256xf32> to vector<2x256xf32>
    %987 = vector.broadcast %985 : vector<2x1xf32> to vector<2x256xf32>
    %988 = arith.mulf %986, %987 : vector<2x256xf32>
    %989 = arith.addf %983, %988 : vector<2x256xf32>
    %c0_259 = arith.constant 0 : index
    %c20_260 = arith.constant 20 : index
    %990 = vector.load %arg19[%c0_259, %c20_260] : memref<2x358xf32, #tpu.memory_space<vmem>>, vector<2x256xf32>
    %991 = vector.extract_strided_slice %990 {offsets = [0, 0], sizes = [1, 256], strides = [1, 1]} : vector<2x256xf32> to vector<1x256xf32>
    %992 = vector.extract_strided_slice %565 {offsets = [0, 11], sizes = [2, 1], strides = [1, 1]} : vector<2x49xf32> to vector<2x1xf32>
    %993 = vector.broadcast %991 : vector<1x256xf32> to vector<2x256xf32>
    %994 = vector.broadcast %992 : vector<2x1xf32> to vector<2x256xf32>
    %995 = arith.mulf %993, %994 : vector<2x256xf32>
    %996 = arith.addf %989, %995 : vector<2x256xf32>
    %997 = vector.extract_strided_slice %990 {offsets = [1, 0], sizes = [1, 256], strides = [1, 1]} : vector<2x256xf32> to vector<1x256xf32>
    %998 = vector.extract_strided_slice %566 {offsets = [0, 11], sizes = [2, 1], strides = [1, 1]} : vector<2x49xf32> to vector<2x1xf32>
    %999 = vector.broadcast %997 : vector<1x256xf32> to vector<2x256xf32>
    %1000 = vector.broadcast %998 : vector<2x1xf32> to vector<2x256xf32>
    %1001 = arith.mulf %999, %1000 : vector<2x256xf32>
    %1002 = arith.addf %996, %1001 : vector<2x256xf32>
    %c0_261 = arith.constant 0 : index
    %c36_262 = arith.constant 36 : index
    %1003 = vector.load %arg19[%c0_261, %c36_262] : memref<2x358xf32, #tpu.memory_space<vmem>>, vector<2x256xf32>
    %1004 = vector.extract_strided_slice %1003 {offsets = [0, 0], sizes = [1, 256], strides = [1, 1]} : vector<2x256xf32> to vector<1x256xf32>
    %1005 = vector.extract_strided_slice %565 {offsets = [0, 18], sizes = [2, 1], strides = [1, 1]} : vector<2x49xf32> to vector<2x1xf32>
    %1006 = vector.broadcast %1004 : vector<1x256xf32> to vector<2x256xf32>
    %1007 = vector.broadcast %1005 : vector<2x1xf32> to vector<2x256xf32>
    %1008 = arith.mulf %1006, %1007 : vector<2x256xf32>
    %1009 = arith.addf %1002, %1008 : vector<2x256xf32>
    %1010 = vector.extract_strided_slice %1003 {offsets = [1, 0], sizes = [1, 256], strides = [1, 1]} : vector<2x256xf32> to vector<1x256xf32>
    %1011 = vector.extract_strided_slice %566 {offsets = [0, 18], sizes = [2, 1], strides = [1, 1]} : vector<2x49xf32> to vector<2x1xf32>
    %1012 = vector.broadcast %1010 : vector<1x256xf32> to vector<2x256xf32>
    %1013 = vector.broadcast %1011 : vector<2x1xf32> to vector<2x256xf32>
    %1014 = arith.mulf %1012, %1013 : vector<2x256xf32>
    %1015 = arith.addf %1009, %1014 : vector<2x256xf32>
    %c0_263 = arith.constant 0 : index
    %c52_264 = arith.constant 52 : index
    %1016 = vector.load %arg19[%c0_263, %c52_264] : memref<2x358xf32, #tpu.memory_space<vmem>>, vector<2x256xf32>
    %1017 = vector.extract_strided_slice %1016 {offsets = [0, 0], sizes = [1, 256], strides = [1, 1]} : vector<2x256xf32> to vector<1x256xf32>
    %1018 = vector.extract_strided_slice %565 {offsets = [0, 25], sizes = [2, 1], strides = [1, 1]} : vector<2x49xf32> to vector<2x1xf32>
    %1019 = vector.broadcast %1017 : vector<1x256xf32> to vector<2x256xf32>
    %1020 = vector.broadcast %1018 : vector<2x1xf32> to vector<2x256xf32>
    %1021 = arith.mulf %1019, %1020 : vector<2x256xf32>
    %1022 = arith.addf %1015, %1021 : vector<2x256xf32>
    %1023 = vector.extract_strided_slice %1016 {offsets = [1, 0], sizes = [1, 256], strides = [1, 1]} : vector<2x256xf32> to vector<1x256xf32>
    %1024 = vector.extract_strided_slice %566 {offsets = [0, 25], sizes = [2, 1], strides = [1, 1]} : vector<2x49xf32> to vector<2x1xf32>
    %1025 = vector.broadcast %1023 : vector<1x256xf32> to vector<2x256xf32>
    %1026 = vector.broadcast %1024 : vector<2x1xf32> to vector<2x256xf32>
    %1027 = arith.mulf %1025, %1026 : vector<2x256xf32>
    %1028 = arith.addf %1022, %1027 : vector<2x256xf32>
    %c0_265 = arith.constant 0 : index
    %c68_266 = arith.constant 68 : index
    %1029 = vector.load %arg19[%c0_265, %c68_266] : memref<2x358xf32, #tpu.memory_space<vmem>>, vector<2x256xf32>
    %1030 = vector.extract_strided_slice %1029 {offsets = [0, 0], sizes = [1, 256], strides = [1, 1]} : vector<2x256xf32> to vector<1x256xf32>
    %1031 = vector.extract_strided_slice %565 {offsets = [0, 32], sizes = [2, 1], strides = [1, 1]} : vector<2x49xf32> to vector<2x1xf32>
    %1032 = vector.broadcast %1030 : vector<1x256xf32> to vector<2x256xf32>
    %1033 = vector.broadcast %1031 : vector<2x1xf32> to vector<2x256xf32>
    %1034 = arith.mulf %1032, %1033 : vector<2x256xf32>
    %1035 = arith.addf %1028, %1034 : vector<2x256xf32>
    %1036 = vector.extract_strided_slice %1029 {offsets = [1, 0], sizes = [1, 256], strides = [1, 1]} : vector<2x256xf32> to vector<1x256xf32>
    %1037 = vector.extract_strided_slice %566 {offsets = [0, 32], sizes = [2, 1], strides = [1, 1]} : vector<2x49xf32> to vector<2x1xf32>
    %1038 = vector.broadcast %1036 : vector<1x256xf32> to vector<2x256xf32>
    %1039 = vector.broadcast %1037 : vector<2x1xf32> to vector<2x256xf32>
    %1040 = arith.mulf %1038, %1039 : vector<2x256xf32>
    %1041 = arith.addf %1035, %1040 : vector<2x256xf32>
    %c0_267 = arith.constant 0 : index
    %c84 = arith.constant 84 : index
    %1042 = vector.load %arg19[%c0_267, %c84] : memref<2x358xf32, #tpu.memory_space<vmem>>, vector<2x256xf32>
    %1043 = vector.extract_strided_slice %1042 {offsets = [0, 0], sizes = [1, 256], strides = [1, 1]} : vector<2x256xf32> to vector<1x256xf32>
    %1044 = vector.extract_strided_slice %565 {offsets = [0, 39], sizes = [2, 1], strides = [1, 1]} : vector<2x49xf32> to vector<2x1xf32>
    %1045 = vector.broadcast %1043 : vector<1x256xf32> to vector<2x256xf32>
    %1046 = vector.broadcast %1044 : vector<2x1xf32> to vector<2x256xf32>
    %1047 = arith.mulf %1045, %1046 : vector<2x256xf32>
    %1048 = arith.addf %1041, %1047 : vector<2x256xf32>
    %1049 = vector.extract_strided_slice %1042 {offsets = [1, 0], sizes = [1, 256], strides = [1, 1]} : vector<2x256xf32> to vector<1x256xf32>
    %1050 = vector.extract_strided_slice %566 {offsets = [0, 39], sizes = [2, 1], strides = [1, 1]} : vector<2x49xf32> to vector<2x1xf32>
    %1051 = vector.broadcast %1049 : vector<1x256xf32> to vector<2x256xf32>
    %1052 = vector.broadcast %1050 : vector<2x1xf32> to vector<2x256xf32>
    %1053 = arith.mulf %1051, %1052 : vector<2x256xf32>
    %1054 = arith.addf %1048, %1053 : vector<2x256xf32>
    %c0_268 = arith.constant 0 : index
    %c100 = arith.constant 100 : index
    %1055 = vector.load %arg19[%c0_268, %c100] : memref<2x358xf32, #tpu.memory_space<vmem>>, vector<2x256xf32>
    %1056 = vector.extract_strided_slice %1055 {offsets = [0, 0], sizes = [1, 256], strides = [1, 1]} : vector<2x256xf32> to vector<1x256xf32>
    %1057 = vector.extract_strided_slice %565 {offsets = [0, 46], sizes = [2, 1], strides = [1, 1]} : vector<2x49xf32> to vector<2x1xf32>
    %1058 = vector.broadcast %1056 : vector<1x256xf32> to vector<2x256xf32>
    %1059 = vector.broadcast %1057 : vector<2x1xf32> to vector<2x256xf32>
    %1060 = arith.mulf %1058, %1059 : vector<2x256xf32>
    %1061 = arith.addf %1054, %1060 : vector<2x256xf32>
    %1062 = vector.extract_strided_slice %1055 {offsets = [1, 0], sizes = [1, 256], strides = [1, 1]} : vector<2x256xf32> to vector<1x256xf32>
    %1063 = vector.extract_strided_slice %566 {offsets = [0, 46], sizes = [2, 1], strides = [1, 1]} : vector<2x49xf32> to vector<2x1xf32>
    %1064 = vector.broadcast %1062 : vector<1x256xf32> to vector<2x256xf32>
    %1065 = vector.broadcast %1063 : vector<2x1xf32> to vector<2x256xf32>
    %1066 = arith.mulf %1064, %1065 : vector<2x256xf32>
    %1067 = arith.addf %1061, %1066 : vector<2x256xf32>
    %c1_i32_269 = arith.constant 1 : i32
    %1068 = vector.broadcast %c1_i32_269 : i32 to vector<1x256xi32>
    %1069 = arith.addi %2, %1068 : vector<1x256xi32>
    %c0_i32_270 = arith.constant 0 : i32
    %1070 = vector.broadcast %c0_i32_270 : i32 to vector<1x256xi32>
    %1071 = arith.cmpi sge, %1069, %1070 : vector<1x256xi32>
    %c16_i32_271 = arith.constant 16 : i32
    %1072 = vector.broadcast %c16_i32_271 : i32 to vector<1x256xi32>
    %1073 = arith.cmpi slt, %1069, %1072 : vector<1x256xi32>
    %1074 = arith.andi %1071, %1073 : vector<1x256xi1>
    %cst_272 = arith.constant 1.000000e+00 : f32
    %cst_273 = arith.constant 0.000000e+00 : f32
    %1075 = vector.broadcast %cst_272 : f32 to vector<1x256xf32>
    %1076 = vector.broadcast %cst_273 : f32 to vector<1x256xf32>
    %1077 = arith.select %1074, %1075, %1076 : vector<1x256xi1>, vector<1x256xf32>
    %1078 = vector.broadcast %1077 : vector<1x256xf32> to vector<2x256xf32>
    %1079 = arith.mulf %1067, %1078 : vector<2x256xf32>
    %1080 = arith.addf %975, %1079 : vector<2x256xf32>
    %cst_274 = arith.constant 0.000000e+00 : f32
    %1081 = vector.broadcast %cst_274 : f32 to vector<2x256xf32>
    %c0_275 = arith.constant 0 : index
    %c5 = arith.constant 5 : index
    %1082 = vector.load %arg19[%c0_275, %c5] : memref<2x358xf32, #tpu.memory_space<vmem>>, vector<2x256xf32>
    %1083 = vector.extract_strided_slice %1082 {offsets = [0, 0], sizes = [1, 256], strides = [1, 1]} : vector<2x256xf32> to vector<1x256xf32>
    %1084 = vector.extract_strided_slice %565 {offsets = [0, 5], sizes = [2, 1], strides = [1, 1]} : vector<2x49xf32> to vector<2x1xf32>
    %1085 = vector.broadcast %1083 : vector<1x256xf32> to vector<2x256xf32>
    %1086 = vector.broadcast %1084 : vector<2x1xf32> to vector<2x256xf32>
    %1087 = arith.mulf %1085, %1086 : vector<2x256xf32>
    %1088 = arith.addf %1081, %1087 : vector<2x256xf32>
    %1089 = vector.extract_strided_slice %1082 {offsets = [1, 0], sizes = [1, 256], strides = [1, 1]} : vector<2x256xf32> to vector<1x256xf32>
    %1090 = vector.extract_strided_slice %566 {offsets = [0, 5], sizes = [2, 1], strides = [1, 1]} : vector<2x49xf32> to vector<2x1xf32>
    %1091 = vector.broadcast %1089 : vector<1x256xf32> to vector<2x256xf32>
    %1092 = vector.broadcast %1090 : vector<2x1xf32> to vector<2x256xf32>
    %1093 = arith.mulf %1091, %1092 : vector<2x256xf32>
    %1094 = arith.addf %1088, %1093 : vector<2x256xf32>
    %c0_276 = arith.constant 0 : index
    %c21 = arith.constant 21 : index
    %1095 = vector.load %arg19[%c0_276, %c21] : memref<2x358xf32, #tpu.memory_space<vmem>>, vector<2x256xf32>
    %1096 = vector.extract_strided_slice %1095 {offsets = [0, 0], sizes = [1, 256], strides = [1, 1]} : vector<2x256xf32> to vector<1x256xf32>
    %1097 = vector.extract_strided_slice %565 {offsets = [0, 12], sizes = [2, 1], strides = [1, 1]} : vector<2x49xf32> to vector<2x1xf32>
    %1098 = vector.broadcast %1096 : vector<1x256xf32> to vector<2x256xf32>
    %1099 = vector.broadcast %1097 : vector<2x1xf32> to vector<2x256xf32>
    %1100 = arith.mulf %1098, %1099 : vector<2x256xf32>
    %1101 = arith.addf %1094, %1100 : vector<2x256xf32>
    %1102 = vector.extract_strided_slice %1095 {offsets = [1, 0], sizes = [1, 256], strides = [1, 1]} : vector<2x256xf32> to vector<1x256xf32>
    %1103 = vector.extract_strided_slice %566 {offsets = [0, 12], sizes = [2, 1], strides = [1, 1]} : vector<2x49xf32> to vector<2x1xf32>
    %1104 = vector.broadcast %1102 : vector<1x256xf32> to vector<2x256xf32>
    %1105 = vector.broadcast %1103 : vector<2x1xf32> to vector<2x256xf32>
    %1106 = arith.mulf %1104, %1105 : vector<2x256xf32>
    %1107 = arith.addf %1101, %1106 : vector<2x256xf32>
    %c0_277 = arith.constant 0 : index
    %c37 = arith.constant 37 : index
    %1108 = vector.load %arg19[%c0_277, %c37] : memref<2x358xf32, #tpu.memory_space<vmem>>, vector<2x256xf32>
    %1109 = vector.extract_strided_slice %1108 {offsets = [0, 0], sizes = [1, 256], strides = [1, 1]} : vector<2x256xf32> to vector<1x256xf32>
    %1110 = vector.extract_strided_slice %565 {offsets = [0, 19], sizes = [2, 1], strides = [1, 1]} : vector<2x49xf32> to vector<2x1xf32>
    %1111 = vector.broadcast %1109 : vector<1x256xf32> to vector<2x256xf32>
    %1112 = vector.broadcast %1110 : vector<2x1xf32> to vector<2x256xf32>
    %1113 = arith.mulf %1111, %1112 : vector<2x256xf32>
    %1114 = arith.addf %1107, %1113 : vector<2x256xf32>
    %1115 = vector.extract_strided_slice %1108 {offsets = [1, 0], sizes = [1, 256], strides = [1, 1]} : vector<2x256xf32> to vector<1x256xf32>
    %1116 = vector.extract_strided_slice %566 {offsets = [0, 19], sizes = [2, 1], strides = [1, 1]} : vector<2x49xf32> to vector<2x1xf32>
    %1117 = vector.broadcast %1115 : vector<1x256xf32> to vector<2x256xf32>
    %1118 = vector.broadcast %1116 : vector<2x1xf32> to vector<2x256xf32>
    %1119 = arith.mulf %1117, %1118 : vector<2x256xf32>
    %1120 = arith.addf %1114, %1119 : vector<2x256xf32>
    %c0_278 = arith.constant 0 : index
    %c53 = arith.constant 53 : index
    %1121 = vector.load %arg19[%c0_278, %c53] : memref<2x358xf32, #tpu.memory_space<vmem>>, vector<2x256xf32>
    %1122 = vector.extract_strided_slice %1121 {offsets = [0, 0], sizes = [1, 256], strides = [1, 1]} : vector<2x256xf32> to vector<1x256xf32>
    %1123 = vector.extract_strided_slice %565 {offsets = [0, 26], sizes = [2, 1], strides = [1, 1]} : vector<2x49xf32> to vector<2x1xf32>
    %1124 = vector.broadcast %1122 : vector<1x256xf32> to vector<2x256xf32>
    %1125 = vector.broadcast %1123 : vector<2x1xf32> to vector<2x256xf32>
    %1126 = arith.mulf %1124, %1125 : vector<2x256xf32>
    %1127 = arith.addf %1120, %1126 : vector<2x256xf32>
    %1128 = vector.extract_strided_slice %1121 {offsets = [1, 0], sizes = [1, 256], strides = [1, 1]} : vector<2x256xf32> to vector<1x256xf32>
    %1129 = vector.extract_strided_slice %566 {offsets = [0, 26], sizes = [2, 1], strides = [1, 1]} : vector<2x49xf32> to vector<2x1xf32>
    %1130 = vector.broadcast %1128 : vector<1x256xf32> to vector<2x256xf32>
    %1131 = vector.broadcast %1129 : vector<2x1xf32> to vector<2x256xf32>
    %1132 = arith.mulf %1130, %1131 : vector<2x256xf32>
    %1133 = arith.addf %1127, %1132 : vector<2x256xf32>
    %c0_279 = arith.constant 0 : index
    %c69 = arith.constant 69 : index
    %1134 = vector.load %arg19[%c0_279, %c69] : memref<2x358xf32, #tpu.memory_space<vmem>>, vector<2x256xf32>
    %1135 = vector.extract_strided_slice %1134 {offsets = [0, 0], sizes = [1, 256], strides = [1, 1]} : vector<2x256xf32> to vector<1x256xf32>
    %1136 = vector.extract_strided_slice %565 {offsets = [0, 33], sizes = [2, 1], strides = [1, 1]} : vector<2x49xf32> to vector<2x1xf32>
    %1137 = vector.broadcast %1135 : vector<1x256xf32> to vector<2x256xf32>
    %1138 = vector.broadcast %1136 : vector<2x1xf32> to vector<2x256xf32>
    %1139 = arith.mulf %1137, %1138 : vector<2x256xf32>
    %1140 = arith.addf %1133, %1139 : vector<2x256xf32>
    %1141 = vector.extract_strided_slice %1134 {offsets = [1, 0], sizes = [1, 256], strides = [1, 1]} : vector<2x256xf32> to vector<1x256xf32>
    %1142 = vector.extract_strided_slice %566 {offsets = [0, 33], sizes = [2, 1], strides = [1, 1]} : vector<2x49xf32> to vector<2x1xf32>
    %1143 = vector.broadcast %1141 : vector<1x256xf32> to vector<2x256xf32>
    %1144 = vector.broadcast %1142 : vector<2x1xf32> to vector<2x256xf32>
    %1145 = arith.mulf %1143, %1144 : vector<2x256xf32>
    %1146 = arith.addf %1140, %1145 : vector<2x256xf32>
    %c0_280 = arith.constant 0 : index
    %c85 = arith.constant 85 : index
    %1147 = vector.load %arg19[%c0_280, %c85] : memref<2x358xf32, #tpu.memory_space<vmem>>, vector<2x256xf32>
    %1148 = vector.extract_strided_slice %1147 {offsets = [0, 0], sizes = [1, 256], strides = [1, 1]} : vector<2x256xf32> to vector<1x256xf32>
    %1149 = vector.extract_strided_slice %565 {offsets = [0, 40], sizes = [2, 1], strides = [1, 1]} : vector<2x49xf32> to vector<2x1xf32>
    %1150 = vector.broadcast %1148 : vector<1x256xf32> to vector<2x256xf32>
    %1151 = vector.broadcast %1149 : vector<2x1xf32> to vector<2x256xf32>
    %1152 = arith.mulf %1150, %1151 : vector<2x256xf32>
    %1153 = arith.addf %1146, %1152 : vector<2x256xf32>
    %1154 = vector.extract_strided_slice %1147 {offsets = [1, 0], sizes = [1, 256], strides = [1, 1]} : vector<2x256xf32> to vector<1x256xf32>
    %1155 = vector.extract_strided_slice %566 {offsets = [0, 40], sizes = [2, 1], strides = [1, 1]} : vector<2x49xf32> to vector<2x1xf32>
    %1156 = vector.broadcast %1154 : vector<1x256xf32> to vector<2x256xf32>
    %1157 = vector.broadcast %1155 : vector<2x1xf32> to vector<2x256xf32>
    %1158 = arith.mulf %1156, %1157 : vector<2x256xf32>
    %1159 = arith.addf %1153, %1158 : vector<2x256xf32>
    %c0_281 = arith.constant 0 : index
    %c101 = arith.constant 101 : index
    %1160 = vector.load %arg19[%c0_281, %c101] : memref<2x358xf32, #tpu.memory_space<vmem>>, vector<2x256xf32>
    %1161 = vector.extract_strided_slice %1160 {offsets = [0, 0], sizes = [1, 256], strides = [1, 1]} : vector<2x256xf32> to vector<1x256xf32>
    %1162 = vector.extract_strided_slice %565 {offsets = [0, 47], sizes = [2, 1], strides = [1, 1]} : vector<2x49xf32> to vector<2x1xf32>
    %1163 = vector.broadcast %1161 : vector<1x256xf32> to vector<2x256xf32>
    %1164 = vector.broadcast %1162 : vector<2x1xf32> to vector<2x256xf32>
    %1165 = arith.mulf %1163, %1164 : vector<2x256xf32>
    %1166 = arith.addf %1159, %1165 : vector<2x256xf32>
    %1167 = vector.extract_strided_slice %1160 {offsets = [1, 0], sizes = [1, 256], strides = [1, 1]} : vector<2x256xf32> to vector<1x256xf32>
    %1168 = vector.extract_strided_slice %566 {offsets = [0, 47], sizes = [2, 1], strides = [1, 1]} : vector<2x49xf32> to vector<2x1xf32>
    %1169 = vector.broadcast %1167 : vector<1x256xf32> to vector<2x256xf32>
    %1170 = vector.broadcast %1168 : vector<2x1xf32> to vector<2x256xf32>
    %1171 = arith.mulf %1169, %1170 : vector<2x256xf32>
    %1172 = arith.addf %1166, %1171 : vector<2x256xf32>
    %c2_i32_282 = arith.constant 2 : i32
    %1173 = vector.broadcast %c2_i32_282 : i32 to vector<1x256xi32>
    %1174 = arith.addi %2, %1173 : vector<1x256xi32>
    %c0_i32_283 = arith.constant 0 : i32
    %1175 = vector.broadcast %c0_i32_283 : i32 to vector<1x256xi32>
    %1176 = arith.cmpi sge, %1174, %1175 : vector<1x256xi32>
    %c16_i32_284 = arith.constant 16 : i32
    %1177 = vector.broadcast %c16_i32_284 : i32 to vector<1x256xi32>
    %1178 = arith.cmpi slt, %1174, %1177 : vector<1x256xi32>
    %1179 = arith.andi %1176, %1178 : vector<1x256xi1>
    %cst_285 = arith.constant 1.000000e+00 : f32
    %cst_286 = arith.constant 0.000000e+00 : f32
    %1180 = vector.broadcast %cst_285 : f32 to vector<1x256xf32>
    %1181 = vector.broadcast %cst_286 : f32 to vector<1x256xf32>
    %1182 = arith.select %1179, %1180, %1181 : vector<1x256xi1>, vector<1x256xf32>
    %1183 = vector.broadcast %1182 : vector<1x256xf32> to vector<2x256xf32>
    %1184 = arith.mulf %1172, %1183 : vector<2x256xf32>
    %1185 = arith.addf %1080, %1184 : vector<2x256xf32>
    %cst_287 = arith.constant 0.000000e+00 : f32
    %1186 = vector.broadcast %cst_287 : f32 to vector<2x256xf32>
    %c0_288 = arith.constant 0 : index
    %c6_289 = arith.constant 6 : index
    %1187 = vector.load %arg19[%c0_288, %c6_289] : memref<2x358xf32, #tpu.memory_space<vmem>>, vector<2x256xf32>
    %1188 = vector.extract_strided_slice %1187 {offsets = [0, 0], sizes = [1, 256], strides = [1, 1]} : vector<2x256xf32> to vector<1x256xf32>
    %1189 = vector.extract_strided_slice %565 {offsets = [0, 6], sizes = [2, 1], strides = [1, 1]} : vector<2x49xf32> to vector<2x1xf32>
    %1190 = vector.broadcast %1188 : vector<1x256xf32> to vector<2x256xf32>
    %1191 = vector.broadcast %1189 : vector<2x1xf32> to vector<2x256xf32>
    %1192 = arith.mulf %1190, %1191 : vector<2x256xf32>
    %1193 = arith.addf %1186, %1192 : vector<2x256xf32>
    %1194 = vector.extract_strided_slice %1187 {offsets = [1, 0], sizes = [1, 256], strides = [1, 1]} : vector<2x256xf32> to vector<1x256xf32>
    %1195 = vector.extract_strided_slice %566 {offsets = [0, 6], sizes = [2, 1], strides = [1, 1]} : vector<2x49xf32> to vector<2x1xf32>
    %1196 = vector.broadcast %1194 : vector<1x256xf32> to vector<2x256xf32>
    %1197 = vector.broadcast %1195 : vector<2x1xf32> to vector<2x256xf32>
    %1198 = arith.mulf %1196, %1197 : vector<2x256xf32>
    %1199 = arith.addf %1193, %1198 : vector<2x256xf32>
    %c0_290 = arith.constant 0 : index
    %c22 = arith.constant 22 : index
    %1200 = vector.load %arg19[%c0_290, %c22] : memref<2x358xf32, #tpu.memory_space<vmem>>, vector<2x256xf32>
    %1201 = vector.extract_strided_slice %1200 {offsets = [0, 0], sizes = [1, 256], strides = [1, 1]} : vector<2x256xf32> to vector<1x256xf32>
    %1202 = vector.extract_strided_slice %565 {offsets = [0, 13], sizes = [2, 1], strides = [1, 1]} : vector<2x49xf32> to vector<2x1xf32>
    %1203 = vector.broadcast %1201 : vector<1x256xf32> to vector<2x256xf32>
    %1204 = vector.broadcast %1202 : vector<2x1xf32> to vector<2x256xf32>
    %1205 = arith.mulf %1203, %1204 : vector<2x256xf32>
    %1206 = arith.addf %1199, %1205 : vector<2x256xf32>
    %1207 = vector.extract_strided_slice %1200 {offsets = [1, 0], sizes = [1, 256], strides = [1, 1]} : vector<2x256xf32> to vector<1x256xf32>
    %1208 = vector.extract_strided_slice %566 {offsets = [0, 13], sizes = [2, 1], strides = [1, 1]} : vector<2x49xf32> to vector<2x1xf32>
    %1209 = vector.broadcast %1207 : vector<1x256xf32> to vector<2x256xf32>
    %1210 = vector.broadcast %1208 : vector<2x1xf32> to vector<2x256xf32>
    %1211 = arith.mulf %1209, %1210 : vector<2x256xf32>
    %1212 = arith.addf %1206, %1211 : vector<2x256xf32>
    %c0_291 = arith.constant 0 : index
    %c38 = arith.constant 38 : index
    %1213 = vector.load %arg19[%c0_291, %c38] : memref<2x358xf32, #tpu.memory_space<vmem>>, vector<2x256xf32>
    %1214 = vector.extract_strided_slice %1213 {offsets = [0, 0], sizes = [1, 256], strides = [1, 1]} : vector<2x256xf32> to vector<1x256xf32>
    %1215 = vector.extract_strided_slice %565 {offsets = [0, 20], sizes = [2, 1], strides = [1, 1]} : vector<2x49xf32> to vector<2x1xf32>
    %1216 = vector.broadcast %1214 : vector<1x256xf32> to vector<2x256xf32>
    %1217 = vector.broadcast %1215 : vector<2x1xf32> to vector<2x256xf32>
    %1218 = arith.mulf %1216, %1217 : vector<2x256xf32>
    %1219 = arith.addf %1212, %1218 : vector<2x256xf32>
    %1220 = vector.extract_strided_slice %1213 {offsets = [1, 0], sizes = [1, 256], strides = [1, 1]} : vector<2x256xf32> to vector<1x256xf32>
    %1221 = vector.extract_strided_slice %566 {offsets = [0, 20], sizes = [2, 1], strides = [1, 1]} : vector<2x49xf32> to vector<2x1xf32>
    %1222 = vector.broadcast %1220 : vector<1x256xf32> to vector<2x256xf32>
    %1223 = vector.broadcast %1221 : vector<2x1xf32> to vector<2x256xf32>
    %1224 = arith.mulf %1222, %1223 : vector<2x256xf32>
    %1225 = arith.addf %1219, %1224 : vector<2x256xf32>
    %c0_292 = arith.constant 0 : index
    %c54_293 = arith.constant 54 : index
    %1226 = vector.load %arg19[%c0_292, %c54_293] : memref<2x358xf32, #tpu.memory_space<vmem>>, vector<2x256xf32>
    %1227 = vector.extract_strided_slice %1226 {offsets = [0, 0], sizes = [1, 256], strides = [1, 1]} : vector<2x256xf32> to vector<1x256xf32>
    %1228 = vector.extract_strided_slice %565 {offsets = [0, 27], sizes = [2, 1], strides = [1, 1]} : vector<2x49xf32> to vector<2x1xf32>
    %1229 = vector.broadcast %1227 : vector<1x256xf32> to vector<2x256xf32>
    %1230 = vector.broadcast %1228 : vector<2x1xf32> to vector<2x256xf32>
    %1231 = arith.mulf %1229, %1230 : vector<2x256xf32>
    %1232 = arith.addf %1225, %1231 : vector<2x256xf32>
    %1233 = vector.extract_strided_slice %1226 {offsets = [1, 0], sizes = [1, 256], strides = [1, 1]} : vector<2x256xf32> to vector<1x256xf32>
    %1234 = vector.extract_strided_slice %566 {offsets = [0, 27], sizes = [2, 1], strides = [1, 1]} : vector<2x49xf32> to vector<2x1xf32>
    %1235 = vector.broadcast %1233 : vector<1x256xf32> to vector<2x256xf32>
    %1236 = vector.broadcast %1234 : vector<2x1xf32> to vector<2x256xf32>
    %1237 = arith.mulf %1235, %1236 : vector<2x256xf32>
    %1238 = arith.addf %1232, %1237 : vector<2x256xf32>
    %c0_294 = arith.constant 0 : index
    %c70 = arith.constant 70 : index
    %1239 = vector.load %arg19[%c0_294, %c70] : memref<2x358xf32, #tpu.memory_space<vmem>>, vector<2x256xf32>
    %1240 = vector.extract_strided_slice %1239 {offsets = [0, 0], sizes = [1, 256], strides = [1, 1]} : vector<2x256xf32> to vector<1x256xf32>
    %1241 = vector.extract_strided_slice %565 {offsets = [0, 34], sizes = [2, 1], strides = [1, 1]} : vector<2x49xf32> to vector<2x1xf32>
    %1242 = vector.broadcast %1240 : vector<1x256xf32> to vector<2x256xf32>
    %1243 = vector.broadcast %1241 : vector<2x1xf32> to vector<2x256xf32>
    %1244 = arith.mulf %1242, %1243 : vector<2x256xf32>
    %1245 = arith.addf %1238, %1244 : vector<2x256xf32>
    %1246 = vector.extract_strided_slice %1239 {offsets = [1, 0], sizes = [1, 256], strides = [1, 1]} : vector<2x256xf32> to vector<1x256xf32>
    %1247 = vector.extract_strided_slice %566 {offsets = [0, 34], sizes = [2, 1], strides = [1, 1]} : vector<2x49xf32> to vector<2x1xf32>
    %1248 = vector.broadcast %1246 : vector<1x256xf32> to vector<2x256xf32>
    %1249 = vector.broadcast %1247 : vector<2x1xf32> to vector<2x256xf32>
    %1250 = arith.mulf %1248, %1249 : vector<2x256xf32>
    %1251 = arith.addf %1245, %1250 : vector<2x256xf32>
    %c0_295 = arith.constant 0 : index
    %c86 = arith.constant 86 : index
    %1252 = vector.load %arg19[%c0_295, %c86] : memref<2x358xf32, #tpu.memory_space<vmem>>, vector<2x256xf32>
    %1253 = vector.extract_strided_slice %1252 {offsets = [0, 0], sizes = [1, 256], strides = [1, 1]} : vector<2x256xf32> to vector<1x256xf32>
    %1254 = vector.extract_strided_slice %565 {offsets = [0, 41], sizes = [2, 1], strides = [1, 1]} : vector<2x49xf32> to vector<2x1xf32>
    %1255 = vector.broadcast %1253 : vector<1x256xf32> to vector<2x256xf32>
    %1256 = vector.broadcast %1254 : vector<2x1xf32> to vector<2x256xf32>
    %1257 = arith.mulf %1255, %1256 : vector<2x256xf32>
    %1258 = arith.addf %1251, %1257 : vector<2x256xf32>
    %1259 = vector.extract_strided_slice %1252 {offsets = [1, 0], sizes = [1, 256], strides = [1, 1]} : vector<2x256xf32> to vector<1x256xf32>
    %1260 = vector.extract_strided_slice %566 {offsets = [0, 41], sizes = [2, 1], strides = [1, 1]} : vector<2x49xf32> to vector<2x1xf32>
    %1261 = vector.broadcast %1259 : vector<1x256xf32> to vector<2x256xf32>
    %1262 = vector.broadcast %1260 : vector<2x1xf32> to vector<2x256xf32>
    %1263 = arith.mulf %1261, %1262 : vector<2x256xf32>
    %1264 = arith.addf %1258, %1263 : vector<2x256xf32>
    %c0_296 = arith.constant 0 : index
    %c102_297 = arith.constant 102 : index
    %1265 = vector.load %arg19[%c0_296, %c102_297] : memref<2x358xf32, #tpu.memory_space<vmem>>, vector<2x256xf32>
    %1266 = vector.extract_strided_slice %1265 {offsets = [0, 0], sizes = [1, 256], strides = [1, 1]} : vector<2x256xf32> to vector<1x256xf32>
    %1267 = vector.extract_strided_slice %565 {offsets = [0, 48], sizes = [2, 1], strides = [1, 1]} : vector<2x49xf32> to vector<2x1xf32>
    %1268 = vector.broadcast %1266 : vector<1x256xf32> to vector<2x256xf32>
    %1269 = vector.broadcast %1267 : vector<2x1xf32> to vector<2x256xf32>
    %1270 = arith.mulf %1268, %1269 : vector<2x256xf32>
    %1271 = arith.addf %1264, %1270 : vector<2x256xf32>
    %1272 = vector.extract_strided_slice %1265 {offsets = [1, 0], sizes = [1, 256], strides = [1, 1]} : vector<2x256xf32> to vector<1x256xf32>
    %1273 = vector.extract_strided_slice %566 {offsets = [0, 48], sizes = [2, 1], strides = [1, 1]} : vector<2x49xf32> to vector<2x1xf32>
    %1274 = vector.broadcast %1272 : vector<1x256xf32> to vector<2x256xf32>
    %1275 = vector.broadcast %1273 : vector<2x1xf32> to vector<2x256xf32>
    %1276 = arith.mulf %1274, %1275 : vector<2x256xf32>
    %1277 = arith.addf %1271, %1276 : vector<2x256xf32>
    %c3_i32_298 = arith.constant 3 : i32
    %1278 = vector.broadcast %c3_i32_298 : i32 to vector<1x256xi32>
    %1279 = arith.addi %2, %1278 : vector<1x256xi32>
    %c0_i32_299 = arith.constant 0 : i32
    %1280 = vector.broadcast %c0_i32_299 : i32 to vector<1x256xi32>
    %1281 = arith.cmpi sge, %1279, %1280 : vector<1x256xi32>
    %c16_i32_300 = arith.constant 16 : i32
    %1282 = vector.broadcast %c16_i32_300 : i32 to vector<1x256xi32>
    %1283 = arith.cmpi slt, %1279, %1282 : vector<1x256xi32>
    %1284 = arith.andi %1281, %1283 : vector<1x256xi1>
    %cst_301 = arith.constant 1.000000e+00 : f32
    %cst_302 = arith.constant 0.000000e+00 : f32
    %1285 = vector.broadcast %cst_301 : f32 to vector<1x256xf32>
    %1286 = vector.broadcast %cst_302 : f32 to vector<1x256xf32>
    %1287 = arith.select %1284, %1285, %1286 : vector<1x256xi1>, vector<1x256xf32>
    %1288 = vector.broadcast %1287 : vector<1x256xf32> to vector<2x256xf32>
    %1289 = arith.mulf %1277, %1288 : vector<2x256xf32>
    %1290 = arith.addf %1185, %1289 : vector<2x256xf32>
    %c0_303 = arith.constant 0 : index
    %c0_304 = arith.constant 0 : index
    %1291 = vector.load %arg13[%c0_303, %c0_304] : memref<2x1xf32, #tpu.memory_space<vmem>>, vector<2x1xf32>
    %1292 = vector.broadcast %1291 : vector<2x1xf32> to vector<2x256xf32>
    %1293 = arith.addf %1290, %1292 : vector<2x256xf32>
    %1294 = arith.negf %1293 : vector<2x256xf32>
    %1295 = math.exp %1294 : vector<2x256xf32>
    %cst_305 = arith.constant 1.000000e+00 : f32
    %1296 = vector.broadcast %cst_305 : f32 to vector<2x256xf32>
    %1297 = arith.addf %1296, %1295 : vector<2x256xf32>
    %1298 = arith.divf %1296, %1297 : vector<2x256xf32>
    %1299 = vector.extract_strided_slice %1298 {offsets = [0, 0], sizes = [1, 256], strides = [1, 1]} : vector<2x256xf32> to vector<1x256xf32>
    %1300 = vector.broadcast %1299 : vector<1x256xf32> to vector<2x256xf32>
    %1301 = arith.mulf %541, %1300 : vector<2x256xf32>
    %1302 = vector.extract_strided_slice %1298 {offsets = [1, 0], sizes = [1, 256], strides = [1, 1]} : vector<2x256xf32> to vector<1x256xf32>
    %1303 = vector.broadcast %1302 : vector<1x256xf32> to vector<2x256xf32>
    %1304 = arith.mulf %546, %1303 : vector<2x256xf32>
    %1305 = arith.addf %1301, %1304 : vector<2x256xf32>
    %c0_306 = arith.constant 0 : index
    %c0_307 = arith.constant 0 : index
    %1306 = vector.load %arg14[%c0_306, %c0_307] : memref<4x2xf32, #tpu.memory_space<vmem>>, vector<4x2xf32>
    %cst_308 = arith.constant dense<0.000000e+00> : vector<4x256xf32>
    %1307 = tpu.matmul %1306, %1305, %cst_308 {dimension_numbers = #tpu.dot_dimension_numbers<[1], [0], [0], [1], [0, 0, 1, 1], [], []>} : vector<4x2xf32>, vector<2x256xf32>, vector<4x256xf32> -> vector<4x256xf32>
    %c0_309 = arith.constant 0 : index
    %c0_310 = arith.constant 0 : index
    %1308 = vector.load %arg15[%c0_309, %c0_310] : memref<4x1xf32, #tpu.memory_space<vmem>>, vector<4x1xf32>
    %1309 = vector.broadcast %1308 : vector<4x1xf32> to vector<4x256xf32>
    %1310 = arith.addf %1307, %1309 : vector<4x256xf32>
    %1311 = arith.mulf %1, %1310 : vector<4x256xf32>
    %c0_311 = arith.constant 0 : index
    %c0_312 = arith.constant 0 : index
    %c0_313 = arith.constant 0 : index
    %1312 = vector.load %arg16[%c0_311, %c0_312, %c0_313] : memref<1x4x256xf32, #tpu.memory_space<vmem>>, vector<1x4x256xf32>
    %1313 = vector.shape_cast %1312 : vector<1x4x256xf32> to vector<4x256xf32>
    %1314 = vector.shape_cast %1311 : vector<4x256xf32> to vector<1x4x256xf32>
    tpu.vector_store %arg16[%c0_311, %c0_312, %c0_313], %1314 {strides = array<i32>} : memref<1x4x256xf32, #tpu.memory_space<vmem>>, vector<1x4x256xf32>,
    return
  }
  func.func @transform_0(%arg0: i32) -> (i32, i32, i32) {
    %c0_i32 = arith.constant 0 : i32
    %c0_i32_0 = arith.constant 0 : i32
    %c0_i32_1 = arith.constant 0 : i32
    return %arg0, %c0_i32, %c0_i32_0 : i32, i32, i32
  }
  func.func @transform_1(%arg0: i32) -> (i32, i32) {
    %c0_i32 = arith.constant 0 : i32
    %c0_i32_0 = arith.constant 0 : i32
    %c0_i32_1 = arith.constant 0 : i32
    return %c0_i32, %c0_i32_0 : i32, i32
  }
  func.func @transform_2(%arg0: i32) -> (i32, i32) {
    %c0_i32 = arith.constant 0 : i32
    %c0_i32_0 = arith.constant 0 : i32
    %c0_i32_1 = arith.constant 0 : i32
    return %c0_i32, %c0_i32_0 : i32, i32
  }
  func.func @transform_3(%arg0: i32) -> (i32, i32) {
    %c0_i32 = arith.constant 0 : i32
    %c0_i32_0 = arith.constant 0 : i32
    %c0_i32_1 = arith.constant 0 : i32
    return %c0_i32, %c0_i32_0 : i32, i32
  }
  func.func @transform_4(%arg0: i32) -> (i32, i32) {
    %c0_i32 = arith.constant 0 : i32
    %c0_i32_0 = arith.constant 0 : i32
    %c0_i32_1 = arith.constant 0 : i32
    return %c0_i32, %c0_i32_0 : i32, i32
  }
  func.func @transform_5(%arg0: i32) -> (i32, i32) {
    %c0_i32 = arith.constant 0 : i32
    %c0_i32_0 = arith.constant 0 : i32
    %c0_i32_1 = arith.constant 0 : i32
    return %c0_i32, %c0_i32_0 : i32, i32
  }
  func.func @transform_6(%arg0: i32) -> (i32, i32) {
    %c0_i32 = arith.constant 0 : i32
    %c0_i32_0 = arith.constant 0 : i32
    %c0_i32_1 = arith.constant 0 : i32
    return %c0_i32, %c0_i32_0 : i32, i32
  }
  func.func @transform_7(%arg0: i32) -> (i32, i32) {
    %c0_i32 = arith.constant 0 : i32
    %c0_i32_0 = arith.constant 0 : i32
    %c0_i32_1 = arith.constant 0 : i32
    return %c0_i32, %c0_i32_0 : i32, i32
  }
  func.func @transform_8(%arg0: i32) -> (i32, i32) {
    %c0_i32 = arith.constant 0 : i32
    %c0_i32_0 = arith.constant 0 : i32
    %c0_i32_1 = arith.constant 0 : i32
    return %c0_i32, %c0_i32_0 : i32, i32
  }
  func.func @transform_9(%arg0: i32) -> (i32, i32) {
    %c0_i32 = arith.constant 0 : i32
    %c0_i32_0 = arith.constant 0 : i32
    %c0_i32_1 = arith.constant 0 : i32
    return %c0_i32, %c0_i32_0 : i32, i32
  }
  func.func @transform_10(%arg0: i32) -> (i32, i32) {
    %c0_i32 = arith.constant 0 : i32
    %c0_i32_0 = arith.constant 0 : i32
    %c0_i32_1 = arith.constant 0 : i32
    return %c0_i32, %c0_i32_0 : i32, i32
  }
  func.func @transform_11(%arg0: i32) -> (i32, i32) {
    %c0_i32 = arith.constant 0 : i32
    %c0_i32_0 = arith.constant 0 : i32
    %c0_i32_1 = arith.constant 0 : i32
    return %c0_i32, %c0_i32_0 : i32, i32
  }
  func.func @transform_12(%arg0: i32) -> (i32, i32) {
    %c0_i32 = arith.constant 0 : i32
    %c0_i32_0 = arith.constant 0 : i32
    %c0_i32_1 = arith.constant 0 : i32
    return %c0_i32, %c0_i32_0 : i32, i32
  }
  func.func @transform_13(%arg0: i32) -> (i32, i32) {
    %c0_i32 = arith.constant 0 : i32
    %c0_i32_0 = arith.constant 0 : i32
    %c0_i32_1 = arith.constant 0 : i32
    return %c0_i32, %c0_i32_0 : i32, i32
  }
  func.func @transform_14(%arg0: i32) -> (i32, i32) {
    %c0_i32 = arith.constant 0 : i32
    %c0_i32_0 = arith.constant 0 : i32
    %c0_i32_1 = arith.constant 0 : i32
    return %c0_i32, %c0_i32_0 : i32, i32
  }
  func.func @transform_15(%arg0: i32) -> (i32, i32, i32) {
    %c0_i32 = arith.constant 0 : i32
    %c0_i32_0 = arith.constant 0 : i32
    %c0_i32_1 = arith.constant 0 : i32
    return %arg0, %c0_i32, %c0_i32_0 : i32, i32, i32
  }
}

</mosaic_0001>

<bundles_post_ra>
// kernel: lsk_forward_pallas.1
= control target key start
LH: loop header
LB: loop body
LE: loop exit
PB: predicated region body
PF: predicated region fallthrough
CT: control target
= control target key end

     0   :  { %s6139_s18 = smov 0   ;;  %s10297_s0 = inlined_call_operand.vmem [shape: f32[2,4,256], index: 0, kind: input, shape index: {}]   ;;  %s10298_s1 = inlined_call_operand.vmem [shape: s32[1,256], index: 1, kind: input, shape index: {}]   ;;  %s10299_s2 = inlined_call_operand.vmem [shape: f32[4,25], index: 2, kind: input, shape index: {}]   ;;  %s10300_s3 = inlined_call_operand.vmem [shape: f32[4,1], index: 3, kind: input, shape index: {}]   ;;  %s10301_s4 = inlined_call_operand.vmem [shape: f32[4,49], index: 4, kind: input, shape index: {}]   ;;  %s10302_s5 = inlined_call_operand.vmem [shape: f32[4,1], index: 5, kind: input, shape index: {}]   ;;  %s10303_s6 = inlined_call_operand.vmem [shape: f32[2,4], index: 6, kind: input, shape index: {}]   ;;  %s10304_s7 = inlined_call_operand.vmem [shape: f32[2,1], index: 7, kind: input, shape index: {}]   ;;  %s10305_s8 = inlined_call_operand.vmem [shape: f32[2,4], index: 8, kind: input, shape index: {}]   ;;  %s10306_s9 = inlined_call_operand.vmem [shape: f32[2,1], index: 9, kind: input, shape index: {}]   ;;  %s10307_s10 = inlined_call_operand.vmem [shape: f32[2,49], index: 10, kind: input, shape index: {}]   ;;  %s10308_s11 = inlined_call_operand.vmem [shape: f32[2,49], index: 11, kind: input, shape index: {}]   ;;  %s10309_s12 = inlined_call_operand.vmem [shape: f32[2,1], index: 12, kind: input, shape index: {}]   ;;  %s10310_s13 = inlined_call_operand.vmem [shape: f32[4,2], index: 13, kind: input, shape index: {}]   ;;  %s10311_s14 = inlined_call_operand.vmem [shape: f32[4,1], index: 14, kind: input, shape index: {}]   ;;  %s10312_s15 = inlined_call_operand.vmem [shape: f32[2,4,256], index: 15, kind: output, shape index: {}]  }
   0x1 LB: > { %s5666_s19 = sadd.s32 4294967295, %s5976_s18   ;;  %p5670_p0 = scmp.ge.s32.totalorder %s5976_s18, 1  ;;  %s5976_s18 = sphi %s6139_s18, %s25_s18  }
   0x2   : > { %p437_p1 = scmp.lt.s32.totalorder %s5976_s18, 3 }
   0x4   : > { %p438_p2 = pnand %p5670_p0, %p437_p1 }
   0x6   : > { %441 = sbr.rel (%p438_p2) target bundleno = 3030 (0xbd6), region = 80 }
   0xd   : > { %v6150_v0 = vld [vmem:[%s10299_s2] sm:$0xf]  ;;  %p485_p3 = scmp.lt.s32.totalorder %s5666_s19, 1  ;;  %v10338_v1 = vmov 5   ;;  %v10328_v2 = vmov 0   ;;  %v10364_v3 = vmov 0.0   ;;  %v10313_v15 = vlaneseq }
   0xe   : > { %5780 = vset.pattern.permute.xlu1 %v10338_v1  ;;  %5779 = vset.pattern.permute.xlu0 %v10328_v2  ;;  %v10319_v4 = vmov 6   ;;  %s5982_s26 = smov 34   ;;  %vm498_vm0 = vcmask 273408   ;;  %vm500_vm1 = vcmask 552208   ;;  %vm1295_vm2 = vcmask 1043656   ;;  %s5993_s29 = smov 1  }
   0xf   : > { %533 = vperm.xlu1 %5780, %v6150_v0   ;;  %s11410_s19 = smov (!%p485_p3, %s5666_s19), 1  ;;  %2882 = vmatprep.mubr.f32.mxu0 %v10364_v3  ;;  %499 = vst.msk [vmem:[#allocation2] sm:$0xf] %vm498_vm0, %v10364_v3  ;;  %vm1296_vm3 = vcmask 408580   ;;  %v10343_v6 = vmov 11   ;;  %vm511_vm4 = vcmask 1047556  }
  0x10   : > { %s10394_s22 = sshll.u32 %s11410_s19, 3  ;;  %2969 = vmatprep.mubr.f32.mxu1 %v10364_v3  ;;  %501 = vst.msk [vmem:[#allocation2 + $0x8] sm:$0xf] %vm500_vm1, %v10364_v3  ;;  %vm1297_vm5 = vmor %vm1296_vm3, %vm1295_vm2  ;;  %v10354_v8 = vmov 10   ;;  %v10369_v9 = vmov 2   ;;  %v10366_v10 = vmov 15  }
  0x11   : > { %s6165_s25 = scalar_lea.vmem %s10297_s0, %s10394_s22  ;;  %1298 = vst.msk [vmem:[#allocation3 + $0xc] sm:$0xff] %vm1297_vm5, %v10364_v3  ;;  %vm6178_vm6 = vmor %vm511_vm4, %vm1295_vm2  ;;  %v10358_v11 = vmov 8   ;;  %v6192_v12 = vld [vmem:[%s10298_s1] sm:$0x3]  ;;  %v10330_v14 = vmov 20   ;;  %v10332_v16 = vmov 13  }
  0x12   : > { %v495_v5 = vld [vmem:[%s6165_s25] sm:$0xff]  ;;  %v780_v13 = vadd.s32 4294967295, %v6192_v12  ;;  %v6201_v17 = vshrl.u32 %v10313_v15, 7  ;;  %v10315_v18 = vmov 1   ;;  %v10360_v22 = vmov 16   ;;  %s6003_s30 = smov 112  }
  0x13   : > { %5785 = vset.pattern.permute.xlu1 %v10319_v4  ;;  %503 = vrot.lane.b32.xlu0 %v495_v5, %s5982_s26  ;;  %v10327_v25 = vmov 21   ;;  %v10317_v27 = vmov 7   ;;  %v10336_v28 = vmov 12   ;;  %v10352_v29 = vmov 17   ;;  %s6005_s16 = smov 96   ;;  %s6006_s17 = smov 80  }
  0x14   : > { %673 = vperm.xlu1 %5785, %v6150_v0   ;;  %vm781_vm7 = vcmp.ge.s32.totalorder %v780_v13, 0  ;;  %vm782_vm8 = vcmp.lt.s32.totalorder %v780_v13, 16  ;;  %10661 = vst [vmem:[#allocation5_spill] sm:$0xff] %v6201_v17  ;;  %v6206_v19 = vsub.s32 0, %v6201_v17  ;;  %v6209_v20 = vsub.s32 1, %v6201_v17  ;;  %s10451_s20 = smov 64  }
  0x15   : > { %vm783_vm9 = vmand %vm781_vm7, %vm782_vm8  ;;  %v10323_v30 = vmov 22   ;;  %v10345_v31 = vmov 3   ;;  %v10341_v32 = vmov 18   ;;  %v10356_v33 = vmov 23   ;;  %s6008_s21 = smov 3   ;;  %s10397_s23 = smov 4  }
  0x16   : > { %10662 = vst [vmem:[#allocation6_spill] sm:$0xff] %v6206_v19  ;;  %10663 = vst [vmem:[#allocation7_spill] sm:$0xff] %v6209_v20  ;;  %v784_v21 = vsel %vm783_vm9, 1.0, %v10364_v3  ;;  %v10362_v34 = vmov 9   ;;  %v6002_v35 = vmov 839922192  }
  0x17   : > { %518 = vperm.xlu0 %5779, %v6150_v0   ;;  %v6215_v23 = vrot.slane %v784_v21, %v6206_v19  ;;  %v6218_v24 = vrot.slane %v784_v21, %v6209_v20  ;;  %v521_v36 = vunpack.c.l.s4 %v6002_v35  ;;  %vm510_vm10 = vcmask 1043728   ;;  %s10407_s27 = smov 127   ;;  %s6020_s28 = smov 125  }
  0x18   : > { %5786 = vset.pattern.permute.xlu1 %v10343_v6  ;;  %vm506_vm11 = vcmask 277504   ;;  %vm512_vm12 = vmor %vm511_vm4, %vm510_vm10  ;;  %v10348_v52 = vmov 4   ;;  %v1078_v56 = vadd.s32 1, %v6192_v12  ;;  %v10326_v4 = vmov 28   ;;  %s10405_s24 = smov 126   ;;  %s10395_s26 = smov 124  }
  0x19   : > { %700 = vperm.xlu1 %5786, %v6150_v0   ;;  %10664 = vst [vmem:[#allocation8_spill] sm:$0xff] %v6215_v23  ;;  %10665 = vst [vmem:[#allocation9_spill] sm:$0xff] %v6218_v24  ;;  %v794_v26 = vcombine.low %v6215_v23, %v6218_v24  ;;  %v522_v38 = vunpack.c.0.s8 %v521_v36  ;;  %vm553_vm3 = vcmask 1043456   ;;  %vm555_vm4 = vcmask 916480   ;;  %s6032_s22 = smov 25  }
  0x1a   : > { %vm1079_vm13 = vcmp.ge.s32.totalorder %v1078_v56, 0  ;;  %vm1080_vm14 = vcmp.lt.s32.totalorder %v1078_v56, 16  ;;  %vm581_vm5 = vcmask 785408   ;;  %vm607_vm7 = vcmask 654336  }
  0x1b   : > { %5781 = vset.pattern.permute.xlu0 %v10354_v8  ;;  %v6243_v41 = vsub.s32 %v522_v38, %v6201_v17  ;;  %vm1081_vm15 = vmand %vm1079_vm13, %vm1080_vm14  ;;  %vm1096_vm8 = vcmask 23552   ;;  %vm633_vm9 = vcmask 523264  }
  0x1c   : > { %560 = vperm.xlu0 %5781, %v6150_v0  }
  0x1d   : > { %5789 = vset.pattern.permute.xlu1 %v10369_v9  ;;  %10666 = vst [vmem:[#allocation10_spill] sm:$0xff] %v6243_v41 }
  0x1e   : > { %820 = vperm.xlu1 %5789, %v6150_v0  }
  0x20   : > { %5782 = vset.pattern.permute.xlu0 %v10366_v10 }
  0x21   : > { %586 = vperm.xlu0 %5782, %v6150_v0  }
  0x22   : > { %5795 = vset.pattern.permute.xlu1 %v10358_v11 }
  0x23   : > { %971 = vperm.xlu1 %5795, %v6150_v0  }
  0x25   : > { %5783 = vset.pattern.permute.xlu0 %v10330_v14 }
  0x26   : > { %612 = vperm.xlu0 %5783, %v6150_v0  }
  0x27   : > { %5796 = vset.pattern.permute.xlu1 %v10332_v16 }
  0x28   : > { %998 = vperm.xlu1 %5796, %v6150_v0  }
  0x2a   : > { %5784 = vset.pattern.permute.xlu0 %v10315_v18 }
  0x2b   : > { %658 = vperm.xlu0 %5784, %v6150_v0  }
  0x2c   : > { %5799 = vset.pattern.permute.xlu1 %v10348_v52  ;;  %v1458_v52 = vld [vmem:[#allocation3 + $0x10] sm:$0xf] }
  0x2f   : > { %5787 = vset.pattern.permute.xlu0 %v10360_v22 }
  0x30   : > { %727 = vperm.xlu0 %5787, %v6150_v0  }
  0x34   : > { %5788 = vset.pattern.permute.xlu0 %v10327_v25 }
  0x35   : > { %754 = vperm.xlu0 %5788, %v6150_v0  }
  0x39   : > { %795 = vrot.lane.b32.xlu0 %v794_v26, %s5993_s29 }
  0x3a   : > { %5790 = vset.pattern.permute.xlu0 %v10317_v27 }
  0x3d   : > { %835 = vperm.xlu0 %5790, %v6150_v0  }
  0x41   : > { %5791 = vset.pattern.permute.xlu0 %v10336_v28 }
  0x42   : > { %862 = vperm.xlu0 %5791, %v6150_v0  }
  0x46   : > { %5792 = vset.pattern.permute.xlu0 %v10352_v29 }
  0x47   : > { %889 = vperm.xlu0 %5792, %v6150_v0  }
  0x4b   : > { %5793 = vset.pattern.permute.xlu0 %v10323_v30 }
  0x4c   : > { %916 = vperm.xlu0 %5793, %v6150_v0  }
  0x50   : > { %5794 = vset.pattern.permute.xlu0 %v10345_v31 }
  0x51   : > { %956 = vperm.xlu0 %5794, %v6150_v0  }
  0x55   : > { %5797 = vset.pattern.permute.xlu0 %v10341_v32 }
  0x56   : > { %1025 = vperm.xlu0 %5797, %v6150_v0  }
  0x5a   : > { %5798 = vset.pattern.permute.xlu0 %v10356_v33 }
  0x5b   : > { %1052 = vperm.xlu0 %5798, %v6150_v0  }
  0x5f   : > { %5800 = vset.pattern.permute.xlu0 %v10362_v34 }
  0x85   : > { %v504_v37 = vpop.permute.xlu0 %503 }
  0x86   : > { %v505_v39 = vrot.slane %v504_v37, 4 }
  0x88   : > { %v507_v40 = vsel %vm506_vm11, %v505_v39, %v504_v37  ;;  %514 = vst.msk [vmem:[#allocation2 + $0x8] sm:$0xf] %vm498_vm0, %v505_v39  ;;  %v1082_v37 = vsel %vm1081_vm15, 1.0, %v10364_v3 }
  0x89   : > { %513 = vst.msk [vmem:[#allocation2] sm:$0xff] %vm512_vm12, %v507_v40 }
  0x8e   : > { %v534_v42 = vpop.permute.xlu1 %533 }
  0x8f   : > { %v6246_v43 = vrot.slane %v534_v42, %v6243_v41  ;;  %v531_v44 = vld [vmem:[#allocation2 + $0x8] sm:$0xf] }
  0x90   : > { %v6249_v47 = vld [vmem:[#allocation2 + $0x8] sm:$0xf]  ;;  %v6286_v36 = vld [vmem:[#allocation2] sm:$0xff] }
  0x91   : > { %v544_v45 = vmul.f32 %v6246_v43, %v531_v44  ;;  %v6275_v62 = vld [vmem:[#allocation2 + $0x8] sm:$0xf] }
  0x93   : > { %v674_v46 = vpop.permute.xlu1 %673  ;;  %549 = vrot.lane.b32.xlu1 %v544_v45, %s6003_s30  ;;  %v6299_v45 = vrot.slane %v1082_v37, %v6206_v19 }
  0x94   : > { %v6253_v48 = vrot.slane %v674_v46, %v6243_v41  ;;  %v6302_v46 = vrot.slane %v1082_v37, %v6209_v20 }
  0x95   : > { %10667 = vst [vmem:[#allocation11_spill] sm:$0xff] %v6299_v45 }
  0x96   : > { %v684_v49 = vmul.f32 %v6253_v48, %v6249_v47  ;;  %v6257_v50 = vpop.permute.xlu0 %518  ;;  %10668 = vst [vmem:[#allocation12_spill] sm:$0xff] %v6302_v46 }
  0x98   : > { %v701_v51 = vpop.permute.xlu1 %700  ;;  %689 = vrot.lane.b32.xlu0 %v684_v49, %s6003_s30 }
  0x99   : > { %v708_v5 = vrot.slane %v701_v51, %v6243_v41  ;;  %v1092_v51 = vcombine.low %v6299_v45, %v6302_v46 }
  0x9b   : > { %v561_v53 = vpop.permute.xlu0 %560  ;;  %v710_v38 = vmul.f32 %v708_v5, %v6286_v36  ;;  %v711_v49 = vmul.f32 %v708_v5, %v6249_v47 }
  0x9c   : > { %v6262_v54 = vrot.slane %v561_v53, %v6243_v41 }
  0x9d   : > { %v6264_v55 = vpop.permute.xlu1 %820 }
  0x9e   : > { %v571_v57 = vmul.f32 %v6262_v54, %v531_v44  ;;  %v6558_v8 = vrot.slane %v6264_v55, %v6243_v41 }
  0xa0   : > { %576 = vrot.lane.b32.xlu1 %v571_v57, %s6005_s16  ;;  %v587_v58 = vpop.permute.xlu0 %586 }
  0xa1   : > { %v6270_v59 = vrot.slane %v587_v58, %v6243_v41 }
  0xa2   : > { %v972_v60 = vpop.permute.xlu1 %971 }
  0xa3   : > { %v6273_v61 = vrot.slane %v972_v60, %v6243_v41  ;;  %v597_v63 = vmul.f32 %v6270_v59, %v531_v44  ;;  %v1240_v60 = vadd.s32 2, %v6192_v12 }
  0xa5   : > { %v982_v13 = vmul.f32 %v6273_v61, %v6275_v62  ;;  %602 = vrot.lane.b32.xlu1 %v597_v63, %s6006_s17  ;;  %v613_v21 = vpop.permute.xlu0 %612  ;;  %vm1241_vm0 = vcmp.ge.s32.totalorder %v1240_v60, 0  ;;  %vm1242_vm1 = vcmp.lt.s32.totalorder %v1240_v60, 16  ;;  %v10350_v60 = vmov 24  }
  0xa6   : > { %v6283_v26 = vrot.slane %v613_v21, %v6243_v41  ;;  %v10318_v21 = vmov 14   ;;  %vm1243_vm2 = vmand %vm1241_vm0, %vm1242_vm1  ;;  %vm798_vm0 = vcmask 7168   ;;  %vm1258_vm1 = vcmask 31744  }
  0xa7   : > { %v999_v35 = vpop.permute.xlu1 %998  ;;  %987 = vrot.lane.b32.xlu0 %v982_v13, %s6003_s30 }
  0xa8   : > { %v623_v39 = vmul.f32 %v6283_v26, %v531_v44  ;;  %v6292_v40 = vrot.slane %v999_v35, %v6243_v41 }
  0xaa   : > { %628 = vrot.lane.b32.xlu1 %v623_v39, %s10451_s20  ;;  %v6296_v42 = vpop.permute.xlu0 %658  ;;  %v1008_v44 = vmul.f32 %v6292_v40, %v6286_v36 }
  0xab   : > { %714 = vrot.lane.b32.xlu0 %v710_v38, %s6005_s16  ;;  %v1244_v38 = vsel %vm1243_vm2, 1.0, %v10364_v3  ;;  %vm1292_vm2 = vcmask 203780  }
  0xae   : > { %716 = vrot.lane.b32.xlu1 %v711_v49, %s6005_s16  ;;  %v10334_v49 = vmov 19  }
  0xaf   : > { %1012 = vrot.lane.b32.xlu0 %v1008_v44, %s6005_s16  ;;  %v728_v53 = vpop.permute.xlu0 %727 }
  0xb0   : > { %v6312_v56 = vrot.slane %v728_v53, %v6243_v41  ;;  %v6343_v53 = vrot.slane %v1244_v38, %v6209_v20 }
  0xb2   : > { %v738_v57 = vmul.f32 %v6312_v56, %v6249_v47  ;;  %10670 = vst [vmem:[#allocation14_spill] sm:$0xff] %v6343_v53 }
  0xb3   : > { %1093 = vrot.lane.b32.xlu0 %v1092_v51, %s6008_s21  ;;  %v6340_v51 = vrot.slane %v1244_v38, %v6206_v19 }
  0xb4   : > { %743 = vrot.lane.b32.xlu1 %v738_v57, %s6006_s17  ;;  %v755_v58 = vpop.permute.xlu0 %754 }
  0xb5   : > { %v6320_v63 = vrot.slane %v755_v58, %v6243_v41  ;;  %10669 = vst [vmem:[#allocation13_spill] sm:$0xff] %v6340_v51 }
  0xb7   : > { %1133 = vperm.xlu0 %5800, %v6150_v0   ;;  %v765_v5 = vmul.f32 %v6320_v63, %v6249_v47 }
  0xb8   : > { %v6325_v13 = vpop.permute.xlu0 %795 }
  0xb9   : > { %770 = vrot.lane.b32.xlu1 %v765_v5, %s10451_s20  ;;  %v1254_v5 = vcombine.low %v6340_v51, %v6343_v53 }
  0xbb   : > { %5801 = vset.pattern.permute.xlu0 %v10318_v21 }
  0xbc   : > { %1160 = vperm.xlu0 %5801, %v6150_v0   ;;  %v836_v35 = vpop.permute.xlu0 %835 }
  0xbd   : > { %v6331_v37 = vrot.slane %v836_v35, %v6243_v41 }
  0xbf   : > { %v846_v39 = vmul.f32 %v6331_v37, %v6275_v62 }
  0xc0   : > { %5802 = vset.pattern.permute.xlu0 %v10334_v49 }
  0xc1   : > { %1187 = vperm.xlu0 %5802, %v6150_v0   ;;  %851 = vrot.lane.b32.xlu1 %v846_v39, %s6003_s30  ;;  %v863_v44 = vpop.permute.xlu0 %862 }
  0xc2   : > { %v6346_v57 = vrot.slane %v863_v44, %v6243_v41  ;;  %v6362_v44 = vld [vmem:[%s10301_s4] sm:$0xf] }
  0xc4   : > { %v873_v58 = vmul.f32 %v6346_v57, %v6275_v62 }
  0xc5   : > { %5803 = vset.pattern.permute.xlu0 %v10350_v60 }
  0xc6   : > { %1214 = vperm.xlu0 %5803, %v6150_v0   ;;  %878 = vrot.lane.b32.xlu1 %v873_v58, %s6005_s16  ;;  %v890_v35 = vpop.permute.xlu0 %889 }
  0xc7   : > { %v897_v38 = vrot.slane %v890_v35, %v6243_v41 }
  0xc9   : > { %v900_v39 = vmul.f32 %v897_v38, %v6275_v62 }
  0xca   : > { %1255 = vrot.lane.b32.xlu0 %v1254_v5, %s10397_s23  ;;  %v1009_v5 = vmul.f32 %v6292_v40, %v6275_v62  ;;  %s6040_s23 = smov 15  }
  0xcb   : > { %5805 = vset.pattern.permute.xlu0 %v10317_v27  ;;  %905 = vrot.lane.b32.xlu1 %v900_v39, %s6006_s17  ;;  %v917_v15 = vpop.permute.xlu0 %916 }
  0xcc   : > { %v924_v58 = vrot.slane %v917_v15, %v6243_v41 }
  0xce   : > { %1329 = vperm.xlu0 %5805, %v6362_v44   ;;  %v927_v35 = vmul.f32 %v924_v58, %v6275_v62 }
  0xd0   : > { %932 = vrot.lane.b32.xlu1 %v927_v35, %s10451_s20  ;;  %v6369_v18 = vpop.permute.xlu0 %956 }
  0xd2   : > { %5806 = vset.pattern.permute.xlu0 %v10318_v21 }
  0xd3   : > { %1354 = vperm.xlu0 %5806, %v6362_v44  }
  0xd4   : > { %1014 = vrot.lane.b32.xlu1 %v1009_v5, %s6005_s16  ;;  %v10325_v5 = vmov 35  }
  0xd5   : > { %v1026_v39 = vpop.permute.xlu0 %1025 }
  0xd6   : > { %v1033_v15 = vrot.slane %v1026_v39, %v6243_v41  ;;  %v543_v39 = vmul.f32 %v6246_v43, %v6286_v36  ;;  %v622_v43 = vmul.f32 %v6283_v26, %v6286_v36  ;;  %v764_v26 = vmul.f32 %v6320_v63, %v6286_v36 }
  0xd7   : > { %5807 = vset.pattern.permute.xlu0 %v10327_v25  ;;  %v981_v63 = vmul.f32 %v6273_v61, %v6286_v36 }
  0xd8   : > { %1382 = vperm.xlu0 %5807, %v6362_v44   ;;  %v1036_v35 = vmul.f32 %v1033_v15, %v6275_v62 }
  0xda   : > { %1041 = vrot.lane.b32.xlu1 %v1036_v35, %s6006_s17  ;;  %v1053_v27 = vpop.permute.xlu0 %1052  ;;  %v10324_v35 = vmov 42  }
  0xdb   : > { %v1060_v21 = vrot.slane %v1053_v27, %v6243_v41  ;;  %v570_v27 = vmul.f32 %v6262_v54, %v6286_v36  ;;  %v10322_v54 = vmov 29  }
  0xdc   : > { %5808 = vset.pattern.permute.xlu0 %v10326_v4 }
  0xdd   : > { %1407 = vperm.xlu0 %5808, %v6362_v44   ;;  %v1063_v40 = vmul.f32 %v1060_v21, %v6275_v62 }
  0xdf   : > { %1068 = vrot.lane.b32.xlu1 %v1063_v40, %s10451_s20  ;;  %v596_v40 = vmul.f32 %v6270_v59, %v6286_v36  ;;  %v10321_v59 = vmov 36  }
  0xe1   : > { %5809 = vset.pattern.permute.xlu0 %v10325_v5  ;;  %v6481_v5 = vld [vmem:[#allocation2 + $0x8] sm:$0xf] }
  0xe2   : > { %1432 = vperm.xlu0 %5809, %v6362_v44  }
  0xe3   : > { %547 = vrot.lane.b32.xlu1 %v543_v39, %s6003_s30  ;;  %v683_v39 = vmul.f32 %v6253_v48, %v6286_v36  ;;  %v845_v48 = vmul.f32 %v6331_v37, %v6286_v36  ;;  %v1035_v37 = vmul.f32 %v1033_v15, %v6286_v36  ;;  %v6450_v15 = vrot.slane %v6296_v42, %v6243_v41 }
  0xe4   : > { %v10340_v42 = vrot.slane %v6325_v13, 4 }
  0xe6   : > { %5810 = vset.pattern.permute.xlu0 %v10324_v35 }
  0xe7   : > { %1460 = vperm.xlu0 %5810, %v6362_v44   ;;  %574 = vrot.lane.b32.xlu1 %v570_v27, %s6005_s16  ;;  %v737_v27 = vmul.f32 %v6312_v56, %v6286_v36  ;;  %v899_v56 = vmul.f32 %v897_v38, %v6286_v36  ;;  %v1062_v38 = vmul.f32 %v1060_v21, %v6286_v36 }
  0xe8   : > { %v669_v21 = vmul.f32 %v6450_v15, %v6249_v47 }
  0xeb   : > { %5813 = vset.pattern.permute.xlu0 %v10323_v30  ;;  %600 = vrot.lane.b32.xlu1 %v596_v40, %s6006_s17  ;;  %v872_v40 = vmul.f32 %v6346_v57, %v6286_v36 }
  0xec   : > { %1576 = vperm.xlu0 %5813, %v6362_v44  }
  0xef   : > { %626 = vrot.lane.b32.xlu1 %v622_v43, %s10451_s20  ;;  %v926_v43 = vmul.f32 %v924_v58, %v6286_v36 }
  0xf0   : > { %5814 = vset.pattern.permute.xlu0 %v10322_v54 }
  0xf1   : > { %1603 = vperm.xlu0 %5814, %v6362_v44  }
  0xf3   : > { %687 = vrot.lane.b32.xlu1 %v683_v39, %s6003_s30 }
  0xf5   : > { %5815 = vset.pattern.permute.xlu0 %v10321_v59 }
  0xf6   : > { %1630 = vperm.xlu0 %5815, %v6362_v44  }
  0xf7   : > { %741 = vrot.lane.b32.xlu1 %v737_v27, %s6006_s17 }
  0xfb   : > { %768 = vrot.lane.b32.xlu1 %v764_v26, %s10451_s20 }
  0xff   : > { %849 = vrot.lane.b32.xlu1 %v845_v48, %s6003_s30 }
 0x103   : > { %876 = vrot.lane.b32.xlu1 %v872_v40, %s6005_s16 }
 0x105   : > { %v6429_v39 = vpop.permute.xlu1 %549 }
 0x107   : > { %903 = vrot.lane.b32.xlu1 %v899_v56, %s6006_s17 }
 0x10a   : > { %v6440_v58 = vpop.permute.xlu0 %689 }
 0x10b   : > { %930 = vrot.lane.b32.xlu1 %v926_v43, %s10451_s20  ;;  %v698_v56 = vadd.f32 %v6440_v58, %v669_v21 }
 0x10f   : > { %985 = vrot.lane.b32.xlu1 %v981_v63, %s6003_s30 }
 0x112   : > { %v6433_v57 = vpop.permute.xlu1 %576 }
 0x113   : > { %1039 = vrot.lane.b32.xlu1 %v1035_v37, %s6006_s17 }
 0x117   : > { %v6437_v27 = vpop.permute.xlu1 %602  ;;  %1066 = vrot.lane.b32.xlu1 %v1062_v38, %s10451_s20 }
 0x119   : > { %v6445_v26 = vpop.permute.xlu0 %987 }
 0x11b   : > { %1118 = vperm.xlu1 %5799, %v6150_v0  }
 0x11c   : > { %v6443_v61 = vpop.permute.xlu1 %628 }
 0x11d   : > { %v6456_v40 = vpop.permute.xlu0 %714 }
 0x11f   : > { %5804 = vset.pattern.permute.xlu1 %v10328_v2 }
 0x120   : > { %v6452_v48 = vpop.permute.xlu1 %716 }
 0x121   : > { %v725_v43 = vadd.f32 %v6452_v48, %v698_v56  ;;  %v6463_v37 = vpop.permute.xlu0 %1012 }
 0x125   : > { %v6472_v21 = vpop.permute.xlu0 %1093 }
 0x126   : > { %v6459_v0 = vpop.permute.xlu1 %743 }
 0x127   : > { %v752_v63 = vadd.f32 %v6459_v0, %v725_v43 }
 0x12b   : > { %v6465_v38 = vpop.permute.xlu1 %770 }
 0x12c   : > { %v779_v59 = vadd.f32 %v6465_v38, %v752_v63 }
 0x12e   : > { %v803_v47 = vmul.f32 %v10340_v42, %v779_v59 }
 0x130   : > { %808 = vrot.lane.b32.xlu0 %v803_v47, %s10407_s27 }
 0x133   : > { %v6474_v54 = vpop.permute.xlu1 %851 }
 0x136   : > { %v1134_v56 = vpop.permute.xlu0 %1133 }
 0x137   : > { %v1141_v43 = vrot.slane %v1134_v56, %v6243_v41 }
 0x138   : > { %v6478_v35 = vpop.permute.xlu1 %878 }
 0x139   : > { %v1143_v30 = vmul.f32 %v1141_v43, %v6286_v36  ;;  %v1144_v59 = vmul.f32 %v1141_v43, %v6481_v5  ;;  %v6496_v43 = vrot.slane %v6369_v18, %v6243_v41 }
 0x13b   : > { %1147 = vrot.lane.b32.xlu1 %v1143_v30, %s6003_s30  ;;  %v1161_v63 = vpop.permute.xlu0 %1160 }
 0x13c   : > { %v1168_v47 = vrot.slane %v1161_v63, %v6243_v41 }
 0x13d   : > { %v6485_v4 = vpop.permute.xlu1 %905 }
 0x13e   : > { %v1170_v56 = vmul.f32 %v1168_v47, %v6286_v36  ;;  %v1171_v30 = vmul.f32 %v1168_v47, %v6481_v5 }
 0x13f   : > { %1149 = vrot.lane.b32.xlu1 %v1144_v59, %s6003_s30 }
 0x140   : > { %v1188_v25 = vpop.permute.xlu0 %1187 }
 0x141   : > { %v1195_v14 = vrot.slane %v1188_v25, %v6243_v41 }
 0x142   : > { %v6489_v2 = vpop.permute.xlu1 %932 }
 0x143   : > { %1174 = vrot.lane.b32.xlu1 %v1170_v56, %s6005_s16  ;;  %v1197_v63 = vmul.f32 %v1195_v14, %v6286_v36  ;;  %v967_v56 = vmul.f32 %v6496_v43, %v6275_v62  ;;  %v1198_v47 = vmul.f32 %v1195_v14, %v6481_v5  ;;  %v10367_v14 = vrot.slane %v6472_v21, 4 }
 0x145   : > { %v1215_v16 = vpop.permute.xlu0 %1214  ;;  %v996_v25 = vadd.f32 %v6445_v26, %v967_v56  ;;  %v10347_v56 = vmov 43  }
 0x146   : > { %v6500_v59 = vpop.permute.xlu1 %1014  ;;  %v1222_v18 = vrot.slane %v1215_v16, %v6243_v41  ;;  %5816 = vset.pattern.permute.xlu0 %v10347_v56 }
 0x147   : > { %1176 = vrot.lane.b32.xlu1 %v1171_v30, %s6005_s16  ;;  %v1023_v1 = vadd.f32 %v6500_v59, %v996_v25 }
 0x148   : > { %v1224_v42 = vmul.f32 %v1222_v18, %v6286_v36  ;;  %v1225_v25 = vmul.f32 %v1222_v18, %v6481_v5 }
 0x149   : > { %v6502_v49 = vpop.permute.xlu0 %1255 }
 0x14b   : > { %1201 = vrot.lane.b32.xlu1 %v1197_v63, %s6006_s17 }
 0x14c   : > { %v6510_v28 = vpop.permute.xlu1 %1041 }
 0x14d   : > { %v6512_v30 = vpop.permute.xlu0 %1329  ;;  %v1050_v32 = vadd.f32 %v6510_v28, %v1023_v1 }
 0x14e   : > { %10671 = vst [vmem:[#allocation15_spill] sm:$0xff] %v6512_v30 }
 0x14f   : > { %1203 = vrot.lane.b32.xlu1 %v1198_v47, %s6006_s17 }
 0x151   : > { %v6518_v6 = vpop.permute.xlu1 %1068 }
 0x152   : > { %v6520_v63 = vpop.permute.xlu0 %1354  ;;  %v1077_v16 = vadd.f32 %v6518_v6, %v1050_v32  ;;  %v1277_v32 = vld [vmem:[%s10300_s3] sm:$0xf] }
 0x153   : > { %10672 = vst [vmem:[#allocation16_spill] sm:$0xff] %v6520_v63  ;;  %1228 = vrot.lane.b32.xlu1 %v1224_v42, %s10451_s20 }
 0x154   : > { %v1101_v47 = vmul.f32 %v10367_v14, %v1077_v16  ;;  %v1016_v14 = vrot.slane %v6463_v37, 4 }
 0x155   : > { %v6529_v31 = vpop.permute.xlu1 %547 }
 0x156   : > { %1106 = vrot.lane.b32.xlu0 %v1101_v47, %s6020_s28 }
 0x157   : > { %1230 = vrot.lane.b32.xlu1 %v1225_v25, %s10451_s20  ;;  %v6533_v1 = vpop.permute.xlu0 %1382 }
 0x159   : > { %v6538_v42 = vpop.permute.xlu1 %574 }
 0x15b   : > { %1280 = vperm.xlu1 %5804, %v1277_v32  }
 0x15c   : > { %v6540_v18 = vpop.permute.xlu0 %1407 }
 0x15d   : > { %v6542_v56 = vpop.permute.xlu1 %600 }
 0x15f   : > { %1314 = vperm.xlu1 %5804, %v6362_v44  }
 0x161   : > { %v6545_v16 = vpop.permute.xlu0 %1432  ;;  %v6547_v47 = vpop.permute.xlu1 %626 }
 0x163   : > { %5811 = vset.pattern.permute.xlu1 %v10358_v11  ;;  %v831_v11 = vmul.f32 %v6558_v8, %v6275_v62 }
 0x165   : > { %v6550_v25 = vpop.permute.xlu1 %687 }
 0x166   : > { %v1461_v60 = vpop.permute.xlu0 %1460 }
 0x167   : > { %v6553_v29 = vrot.slane %v1461_v60, %v6243_v41  ;;  %v860_v60 = vadd.f32 %v6474_v54, %v831_v11 }
 0x169   : > { %10673 = vst [vmem:[#allocation17_spill] sm:$0xff] %v6553_v29  ;;  %v1471_v32 = vmul.f32 %v6553_v29, %v1458_v52  ;;  %v6560_v33 = vpop.permute.xlu1 %741  ;;  %v887_v34 = vadd.f32 %v6478_v35, %v860_v60  ;;  %v1017_v60 = vrot.slane %v6500_v59, 4  ;;  %v1044_v59 = vrot.slane %v6510_v28, 4  ;;  %v6763_v29 = vld [vmem:[#allocation3 + $0x10] sm:$0xf] }
 0x16b   : > { %1476 = vrot.lane.b32.xlu1 %v1471_v32, %s6005_s16  ;;  %v914_v55 = vadd.f32 %v6485_v4, %v887_v34  ;;  %v990_v34 = vrot.slane %v6445_v26, 4 }
 0x16d   : > { %v6565_v22 = vpop.permute.xlu1 %768  ;;  %v941_v32 = vadd.f32 %v6489_v2, %v914_v55  ;;  %v966_v55 = vmul.f32 %v6496_v43, %v6286_v36 }
 0x16f   : > { %1520 = vperm.xlu1 %5811, %v6362_v44  }
 0x171   : > { %v6570_v52 = vpop.permute.xlu1 %849 }
 0x173   : > { %5812 = vset.pattern.permute.xlu1 %v10366_v10 }
 0x174   : > { %1547 = vperm.xlu1 %5812, %v6362_v44  }
 0x175   : > { %v6576_v3 = vpop.permute.xlu1 %876 }
 0x178   : > { %946 = vrot.lane.b32.xlu1 %v941_v32, %s10405_s24  ;;  %v1018_v32 = vsel %vm553_vm3, %v1016_v14, %v1017_v60 }
 0x179   : > { %5817 = vset.pattern.permute.xlu1 %v10369_v9  ;;  %v6580_v11 = vpop.permute.xlu1 %903  ;;  %v1019_v17 = vsel %vm581_vm5, %v6463_v37, %v1018_v32  ;;  %v10674_v37 = vrot.slane %v6472_v21, 4 }
 0x17d   : > { %v6582_v62 = vpop.permute.xlu1 %930 }
 0x181   : > { %v986_v10 = vpop.permute.xlu1 %985 }
 0x182   : > { %v989_v46 = vrot.slane %v986_v10, 4 }
 0x184   : > { %v991_v9 = vsel %vm553_vm3, %v989_v46, %v990_v34  ;;  %v1071_v46 = vrot.slane %v6518_v6, 4 }
 0x185   : > { %v992_v45 = vsel %vm555_vm4, %v986_v10, %v991_v9  ;;  %v1040_v53 = vpop.permute.xlu1 %1039 }
 0x186   : > { %v995_v51 = vadd.f32 %v992_v45, %v966_v55  ;;  %v1043_v26 = vrot.slane %v1040_v53, 4 }
 0x188   : > { %v1022_v24 = vadd.f32 %v1019_v17, %v995_v51  ;;  %v1045_v43 = vsel %vm553_vm3, %v1043_v26, %v1044_v59  ;;  %v1097_v17 = vsel %vm1096_vm8, %v10674_v37, %v6472_v21  ;;  %v854_v21 = vrot.slane %v6474_v54, 4 }
 0x189   : > { %v1046_v14 = vsel %vm607_vm7, %v1040_v53, %v1045_v43  ;;  %v1067_v60 = vpop.permute.xlu1 %1066  ;;  %v853_v43 = vrot.slane %v6570_v52, 4  ;;  %v1685_v37 = vadd.s32 4294967290, %v6192_v12 }
 0x18a   : > { %v1070_v34 = vrot.slane %v1067_v60, 4  ;;  %v1049_v9 = vadd.f32 %v1046_v14, %v1022_v24 }
 0x18b   : > { %vm1686_vm10 = vcmp.ge.s32.totalorder %v1685_v37, 0  ;;  %vm1687_vm11 = vcmp.lt.s32.totalorder %v1685_v37, 16  ;;  %v10675_v37 = vmov 0.0  }
 0x18c   : > { %v1072_v10 = vsel %vm553_vm3, %v1070_v34, %v1071_v46  ;;  %v881_v34 = vrot.slane %v6478_v35, 4  ;;  %vm1688_vm12 = vmand %vm1686_vm10, %vm1687_vm11 }
 0x18d   : > { %v1073_v28 = vsel %vm633_vm9, %v1067_v60, %v1072_v10  ;;  %v880_v60 = vrot.slane %v6576_v3, 4  ;;  %v907_v10 = vrot.slane %v6580_v11, 4  ;;  %vm1293_vm10 = vmor %vm1292_vm2, %vm553_vm3  ;;  %vm1111_vm2 = vcmask 1022976  }
 0x18e   : > { %v1076_v45 = vadd.f32 %v1073_v28, %v1049_v9  ;;  %v855_v9 = vsel %vm553_vm3, %v853_v43, %v854_v21  ;;  %v830_v43 = vmul.f32 %v6558_v8, %v6286_v36  ;;  %v935_v21 = vrot.slane %v6489_v2, 4  ;;  %1294 = vst.msk [vmem:[#allocation3] sm:$0xff] %vm1293_vm10, %v10675_v37 }
 0x18f   : > { %v882_v54 = vsel %vm553_vm3, %v880_v60, %v881_v34  ;;  %v856_v35 = vsel %vm555_vm4, %v6570_v52, %v855_v9  ;;  %v10386_v34 = vrot.slane %v6502_v49, 4  ;;  %vm10477_vm10 = vcmask 1014784  }
 0x190   : > { %v6604_v51 = vmul.f32 %v1097_v17, %v1076_v45  ;;  %v908_v17 = vrot.slane %v6485_v4, 4  ;;  %v883_v4 = vsel %vm581_vm5, %v6576_v3, %v882_v54  ;;  %v1689_v54 = vsel %vm1688_vm12, 1.0, %v10675_v37 }
 0x19a   : > { %v1119_v53 = vpop.permute.xlu1 %1118 }
 0x19b   : > { %v6617_v26 = vrot.slane %v1119_v53, %v6243_v41  ;;  %v934_v53 = vrot.slane %v6582_v62, 4 }
 0x19d   : > { %v1129_v46 = vmul.f32 %v6617_v26, %v6481_v5  ;;  %v936_v52 = vsel %vm553_vm3, %v934_v53, %v935_v21  ;;  %v10678_v21 = vmov 23  }
 0x19e   : > { %v937_v3 = vsel %vm633_vm9, %v6582_v62, %v936_v52  ;;  %v10677_v62 = vmov 16  }
 0x1ad   : > { %v6606_v55 = vpop.permute.xlu1 %1147 }
 0x1b1   : > { %v6608_v6 = vpop.permute.xlu1 %1149 }
 0x1b2   : > { %v1158_v28 = vadd.f32 %v6608_v6, %v1129_v46  ;;  %v909_v46 = vsel %vm553_vm3, %v907_v10, %v908_v17 }
 0x1b3   : > { %v910_v2 = vsel %vm607_vm7, %v6580_v11, %v909_v46  ;;  %v1698_v11 = vrot.slane %v1689_v54, %v6209_v20  ;;  %v10385_v46 = vmov 30  }
 0x1b5   : > { %v6610_v32 = vpop.permute.xlu1 %1174 }
 0x1b9   : > { %v6612_v24 = vpop.permute.xlu1 %1176 }
 0x1ba   : > { %v1185_v5 = vadd.f32 %v6612_v24, %v1158_v28  ;;  %v859_v28 = vadd.f32 %v856_v35, %v830_v43  ;;  %v10676_v35 = vmov 9   ;;  %v1903_v43 = vadd.s32 4294967293, %v6192_v12 }
 0x1bc   : > { %v886_v9 = vadd.f32 %v883_v4, %v859_v28  ;;  %vm1904_vm13 = vcmp.ge.s32.totalorder %v1903_v43, 0  ;;  %vm1905_vm14 = vcmp.lt.s32.totalorder %v1903_v43, 16  ;;  %v10384_v28 = vmov 37  }
 0x1bd   : > { %v6614_v59 = vpop.permute.xlu1 %1201  ;;  %vm1906_vm15 = vmand %vm1904_vm13, %vm1905_vm14  ;;  %vm813_vm14 = vcmask 1039360  }
 0x1be   : > { %v913_v17 = vadd.f32 %v910_v2, %v886_v9  ;;  %v1907_v4 = vsel %vm1906_vm15, 1.0, %v10675_v37  ;;  %v10681_v9 = vmov 10   ;;  %vm951_vm15 = vcmask 1031168  }
 0x1bf   : > { %v6677_v12 = vrot.slane %v1907_v4, %v6206_v19  ;;  %v6680_v52 = vrot.slane %v1907_v4, %v6209_v20 }
 0x1c0   : > { %v940_v53 = vadd.f32 %v937_v3, %v913_v17  ;;  %v10683_v3 = vmov 24   ;;  %v10380_v17 = vmov 31  }
 0x1c1   : > { %v6620_v14 = vpop.permute.xlu1 %1203  ;;  %10679 = vst [vmem:[#allocation18_spill] sm:$0xff] %v6677_v12  ;;  %10680 = vst [vmem:[#allocation19_spill] sm:$0xff] %v6680_v52  ;;  %v1917_v2 = vcombine.low %v6677_v12, %v6680_v52 }
 0x1c2   : > { %v1212_v23 = vadd.f32 %v6620_v14, %v1185_v5 }
 0x1c5   : > { %v6630_v45 = vpop.permute.xlu1 %1228 }
 0x1c9   : > { %v6646_v60 = vpop.permute.xlu1 %1230 }
 0x1ca   : > { %v1239_v8 = vadd.f32 %v6646_v60, %v1212_v23  ;;  %v1694_v23 = vrot.slane %v1689_v54, %v6206_v19  ;;  %v10378_v54 = vmov 38  }
 0x1cc   : > { %v1263_v10 = vmul.f32 %v10386_v34, %v1239_v8  ;;  %v1699_v5 = vcombine.low %v1694_v23, %v1698_v11  ;;  %v10381_v8 = vmov 44   ;;  %v10684_v23 = vmov 4   ;;  %v6701_v11 = vpop.permute.xlu0 %1576 }
 0x1ce   : > { %1268 = vrot.lane.b32.xlu0 %v1263_v10, %s10395_s26  ;;  %v10682_v10 = vmov 17  }
 0x1d2   : > { %944 = vrot.lane.b32.xlu0 %v940_v53, %s10405_s24  ;;  %v10382_v53 = vmov 45   ;;  %s6052_s24 = smov 110  }
 0x1d6   : > { %1659 = vperm.xlu0 %5816, %v6362_v44  }
 0x1da   : > { %1700 = vrot.lane.b32.xlu0 %v1699_v5, %s6008_s21  ;;  %s10404_s21 = smov 6   ;;  %v6703_v5 = vpop.permute.xlu0 %1603 }
 0x1db   : > { %5818 = vset.pattern.permute.xlu0 %v10676_v35 }
 0x1de   : > { %1738 = vperm.xlu0 %5818, %v6362_v44   ;;  %v6705_v43 = vpop.permute.xlu0 %1630 }
 0x1e2   : > { %5819 = vset.pattern.permute.xlu0 %v10677_v62  ;;  %v6707_v4 = vpop.permute.xlu0 %808 }
 0x1e3   : > { %1765 = vperm.xlu0 %5819, %v6362_v44  }
 0x1e7   : > { %5820 = vset.pattern.permute.xlu0 %v10678_v21  ;;  %v1875_v21 = vld [vmem:[#allocation3 + $0x10] sm:$0xf] }
 0x1e8   : > { %1794 = vperm.xlu0 %5820, %v6362_v44  }
 0x1ec   : > { %5821 = vset.pattern.permute.xlu0 %v10385_v46 }
 0x1ed   : > { %1821 = vperm.xlu0 %5821, %v6362_v44  }
 0x1f1   : > { %5822 = vset.pattern.permute.xlu0 %v10384_v28 }
 0x1f2   : > { %1848 = vperm.xlu0 %5822, %v6362_v44  }
 0x1f6   : > { %5823 = vset.pattern.permute.xlu0 %v10381_v8  ;;  %v1657_v8 = vld [vmem:[#allocation3 + $0x10] sm:$0xf] }
 0x1f7   : > { %1877 = vperm.xlu0 %5823, %v6362_v44  }
 0x1fb   : > { %1918 = vrot.lane.b32.xlu0 %v1917_v2, %s10404_s21  ;;  %v6709_v2 = vpop.permute.xlu0 %1106 }
 0x1fc   : > { %5825 = vset.pattern.permute.xlu0 %v10681_v9 }
 0x1ff   : > { %1958 = vperm.xlu0 %5825, %v6362_v44  }
 0x203   : > { %5826 = vset.pattern.permute.xlu0 %v10682_v10 }
 0x204   : > { %1985 = vperm.xlu0 %5826, %v6362_v44  }
 0x208   : > { %5827 = vset.pattern.permute.xlu0 %v10683_v3  ;;  %v10689_v3 = vmov 3  }
 0x209   : > { %2014 = vperm.xlu0 %5827, %v6362_v44  }
 0x20d   : > { %5828 = vset.pattern.permute.xlu0 %v10380_v17 }
 0x20e   : > { %2041 = vperm.xlu0 %5828, %v6362_v44  }
 0x212   : > { %5829 = vset.pattern.permute.xlu0 %v10378_v54 }
 0x213   : > { %2068 = vperm.xlu0 %5829, %v6362_v44  }
 0x217   : > { %5830 = vset.pattern.permute.xlu0 %v10382_v53 }
 0x218   : > { %2097 = vperm.xlu0 %5830, %v6362_v44  }
 0x21c   : > { %5831 = vset.pattern.permute.xlu0 %v10684_v23 }
 0x21d   : > { %2137 = vperm.xlu0 %5831, %v6362_v44  }
 0x240   : > { %v6711_v54 = vpop.permute.xlu0 %1268 }
 0x244   : > { %v6713_v17 = vpop.permute.xlu0 %944 }
 0x255   : > { %v1660_v53 = vpop.permute.xlu0 %1659 }
 0x256   : > { %v6716_v28 = vrot.slane %v1660_v53, %v6243_v41 }
 0x258   : > { %10685 = vst [vmem:[#allocation20_spill] sm:$0xff] %v6716_v28  ;;  %v1670_v46 = vmul.f32 %v6716_v28, %v1657_v8  ;;  %v745_v28 = vrot.slane %v6560_v33, 4 }
 0x259   : > { %v6719_v34 = vpop.permute.xlu0 %1700 }
 0x25a   : > { %10686 = vst [vmem:[#allocation21_spill] sm:$0xff] %v6719_v34  ;;  %1675 = vrot.lane.b32.xlu1 %v1670_v46, %s6005_s16  ;;  %v10694_v34 = vmov 11  }
 0x25d   : > { %v6722_v12 = vpop.permute.xlu0 %1738 }
 0x25e   : > { %10687 = vst [vmem:[#allocation22_spill] sm:$0xff] %v6722_v12  ;;  %1723 = vperm.xlu1 %5817, %v6362_v44  }
 0x262   : > { %v6725_v52 = vpop.permute.xlu0 %1765  ;;  %5824 = vset.pattern.permute.xlu1 %v10689_v3 }
 0x263   : > { %10688 = vst [vmem:[#allocation23_spill] sm:$0xff] %v6725_v52 }
 0x267   : > { %v6728_v10 = vpop.permute.xlu0 %1794 }
 0x26c   : > { %v6730_v23 = vpop.permute.xlu0 %1821 }
 0x271   : > { %v6732_v53 = vpop.permute.xlu0 %1848 }
 0x276   : > { %v1878_v8 = vpop.permute.xlu0 %1877 }
 0x277   : > { %v6735_v62 = vrot.slane %v1878_v8, %v6243_v41  ;;  %v691_v8 = vrot.slane %v6550_v25, 4 }
 0x279   : > { %10690 = vst [vmem:[#allocation24_spill] sm:$0xff] %v6735_v62  ;;  %v1888_v46 = vmul.f32 %v6735_v62, %v1875_v21  ;;  %v692_v21 = vrot.slane %v6440_v58, 4 }
 0x27a   : > { %v6738_v9 = vpop.permute.xlu0 %1918 }
 0x27b   : > { %10691 = vst [vmem:[#allocation25_spill] sm:$0xff] %v6738_v9  ;;  %1893 = vrot.lane.b32.xlu1 %v1888_v46, %s6005_s16  ;;  %v693_v46 = vsel %vm553_vm3, %v691_v8, %v692_v21  ;;  %v719_v9 = vrot.slane %v6452_v48, 4  ;;  %v746_v48 = vrot.slane %v6459_v0, 4 }
 0x27d   : > { %v747_v30 = vsel %vm553_vm3, %v745_v28, %v746_v48  ;;  %v1178_v28 = vrot.slane %v6610_v32, 4 }
 0x27e   : > { %v6741_v35 = vpop.permute.xlu0 %1958 }
 0x27f   : > { %10692 = vst [vmem:[#allocation26_spill] sm:$0xff] %v6741_v35  ;;  %1943 = vperm.xlu1 %5824, %v6362_v44   ;;  %v694_v35 = vsel %vm555_vm4, %v6550_v25, %v693_v46  ;;  %v772_v25 = vrot.slane %v6565_v22, 4  ;;  %v773_v46 = vrot.slane %v6465_v38, 4 }
 0x281   : > { %v774_v0 = vsel %vm553_vm3, %v772_v25, %v773_v46 }
 0x283   : > { %v6744_v3 = vpop.permute.xlu0 %1985  ;;  %5832 = vset.pattern.permute.xlu1 %v10694_v34  ;;  %v668_v34 = vmul.f32 %v6450_v15, %v6286_v36 }
 0x284   : > { %10693 = vst [vmem:[#allocation27_spill] sm:$0xff] %v6744_v3  ;;  %v718_v3 = vrot.slane %v6456_v40, 4 }
 0x285   : > { %v697_v21 = vadd.f32 %v694_v35, %v668_v34  ;;  %v1151_v34 = vrot.slane %v6606_v55, 4  ;;  %v1179_v35 = vrot.slane %v6612_v24, 4  ;;  %v1233_v24 = vrot.slane %v6646_v60, 4 }
 0x286   : > { %v720_v8 = vsel %vm553_vm3, %v718_v3, %v719_v9  ;;  %v748_v3 = vsel %vm607_vm7, %v6560_v33, %v747_v30 }
 0x287   : > { %v1180_v48 = vsel %vm553_vm3, %v1178_v28, %v1179_v35 }
 0x288   : > { %v6747_v52 = vpop.permute.xlu0 %2014  ;;  %v1181_v25 = vsel %vm581_vm5, %v6610_v32, %v1180_v48 }
 0x28d   : > { %v6749_v12 = vpop.permute.xlu0 %2041 }
 0x292   : > { %v6753_v62 = vpop.permute.xlu0 %2068 }
 0x293   : > { %10695 = vst [vmem:[#allocation28_spill] sm:$0xff] %v6753_v62  ;;  %v1152_v62 = vrot.slane %v6608_v6, 4  ;;  %v1206_v6 = vrot.slane %v6620_v14, 4  ;;  %v1128_v14 = vmul.f32 %v6617_v26, %v6286_v36 }
 0x295   : > { %v1153_v38 = vsel %vm553_vm3, %v1151_v34, %v1152_v62 }
 0x296   : > { %v1154_v33 = vsel %vm555_vm4, %v6606_v55, %v1153_v38  ;;  %v10697_v55 = vrot.slane %v6325_v13, 4 }
 0x297   : > { %v2098_v63 = vpop.permute.xlu0 %2097  ;;  %v1157_v46 = vadd.f32 %v1154_v33, %v1128_v14  ;;  %v6847_v14 = vld [vmem:[%s10298_s1] sm:$0x3] }
 0x298   : > { %v6766_v58 = vrot.slane %v2098_v63, %v6243_v41  ;;  %v721_v63 = vsel %vm581_vm5, %v6456_v40, %v720_v8  ;;  %v775_v40 = vsel %vm633_vm9, %v6565_v22, %v774_v0  ;;  %v1232_v22 = vrot.slane %v6630_v45, 4 }
 0x299   : > { %v724_v9 = vadd.f32 %v721_v63, %v697_v21  ;;  %v1205_v21 = vrot.slane %v6614_v59, 4  ;;  %v799_v63 = vsel %vm798_vm0, %v10697_v55, %v6325_v13  ;;  %v1184_v32 = vadd.f32 %v1181_v25, %v1157_v46 }
 0x29a   : > { %v2108_v15 = vmul.f32 %v6766_v58, %v6763_v29  ;;  %v1234_v60 = vsel %vm553_vm3, %v1232_v22, %v1233_v24  ;;  %v551_v22 = vrot.slane %v6529_v31, 4  ;;  %v552_v25 = vrot.slane %v6429_v39, 4 }
 0x29b   : > { %v751_v8 = vadd.f32 %v748_v3, %v724_v9  ;;  %v1207_v62 = vsel %vm553_vm3, %v1205_v21, %v1206_v6  ;;  %v10424_v9 = vmov 25   ;;  %v1235_v34 = vsel %vm633_vm9, %v6630_v45, %v1234_v60  ;;  %v6824_v45 = vpop.permute.xlu1 %1280 }
 0x29c   : > { %2113 = vrot.lane.b32.xlu1 %v2108_v15, %s6005_s16  ;;  %v10696_v15 = vmov 18   ;;  %v1208_v26 = vsel %vm607_vm7, %v6614_v59, %v1207_v62  ;;  %5834 = vset.pattern.permute.xlu0 %v10424_v9  ;;  %v10698_v3 = vmov 5   ;;  %v10699_v59 = vrot.slane %v6502_v49, 4 }
 0x29d   : > { %v778_v30 = vadd.f32 %v775_v40, %v751_v8  ;;  %2206 = vperm.xlu0 %5834, %v6362_v44   ;;  %v1211_v35 = vadd.f32 %v1208_v26, %v1184_v32  ;;  %v10423_v6 = vmov 32   ;;  %v637_v62 = vadd.s32 4294967294, %v6847_v14 }
 0x29e   : > { %v1259_v38 = vsel %vm1258_vm1, %v10699_v59, %v6502_v49  ;;  %v578_v46 = vrot.slane %v6538_v42, 4  ;;  %v526_v60 = vrot.slane %v6257_v50, %v6243_v41  ;;  %v579_v55 = vrot.slane %v6433_v57, 4 }
 0x29f   : > { %v802_v0 = vmul.f32 %v799_v63, %v778_v30  ;;  %v1238_v13 = vadd.f32 %v1235_v34, %v1211_v35  ;;  %v6826_v40 = vpop.permute.xlu1 %1314  ;;  %vm638_vm11 = vcmp.ge.s32.totalorder %v637_v62, 0  ;;  %vm639_vm12 = vcmp.lt.s32.totalorder %v637_v62, 16 }
 0x2a0   : > { %2152 = vperm.xlu1 %5832, %v6362_v44   ;;  %10700 = vst [vmem:[#allocation29_spill] sm:$0xff] %v6826_v40  ;;  %v554_v63 = vsel %vm553_vm3, %v551_v22, %v552_v25  ;;  %v604_v26 = vrot.slane %v6542_v56, 4  ;;  %v605_v32 = vrot.slane %v6437_v27, 4  ;;  %v580_v34 = vsel %vm553_vm3, %v578_v46, %v579_v55  ;;  %vm640_vm13 = vmand %vm638_vm11, %vm639_vm12 }
 0x2a1   : > { %v1262_v28 = vmul.f32 %v1259_v38, %v1238_v13  ;;  %5835 = vset.pattern.permute.xlu0 %v10423_v6  ;;  %v630_v39 = vrot.slane %v6547_v47, 4  ;;  %v556_v35 = vsel %vm555_vm4, %v6529_v31, %v554_v63  ;;  %v528_v50 = vmul.f32 %v6286_v36, %v526_v60 }
 0x2a2   : > { %v631_v57 = vrot.slane %v6443_v61, 4  ;;  %v606_v13 = vsel %vm553_vm3, %v604_v26, %v605_v32  ;;  %v582_v38 = vsel %vm581_vm5, %v6538_v42, %v580_v34  ;;  %v641_v27 = vsel %vm640_vm13, 1.0, %v10675_v37 }
 0x2a3   : > { %v6828_v8 = vpop.permute.xlu1 %1476  ;;  %v608_v22 = vsel %vm607_vm7, %v6542_v56, %v606_v13  ;;  %v6877_v36 = vrot.slane %v641_v27, %v6206_v19  ;;  %v6880_v61 = vrot.slane %v641_v27, %v6209_v20  ;;  %v948_v55 = vrot.slane %v6713_v17, 4 }
 0x2a4   : > { %5833 = vset.pattern.permute.xlu1 %v10696_v15  ;;  %10701 = vst [vmem:[#allocation30_spill] sm:$0xff] %v6828_v8  ;;  %v632_v62 = vsel %vm553_vm3, %v630_v39, %v631_v57  ;;  %v811_v26 = vrot.slane %v6707_v4, 4  ;;  %v1109_v13 = vrot.slane %v6709_v2, 4  ;;  %v7044_v9 = vrot.slane %v6533_v1, %v6243_v41 }
 0x2a5   : > { %2179 = vperm.xlu1 %5833, %v6362_v44   ;;  %10703 = vst [vmem:[#allocation32_spill] sm:$0xff] %v6877_v36  ;;  %10704 = vst [vmem:[#allocation33_spill] sm:$0xff] %v6880_v61  ;;  %v634_v25 = vsel %vm633_vm9, %v6547_v47, %v632_v62  ;;  %v651_v63 = vcombine.low %v6877_v36, %v6880_v61 }
 0x2a7   : > { %v6830_v48 = vpop.permute.xlu1 %1520 }
 0x2a9   : > { %806 = vrot.lane.b32.xlu1 %v802_v0, %s10407_s27  ;;  %s6047_s27 = smov 16  }
 0x2aa   : > { %5838 = vset.pattern.permute.xlu1 %v10698_v3 }
 0x2ad   : > { %1104 = vrot.lane.b32.xlu1 %v6604_v51, %s6020_s28  ;;  %v6832_v51 = vpop.permute.xlu1 %1547 }
 0x2b1   : > { %1266 = vrot.lane.b32.xlu1 %v1262_v28, %s10395_s26  ;;  %v947_v49 = vpop.permute.xlu1 %946  ;;  %v558_v28 = vadd.f32 %v556_v35, %v528_v50  ;;  %s6035_s26 = smov 12  }
 0x2b2   : > { %v949_v32 = vrot.slane %v947_v49, 4 }
 0x2b3   : > { %v584_v31 = vadd.f32 %v582_v38, %v558_v28 }
 0x2b4   : > { %v950_v39 = vsel %vm553_vm3, %v948_v55, %v949_v32  ;;  %v1288_v55 = vrot.slane %v6824_v45, %v6243_v41  ;;  %v10417_v32 = vmov 39  }
 0x2b5   : > { %v610_v42 = vadd.f32 %v608_v22, %v584_v31  ;;  %v952_v4 = vsel %vm951_vm15, %v6713_v17, %v950_v39  ;;  %v1271_v31 = vrot.slane %v6711_v54, 4  ;;  %v2313_v17 = vadd.s32 3, %v6847_v14 }
 0x2b6   : > { %v10398_v39 = vmov 46  }
 0x2b7   : > { %v636_v60 = vadd.f32 %v634_v25, %v610_v42  ;;  %vm2314_vm11 = vcmp.ge.s32.totalorder %v2313_v17, 0  ;;  %vm2315_vm12 = vcmp.lt.s32.totalorder %v2313_v17, 16 }
 0x2b8   : > { %vm2316_vm13 = vmand %vm2314_vm11, %vm2315_vm12 }
 0x2b9   : > { %v653_v35 = vmul.f32 %v651_v63, %v636_v60  ;;  %v2317_v54 = vsel %vm2316_vm13, 1.0, %v10675_v37 }
 0x2ba   : > { %v6911_v45 = vrot.slane %v2317_v54, %v6206_v19 }
 0x2bc   : > { %10705 = vst [vmem:[#allocation34_spill] sm:$0xff] %v6911_v45 }
 0x2cc   : > { %v6836_v21 = vpop.permute.xlu1 %1675 }
 0x2dd   : > { %v6838_v24 = vpop.permute.xlu1 %1723 }
 0x2ed   : > { %v6840_v33 = vpop.permute.xlu1 %1893 }
 0x2fe   : > { %v6842_v30 = vpop.permute.xlu1 %1943 }
 0x30e   : > { %v6858_v0 = vpop.permute.xlu1 %2113 }
 0x30f   : > { %10702 = vst [vmem:[#allocation31_spill] sm:$0xff] %v6858_v0 }
 0x31f   : > { %v6868_v59 = vpop.permute.xlu1 %2152 }
 0x324   : > { %v6884_v46 = vpop.permute.xlu1 %2179 }
 0x328   : > { %v807_v56 = vpop.permute.xlu1 %806 }
 0x329   : > { %v810_v34 = vrot.slane %v807_v56, 4 }
 0x32b   : > { %v812_v47 = vsel %vm553_vm3, %v810_v34, %v811_v26  ;;  %v6914_v34 = vrot.slane %v2317_v54, %v6209_v20  ;;  %v6958_v54 = vrot.slane %v6830_v48, %v6243_v41 }
 0x32c   : > { %v814_v50 = vsel %vm813_vm14, %v807_v56, %v812_v47  ;;  %v1105_v57 = vpop.permute.xlu1 %1104  ;;  %v10707_v47 = vmov 12  }
 0x32d   : > { %v816_v38 = vadd.f32 %v814_v50, %v653_v35  ;;  %v1108_v27 = vrot.slane %v1105_v57, 4  ;;  %10706 = vst [vmem:[#allocation35_spill] sm:$0xff] %v6914_v34  ;;  %v2327_v35 = vcombine.low %v6911_v45, %v6914_v34  ;;  %v10708_v50 = vmov 19  }
 0x32e   : > { %v7063_v45 = vrot.slane %v6701_v11, %v6243_v41 }
 0x32f   : > { %v954_v49 = vadd.f32 %v952_v4, %v816_v38  ;;  %v1110_v28 = vsel %vm553_vm3, %v1108_v27, %v1109_v13  ;;  %v10409_v13 = vmov 26   ;;  %v10419_v38 = vmov 33  }
 0x330   : > { %v1112_v62 = vsel %vm1111_vm2, %v1105_v57, %v1110_v28  ;;  %v1267_v22 = vpop.permute.xlu1 %1266  ;;  %v2533_v57 = vadd.s32 6, %v6847_v14  ;;  %v10400_v4 = vmov 40  }
 0x331   : > { %v1270_v25 = vrot.slane %v1267_v22, 4  ;;  %v1114_v42 = vadd.f32 %v1112_v62, %v954_v49  ;;  %v10413_v62 = vmov 47  }
 0x332   : > { %vm2534_vm11 = vcmp.ge.s32.totalorder %v2533_v57, 0  ;;  %vm2535_vm12 = vcmp.lt.s32.totalorder %v2533_v57, 16 }
 0x333   : > { %v1272_v60 = vsel %vm553_vm3, %v1270_v25, %v1271_v31  ;;  %vm2536_vm13 = vmand %vm2534_vm11, %vm2535_vm12  ;;  %v10709_v25 = vmov 13   ;;  %vm1303_vm11 = vcmask 203776   ;;  %vm1309_vm12 = vcmask 199680  }
 0x334   : > { %v1274_v2 = vsel %vm10477_vm10, %v1267_v22, %v1272_v60  ;;  %v2537_v27 = vsel %vm2536_vm13, 1.0, %v10675_v37  ;;  %v6938_v22 = vld [vmem:[%s10301_s4] sm:$0xf]  ;;  %v10402_v60 = vmov 34  }
 0x335   : > { %v1276_v63 = vadd.f32 %v1274_v2, %v1114_v42  ;;  %v2542_v49 = vrot.slane %v2537_v27, %v6206_v19  ;;  %v2546_v28 = vrot.slane %v2537_v27, %v6209_v20  ;;  %v10421_v42 = vmov 27  }
 0x336   : > { %v10415_v2 = vmov 41  }
 0x337   : > { %v1290_v56 = vadd.f32 %v1288_v55, %v1276_v63  ;;  %v2547_v31 = vcombine.low %v2542_v49, %v2546_v28  ;;  %v6950_v55 = vpop.permute.xlu0 %2137  ;;  %v6968_v49 = vrot.slane %v6832_v51, %v6243_v41 }
 0x339   : > { %1300 = vrot.lane.b32.xlu0 %v1290_v56, %s6032_s22  ;;  %v2810_v26 = vcombine.high %v1290_v56, %v1290_v56  ;;  %s6046_s22 = smov 18  }
 0x33b   : > { %5675 = vmatprep.subr.msk.mxu0 %vm553_vm3, %v2810_v26  ;;  %v6952_v63 = vpop.permute.xlu0 %2206 }
 0x33c   : > { %5676 = vmatpush1.msk.msra.mxu0 %vm553_vm3, %v1290_v56 }
 0x33d   : > { %2233 = vperm.xlu0 %5835, %v6362_v44  }
 0x341   : > { %5836 = vset.pattern.permute.xlu0 %v10417_v32 }
 0x342   : > { %2260 = vperm.xlu0 %5836, %v6362_v44  }
 0x346   : > { %5837 = vset.pattern.permute.xlu0 %v10398_v39 }
 0x347   : > { %2287 = vperm.xlu0 %5837, %v6362_v44  }
 0x34b   : > { %2328 = vrot.lane.b32.xlu0 %v2327_v35, %s6035_s26  ;;  %s6051_s26 = smov 119  }
 0x34c   : > { %5839 = vset.pattern.permute.xlu0 %v10707_v47 }
 0x34f   : > { %2368 = vperm.xlu0 %5839, %v6362_v44  }
 0x353   : > { %5840 = vset.pattern.permute.xlu0 %v10708_v50 }
 0x354   : > { %2395 = vperm.xlu0 %5840, %v6362_v44  }
 0x358   : > { %5841 = vset.pattern.permute.xlu0 %v10409_v13  ;;  %v7022_v13 = vld [vmem:[%s10308_s11] sm:$0x3] }
 0x359   : > { %2424 = vperm.xlu0 %5841, %v6362_v44  }
 0x35d   : > { %5842 = vset.pattern.permute.xlu0 %v10419_v38 }
 0x35e   : > { %2451 = vperm.xlu0 %5842, %v6362_v44  }
 0x362   : > { %5843 = vset.pattern.permute.xlu0 %v10400_v4 }
 0x363   : > { %2478 = vperm.xlu0 %5843, %v6362_v44   ;;  %v10710_v44 = vmov 20  }
 0x367   : > { %5844 = vset.pattern.permute.xlu0 %v10413_v62 }
 0x368   : > { %2507 = vperm.xlu0 %5844, %v6938_v22  }
 0x36c   : > { %2548 = vrot.lane.b32.xlu0 %v2547_v31, %s6040_s23  ;;  %v6979_v31 = vrot.slane %v6868_v59, %v6243_v41  ;;  %s10449_s23 = smov 32  }
 0x36d   : > { %5846 = vset.pattern.permute.xlu0 %v10709_v25 }
 0x370   : > { %2588 = vperm.xlu0 %5846, %v6938_v22  }
 0x374   : > { %5847 = vset.pattern.permute.xlu0 %v10710_v44 }
 0x375   : > { %2615 = vperm.xlu0 %5847, %v6938_v22  }
 0x379   : > { %5848 = vset.pattern.permute.xlu0 %v10421_v42  ;;  %v10716_v42 = vmov 2  }
 0x37a   : > { %2644 = vperm.xlu0 %5848, %v6938_v22  }
 0x37e   : > { %5849 = vset.pattern.permute.xlu0 %v10402_v60  ;;  %v10712_v60 = vmov 0  }
 0x37f   : > { %2671 = vperm.xlu0 %5849, %v6938_v22  }
 0x383   : > { %5850 = vset.pattern.permute.xlu0 %v10415_v2  ;;  %v10715_v2 = vmov 8  }
 0x3ab   : > { %v1301_v17 = vpop.permute.xlu0 %1300 }
 0x3ac   : > { %v1302_v56 = vrot.slane %v1301_v17, 4 }
 0x3ae   : > { %v1304_v26 = vsel %vm1303_vm11, %v1302_v56, %v1301_v17  ;;  %1310 = vst.msk [vmem:[#allocation3 + $0xc] sm:$0xf] %vm1309_vm12, %v1302_v56  ;;  %v2752_v17 = vadd.s32 9, %v6847_v14  ;;  %v2187_v56 = vrot.slane %v6884_v46, %v6243_v41  ;;  %vm1453_vm12 = vcmask 130048  }
 0x3af   : > { %1308 = vst.msk [vmem:[#allocation3 + $0x4] sm:$0xff] %vm6178_vm6, %v1304_v26 }
 0x3b0   : > { %vm2753_vm6 = vcmp.ge.s32.totalorder %v2752_v17, 0  ;;  %vm2754_vm13 = vcmp.lt.s32.totalorder %v2752_v17, 16 }
 0x3b1   : > { %vm2755_vm11 = vmand %vm2753_vm6, %vm2754_vm13  ;;  %vm1921_vm6 = vcmask 48128   ;;  %vm2331_vm13 = vcmask 97280  }
 0x3b2   : > { %v2756_v46 = vsel %vm2755_vm11, 1.0, %v10675_v37  ;;  %vm2551_vm11 = vcmask 121856  }
 0x3b3   : > { %v2761_v39 = vrot.slane %v2756_v46, %v6206_v19 }
 0x3b5   : > { %v1380_v6 = vld [vmem:[#allocation3 + $0xc] sm:$0xf] }
 0x3b6   : > { %v6960_v35 = vld [vmem:[#allocation3 + $0x8] sm:$0xf]  ;;  %v6964_v27 = vld [vmem:[#allocation3] sm:$0xff]  ;;  %v1393_v34 = vmul.f32 %v7044_v9, %v1380_v6  ;;  %v2422_v44 = vld [vmem:[#allocation3 + $0xc] sm:$0xf] }
 0x3b7   : > { %v1531_v57 = vmul.f32 %v6958_v54, %v6960_v35  ;;  %v1557_v7 = vmul.f32 %v6968_v49, %v6964_v27  ;;  %v6975_v48 = vld [vmem:[#allocation3 + $0x8] sm:$0xf]  ;;  %v2189_v59 = vmul.f32 %v2187_v56, %v6964_v27 }
 0x3b8   : > { %v2163_v51 = vmul.f32 %v6979_v31, %v6975_v48  ;;  %v7180_v8 = vld [vmem:[#allocation3 + $0x4] sm:$0xff] }
 0x3b9   : > { %1536 = vrot.lane.b32.xlu0 %v1531_v57, %s6006_s17  ;;  %v6992_v57 = vmul.f32 %v2187_v56, %v6975_v48  ;;  %v2765_v56 = vrot.slane %v2756_v46, %v6209_v20  ;;  %v2804_v46 = vld [vmem:[%s10304_s7] sm:$0x3]  ;;  %v10718_v20 = vld [vmem:[#allocation15_spill] sm:$0xff] }
 0x3ba   : > { %v1337_v19 = vrot.slane %v10718_v20, %v6243_v41  ;;  %v1392_v20 = vmul.f32 %v7180_v8, %v7044_v9  ;;  %v1530_v9 = vmul.f32 %v6958_v54, %v6964_v27 }
 0x3bb   : > { %v2766_v4 = vcombine.low %v2761_v39, %v2765_v56  ;;  %v10714_v56 = vmov 1  }
 0x3bc   : > { %v6973_v28 = vpop.permute.xlu0 %2233 }
 0x3bd   : > { %1561 = vrot.lane.b32.xlu0 %v1557_v7, %s10449_s23 }
 0x3c1   : > { %2168 = vrot.lane.b32.xlu0 %v2163_v51, %s6006_s17  ;;  %v6988_v26 = vpop.permute.xlu0 %2260 }
 0x3c5   : > { %2193 = vrot.lane.b32.xlu0 %v2189_v59, %s10449_s23  ;;  %v10411_v59 = vmov 48  }
 0x3c6   : > { %v2288_v14 = vpop.permute.xlu0 %2287 }
 0x3c7   : > { %v6996_v7 = vrot.slane %v2288_v14, %v6243_v41 }
 0x3c9   : > { %v2298_v51 = vmul.f32 %v6996_v7, %v6763_v29  ;;  %2700 = vperm.xlu0 %5850, %v6938_v22  }
 0x3ca   : > { %v7002_v17 = vpop.permute.xlu0 %2328 }
 0x3cb   : > { %10711 = vst [vmem:[#allocation36_spill] sm:$0xff] %v7002_v17  ;;  %2303 = vrot.lane.b32.xlu1 %v2298_v51, %s6005_s16  ;;  %v10713_v51 = vmov 6  }
 0x3cd   : > { %5851 = vset.pattern.permute.xlu0 %v10411_v59 }
 0x3ce   : > { %2726 = vperm.xlu0 %5851, %v6938_v22   ;;  %v7009_v14 = vpop.permute.xlu0 %2368 }
 0x3cf   : > { %2353 = vperm.xlu1 %5838, %v6938_v22  }
 0x3d2   : > { %2767 = vrot.lane.b32.xlu0 %v2766_v4, %s6046_s22  ;;  %s6048_s22 = smov 122  }
 0x3d3   : > { %v7012_v29 = vpop.permute.xlu0 %2395  ;;  %5853 = vset.pattern.permute.xlu0 %v10712_v60  ;;  %5845 = vset.pattern.permute.xlu1 %v10713_v51 }
 0x3d6   : > { %2807 = vperm.xlu0 %5853, %v2804_v46   ;;  %v2505_v46 = vld [vmem:[#allocation3 + $0x10] sm:$0xf] }
 0x3d8   : > { %v7024_v39 = vpop.permute.xlu0 %2424 }
 0x3da   : > { %3146 = vperm.xlu0 %5853, %v7022_v13  }
 0x3dd   : > { %v7027_v4 = vpop.permute.xlu0 %2451 }
 0x3de   : > { %5854 = vset.pattern.permute.xlu0 %v10714_v56 }
 0x3df   : > { %1505 = vperm.xlu0 %5854, %v6938_v22  }
 0x3e2   : > { %v7031_v59 = vpop.permute.xlu0 %2478 }
 0x3e3   : > { %3491 = vperm.xlu0 %5854, %v7022_v13  }
 0x3e7   : > { %v2508_v62 = vpop.permute.xlu0 %2507  ;;  %5863 = vset.pattern.permute.xlu0 %v10715_v2 }
 0x3e8   : > { %v7036_v32 = vrot.slane %v2508_v62, %v6243_v41  ;;  %3525 = vperm.xlu0 %5863, %v7022_v13   ;;  %v7050_v62 = vrot.slane %v6540_v18, %v6243_v41 }
 0x3ea   : > { %v2518_v38 = vmul.f32 %v7036_v32, %v2505_v46  ;;  %v7057_v46 = vrot.slane %v6545_v16, %v6243_v41 }
 0x3ec   : > { %2523 = vrot.lane.b32.xlu1 %v2518_v38, %s6005_s16  ;;  %5875 = vset.pattern.permute.xlu0 %v10716_v42  ;;  %v1418_v38 = vmul.f32 %v7050_v62, %v1380_v6  ;;  %v1443_v1 = vmul.f32 %v7057_v46, %v1380_v6  ;;  %v7075_v6 = vrot.slane %v6705_v43, %v6243_v41 }
 0x3f0   : > { %2573 = vperm.xlu1 %5845, %v6938_v22   ;;  %v1574_v22 = vld [vmem:[#allocation3 + $0xc] sm:$0xf] }
 0x3f1   : > { %v1587_v18 = vmul.f32 %v7063_v45, %v1574_v22  ;;  %v1641_v11 = vmul.f32 %v7075_v6, %v1574_v22 }
 0x3f4   : > { %1398 = vrot.lane.b32.xlu1 %v1393_v34, %s6003_s30  ;;  %v7069_v34 = vrot.slane %v6703_v5, %v6243_v41 }
 0x3f5   : > { %5852 = vset.pattern.permute.xlu1 %v10712_v60 }
 0x3f6   : > { %v1614_v16 = vmul.f32 %v7069_v34, %v1574_v22  ;;  %v7093_v22 = vrot.slane %v6732_v53, %v6243_v41 }
 0x3f8   : > { %1423 = vrot.lane.b32.xlu1 %v1418_v38, %s10451_s20  ;;  %v1792_v38 = vld [vmem:[#allocation3 + $0xc] sm:$0xf] }
 0x3fc   : > { %1448 = vrot.lane.b32.xlu1 %v1443_v1, %s6047_s27  ;;  %v7081_v1 = vrot.slane %v6728_v10, %v6243_v41  ;;  %v1859_v10 = vmul.f32 %v7093_v22, %v1792_v38 }
 0x3fe   : > { %v1805_v5 = vmul.f32 %v7081_v1, %v1792_v38 }
 0x400   : > { %1592 = vrot.lane.b32.xlu1 %v1587_v18, %s6003_s30  ;;  %v7087_v18 = vrot.slane %v6730_v23, %v6243_v41  ;;  %v2803_v23 = vld [vmem:[%s10303_s6] sm:$0x3] }
 0x401   : > { %5677 = vmatmul.mubr.msk.f32.vlgmr.msra.gmra.mrb[0].mxu0 %vm1258_vm1, %v2803_v23 }
 0x402   : > { %v1832_v43 = vmul.f32 %v7087_v18, %v1792_v38  ;;  %5598 = vmatprep.mubr.f32.mxu0 %v10675_v37  ;;  %v7110_v38 = vrot.slane %v6749_v12, %v6243_v41  ;;  %v7125_v12 = vpop.permute.xlu0 %2548 }
 0x404   : > { %1619 = vrot.lane.b32.xlu1 %v1614_v16, %s10451_s20  ;;  %v2012_v16 = vld [vmem:[#allocation3 + $0xc] sm:$0xf] }
 0x408   : > { %1646 = vrot.lane.b32.xlu1 %v1641_v11, %s6047_s27  ;;  %v7099_v11 = vrot.slane %v6747_v52, %v6243_v41  ;;  %v2052_v52 = vmul.f32 %v7110_v38, %v2012_v16 }
 0x40a   : > { %v2025_v53 = vmul.f32 %v7099_v11, %v2012_v16 }
 0x40c   : > { %1810 = vrot.lane.b32.xlu1 %v1805_v5, %s6003_s30  ;;  %v10717_v5 = vld [vmem:[#allocation28_spill] sm:$0xff] }
 0x410   : > { %1837 = vrot.lane.b32.xlu1 %v1832_v43, %s10451_s20  ;;  %v7116_v43 = vrot.slane %v10717_v5, %v6243_v41  ;;  %v7138_v5 = vpop.permute.xlu0 %2588 }
 0x412   : > { %v2079_v23 = vmul.f32 %v7116_v43, %v2012_v16 }
 0x414   : > { %1864 = vrot.lane.b32.xlu1 %v1859_v10, %s6047_s27  ;;  %v7121_v10 = vrot.slane %v6952_v63, %v6243_v41  ;;  %v7136_v63 = vrot.slane %v6988_v26, %v6243_v41  ;;  %v7152_v26 = vrot.slane %v7027_v4, %v6243_v41  ;;  %v7166_v4 = vld [vmem:[#allocation3 + $0xc] sm:$0xf] }
 0x416   : > { %v2217_v3 = vmul.f32 %v7121_v10, %v2012_v16 }
 0x418   : > { %2030 = vrot.lane.b32.xlu1 %v2025_v53, %s6003_s30  ;;  %v7129_v53 = vrot.slane %v6973_v28, %v6243_v41  ;;  %v7144_v28 = vrot.slane %v7024_v39, %v6243_v41 }
 0x41a   : > { %v2435_v25 = vmul.f32 %v7144_v28, %v2422_v44 }
 0x41c   : > { %2057 = vrot.lane.b32.xlu1 %v2052_v52, %s10451_s20  ;;  %v2244_v52 = vmul.f32 %v7129_v53, %v2012_v16 }
 0x420   : > { %2084 = vrot.lane.b32.xlu1 %v2079_v23, %s6047_s27  ;;  %v2271_v23 = vmul.f32 %v7136_v63, %v2012_v16  ;;  %v7158_v16 = vrot.slane %v7031_v59, %v6243_v41  ;;  %v1339_v59 = vmul.f32 %v6964_v27, %v1337_v19 }
 0x424   : > { %2222 = vrot.lane.b32.xlu1 %v2217_v3, %s6003_s30  ;;  %v7147_v3 = vpop.permute.xlu0 %2615 }
 0x428   : > { %2249 = vrot.lane.b32.xlu1 %v2244_v52, %s10451_s20  ;;  %v2462_v52 = vmul.f32 %v7152_v26, %v2422_v44  ;;  %v2645_v39 = vpop.permute.xlu0 %2644 }
 0x429   : > { %v7163_v15 = vrot.slane %v2645_v39, %v6243_v41  ;;  %v10719_v39 = vld [vmem:[#allocation16_spill] sm:$0xff] }
 0x42a   : > { %v1362_v37 = vrot.slane %v10719_v39, %v6243_v41  ;;  %v1613_v39 = vmul.f32 %v7180_v8, %v7069_v34 }
 0x42c   : > { %2276 = vrot.lane.b32.xlu1 %v2271_v23, %s6047_s27  ;;  %v2489_v23 = vmul.f32 %v7158_v16, %v2422_v44 }
 0x430   : > { %2440 = vrot.lane.b32.xlu1 %v2435_v25, %s6003_s30  ;;  %v2655_v25 = vmul.f32 %v7163_v15, %v7166_v4 }
 0x434   : > { %2467 = vrot.lane.b32.xlu1 %v2462_v52, %s10451_s20  ;;  %v1327_v52 = vld [vmem:[#allocation3 + $0x8] sm:$0xf] }
 0x435   : > { %v1340_v44 = vmul.f32 %v1337_v19, %v1327_v52  ;;  %v1365_v60 = vmul.f32 %v1362_v37, %v1327_v52  ;;  %v1417_v19 = vmul.f32 %v7180_v8, %v7050_v62  ;;  %v1558_v62 = vmul.f32 %v6968_v49, %v6960_v35 }
 0x436   : > { %v1640_v49 = vmul.f32 %v7180_v8, %v7075_v6 }
 0x438   : > { %2494 = vrot.lane.b32.xlu1 %v2489_v23, %s6047_s27  ;;  %v1364_v23 = vmul.f32 %v6964_v27, %v1362_v37  ;;  %v10720_v37 = vld [vmem:[#allocation17_spill] sm:$0xff] }
 0x43c   : > { %2660 = vrot.lane.b32.xlu1 %v2655_v25, %s6003_s30  ;;  %v1442_v25 = vmul.f32 %v7180_v8, %v7057_v46  ;;  %v1586_v46 = vmul.f32 %v7180_v8, %v7063_v45 }
 0x43d   : > { %v7202_v52 = vpop.permute.xlu1 %2303 }
 0x440   : > { %1343 = vrot.lane.b32.xlu1 %v1339_v59, %s6006_s17  ;;  %v7191_v59 = vld [vmem:[#allocation3 + $0x8] sm:$0xff] }
 0x444   : > { %1345 = vrot.lane.b32.xlu1 %v1340_v44, %s6006_s17 }
 0x448   : > { %1368 = vrot.lane.b32.xlu1 %v1364_v23, %s10449_s23 }
 0x44c   : > { %1370 = vrot.lane.b32.xlu1 %v1365_v60, %s10449_s23  ;;  %v1470_v60 = vmul.f32 %v7191_v59, %v10720_v37 }
 0x44e   : > { %v7207_v44 = vpop.permute.xlu1 %2353 }
 0x450   : > { %1396 = vrot.lane.b32.xlu1 %v1392_v20, %s6003_s30  ;;  %v10722_v20 = vld [vmem:[#allocation20_spill] sm:$0xff] }
 0x451   : > { %v1669_v45 = vmul.f32 %v7191_v59, %v10722_v20 }
 0x454   : > { %1421 = vrot.lane.b32.xlu1 %v1417_v19, %s10451_s20 }
 0x458   : > { %1446 = vrot.lane.b32.xlu1 %v1442_v25, %s6047_s27  ;;  %v10724_v25 = vld [vmem:[#allocation22_spill] sm:$0xff] }
 0x459   : > { %v1746_v37 = vrot.slane %v10724_v25, %v6243_v41 }
 0x45b   : > { %v1748_v34 = vmul.f32 %v1746_v37, %v6964_v27 }
 0x45c   : > { %1474 = vrot.lane.b32.xlu1 %v1470_v60, %s6005_s16 }
 0x45e   : > { %v7212_v54 = vpop.permute.xlu1 %2523 }
 0x460   : > { %1534 = vrot.lane.b32.xlu1 %v1530_v9, %s6006_s17  ;;  %v7230_v9 = vld [vmem:[#allocation3 + $0x8] sm:$0xf] }
 0x461   : > { %v1749_v6 = vmul.f32 %v1746_v37, %v7230_v9  ;;  %v1804_v37 = vmul.f32 %v7180_v8, %v7081_v1 }
 0x464   : > { %1563 = vrot.lane.b32.xlu1 %v1558_v62, %s10449_s23 }
 0x468   : > { %1590 = vrot.lane.b32.xlu1 %v1586_v46, %s6003_s30  ;;  %v10727_v46 = vld [vmem:[#allocation23_spill] sm:$0xff] }
 0x46c   : > { %1617 = vrot.lane.b32.xlu1 %v1613_v39, %s10451_s20  ;;  %v1773_v39 = vrot.slane %v10727_v46, %v6243_v41 }
 0x46f   : > { %v7217_v23 = vpop.permute.xlu1 %2573 }
 0x470   : > { %10721 = vst [vmem:[#allocation28_spill] sm:$0xff] %v7217_v23  ;;  %1644 = vrot.lane.b32.xlu1 %v1640_v49, %s6047_s27  ;;  %v1775_v49 = vmul.f32 %v1773_v39, %v6964_v27 }
 0x473   : > { %v7222_v19 = vpop.permute.xlu1 %1398 }
 0x474   : > { %10723 = vst [vmem:[#allocation15_spill] sm:$0xff] %v7222_v19  ;;  %1673 = vrot.lane.b32.xlu1 %v1669_v45, %s6005_s16  ;;  %v1776_v45 = vmul.f32 %v1773_v39, %v7230_v9  ;;  %v1858_v39 = vmul.f32 %v7180_v8, %v7093_v22 }
 0x477   : > { %v7228_v60 = vpop.permute.xlu1 %1423 }
 0x478   : > { %10725 = vst [vmem:[#allocation16_spill] sm:$0xff] %v7228_v60  ;;  %1752 = vrot.lane.b32.xlu1 %v1748_v34, %s6006_s17 }
 0x47b   : > { %v7234_v62 = vpop.permute.xlu1 %1448 }
 0x47c   : > { %10726 = vst [vmem:[#allocation17_spill] sm:$0xff] %v7234_v62  ;;  %1754 = vrot.lane.b32.xlu1 %v1749_v6, %s6006_s17  ;;  %v1831_v6 = vmul.f32 %v7180_v8, %v7087_v18 }
 0x47f   : > { %v7240_v20 = vpop.permute.xlu1 %1592 }
 0x480   : > { %1779 = vrot.lane.b32.xlu1 %v1775_v49, %s10449_s23 }
 0x483   : > { %v7244_v25 = vpop.permute.xlu1 %1619 }
 0x484   : > { %1781 = vrot.lane.b32.xlu1 %v1776_v45, %s10449_s23  ;;  %v10728_v45 = vld [vmem:[#allocation24_spill] sm:$0xff] }
 0x485   : > { %v1887_v1 = vmul.f32 %v7191_v59, %v10728_v45 }
 0x487   : > { %v7249_v34 = vpop.permute.xlu1 %1646 }
 0x488   : > { %1808 = vrot.lane.b32.xlu1 %v1804_v37, %s6003_s30  ;;  %v10729_v37 = vld [vmem:[#allocation26_spill] sm:$0xff] }
 0x489   : > { %v1966_v60 = vrot.slane %v10729_v37, %v6243_v41  ;;  %v7280_v37 = vpop.permute.xlu0 %2671 }
 0x48b   : > { %v7254_v46 = vpop.permute.xlu1 %1810  ;;  %v1968_v18 = vmul.f32 %v1966_v60, %v6964_v27  ;;  %v1969_v22 = vmul.f32 %v1966_v60, %v6975_v48 }
 0x48c   : > { %1835 = vrot.lane.b32.xlu1 %v1831_v6, %s10451_s20 }
 0x48f   : > { %v7259_v49 = vpop.permute.xlu1 %1837 }
 0x490   : > { %1862 = vrot.lane.b32.xlu1 %v1858_v39, %s6047_s27  ;;  %v10731_v39 = vld [vmem:[#allocation27_spill] sm:$0xff] }
 0x491   : > { %v1993_v45 = vrot.slane %v10731_v39, %v6243_v41  ;;  %v2024_v39 = vmul.f32 %v7099_v11, %v7180_v8  ;;  %v2107_v11 = vmul.f32 %v6766_v58, %v7191_v59  ;;  %v2216_v58 = vmul.f32 %v7121_v10, %v7180_v8 }
 0x492   : > { %v2297_v10 = vmul.f32 %v6996_v7, %v7191_v59 }
 0x493   : > { %v7264_v62 = vpop.permute.xlu1 %1864  ;;  %v1995_v19 = vmul.f32 %v1993_v45, %v6964_v27  ;;  %v1996_v40 = vmul.f32 %v1993_v45, %v6975_v48  ;;  %v2078_v45 = vmul.f32 %v7116_v43, %v7180_v8 }
 0x494   : > { %1891 = vrot.lane.b32.xlu1 %v1887_v1, %s6005_s16 }
 0x497   : > { %v7270_v6 = vpop.permute.xlu1 %2030 }
 0x498   : > { %1972 = vrot.lane.b32.xlu1 %v1968_v18, %s6006_s17  ;;  %v7286_v18 = vpop.permute.xlu0 %1536 }
 0x49b   : > { %v7274_v51 = vpop.permute.xlu1 %2057 }
 0x49c   : > { %10730 = vst [vmem:[#allocation20_spill] sm:$0xff] %v7274_v51  ;;  %1974 = vrot.lane.b32.xlu1 %v1969_v22, %s6006_s17  ;;  %v7296_v50 = vpop.permute.xlu0 %1561 }
 0x49f   : > { %v7282_v1 = vpop.permute.xlu1 %2084 }
 0x4a0   : > { %10732 = vst [vmem:[#allocation22_spill] sm:$0xff] %v7282_v1  ;;  %1999 = vrot.lane.b32.xlu1 %v1995_v19, %s10449_s23  ;;  %v2051_v19 = vmul.f32 %v7110_v38, %v7180_v8 }
 0x4a3   : > { %v7288_v60 = vpop.permute.xlu1 %2222 }
 0x4a4   : > { %2001 = vrot.lane.b32.xlu1 %v1996_v40, %s10449_s23  ;;  %v7305_v40 = vpop.permute.xlu0 %2168 }
 0x4a7   : > { %v7293_v22 = vpop.permute.xlu1 %2249 }
 0x4a8   : > { %2028 = vrot.lane.b32.xlu1 %v2024_v39, %s6003_s30  ;;  %v7315_v38 = vpop.permute.xlu0 %2193 }
 0x4ab   : > { %v7300_v42 = vpop.permute.xlu1 %2276 }
 0x4ac   : > { %2055 = vrot.lane.b32.xlu1 %v2051_v19, %s10451_s20  ;;  %v2162_v19 = vmul.f32 %v6979_v31, %v6964_v27  ;;  %v7322_v43 = vpop.permute.xlu0 %2700  ;;  %v2243_v31 = vmul.f32 %v7129_v53, %v7180_v8 }
 0x4af   : > { %v7307_v47 = vpop.permute.xlu1 %2440 }
 0x4b0   : > { %2082 = vrot.lane.b32.xlu1 %v2078_v45, %s6047_s27  ;;  %v7330_v45 = vpop.permute.xlu0 %2726 }
 0x4b3   : > { %v7312_v39 = vpop.permute.xlu1 %2467 }
 0x4b4   : > { %2111 = vrot.lane.b32.xlu1 %v2107_v11, %s6005_s16 }
 0x4b7   : > { %v7319_v61 = vpop.permute.xlu1 %2494 }
 0x4b8   : > { %2166 = vrot.lane.b32.xlu1 %v2162_v19, %s6006_s17 }
 0x4bb   : > { %v7324_v36 = vpop.permute.xlu1 %2660 }
 0x4bc   : > { %10733 = vst [vmem:[#allocation23_spill] sm:$0xff] %v7324_v36  ;;  %2195 = vrot.lane.b32.xlu1 %v6992_v57, %s10449_s23  ;;  %v7340_v36 = vpop.permute.xlu0 %2767  ;;  %v2270_v57 = vmul.f32 %v7136_v63, %v7180_v8  ;;  %v7360_v63 = vld [vmem:[#allocation3 + $0x8] sm:$0xf] }
 0x4bd   : > { %10736 = vst [vmem:[#allocation27_spill] sm:$0xff] %v7340_v36 }
 0x4bf   : > { %v7332_v11 = vpop.permute.xlu1 %1343 }
 0x4c0   : > { %10734 = vst [vmem:[#allocation24_spill] sm:$0xff] %v7332_v11  ;;  %2220 = vrot.lane.b32.xlu1 %v2216_v58, %s6003_s30  ;;  %v2376_v58 = vrot.slane %v7009_v14, %v6243_v41  ;;  %v7351_v53 = vpop.permute.xlu0 %2807  ;;  %v2403_v14 = vrot.slane %v7012_v29, %v6243_v41  ;;  %v2434_v29 = vmul.f32 %v7144_v28, %v7180_v8 }
 0x4c1   : > { %10738 = vst [vmem:[#allocation38_spill] sm:$0xff] %v7351_v53  ;;  %v2488_v28 = vmul.f32 %v7158_v16, %v7180_v8 }
 0x4c2   : > { %v2379_v7 = vmul.f32 %v2376_v58, %v7360_v63 }
 0x4c3   : > { %v7337_v19 = vpop.permute.xlu1 %1345 }
 0x4c4   : > { %10735 = vst [vmem:[#allocation26_spill] sm:$0xff] %v7337_v19  ;;  %2247 = vrot.lane.b32.xlu1 %v2243_v31, %s10451_s20  ;;  %v2378_v31 = vmul.f32 %v2376_v58, %v6964_v27 }
 0x4c7   : > { %v7344_v23 = vpop.permute.xlu1 %1368 }
 0x4c8   : > { %10737 = vst [vmem:[#allocation37_spill] sm:$0xff] %v7344_v23  ;;  %2274 = vrot.lane.b32.xlu1 %v2270_v57, %s6047_s27  ;;  %v7362_v57 = vpop.permute.xlu0 %3146 }
 0x4c9   : > { %10741 = vst [vmem:[#allocation41_spill] sm:$0xff] %v7362_v57 }
 0x4cb   : > { %v7353_v11 = vpop.permute.xlu1 %1370 }
 0x4cc   : > { %10739 = vst [vmem:[#allocation39_spill] sm:$0xff] %v7353_v11  ;;  %2301 = vrot.lane.b32.xlu1 %v2297_v10, %s6005_s16  ;;  %v2405_v10 = vmul.f32 %v2403_v14, %v6964_v27  ;;  %v1506_v23 = vpop.permute.xlu0 %1505 }
 0x4cd   : > { %v7376_v57 = vrot.slane %v1506_v23, %v6243_v41 }
 0x4cf   : > { %v7357_v19 = vpop.permute.xlu1 %1396 }
 0x4d0   : > { %10740 = vst [vmem:[#allocation40_spill] sm:$0xff] %v7357_v19  ;;  %2382 = vrot.lane.b32.xlu1 %v2378_v31, %s6006_s17  ;;  %v2406_v31 = vmul.f32 %v2403_v14, %v7360_v63  ;;  %v2461_v14 = vmul.f32 %v7152_v26, %v7180_v8  ;;  %v2517_v26 = vmul.f32 %v7036_v32, %v7191_v59 }
 0x4d3   : > { %v7367_v53 = vpop.permute.xlu1 %1421 }
 0x4d4   : > { %10742 = vst [vmem:[#allocation42_spill] sm:$0xff] %v7367_v53  ;;  %2384 = vrot.lane.b32.xlu1 %v2379_v7, %s6006_s17  ;;  %v1516_v7 = vmul.f32 %v7376_v57, %v6960_v35  ;;  %v7412_v19 = vpop.f32.mrb[0].mxu0 }
 0x4d6   : > { %v1545_v23 = vadd.f32 %v7286_v18, %v1516_v7  ;;  %v2596_v7 = vrot.slane %v7138_v5, %v6243_v41 }
 0x4d7   : > { %v7371_v11 = vpop.permute.xlu1 %1446 }
 0x4d8   : > { %10743 = vst [vmem:[#allocation43_spill] sm:$0xff] %v7371_v11  ;;  %2409 = vrot.lane.b32.xlu1 %v2405_v10, %s10449_s23  ;;  %v10745_v11 = vld [vmem:[#allocation21_spill] sm:$0xff] }
 0x4d9   : > { %v10445_v16 = vrot.slane %v10745_v11, 4  ;;  %10746 = vst [vmem:[#allocation21_spill] sm:$0xff] %v7412_v19 }
 0x4db   : > { %v7378_v58 = vpop.permute.xlu1 %1474 }
 0x4dc   : > { %10744 = vst [vmem:[#allocation44_spill] sm:$0xff] %v7378_v58  ;;  %2411 = vrot.lane.b32.xlu1 %v2406_v31, %s10449_s23 }
 0x4df   : > { %v7385_v53 = vpop.permute.xlu1 %1534 }
 0x4e0   : > { %2438 = vrot.lane.b32.xlu1 %v2434_v29, %s6003_s30 }
 0x4e3   : > { %v7391_v10 = vpop.permute.xlu1 %1563 }
 0x4e4   : > { %v1572_v58 = vadd.f32 %v7391_v10, %v1545_v23  ;;  %2465 = vrot.lane.b32.xlu1 %v2461_v14, %s10451_s20 }
 0x4e6   : > { %v1601_v35 = vadd.f32 %v7240_v20, %v1572_v58 }
 0x4e7   : > { %v7398_v31 = vpop.permute.xlu1 %1590 }
 0x4e8   : > { %v1628_v29 = vadd.f32 %v7244_v25, %v1601_v35  ;;  %2492 = vrot.lane.b32.xlu1 %v2488_v28, %s6047_s27  ;;  %v7414_v35 = vpop.f32.mrb[1].mxu0  ;;  %v2598_v28 = vmul.f32 %v2596_v7, %v6964_v27 }
 0x4e9   : > { %10747 = vst [vmem:[#allocation45_spill] sm:$0xff] %v7414_v35 }
 0x4ea   : > { %v1655_v23 = vadd.f32 %v7249_v34, %v1628_v29  ;;  %v7423_v29 = vld [vmem:[#allocation3 + $0x8] sm:$0xf] }
 0x4eb   : > { %v7407_v14 = vpop.permute.xlu1 %1617  ;;  %10748 = vst [vmem:[#allocation46_spill] sm:$0xff] %v7423_v29 }
 0x4ec   : > { %2521 = vrot.lane.b32.xlu1 %v2517_v26, %s6005_s16  ;;  %v1684_v58 = vadd.f32 %v6836_v21, %v1655_v23  ;;  %v2599_v26 = vmul.f32 %v2596_v7, %v7423_v29  ;;  %v2623_v23 = vrot.slane %v7147_v3, %v6243_v41  ;;  %v7441_v7 = vrot.slane %v6838_v24, %v6243_v41 }
 0x4ed   : > { %v2654_v3 = vmul.f32 %v7163_v15, %v7180_v8 }
 0x4ee   : > { %v1707_v32 = vmul.f32 %v10445_v16, %v1684_v58  ;;  %v2625_v35 = vmul.f32 %v2623_v23, %v6964_v27 }
 0x4ef   : > { %v7419_v5 = vpop.permute.xlu1 %1644 }
 0x4f0   : > { %2602 = vrot.lane.b32.xlu1 %v2598_v28, %s6006_s17  ;;  %1712 = vrot.lane.b32.xlu0 %v1707_v32, %s6020_s28  ;;  %v2626_v28 = vmul.f32 %v2623_v23, %v7423_v29 }
 0x4f3   : > { %v7428_v19 = vpop.permute.xlu1 %1673 }
 0x4f4   : > { %2604 = vrot.lane.b32.xlu1 %v2599_v26, %s6006_s17  ;;  %v2679_v26 = vrot.slane %v7280_v37, %v6243_v41  ;;  %v2708_v37 = vrot.slane %v7322_v43, %v6243_v41 }
 0x4f6   : > { %v2681_v23 = vmul.f32 %v2679_v26, %v7180_v8  ;;  %v2682_v15 = vmul.f32 %v2679_v26, %v7166_v4  ;;  %v2698_v8 = vld [vmem:[#allocation3 + $0x10] sm:$0xf] }
 0x4f7   : > { %v7432_v58 = vpop.permute.xlu1 %1752  ;;  %v2711_v26 = vmul.f32 %v2708_v37, %v2698_v8 }
 0x4f8   : > { %2629 = vrot.lane.b32.xlu1 %v2625_v35, %s10449_s23  ;;  %v1734_v35 = vmul.f32 %v7441_v7, %v7230_v9 }
 0x4fb   : > { %v7436_v32 = vpop.permute.xlu1 %1754 }
 0x4fc   : > { %2631 = vrot.lane.b32.xlu1 %v2626_v28, %s10449_s23  ;;  %v1763_v28 = vadd.f32 %v7436_v32, %v1734_v35  ;;  %v2710_v35 = vmul.f32 %v2708_v37, %v7191_v59  ;;  %s6050_s23 = smov 113  }
 0x4ff   : > { %v7447_v16 = vpop.permute.xlu1 %1779 }
 0x500   : > { %2658 = vrot.lane.b32.xlu1 %v2654_v3, %s6003_s30 }
 0x503   : > { %v7454_v36 = vpop.permute.xlu1 %1781 }
 0x504   : > { %v1790_v24 = vadd.f32 %v7454_v36, %v1763_v28  ;;  %2685 = vrot.lane.b32.xlu1 %v2681_v23, %s10451_s20  ;;  %v10749_v23 = vld [vmem:[#allocation25_spill] sm:$0xff] }
 0x505   : > { %v10453_v4 = vrot.slane %v10749_v23, 4 }
 0x506   : > { %v1819_v29 = vadd.f32 %v7254_v46, %v1790_v24  ;;  %v2734_v24 = vrot.slane %v7330_v45, %v6243_v41  ;;  %v2789_v45 = vld [vmem:[%s10302_s5] sm:$0xf] }
 0x507   : > { %v7462_v9 = vpop.permute.xlu1 %1808 }
 0x508   : > { %v1846_v3 = vadd.f32 %v7259_v49, %v1819_v29  ;;  %2687 = vrot.lane.b32.xlu1 %v2682_v15, %s10451_s20  ;;  %s6049_s20 = smov 116  }
 0x50a   : > { %v1873_v28 = vadd.f32 %v7264_v62, %v1846_v3  ;;  %v2736_v3 = vmul.f32 %v2734_v24, %v7191_v59  ;;  %v2890_v59 = vld [vmem:[%s10306_s9] sm:$0x3] }
 0x50b   : > { %v7468_v0 = vpop.permute.xlu1 %1835 }
 0x50c   : > { %2714 = vrot.lane.b32.xlu1 %v2710_v35, %s6047_s27  ;;  %v1902_v43 = vadd.f32 %v6840_v33, %v1873_v28  ;;  %v2737_v35 = vmul.f32 %v2734_v24, %v2698_v8  ;;  %v7501_v8 = vld [vmem:[%s10307_s10] sm:$0x3] }
 0x50e   : > { %v1926_v29 = vmul.f32 %v10453_v4, %v1902_v43 }
 0x50f   : > { %v7477_v15 = vpop.permute.xlu1 %1862 }
 0x510   : > { %2716 = vrot.lane.b32.xlu1 %v2711_v26, %s6047_s27  ;;  %1931 = vrot.lane.b32.xlu0 %v1926_v29, %s6048_s22  ;;  %s11298_s27 = smov 4  }
 0x513   : > { %v7482_v37 = vpop.permute.xlu1 %1891 }
 0x514   : > { %10750 = vst [vmem:[#allocation47_spill] sm:$0xff] %v7482_v37  ;;  %2740 = vrot.lane.b32.xlu1 %v2736_v3, %s6005_s16  ;;  %v10754_v3 = vmov 7  }
 0x517   : > { %v7485_v28 = vpop.permute.xlu1 %1972 }
 0x518   : > { %10751 = vst [vmem:[#allocation48_spill] sm:$0xff] %v7485_v28  ;;  %2742 = vrot.lane.b32.xlu1 %v2737_v35, %s6005_s16  ;;  %v10759_v28 = vmov 21  }
 0x51b   : > { %v7491_v43 = vpop.permute.xlu1 %1974 }
 0x51c   : > { %2792 = vperm.xlu1 %5852, %v2789_v45  }
 0x51f   : > { %v7496_v26 = vpop.permute.xlu1 %1999 }
 0x520   : > { %10752 = vst [vmem:[#allocation49_spill] sm:$0xff] %v7496_v26  ;;  %2893 = vperm.xlu1 %5852, %v2890_v59   ;;  %v10757_v59 = vmov 14   ;;  %v2145_v26 = vrot.slane %v6950_v55, %v6243_v41 }
 0x523   : > { %v7503_v24 = vpop.permute.xlu1 %2001 }
 0x524   : > { %3119 = vperm.xlu1 %5852, %v7501_v8  }
 0x527   : > { %v7506_v29 = vpop.permute.xlu1 %2028 }
 0x528   : > { %10753 = vst [vmem:[#allocation50_spill] sm:$0xff] %v7506_v29  ;;  %5855 = vset.pattern.permute.xlu1 %v10754_v3  ;;  %v2148_v29 = vmul.f32 %v2145_v26, %v6975_v48 }
 0x529   : > { %3183 = vperm.xlu1 %5855, %v7501_v8  }
 0x52b   : > { %v7510_v35 = vpop.permute.xlu1 %2055 }
 0x52c   : > { %10755 = vst [vmem:[#allocation51_spill] sm:$0xff] %v7510_v35  ;;  %v2177_v35 = vadd.f32 %v7305_v40, %v2148_v29  ;;  %v10761_v29 = vmov 28  }
 0x52d   : > { %3232 = vperm.xlu1 %5855, %v7022_v13  }
 0x52f   : > { %v7513_v45 = vpop.permute.xlu1 %2082 }
 0x530   : > { %10756 = vst [vmem:[#allocation52_spill] sm:$0xff] %v7513_v45 }
 0x531   : > { %5856 = vset.pattern.permute.xlu1 %v10757_v59 }
 0x532   : > { %3254 = vperm.xlu1 %5856, %v7501_v8  }
 0x533   : > { %v7517_v4 = vpop.permute.xlu1 %2111 }
 0x534   : > { %10758 = vst [vmem:[#allocation53_spill] sm:$0xff] %v7517_v4 }
 0x536   : > { %3276 = vperm.xlu1 %5856, %v7022_v13  }
 0x537   : > { %v7522_v3 = vpop.permute.xlu1 %2166 }
 0x53a   : > { %5857 = vset.pattern.permute.xlu1 %v10759_v28  ;;  %v10464_v28 = vrot.slane %v7002_v17, 4 }
 0x53b   : > { %v7527_v45 = vpop.permute.xlu1 %2195  ;;  %3298 = vperm.xlu1 %5857, %v7501_v8  }
 0x53c   : > { %v2204_v59 = vadd.f32 %v7527_v45, %v2177_v35 }
 0x53e   : > { %v2231_v4 = vadd.f32 %v7288_v60, %v2204_v59 }
 0x53f   : > { %v7532_v23 = vpop.permute.xlu1 %2220  ;;  %3320 = vperm.xlu1 %5857, %v7022_v13  }
 0x540   : > { %v2258_v55 = vadd.f32 %v7293_v22, %v2231_v4 }
 0x542   : > { %v2285_v1 = vadd.f32 %v7300_v42, %v2258_v55  ;;  %v10764_v55 = vmov 35  }
 0x543   : > { %v7537_v37 = vpop.permute.xlu1 %2247  ;;  %5858 = vset.pattern.permute.xlu1 %v10761_v29 }
 0x544   : > { %10760 = vst [vmem:[#allocation54_spill] sm:$0xff] %v7537_v37  ;;  %3342 = vperm.xlu1 %5858, %v7501_v8   ;;  %v2312_v35 = vadd.f32 %v7202_v52, %v2285_v1  ;;  %v7585_v37 = vmul.f32 %v7441_v7, %v6964_v27  ;;  %v1566_v7 = vrot.slane %v7391_v10, 4  ;;  %v1594_v10 = vrot.slane %v7398_v31, 4 }
 0x546   : > { %v2336_v59 = vmul.f32 %v10464_v28, %v2312_v35  ;;  %v2361_v35 = vrot.slane %v7207_v44, %v6243_v41  ;;  %v10766_v28 = vmov 42   ;;  %v1538_v44 = vrot.slane %v7385_v53, 4 }
 0x547   : > { %v7545_v51 = vpop.permute.xlu1 %2274 }
 0x548   : > { %10762 = vst [vmem:[#allocation55_spill] sm:$0xff] %v7545_v51  ;;  %3364 = vperm.xlu1 %5858, %v7022_v13   ;;  %2341 = vrot.lane.b32.xlu0 %v2336_v59, %s6049_s20  ;;  %v2364_v17 = vmul.f32 %v2361_v35, %v7360_v63  ;;  %v7571_v51 = vrot.slane %v6842_v30, %v6243_v41  ;;  %v1539_v30 = vrot.slane %v7286_v18, 4 }
 0x549   : > { %v1515_v63 = vmul.f32 %v7376_v57, %v6964_v27 }
 0x54a   : > { %10769 = vst [vmem:[#allocation60_spill] sm:$0xff] %v7571_v51  ;;  %v1954_v41 = vmul.f32 %v7571_v51, %v6975_v48  ;;  %v1622_v51 = vrot.slane %v7244_v25, 4  ;;  %v1649_v48 = vrot.slane %v7249_v34, 4  ;;  %v1867_v25 = vrot.slane %v7264_v62, 4 }
 0x54b   : > { %v7549_v4 = vpop.permute.xlu1 %2301  ;;  %v1648_v34 = vrot.slane %v7419_v5, 4 }
 0x54c   : > { %10763 = vst [vmem:[#allocation56_spill] sm:$0xff] %v7549_v4  ;;  %5859 = vset.pattern.permute.xlu1 %v10764_v55 }
 0x54d   : > { %3386 = vperm.xlu1 %5859, %v7501_v8  }
 0x54f   : > { %v7553_v29 = vpop.permute.xlu1 %2382 }
 0x550   : > { %10765 = vst [vmem:[#allocation57_spill] sm:$0xff] %v7553_v29  ;;  %v10770_v29 = vrot.slane %v10745_v11, 4 }
 0x551   : > { %3409 = vperm.xlu1 %5859, %v7022_v13  }
 0x553   : > { %v7556_v1 = vpop.permute.xlu1 %2384 }
 0x554   : > { %v2393_v55 = vadd.f32 %v7556_v1, %v2364_v17 }
 0x555   : > { %5860 = vset.pattern.permute.xlu1 %v10766_v28 }
 0x556   : > { %3431 = vperm.xlu1 %5860, %v7501_v8  }
 0x557   : > { %v7562_v59 = vpop.permute.xlu1 %2409 }
 0x558   : > { %10767 = vst [vmem:[#allocation58_spill] sm:$0xff] %v7562_v59  ;;  %v7579_v59 = vsel %vm1096_vm8, %v10770_v29, %v10745_v11  ;;  %v1565_v29 = vrot.slane %v7296_v50, 4  ;;  %vm1375_vm8 = vcmask 261120   ;;  %v1595_v11 = vrot.slane %v7240_v20, 4 }
 0x559   : > { %10771 = vst [vmem:[#allocation61_spill] sm:$0xff] %v7579_v59  ;;  %v1840_v20 = vrot.slane %v7259_v49, 4  ;;  %v10772_v49 = vrot.slane %v7125_v12, 4 }
 0x55a   : > { %3453 = vperm.xlu1 %5860, %v7022_v13  }
 0x55b   : > { %v7567_v4 = vpop.permute.xlu1 %2411 }
 0x55c   : > { %10768 = vst [vmem:[#allocation59_spill] sm:$0xff] %v7567_v4  ;;  %v2420_v28 = vadd.f32 %v7567_v4, %v2393_v55  ;;  %v7591_v55 = vmul.f32 %v2145_v26, %v6964_v27  ;;  %v1540_v26 = vsel %vm553_vm3, %v1538_v44, %v1539_v30  ;;  %v1567_v30 = vsel %vm553_vm3, %v1565_v29, %v1566_v7 }
 0x55d   : > { %v1596_v29 = vsel %vm553_vm3, %v1594_v10, %v1595_v11  ;;  %v1757_v7 = vrot.slane %v7436_v32, 4  ;;  %v1568_v62 = vsel %vm1375_vm8, %v7296_v50, %v1567_v30  ;;  %v1650_v50 = vsel %vm553_vm3, %v1648_v34, %v1649_v48 }
 0x55e   : > { %v2449_v4 = vadd.f32 %v7307_v47, %v2420_v28  ;;  %5861 = vset.pattern.permute.xlu1 %v10714_v56  ;;  %v7607_v28 = vmul.f32 %v2361_v35, %v6964_v27  ;;  %v1541_v35 = vsel %vm607_vm7, %v7385_v53, %v1540_v26  ;;  %v1621_v27 = vrot.slane %v7407_v14, 4 }
 0x55f   : > { %v7599_v17 = vpop.permute.xlu1 %2438  ;;  %3481 = vperm.xlu1 %5861, %v7501_v8   ;;  %v2225_v53 = vrot.slane %v7288_v60, 4  ;;  %v1983_v26 = vadd.f32 %v7491_v43, %v1954_v41  ;;  %v1784_v60 = vrot.slane %v7454_v36, 4  ;;  %v2279_v41 = vrot.slane %v7300_v42, 4 }
 0x560   : > { %v2476_v56 = vadd.f32 %v7312_v39, %v2449_v4  ;;  %v1813_v4 = vrot.slane %v7254_v46, 4  ;;  %v1623_v59 = vsel %vm553_vm3, %v1621_v27, %v1622_v51  ;;  %v1677_v10 = vrot.slane %v7428_v19, 4 }
 0x561   : > { %v2010_v11 = vadd.f32 %v7503_v24, %v1983_v26  ;;  %v1783_v30 = vrot.slane %v7447_v16, 4  ;;  %v1812_v27 = vrot.slane %v7462_v9, 4  ;;  %v1624_v48 = vsel %vm633_vm9, %v7407_v14, %v1623_v59 }
 0x562   : > { %v2503_v44 = vadd.f32 %v7319_v61, %v2476_v56  ;;  %v1544_v56 = vadd.f32 %v1541_v35, %v1515_v63  ;;  %v1597_v63 = vsel %vm555_vm4, %v7398_v31, %v1596_v29  ;;  %v10773_v35 = vmov 15  }
 0x563   : > { %v7621_v57 = vpop.permute.xlu1 %2465  ;;  %5862 = vset.pattern.permute.xlu1 %v10715_v2  ;;  %v2252_v2 = vrot.slane %v7293_v22, 4  ;;  %v2443_v31 = vrot.slane %v7307_v47, 4  ;;  %v1839_v34 = vrot.slane %v7468_v0, 4  ;;  %v2039_v26 = vadd.f32 %v7270_v6, %v2010_v11 }
 0x564   : > { %3501 = vperm.xlu1 %5862, %v7501_v8   ;;  %v2532_v46 = vadd.f32 %v7212_v54, %v2503_v44  ;;  %v1756_v44 = vrot.slane %v7432_v58, 4  ;;  %v1571_v51 = vadd.f32 %v1568_v62, %v1544_v56  ;;  %v10774_v62 = vrot.slane %v6836_v21, 4 }
 0x565   : > { %v1866_v59 = vrot.slane %v7477_v15, 4  ;;  %v1814_v11 = vsel %vm553_vm3, %v1812_v27, %v1813_v4  ;;  %v10776_v4 = vld [vmem:[#allocation20_spill] sm:$0xff] }
 0x566   : > { %v2556_v18 = vmul.f32 %v10772_v49, %v2532_v46  ;;  %v1758_v36 = vsel %vm553_vm3, %v1756_v44, %v1757_v7  ;;  %v2170_v46 = vrot.slane %v7522_v3, 4  ;;  %v1600_v29 = vadd.f32 %v1597_v63, %v1571_v51 }
 0x567   : > { %v7642_v32 = vpop.permute.xlu1 %2492  ;;  %v1785_v7 = vsel %vm553_vm3, %v1783_v30, %v1784_v60  ;;  %v1679_v49 = vsel %vm553_vm3, %v1677_v10, %v10774_v62  ;;  %v1759_v14 = vsel %vm607_vm7, %v7432_v58, %v1758_v36  ;;  %v2198_v44 = vrot.slane %v7527_v45, 4  ;;  %v10781_v62 = vld [vmem:[#allocation57_spill] sm:$0xff] }
 0x568   : > { %5864 = vset.pattern.permute.xlu1 %v10773_v35  ;;  %2561 = vrot.lane.b32.xlu0 %v2556_v18, %s6050_s23  ;;  %v1651_v18 = vsel %vm1453_vm12, %v7419_v5, %v1650_v50  ;;  %v2470_v63 = vrot.slane %v7312_v39, 4  ;;  %v2497_v5 = vrot.slane %v7319_v61, 4  ;;  %v1627_v60 = vadd.f32 %v1624_v48, %v1600_v29 }
 0x569   : > { %3549 = vperm.xlu1 %5864, %v7501_v8   ;;  %v1786_v21 = vsel %vm1375_vm8, %v7447_v16, %v1785_v7  ;;  %v1841_v50 = vsel %vm553_vm3, %v1839_v34, %v1840_v20  ;;  %v10775_v58 = vrot.slane %v7305_v40, 4  ;;  %v2224_v45 = vrot.slane %v7532_v23, 4 }
 0x56a   : > { %v1654_v35 = vadd.f32 %v1651_v18, %v1627_v60  ;;  %v1680_v51 = vsel %vm581_vm5, %v7428_v19, %v1679_v49  ;;  %v1762_v36 = vadd.f32 %v1759_v14, %v7585_v37  ;;  %v2066_v30 = vadd.f32 %v10776_v4, %v2039_v26  ;;  %v10778_v37 = vld [vmem:[#allocation47_spill] sm:$0xff]  ;;  %v10783_v60 = vld [vmem:[#allocation22_spill] sm:$0xff] }
 0x56b   : > { %v7664_v56 = vpop.permute.xlu1 %2521  ;;  %v2172_v10 = vsel %vm553_vm3, %v2170_v46, %v10775_v58  ;;  %v1815_v16 = vsel %vm555_vm4, %v7462_v9, %v1814_v11  ;;  %v1868_v20 = vsel %vm553_vm3, %v1866_v59, %v1867_v25  ;;  %v10777_v40 = vrot.slane %v7315_v38, 4  ;;  %v10780_v25 = vld [vmem:[#allocation54_spill] sm:$0xff]  ;;  %v10782_v14 = vld [vmem:[#allocation59_spill] sm:$0xff] }
 0x56c   : > { %v2387_v34 = vrot.slane %v7556_v1, 4  ;;  %v1789_v46 = vadd.f32 %v1786_v21, %v1762_v36  ;;  %v1842_v19 = vsel %vm633_vm9, %v7468_v0, %v1841_v50  ;;  %v1895_v29 = vrot.slane %v10778_v37, 4  ;;  %v10785_v58 = vld [vmem:[#allocation58_spill] sm:$0xff] }
 0x56d   : > { %3573 = vperm.xlu1 %5864, %v7022_v13   ;;  %v2199_v48 = vsel %vm553_vm3, %v10777_v40, %v2198_v44  ;;  %v2173_v18 = vsel %vm607_vm7, %v7522_v3, %v2172_v10  ;;  %v10779_v7 = vmov 22   ;;  %v2226_v9 = vsel %vm553_vm3, %v2224_v45, %v2225_v53  ;;  %v10784_v53 = vld [vmem:[#allocation55_spill] sm:$0xff]  ;;  %v10787_v40 = vld [vmem:[#allocation56_spill] sm:$0xff] }
 0x56e   : > { %v2251_v26 = vrot.slane %v10780_v25, 4  ;;  %v2386_v49 = vrot.slane %v10781_v62, 4  ;;  %v2414_v59 = vrot.slane %v10782_v14, 4  ;;  %v1818_v1 = vadd.f32 %v1815_v16, %v1789_v46 }
 0x56f   : > { %v7688_v27 = vpop.permute.xlu1 %2602  ;;  %v1869_v0 = vsel %vm1453_vm12, %v7477_v15, %v1868_v20  ;;  %v2200_v44 = vsel %vm1375_vm8, %v7315_v38, %v2199_v48  ;;  %v2093_v11 = vadd.f32 %v10783_v60, %v2066_v30  ;;  %v2278_v21 = vrot.slane %v10784_v53, 4 }
 0x570   : > { %v2388_v50 = vsel %vm553_vm3, %v2386_v49, %v2387_v34  ;;  %v2413_v10 = vrot.slane %v10785_v58, 4  ;;  %v2442_v45 = vrot.slane %v7599_v17, 4  ;;  %v1845_v36 = vadd.f32 %v1842_v19, %v1818_v1 }
 0x571   : > { %5865 = vset.pattern.permute.xlu1 %v10779_v7  ;;  %v10786_v16 = vrot.slane %v6840_v33, 4  ;;  %v2176_v38 = vadd.f32 %v2173_v18, %v7591_v55  ;;  %v2227_v20 = vsel %vm555_vm4, %v7532_v23, %v2226_v9  ;;  %v2253_v30 = vsel %vm553_vm3, %v2251_v26, %v2252_v2  ;;  %v10788_v7 = vld [vmem:[#allocation31_spill] sm:$0xff] }
 0x572   : > { %3597 = vperm.xlu1 %5865, %v7501_v8   ;;  %v2305_v48 = vrot.slane %v10787_v40, 4  ;;  %v2415_v34 = vsel %vm553_vm3, %v2413_v10, %v2414_v59  ;;  %v2469_v46 = vrot.slane %v7621_v57, 4  ;;  %v1683_v33 = vadd.f32 %v1680_v51, %v1654_v35 }
 0x573   : > { %v7712_v3 = vpop.permute.xlu1 %2604  ;;  %v1897_v15 = vsel %vm553_vm3, %v1895_v29, %v10786_v16  ;;  %v1872_v19 = vadd.f32 %v1869_v0, %v1845_v36  ;;  %v2203_v29 = vadd.f32 %v2200_v44, %v2176_v38  ;;  %v2389_v55 = vsel %vm607_vm7, %v10781_v62, %v2388_v50 }
 0x574   : > { %v2280_v22 = vsel %vm553_vm3, %v2278_v21, %v2279_v41  ;;  %v2444_v23 = vsel %vm553_vm3, %v2442_v45, %v2443_v31  ;;  %v2496_v2 = vrot.slane %v7642_v32, 4  ;;  %v1898_v35 = vsel %vm581_vm5, %v10778_v37, %v1897_v15  ;;  %v10792_v21 = vld [vmem:[#allocation25_spill] sm:$0xff]  ;;  %v10794_v15 = vld [vmem:[#allocation36_spill] sm:$0xff] }
 0x575   : > { %v2230_v51 = vadd.f32 %v2227_v20, %v2203_v29  ;;  %v2254_v9 = vsel %vm633_vm9, %v10780_v25, %v2253_v30  ;;  %v2416_v42 = vsel %vm1375_vm8, %v10785_v58, %v2415_v34  ;;  %v10789_v41 = vrot.slane %v7202_v52, 4  ;;  %v10790_v25 = vld [vmem:[#allocation61_spill] sm:$0xff]  ;;  %v10797_v34 = vld [vmem:[#allocation28_spill] sm:$0xff] }
 0x576   : > { %3621 = vperm.xlu1 %5865, %v7022_v13   ;;  %v2122_v13 = vadd.f32 %v10788_v7, %v2093_v11  ;;  %v2392_v31 = vadd.f32 %v2389_v55, %v7607_v28  ;;  %v2471_v26 = vsel %vm553_vm3, %v2469_v46, %v2470_v63  ;;  %v2525_v62 = vrot.slane %v7664_v56, 4 }
 0x577   : > { %v7734_v18 = vpop.permute.xlu1 %2629  ;;  %v2307_v47 = vsel %vm553_vm3, %v2305_v48, %v10789_v41  ;;  %v2526_v37 = vrot.slane %v7212_v54, 4  ;;  %v1706_v49 = vmul.f32 %v10790_v25, %v1683_v33  ;;  %v2281_v52 = vsel %vm1453_vm12, %v10784_v53, %v2280_v22 }
 0x578   : > { %v2445_v14 = vsel %vm555_vm4, %v7599_v17, %v2444_v23  ;;  %v10791_v59 = vmov 29   ;;  %v1901_v39 = vadd.f32 %v1898_v35, %v1872_v19  ;;  %v2257_v63 = vadd.f32 %v2254_v9, %v2230_v51  ;;  %v10800_v51 = vld [vmem:[#allocation46_spill] sm:$0xff] }
 0x579   : > { %v2419_v1 = vadd.f32 %v2416_v42, %v2392_v31  ;;  %v2498_v0 = vsel %vm553_vm3, %v2496_v2, %v2497_v5  ;;  %v2308_v54 = vsel %vm581_vm5, %v10787_v40, %v2307_v47  ;;  %v2472_v44 = vsel %vm633_vm9, %v7621_v57, %v2471_v26  ;;  %v10801_v31 = vld [vmem:[#allocation23_spill] sm:$0xff] }
 0x57a   : > { %2127 = vrot.lane.b32.xlu1 %v2122_v13, %s6051_s26  ;;  %v2284_v11 = vadd.f32 %v2281_v52, %v2257_v63  ;;  %v2527_v17 = vsel %vm553_vm3, %v2525_v62, %v2526_v37  ;;  %v10793_v50 = vrot.slane %v10792_v21, 4  ;;  %v2499_v61 = vsel %vm1453_vm12, %v7642_v32, %v2498_v0  ;;  %v10796_v32 = vld [vmem:[#allocation10_spill] sm:$0xff]  ;;  %v10799_v13 = vld [vmem:[#allocation48_spill] sm:$0xff]  ;;  %v10803_v63 = vld [vmem:[#allocation49_spill] sm:$0xff] }
 0x57b   : > { %v2632_v28 = vpop.permute.xlu1 %2631  ;;  %5866 = vset.pattern.permute.xlu1 %v10791_v59  ;;  %v2448_v53 = vadd.f32 %v2445_v14, %v2419_v1  ;;  %v2528_v57 = vsel %vm581_vm5, %v7664_v56, %v2527_v17  ;;  %v10795_v38 = vrot.slane %v10794_v15, 4  ;;  %v2581_v46 = vrot.slane %v10797_v34, %v10796_v32  ;;  %v10802_v37 = vld [vmem:[#allocation50_spill] sm:$0xff] }
 0x57c   : > { %v1922_v58 = vsel %vm1921_vm6, %v10793_v50, %v10792_v21  ;;  %v2311_v45 = vadd.f32 %v2308_v54, %v2284_v11  ;;  %v2607_v33 = vrot.slane %v7712_v3, 4  ;;  %v10798_v56 = vrot.slane %v7125_v12, 4  ;;  %v7807_v59 = vld [vmem:[#allocation3] sm:$0xff] }
 0x57d   : > { %v1925_v10 = vmul.f32 %v1922_v58, %v1901_v39  ;;  %v2475_v36 = vadd.f32 %v2472_v44, %v2448_v53  ;;  %v2332_v20 = vsel %vm2331_vm13, %v10795_v38, %v10794_v15  ;;  %v1977_v29 = vrot.slane %v7491_v43, 4  ;;  %v10804_v53 = vld [vmem:[#allocation60_spill] sm:$0xff] }
 0x57e   : > { %1710 = vrot.lane.b32.xlu1 %v1706_v49, %s6020_s28  ;;  %v2335_v40 = vmul.f32 %v2332_v20, %v2311_v45  ;;  %v2552_v19 = vsel %vm2551_vm11, %v10798_v56, %v7125_v12  ;;  %v2606_v23 = vrot.slane %v7688_v27, 4  ;;  %v2634_v2 = vrot.slane %v2632_v28, 4  ;;  %v10806_v38 = vld [vmem:[#allocation52_spill] sm:$0xff] }
 0x57f   : > { %v2659_v5 = vpop.permute.xlu1 %2658  ;;  %v2502_v16 = vadd.f32 %v2499_v61, %v2475_v36  ;;  %v1976_v35 = vrot.slane %v10799_v13, 4  ;;  %v2584_v9 = vmul.f32 %v2581_v46, %v10800_v51  ;;  %v2633_v41 = vrot.slane %v7734_v18, 4  ;;  %v10805_v61 = vld [vmem:[#allocation51_spill] sm:$0xff] }
 0x580   : > { %v2608_v42 = vsel %vm553_vm3, %v2606_v23, %v2607_v33  ;;  %v2662_v47 = vrot.slane %v2659_v5, 4  ;;  %v2663_v12 = vrot.slane %v10801_v31, 4  ;;  %v2004_v26 = vrot.slane %v7503_v24, 4  ;;  %v10807_v33 = vld [vmem:[#allocation53_spill] sm:$0xff]  ;;  %v10808_v51 = vld [vmem:[#allocation27_spill] sm:$0xff] }
 0x581   : > { %v2531_v48 = vadd.f32 %v2528_v57, %v2502_v16  ;;  %v1978_v43 = vsel %vm553_vm3, %v1976_v35, %v1977_v29  ;;  %v2032_v25 = vrot.slane %v10802_v37, 4  ;;  %v2613_v49 = vadd.f32 %v7712_v3, %v2584_v9 }
 0x582   : > { %1929 = vrot.lane.b32.xlu1 %v1925_v10, %s6048_s22  ;;  %v2635_v52 = vsel %vm553_vm3, %v2633_v41, %v2634_v2  ;;  %v2583_v39 = vmul.f32 %v7807_v59, %v2581_v46  ;;  %v2003_v1 = vrot.slane %v10803_v63, 4  ;;  %v2609_v0 = vsel %vm607_vm7, %v7688_v27, %v2608_v42 }
 0x583   : > { %v2686_v30 = vpop.permute.xlu1 %2685  ;;  %v2555_v22 = vmul.f32 %v2552_v19, %v2531_v48  ;;  %v2033_v54 = vrot.slane %v7270_v6, 4  ;;  %v2640_v24 = vadd.f32 %v2632_v28, %v2613_v49  ;;  %v2664_v44 = vsel %vm553_vm3, %v2662_v47, %v2663_v12 }
 0x584   : > { %v2689_v11 = vrot.slane %v2686_v30, 4  ;;  %v2005_v3 = vsel %vm553_vm3, %v2003_v1, %v2004_v26  ;;  %v1953_v17 = vmul.f32 %v7807_v59, %v10804_v53  ;;  %v1979_v21 = vsel %vm607_vm7, %v10799_v13, %v1978_v43 }
 0x585   : > { %v2636_v50 = vsel %vm1375_vm8, %v7734_v18, %v2635_v52  ;;  %v2034_v27 = vsel %vm553_vm3, %v2032_v25, %v2033_v54  ;;  %v2059_v6 = vrot.slane %v10805_v61, 4  ;;  %v2612_v28 = vadd.f32 %v2609_v0, %v2583_v39 }
 0x586   : > { %2339 = vrot.lane.b32.xlu1 %v2335_v40, %s6049_s20  ;;  %v2060_v45 = vrot.slane %v10776_v4, 4  ;;  %v2087_v36 = vrot.slane %v10783_v60, 4  ;;  %v2665_v57 = vsel %vm555_vm4, %v2659_v5, %v2664_v44  ;;  %v2006_v15 = vsel %vm1375_vm8, %v10803_v63, %v2005_v3  ;;  %s10933_s20 = smov 64  }
 0x587   : > { %v2688_v55 = vpop.permute.xlu1 %2687  ;;  %v2086_v18 = vrot.slane %v10806_v38, 4  ;;  %v2639_v20 = vadd.f32 %v2636_v50, %v2612_v28  ;;  %v2669_v40 = vadd.f32 %v10801_v31, %v2640_v24  ;;  %v1982_v48 = vadd.f32 %v1979_v21, %v1953_v17 }
 0x588   : > { %v2690_v14 = vrot.slane %v2688_v55, 4  ;;  %v2035_v34 = vsel %vm555_vm4, %v10802_v37, %v2034_v27  ;;  %v2061_v5 = vsel %vm553_vm3, %v2059_v6, %v2060_v45  ;;  %v2115_v56 = vrot.slane %v10807_v33, 4  ;;  %v10816_v45 = vld [vmem:[#allocation32_spill] sm:$0xff] }
 0x589   : > { %v2668_v19 = vadd.f32 %v2665_v57, %v2639_v20  ;;  %v2696_v29 = vadd.f32 %v2688_v55, %v2669_v40  ;;  %v2116_v23 = vrot.slane %v10788_v7, 4  ;;  %v2088_v2 = vsel %vm553_vm3, %v2086_v18, %v2087_v36  ;;  %v10817_v36 = vld [vmem:[#allocation33_spill] sm:$0xff] }
 0x58a   : > { %2559 = vrot.lane.b32.xlu1 %v2555_v22, %s6050_s23  ;;  %v2691_v10 = vsel %vm553_vm3, %v2689_v11, %v2690_v14  ;;  %v2009_v22 = vadd.f32 %v2006_v15, %v1982_v48  ;;  %v2769_v9 = vrot.slane %v10808_v51, 4  ;;  %vm2770_vm13 = vcmask 146432   ;;  %v7863_v11 = vld [vmem:[%s10308_s11] sm:$0x3]  ;;  %s6056_s23 = smov 48  }
 0x58b   : > { %v2715_v62 = vpop.permute.xlu1 %2714  ;;  %v2692_v46 = vsel %vm633_vm9, %v2686_v30, %v2691_v10  ;;  %v2062_v30 = vsel %vm633_vm9, %v10805_v61, %v2061_v5  ;;  %v2117_v31 = vsel %vm553_vm3, %v2115_v56, %v2116_v23  ;;  %v2089_v7 = vsel %vm1453_vm12, %v10806_v38, %v2088_v2 }
 0x58c   : > { %v2718_v16 = vrot.slane %v2715_v62, 4  ;;  %v2695_v13 = vadd.f32 %v2692_v46, %v2668_v19  ;;  %v2038_v42 = vadd.f32 %v2035_v34, %v2009_v22  ;;  %v2118_v52 = vsel %vm581_vm5, %v10807_v33, %v2117_v31 }
 0x58d   : > { %v2771_v1 = vsel %vm2770_vm13, %v2769_v9, %v10808_v51  ;;  %v10810_v53 = vmov 9   ;;  %v10811_v21 = vmov 36   ;;  %v10812_v50 = vmov 3  }
 0x58e   : > { %v2719_v41 = vsel %vm1453_vm12, %v2718_v16, %v2715_v62  ;;  %v2065_v26 = vadd.f32 %v2062_v30, %v2038_v42  ;;  %v10813_v27 = vmov 10   ;;  %v10814_v6 = vmov 43  }
 0x58f   : > { %v2717_v58 = vpop.permute.xlu1 %2716  ;;  %v2723_v37 = vadd.f32 %v2719_v41, %v2695_v13  ;;  %v10815_v28 = vmov 11   ;;  %v5869_v57 = vpack.i.bf16 %v10817_v36, %v10816_v45  ;;  %v10819_v38 = vmov 2   ;;  %v10845_v45 = vld [vmem:[#allocation37_spill] sm:$0xff] }
 0x590   : > { %v2720_v4 = vsel %vm1453_vm12, %v2718_v16, %v2717_v58  ;;  %v2092_v39 = vadd.f32 %v2089_v7, %v2065_v26  ;;  %v10818_v16 = vmov 12   ;;  %v10820_v18 = vmov 19  }
 0x591   : > { %v2724_v35 = vadd.f32 %v2720_v4, %v2696_v29  ;;  %v10821_v48 = vmov 25   ;;  %v10822_v34 = vmov 16   ;;  %v10823_v4 = vmov 32  }
 0x592   : > { %v2121_v0 = vadd.f32 %v2118_v52, %v2092_v39  ;;  %v10824_v5 = vmov 23   ;;  %v10825_v56 = vmov 27   ;;  %v10826_v29 = vmov 30   ;;  %v10842_v39 = vld [vmem:[#allocation24_spill] sm:$0xff] }
 0x593   : > { %v2741_v60 = vpop.permute.xlu1 %2740  ;;  %v10827_v22 = vmov 33   ;;  %v10829_v2 = vmov 39   ;;  %v10831_v51 = vmov 45   ;;  %v10832_v30 = vmov 41  }
 0x594   : > { %v2744_v12 = vrot.slane %v2741_v60, 4  ;;  %v10833_v41 = vmov 44   ;;  %v10835_v31 = vmov 47   ;;  %v1372_v36 = vrot.slane %v10845_v45, 4 }
 0x597   : > { %v2743_v47 = vpop.permute.xlu1 %2742 }
 0x598   : > { %v2745_v55 = vrot.slane %v2743_v47, 4  ;;  %v2751_v43 = vadd.f32 %v2743_v47, %v2724_v35  ;;  %v10830_v35 = vmov 37  }
 0x59a   : > { %v2746_v25 = vsel %vm553_vm3, %v2744_v12, %v2745_v55  ;;  %v2775_v49 = vmul.f32 %v2769_v9, %v2751_v43  ;;  %v7957_v12 = vpop.permute.xlu0 %3491  ;;  %v10837_v55 = vld [vmem:[#allocation8_spill] sm:$0xff]  ;;  %v10838_v43 = vld [vmem:[#allocation9_spill] sm:$0xff] }
 0x59b   : > { %v2747_v62 = vsel %vm581_vm5, %v2741_v60, %v2746_v25  ;;  %v7851_v14 = vpop.permute.xlu1 %2792  ;;  %10836 = vst [vmem:[#allocation57_spill] sm:$0xff] %v7957_v12  ;;  %v5883_v7 = vpack.i.bf16 %v10838_v43, %v10837_v55 }
 0x59c   : > { %2780 = vrot.lane.b32.xlu0 %v2775_v49, %s6052_s24  ;;  %v2750_v63 = vadd.f32 %v2747_v62, %v2723_v37  ;;  %v10840_v37 = vmov 48   ;;  %v10841_v49 = vld [vmem:[#allocation26_spill] sm:$0xff] }
 0x59d   : > { %v1348_v52 = vrot.slane %v10841_v49, 4  ;;  %v10851_v49 = vld [vmem:[#allocation16_spill] sm:$0xff] }
 0x59e   : > { %v2774_v54 = vmul.f32 %v2771_v1, %v2750_v63  ;;  %v7967_v25 = vpop.permute.xlu0 %3525  ;;  %v1347_v63 = vrot.slane %v10842_v39, 4  ;;  %v10843_v1 = vld [vmem:[#allocation39_spill] sm:$0xff] }
 0x59f   : > { %v7854_v24 = vpop.permute.xlu1 %2893 }
 0x5a0   : > { %2125 = vrot.lane.b32.xlu0 %v2121_v0, %s6051_s26  ;;  %2778 = vrot.lane.b32.xlu1 %v2774_v54, %s6052_s24  ;;  %v1373_v0 = vrot.slane %v10843_v1, 4  ;;  %v10844_v54 = vmov 4   ;;  %s10934_s26 = smov 32   ;;  %s11121_s24 = smov 126  }
 0x5a3   : > { %v7857_v44 = vpop.permute.xlu1 %3119 }
 0x5a4   : > { %10809 = vst [vmem:[#allocation20_spill] sm:$0xff] %v7857_v44  ;;  %3645 = vperm.xlu1 %5866, %v7501_v8   ;;  %3825 = vperm.xlu0 %5875, %v7863_v11   ;;  %v10854_v44 = vld [vmem:[#allocation44_spill] sm:$0xff] }
 0x5a8   : > { %v7866_v3 = vpop.permute.xlu1 %3183  ;;  %3669 = vperm.xlu1 %5866, %v7863_v11   ;;  %5877 = vset.pattern.permute.xlu0 %v10810_v53 }
 0x5a9   : > { %3859 = vperm.xlu0 %5877, %v7863_v11  }
 0x5ac   : > { %v7871_v17 = vpop.permute.xlu1 %3232  ;;  %5867 = vset.pattern.permute.xlu1 %v10811_v21 }
 0x5ad   : > { %3693 = vperm.xlu1 %5867, %v7501_v8   ;;  %5889 = vset.pattern.permute.xlu0 %v10812_v50 }
 0x5ae   : > { %4160 = vperm.xlu0 %5889, %v7863_v11  }
 0x5b1   : > { %v7877_v58 = vpop.permute.xlu1 %3254  ;;  %3717 = vperm.xlu1 %5867, %v7863_v11  }
 0x5b2   : > { %5891 = vset.pattern.permute.xlu0 %v10813_v27 }
 0x5b3   : > { %4194 = vperm.xlu0 %5891, %v7863_v11  }
 0x5b5   : > { %v7882_v61 = vpop.permute.xlu1 %3276  ;;  %5868 = vset.pattern.permute.xlu1 %v10814_v6  ;;  %v1349_v6 = vsel %vm553_vm3, %v1347_v63, %v1348_v52  ;;  %v1426_v52 = vrot.slane %v10851_v49, 4 }
 0x5b6   : > { %3741 = vperm.xlu1 %5868, %v7501_v8   ;;  %v1350_v43 = vsel %vm607_vm7, %v10842_v39, %v1349_v6 }
 0x5b7   : > { %5896 = vset.pattern.permute.xlu0 %v10815_v28 }
 0x5b8   : > { %4517 = vperm.xlu0 %5896, %v7863_v11  }
 0x5ba   : > { %v7888_v10 = vpop.permute.xlu1 %3298  ;;  %3765 = vperm.xlu1 %5868, %v7863_v11  }
 0x5bc   : > { %5899 = vset.pattern.permute.xlu0 %v10818_v16 }
 0x5bd   : > { %4851 = vperm.xlu0 %5899, %v7863_v11  }
 0x5be   : > { %v7895_v15 = vpop.permute.xlu1 %3320  ;;  %5870 = vrot.lane.b32.xlu1 %v5869_v57, %s5993_s29  ;;  %s6053_s29 = smov 2  }
 0x5bf   : > { %5874 = vset.pattern.permute.xlu1 %v10819_v38 }
 0x5c1   : > { %5902 = vset.pattern.permute.xlu0 %v10820_v18  ;;  %v1713_v18 = vpop.permute.xlu0 %1712 }
 0x5c2   : > { %3815 = vperm.xlu1 %5874, %v7501_v8   ;;  %4875 = vperm.xlu0 %5902, %v7501_v8  }
 0x5c3   : > { %v7902_v20 = vpop.permute.xlu1 %3342 }
 0x5c6   : > { %5876 = vset.pattern.permute.xlu1 %v10810_v53  ;;  %4899 = vperm.xlu0 %5902, %v7863_v11   ;;  %v5967_v53 = vld [vmem:[%s10298_s1] sm:$0x3] }
 0x5c7   : > { %v7906_v40 = vpop.permute.xlu1 %3364  ;;  %3835 = vperm.xlu1 %5876, %v7501_v8   ;;  %v1484_v21 = vadd.s32 4294967287, %v5967_v53  ;;  %v10852_v53 = vld [vmem:[#allocation43_spill] sm:$0xff] }
 0x5c9   : > { %vm1485_vm11 = vcmp.ge.s32.totalorder %v1484_v21, 0  ;;  %vm1486_vm13 = vcmp.lt.s32.totalorder %v1484_v21, 16 }
 0x5ca   : > { %5906 = vset.pattern.permute.xlu0 %v10821_v48  ;;  %vm1487_vm10 = vmand %vm1485_vm11, %vm1486_vm13  ;;  %vm2346_vm11 = vcmask 949248   ;;  %vm2566_vm13 = vcmask 924672  }
 0x5cb   : > { %5878 = vset.pattern.permute.xlu1 %v10822_v34  ;;  %4613 = vperm.xlu0 %5906, %v7863_v11   ;;  %v10847_v34 = vld [vmem:[#allocation29_spill] sm:$0xff] }
 0x5cc   : > { %v7912_v46 = vpop.permute.xlu1 %3386  ;;  %3883 = vperm.xlu1 %5878, %v7501_v8  }
 0x5cf   : > { %5909 = vset.pattern.permute.xlu0 %v10823_v4  ;;  %v1322_v4 = vrot.slane %v10847_v34, %v10796_v32  ;;  %v1450_v34 = vrot.slane %v10852_v53, 4 }
 0x5d0   : > { %v7916_v60 = vpop.permute.xlu1 %3409  ;;  %3907 = vperm.xlu1 %5878, %v7863_v11   ;;  %4637 = vperm.xlu0 %5909, %v7501_v8  }
 0x5d1   : > { %v1324_v63 = vmul.f32 %v7807_v59, %v1322_v4  ;;  %v1478_v59 = vrot.slane %v10854_v44, 4  ;;  %v10855_v4 = vld [vmem:[#allocation30_spill] sm:$0xff] }
 0x5d4   : > { %5879 = vset.pattern.permute.xlu1 %v10824_v5  ;;  %4661 = vperm.xlu0 %5909, %v7863_v11   ;;  %v10848_v5 = vld [vmem:[#allocation15_spill] sm:$0xff] }
 0x5d5   : > { %v7922_v33 = vpop.permute.xlu1 %3431  ;;  %3931 = vperm.xlu1 %5879, %v7501_v8  }
 0x5d8   : > { %5913 = vset.pattern.permute.xlu0 %v10825_v56 }
 0x5d9   : > { %v7926_v19 = vpop.permute.xlu1 %3453  ;;  %3955 = vperm.xlu1 %5879, %v7863_v11   ;;  %5283 = vperm.xlu0 %5913, %v7863_v11  }
 0x5dd   : > { %5880 = vset.pattern.permute.xlu1 %v10826_v29  ;;  %5916 = vset.pattern.permute.xlu0 %v10827_v22  ;;  %v1401_v29 = vrot.slane %v10848_v5, 4  ;;  %v1352_v5 = vadd.f32 %v1350_v43, %v1324_v63 }
 0x5de   : > { %v7932_v23 = vpop.permute.xlu1 %3481  ;;  %3979 = vperm.xlu1 %5880, %v7501_v8   ;;  %4995 = vperm.xlu0 %5916, %v7863_v11  }
 0x5df   : > { %10828 = vst [vmem:[#allocation47_spill] sm:$0xff] %v7932_v23  ;;  %v10857_v23 = vmov 0  }
 0x5e2   : > { %4003 = vperm.xlu1 %5880, %v7863_v11   ;;  %5919 = vset.pattern.permute.xlu0 %v10829_v2 }
 0x5e3   : > { %v7938_v13 = vpop.permute.xlu1 %3501  ;;  %4709 = vperm.xlu0 %5919, %v7863_v11  }
 0x5e6   : > { %5881 = vset.pattern.permute.xlu1 %v10830_v35  ;;  %v1374_v35 = vsel %vm553_vm3, %v1372_v36, %v1373_v0  ;;  %v1932_v0 = vpop.permute.xlu0 %1931 }
 0x5e7   : > { %4027 = vperm.xlu1 %5881, %v7501_v8   ;;  %5922 = vset.pattern.permute.xlu0 %v10831_v51  ;;  %v1376_v39 = vsel %vm1375_vm8, %v10845_v45, %v1374_v35  ;;  %v10856_v35 = vmov 17  }
 0x5e8   : > { %v7944_v9 = vpop.permute.xlu1 %3549  ;;  %4410 = vperm.xlu0 %5922, %v7501_v8   ;;  %v1378_v12 = vadd.f32 %v1376_v39, %v1352_v5  ;;  %v10860_v5 = vld [vmem:[#allocation7_spill] sm:$0xff] }
 0x5ea   : > { %v2342_v43 = vpop.permute.xlu0 %2341 }
 0x5eb   : > { %4051 = vperm.xlu1 %5881, %v7863_v11  }
 0x5ec   : > { %v7948_v42 = vpop.permute.xlu1 %3573  ;;  %5925 = vset.pattern.permute.xlu0 %v10832_v30 }
 0x5ed   : > { %5355 = vperm.xlu0 %5925, %v7501_v8  }
 0x5ef   : > { %5882 = vset.pattern.permute.xlu1 %v10833_v41  ;;  %v10849_v41 = vld [vmem:[#allocation42_spill] sm:$0xff] }
 0x5f0   : > { %4075 = vperm.xlu1 %5882, %v7501_v8   ;;  %v1425_v55 = vrot.slane %v10849_v41, 4 }
 0x5f1   : > { %v7954_v47 = vpop.permute.xlu1 %3597  ;;  %5928 = vset.pattern.permute.xlu0 %v10835_v31 }
 0x5f2   : > { %10834 = vst [vmem:[#allocation54_spill] sm:$0xff] %v7954_v47  ;;  %5067 = vperm.xlu0 %5928, %v7501_v8   ;;  %v1427_v49 = vsel %vm553_vm3, %v1425_v55, %v1426_v52  ;;  %v10858_v52 = vmov 0.0  }
 0x5f3   : > { %v1428_v55 = vsel %vm633_vm9, %v10849_v41, %v1427_v49  ;;  %v1488_v63 = vsel %vm1487_vm10, 1.0, %v10858_v52  ;;  %v2562_v49 = vpop.permute.xlu0 %2561  ;;  %vm10482_vm10 = vcmask 998400  }
 0x5f4   : > { %4099 = vperm.xlu1 %5882, %v7863_v11  }
 0x5f5   : > { %v7963_v26 = vpop.permute.xlu1 %3621 }
 0x5f6   : > { %10839 = vst [vmem:[#allocation59_spill] sm:$0xff] %v7963_v26  ;;  %5931 = vset.pattern.permute.xlu0 %v10840_v37 }
 0x5f7   : > { %5403 = vperm.xlu0 %5931, %v7501_v8  }
 0x5f8   : > { %5884 = vrot.lane.b32.xlu1 %v5883_v7, %s6053_s29  ;;  %v10850_v7 = vmov 6   ;;  %s6055_s29 = smov 51  }
 0x5f9   : > { %v7970_v62 = vpop.permute.xlu1 %2127  ;;  %5888 = vset.pattern.permute.xlu1 %v10812_v50  ;;  %v10846_v50 = vld [vmem:[#allocation40_spill] sm:$0xff] }
 0x5fa   : > { %v1400_v57 = vrot.slane %v10846_v50, 4 }
 0x5fb   : > { %5934 = vset.pattern.permute.xlu0 %v10844_v54 }
 0x5fc   : > { %4150 = vperm.xlu1 %5888, %v7501_v8   ;;  %4483 = vperm.xlu0 %5934, %v7863_v11   ;;  %v1402_v1 = vsel %vm553_vm3, %v1400_v57, %v1401_v29  ;;  %v1479_v29 = vrot.slane %v10855_v4, 4  ;;  %v1497_v4 = vrot.slane %v1488_v63, %v10860_v5 }
 0x5fd   : > { %v1711_v38 = vpop.permute.xlu1 %1710  ;;  %v1403_v57 = vsel %vm555_vm4, %v10846_v50, %v1402_v1 }
 0x5fe   : > { %v1405_v21 = vadd.f32 %v1403_v57, %v1378_v12  ;;  %v1480_v50 = vsel %vm553_vm3, %v1478_v59, %v1479_v29  ;;  %v1715_v12 = vrot.slane %v1713_v18, 4  ;;  %v1934_v29 = vrot.slane %v1932_v0, 4 }
 0x5ff   : > { %v1481_v41 = vsel %vm581_vm5, %v10854_v44, %v1480_v50  ;;  %v2344_v18 = vrot.slane %v2342_v43, 4 }
 0x600   : > { %5890 = vset.pattern.permute.xlu1 %v10813_v27  ;;  %5936 = vset.pattern.permute.xlu0 %v10850_v7  ;;  %v10853_v27 = vld [vmem:[#allocation17_spill] sm:$0xff] }
 0x601   : > { %4170 = vperm.xlu1 %5890, %v7501_v8   ;;  %5143 = vperm.xlu0 %5936, %v7501_v8   ;;  %v1930_v6 = vpop.permute.xlu1 %1929  ;;  %v1451_v36 = vrot.slane %v10853_v27, 4  ;;  %v10859_v27 = vld [vmem:[#allocation6_spill] sm:$0xff] }
 0x602   : > { %v1933_v57 = vrot.slane %v1930_v6, 4 }
 0x603   : > { %v1452_v45 = vsel %vm553_vm3, %v1450_v34, %v1451_v36  ;;  %v1430_v34 = vadd.f32 %v1428_v55, %v1405_v21  ;;  %v1493_v36 = vrot.slane %v1488_v63, %v10859_v27  ;;  %v10861_v21 = vmov 24  }
 0x604   : > { %v1454_v1 = vsel %vm1453_vm12, %v10852_v53, %v1452_v45  ;;  %v1935_v63 = vsel %vm553_vm3, %v1933_v57, %v1934_v29  ;;  %vm2132_vm12 = vcmask 973824  }
 0x605   : > { %5892 = vset.pattern.permute.xlu1 %v10856_v35  ;;  %5954 = vset.pattern.permute.xlu0 %v10857_v23  ;;  %v2340_v39 = vpop.permute.xlu1 %2339  ;;  %v1714_v35 = vrot.slane %v1711_v38, 4  ;;  %v1456_v26 = vadd.f32 %v1454_v1, %v1430_v34  ;;  %v1498_v47 = vcombine.low %v1493_v36, %v1497_v4  ;;  %v2130_v36 = vrot.slane %v7970_v62, 4 }
 0x606   : > { %4218 = vperm.xlu1 %5892, %v7501_v8   ;;  %v2343_v1 = vrot.slane %v2340_v39, 4  ;;  %v10862_v62 = vmov 31  }
 0x607   : > { %v1483_v59 = vadd.f32 %v1481_v41, %v1456_v26  ;;  %v1716_v53 = vsel %vm553_vm3, %v1714_v35, %v1715_v12  ;;  %v1937_v26 = vsel %vm10482_vm10, %v1930_v6, %v1935_v63  ;;  %v2564_v12 = vrot.slane %v2562_v49, 4 }
 0x608   : > { %v1717_v44 = vsel %vm1111_vm2, %v1711_v38, %v1716_v53  ;;  %v2345_v38 = vsel %vm553_vm3, %v2343_v1, %v2344_v18  ;;  %vm2785_vm10 = vcmask 900096   ;;  %v2800_v18 = vrot.slane %v7851_v14, %v10796_v32 }
 0x609   : > { %v2560_v45 = vpop.permute.xlu1 %2559  ;;  %v1500_v50 = vmul.f32 %v1498_v47, %v1483_v59  ;;  %v10863_v32 = vmov 18   ;;  %v10864_v14 = vmov 13  }
 0x60a   : > { %4242 = vperm.xlu1 %5892, %v7863_v11   ;;  %v2563_v35 = vrot.slane %v2560_v45, 4 }
 0x60b   : > { %v1719_v4 = vadd.f32 %v1717_v44, %v1500_v50 }
 0x60c   : > { %v2565_v6 = vsel %vm553_vm3, %v2563_v35, %v2564_v12 }
 0x60d   : > { %v1939_v57 = vadd.f32 %v1937_v26, %v1719_v4  ;;  %v2567_v44 = vsel %vm2566_vm13, %v2560_v45, %v2565_v6  ;;  %v10866_v4 = vmov 26  }
 0x60e   : > { %v2781_v55 = vpop.permute.xlu0 %2780  ;;  %5893 = vset.pattern.permute.xlu1 %v10861_v21  ;;  %v2347_v21 = vsel %vm2346_vm11, %v2340_v39, %v2345_v38  ;;  %v2889_v39 = vld [vmem:[%s10305_s8] sm:$0x3]  ;;  %v10869_v38 = vmov 38  }
 0x60f   : > { %4266 = vperm.xlu1 %5893, %v7501_v8   ;;  %v2783_v29 = vrot.slane %v2781_v55, 4 }
 0x612   : > { %v2779_v0 = vpop.permute.xlu1 %2778  ;;  %v2126_v34 = vpop.permute.xlu0 %2125 }
 0x613   : > { %v2129_v41 = vrot.slane %v2126_v34, 4  ;;  %4290 = vperm.xlu1 %5893, %v7863_v11   ;;  %v2782_v47 = vrot.slane %v2779_v0, 4 }
 0x615   : > { %v2131_v43 = vsel %vm553_vm3, %v2129_v41, %v2130_v36  ;;  %v2784_v49 = vsel %vm553_vm3, %v2782_v47, %v2783_v29  ;;  %v10865_v36 = vmov 20   ;;  %v10874_v29 = vmov 46  }
 0x616   : > { %v2133_v59 = vsel %vm2132_vm12, %v2126_v34, %v2131_v43  ;;  %v2786_v1 = vsel %vm2785_vm10, %v2779_v0, %v2784_v49  ;;  %v10870_v43 = vmov 34   ;;  %vm3041_vm10 = vcmask 828824  }
 0x617   : > { %v2135_v53 = vadd.f32 %v2133_v59, %v1939_v57  ;;  %5894 = vset.pattern.permute.xlu1 %v10862_v62  ;;  %v10871_v59 = vmov 40   ;;  %3042 = vst.msk [vmem:[#allocation4 + $0x4] sm:$0x3] %vm3041_vm10, %v10858_v52  ;;  %vm2976_vm12 = vcmask 1041408  }
 0x618   : > { %4314 = vperm.xlu1 %5894, %v7501_v8   ;;  %v8045_v8 = vld [vmem:[%s10307_s10] sm:$0x3] }
 0x619   : > { %v2349_v63 = vadd.f32 %v2347_v21, %v2135_v53 }
 0x61b   : > { %v2569_v50 = vadd.f32 %v2567_v44, %v2349_v63  ;;  %v10882_v44 = vmov 5  }
 0x61c   : > { %4338 = vperm.xlu1 %5894, %v7863_v11  }
 0x61d   : > { %v2788_v26 = vadd.f32 %v2786_v1, %v2569_v50 }
 0x61f   : > { %v2802_v55 = vadd.f32 %v2800_v18, %v2788_v26 }
 0x620   : > { %5895 = vset.pattern.permute.xlu1 %v10815_v28 }
 0x621   : > { %v2897_v34 = vcombine.high %v2802_v55, %v2802_v55  ;;  %4493 = vperm.xlu1 %5895, %v8045_v8  }
 0x623   : > { %5678 = vmatprep.subr.msk.mxu1 %vm553_vm3, %v2897_v34  ;;  %v8060_v28 = vpop.permute.xlu1 %3645 }
 0x624   : > { %5679 = vmatpush1.msk.msra.mxu1 %vm553_vm3, %v2802_v55  ;;  %vm3039_vm3 = vcmask 410624  }
 0x625   : > { %5680 = vmatmul.mubr.msk.f32.vlgmr.msra.gmra.mrb[0].mxu1 %vm1258_vm1, %v2889_v39  ;;  %5897 = vset.pattern.permute.xlu1 %v10818_v16  ;;  %3040 = vst.msk [vmem:[#allocation4] sm:$0x3] %vm3039_vm3, %v10858_v52  ;;  %v10894_v52 = vld [vmem:[#allocation38_spill] sm:$0xff]  ;;  %vm3063_vm3 = vcmask 416768  }
 0x626   : > { %4827 = vperm.xlu1 %5897, %v8045_v8  }
 0x627   : > { %v8064_v45 = vpop.permute.xlu1 %3669 }
 0x62a   : > { %5898 = vset.pattern.permute.xlu1 %v10863_v32 }
 0x62b   : > { %4541 = vperm.xlu1 %5898, %v8045_v8  }
 0x62c   : > { %v8068_v16 = vpop.permute.xlu1 %3693 }
 0x62f   : > { %5900 = vset.pattern.permute.xlu1 %v10864_v14 }
 0x630   : > { %5163 = vperm.xlu1 %5900, %v8045_v8   ;;  %v8072_v0 = vpop.permute.xlu1 %3717 }
 0x634   : > { %5901 = vset.pattern.permute.xlu1 %v10863_v32  ;;  %v10898_v32 = vld [vmem:[#allocation45_spill] sm:$0xff] }
 0x635   : > { %4565 = vperm.xlu1 %5901, %v7863_v11   ;;  %v8077_v35 = vpop.permute.xlu1 %3741 }
 0x639   : > { %5903 = vset.pattern.permute.xlu1 %v10864_v14  ;;  %v8082_v41 = vpop.permute.xlu1 %3765  ;;  %v8186_v14 = vadd.f32 %v10898_v32, %v10894_v52 }
 0x63a   : > { %5187 = vperm.xlu1 %5903, %v7863_v11  }
 0x63b   : > { %10899 = vst [vmem:[#allocation26_spill] sm:$0xff] %v8186_v14 }
 0x63e   : > { %5904 = vset.pattern.permute.xlu1 %v10821_v48  ;;  %v8086_v48 = vpop.permute.xlu1 %5870 }
 0x63f   : > { %4589 = vperm.xlu1 %5904, %v8045_v8   ;;  %10867 = vst [vmem:[#allocation22_spill] sm:$0xff] %v8086_v48 }
 0x642   : > { %v8090_v12 = vpop.permute.xlu1 %3815 }
 0x643   : > { %5905 = vset.pattern.permute.xlu1 %v10865_v36  ;;  %10868 = vst [vmem:[#allocation55_spill] sm:$0xff] %v8090_v12 }
 0x644   : > { %5211 = vperm.xlu1 %5905, %v8045_v8  }
 0x646   : > { %v8094_v57 = vpop.permute.xlu1 %3835 }
 0x648   : > { %5907 = vset.pattern.permute.xlu1 %v10866_v4 }
 0x649   : > { %4923 = vperm.xlu1 %5907, %v8045_v8  }
 0x64b   : > { %v8098_v47 = vpop.permute.xlu1 %3883 }
 0x64d   : > { %5908 = vset.pattern.permute.xlu1 %v10865_v36 }
 0x64e   : > { %5235 = vperm.xlu1 %5908, %v7863_v11  }
 0x652   : > { %5910 = vset.pattern.permute.xlu1 %v10866_v4 }
 0x653   : > { %4947 = vperm.xlu1 %5910, %v7863_v11  }
 0x657   : > { %5911 = vset.pattern.permute.xlu1 %v10825_v56  ;;  %v8102_v56 = vpop.permute.xlu1 %3907 }
 0x658   : > { %5259 = vperm.xlu1 %5911, %v8045_v8  }
 0x65c   : > { %5912 = vset.pattern.permute.xlu1 %v10827_v22  ;;  %v8107_v22 = vpop.permute.xlu1 %3931 }
 0x65d   : > { %4971 = vperm.xlu1 %5912, %v8045_v8  }
 0x660   : > { %v8112_v6 = vpop.permute.xlu1 %3955 }
 0x661   : > { %5914 = vset.pattern.permute.xlu1 %v10869_v38  ;;  %10872 = vst [vmem:[#allocation58_spill] sm:$0xff] %v8112_v6 }
 0x662   : > { %4362 = vperm.xlu1 %5914, %v8045_v8  }
 0x666   : > { %5915 = vset.pattern.permute.xlu1 %v10829_v2  ;;  %v8116_v2 = vpop.permute.xlu1 %3979 }
 0x667   : > { %4685 = vperm.xlu1 %5915, %v8045_v8   ;;  %10873 = vst [vmem:[#allocation56_spill] sm:$0xff] %v8116_v2 }
 0x66a   : > { %v8120_v53 = vpop.permute.xlu1 %4003 }
 0x66b   : > { %5917 = vset.pattern.permute.xlu1 %v10870_v43  ;;  %10875 = vst [vmem:[#allocation31_spill] sm:$0xff] %v8120_v53 }
 0x66c   : > { %5307 = vperm.xlu1 %5917, %v8045_v8  }
 0x66e   : > { %v8124_v62 = vpop.permute.xlu1 %4027 }
 0x66f   : > { %10876 = vst [vmem:[#allocation61_spill] sm:$0xff] %v8124_v62 }
 0x670   : > { %5918 = vset.pattern.permute.xlu1 %v10869_v38  ;;  %v2984_v38 = vsel %vm2976_vm12, %v8186_v14, 0.0 }
 0x671   : > { %4386 = vperm.xlu1 %5918, %v7863_v11  }
 0x672   : > { %v8129_v21 = vpop.permute.xlu1 %4051 }
 0x673   : > { %10877 = vst [vmem:[#allocation25_spill] sm:$0xff] %v8129_v21 }
 0x675   : > { %5920 = vset.pattern.permute.xlu1 %v10871_v59 }
 0x676   : > { %5019 = vperm.xlu1 %5920, %v8045_v8   ;;  %v8134_v49 = vpop.permute.xlu1 %4075 }
 0x677   : > { %10878 = vst [vmem:[#allocation36_spill] sm:$0xff] %v8134_v49  ;;  %v6054_v49 = vmov 1966171168  }
 0x678   : > { %v3047_v21 = vunpack.c.l.s4 %v6054_v49 }
 0x67a   : > { %5921 = vset.pattern.permute.xlu1 %v10870_v43  ;;  %v8138_v63 = vpop.permute.xlu1 %4099  ;;  %v3016_v43 = vsel %vm2976_vm12, %v8186_v14, -inf }
 0x67b   : > { %5331 = vperm.xlu1 %5921, %v7863_v11   ;;  %10879 = vst [vmem:[#allocation10_spill] sm:$0xff] %v8138_v63 }
 0x67f   : > { %5923 = vset.pattern.permute.xlu1 %v10874_v29 }
 0x680   : > { %4733 = vperm.xlu1 %5923, %v8045_v8  }
 0x684   : > { %5924 = vset.pattern.permute.xlu1 %v10871_v59 }
 0x685   : > { %5043 = vperm.xlu1 %5924, %v7863_v11  }
 0x689   : > { %5926 = vset.pattern.permute.xlu1 %v10831_v51  ;;  %v8142_v51 = vpop.permute.xlu1 %5884 }
 0x68a   : > { %4434 = vperm.xlu1 %5926, %v7863_v11   ;;  %10880 = vst [vmem:[#allocation28_spill] sm:$0xff] %v8142_v51 }
 0x68e   : > { %5927 = vset.pattern.permute.xlu1 %v10874_v29 }
 0x68f   : > { %4757 = vperm.xlu1 %5927, %v7863_v11  }
 0x693   : > { %5929 = vset.pattern.permute.xlu1 %v10832_v30  ;;  %v8146_v30 = vpop.permute.xlu1 %4150 }
 0x694   : > { %5379 = vperm.xlu1 %5929, %v7863_v11   ;;  %10881 = vst [vmem:[#allocation48_spill] sm:$0xff] %v8146_v30  ;;  %v3017_v30 = vrot.slane %v3016_v43, 4 }
 0x696   : > { %v3018_v48 = vmax.f32 %v3016_v43, %v3017_v30 }
 0x698   : > { %5930 = vset.pattern.permute.xlu1 %v10835_v31  ;;  %v8150_v31 = vpop.permute.xlu1 %4170 }
 0x699   : > { %5091 = vperm.xlu1 %5930, %v7863_v11   ;;  %10883 = vst [vmem:[#allocation46_spill] sm:$0xff] %v8150_v31 }
 0x69d   : > { %5932 = vset.pattern.permute.xlu1 %v10840_v37  ;;  %v8154_v37 = vpop.permute.xlu1 %4218 }
 0x69e   : > { %5427 = vperm.xlu1 %5932, %v7863_v11   ;;  %10884 = vst [vmem:[#allocation23_spill] sm:$0xff] %v8154_v37 }
 0x6a2   : > { %5933 = vset.pattern.permute.xlu1 %v10844_v54  ;;  %v8160_v54 = vpop.permute.xlu1 %4242 }
 0x6a3   : > { %4473 = vperm.xlu1 %5933, %v8045_v8   ;;  %10885 = vst [vmem:[#allocation50_spill] sm:$0xff] %v8160_v54 }
 0x6a6   : > { %v8162_v50 = vpop.permute.xlu1 %4266 }
 0x6a7   : > { %5935 = vset.pattern.permute.xlu1 %v10882_v44  ;;  %10886 = vst [vmem:[#allocation49_spill] sm:$0xff] %v8162_v50 }
 0x6a8   : > { %4807 = vperm.xlu1 %5935, %v8045_v8  }
 0x6aa   : > { %v8164_v1 = vpop.permute.xlu1 %4290 }
 0x6ab   : > { %10887 = vst [vmem:[#allocation60_spill] sm:$0xff] %v8164_v1 }
 0x6ac   : > { %4817 = vperm.xlu1 %5935, %v7863_v11  }
 0x6ae   : > { %v8166_v18 = vpop.permute.xlu1 %4314 }
 0x6af   : > { %10888 = vst [vmem:[#allocation51_spill] sm:$0xff] %v8166_v18 }
 0x6b0   : > { %5937 = vset.pattern.permute.xlu1 %v10850_v7 }
 0x6b1   : > { %5153 = vperm.xlu1 %5937, %v7863_v11  }
 0x6b2   : > { %v8168_v7 = vpop.permute.xlu1 %4338 }
 0x6b3   : > { %10889 = vst [vmem:[#allocation52_spill] sm:$0xff] %v8168_v7 }
 0x6b5   : > { %5953 = vset.pattern.permute.xlu1 %v10857_v23  ;;  %v10895_v23 = vld [vmem:[#allocation21_spill] sm:$0xff] }
 0x6b6   : > { %v8170_v26 = vpop.permute.xlu1 %4493  ;;  %v8180_v8 = vadd.f32 %v10895_v23, %v10894_v52  ;;  %v2985_v23 = vrot.slane %v2984_v38, 4 }
 0x6b7   : > { %10890 = vst [vmem:[#allocation53_spill] sm:$0xff] %v8170_v26 }
 0x6b8   : > { %10896 = vst [vmem:[#allocation8_spill] sm:$0xff] %v8180_v8  ;;  %v2977_v36 = vsel %vm2976_vm12, %v8180_v8, 0.0  ;;  %v3009_v4 = vsel %vm2976_vm12, %v8180_v8, -inf  ;;  %v2986_v51 = vadd.f32 %v2985_v23, %v2984_v38 }
 0x6b9   : > { %v2978_v59 = vrot.slane %v2977_v36, 4  ;;  %v3010_v44 = vrot.slane %v3009_v4, 4 }
 0x6ba   : > { %v8172_v55 = vpop.permute.xlu1 %4827 }
 0x6bb   : > { %10891 = vst [vmem:[#allocation27_spill] sm:$0xff] %v8172_v55  ;;  %v2979_v52 = vadd.f32 %v2978_v59, %v2977_v36  ;;  %v3011_v32 = vmax.f32 %v3009_v4, %v3010_v44  ;;  %v3019_v55 = vrot.slane %v3018_v48, 2 }
 0x6bd   : > { %v2980_v8 = vrot.slane %v2979_v52, 2  ;;  %v3020_v1 = vmax.f32 %v3018_v48, %v3019_v55 }
 0x6be   : > { %v8174_v11 = vpop.permute.xlu1 %4541 }
 0x6bf   : > { %10892 = vst [vmem:[#allocation32_spill] sm:$0xff] %v8174_v11  ;;  %v3012_v11 = vrot.slane %v3011_v32, 2  ;;  %v2981_v59 = vadd.f32 %v2980_v8, %v2979_v52  ;;  %v3021_v2 = vrot.slane %v3020_v1, 1 }
 0x6c1   : > { %v3013_v23 = vmax.f32 %v3011_v32, %v3012_v11  ;;  %v2982_v62 = vrot.slane %v2981_v59, 1 }
 0x6c2   : > { %v8176_v34 = vpop.permute.xlu1 %5163 }
 0x6c3   : > { %10893 = vst [vmem:[#allocation33_spill] sm:$0xff] %v8176_v34 }
 0x6c6   : > { %v8182_v39 = vpop.permute.xlu1 %4565 }
 0x6c7   : > { %10897 = vst [vmem:[#allocation9_spill] sm:$0xff] %v8182_v39 }
 0x6ca   : > { %v8196_v29 = vpop.permute.xlu1 %5187 }
 0x6cb   : > { %10900 = vst [vmem:[#allocation24_spill] sm:$0xff] %v8196_v29  ;;  %v2987_v29 = vrot.slane %v2986_v51, 2 }
 0x6cd   : > { %v2988_v18 = vadd.f32 %v2987_v29, %v2986_v51 }
 0x6ce   : > { %v8198_v12 = vpop.permute.xlu1 %4589 }
 0x6cf   : > { %10901 = vst [vmem:[#allocation39_spill] sm:$0xff] %v8198_v12  ;;  %v2989_v53 = vrot.slane %v2988_v18, 1 }
 0x6d1   : > { %v2990_v49 = vadd.f32 %v2989_v53, %v2988_v18 }
 0x6f8   : > { %v2971_v7 = vpop.f32.mrb[0].mxu1 }
 0x6f9   : > { %v8201_v39 = vadd.f32 %v2971_v7, %v7854_v24  ;;  %v2973_v34 = vpop.f32.mrb[1].mxu1 }
 0x6fa   : > { %v8204_v14 = vadd.f32 %v2973_v34, %v7854_v24  ;;  %v8214_v34 = vpop.permute.xlu1 %5211 }
 0x6fb   : > { %10902 = vst [vmem:[#allocation37_spill] sm:$0xff] %v8201_v39  ;;  %v2991_v36 = vsel %vm2976_vm12, %v8201_v39, 0.0  ;;  %v3023_v30 = vsel %vm2976_vm12, %v8201_v39, -inf  ;;  %10904 = vst [vmem:[#allocation29_spill] sm:$0xff] %v8214_v34 }
 0x6fc   : > { %10903 = vst [vmem:[#allocation40_spill] sm:$0xff] %v8204_v14  ;;  %v2992_v4 = vrot.slane %v2991_v36, 4  ;;  %v3024_v38 = vrot.slane %v3023_v30, 4  ;;  %v2998_v43 = vsel %vm2976_vm12, %v8204_v14, 0.0  ;;  %v3030_v7 = vsel %vm2976_vm12, %v8204_v14, -inf }
 0x6fd   : > { %v2999_v44 = vrot.slane %v2998_v43, 4  ;;  %v3031_v24 = vrot.slane %v3030_v7, 4  ;;  %v3014_v14 = vrot.slane %v3013_v23, 1 }
 0x6fe   : > { %v2993_v12 = vadd.f32 %v2992_v4, %v2991_v36  ;;  %v3025_v26 = vmax.f32 %v3023_v30, %v3024_v38  ;;  %v8216_v32 = vpop.permute.xlu1 %4923  ;;  %v3048_v36 = vunpack.c.0.s8 %v3047_v21  ;;  %v2983_v30 = vadd.f32 %v2982_v62, %v2981_v59 }
 0x6ff   : > { %v3000_v50 = vadd.f32 %v2999_v44, %v2998_v43  ;;  %v3032_v39 = vmax.f32 %v3030_v7, %v3031_v24  ;;  %10905 = vst [vmem:[#allocation15_spill] sm:$0xff] %v8216_v32  ;;  %v3015_v4 = vmax.f32 %v3013_v23, %v3014_v14  ;;  %v3022_v7 = vmax.f32 %v3020_v1, %v3021_v2  ;;  %v8223_v2 = vpop.permute.xlu0 %3825 }
 0x700   : > { %v2994_v54 = vrot.slane %v2993_v12, 2  ;;  %v3026_v37 = vrot.slane %v3025_v26, 2  ;;  %10908 = vst [vmem:[#allocation16_spill] sm:$0xff] %v8223_v2 }
 0x701   : > { %v3001_v31 = vrot.slane %v3000_v50, 2  ;;  %v3033_v63 = vrot.slane %v3032_v39, 2 }
 0x702   : > { %v2995_v8 = vadd.f32 %v2994_v54, %v2993_v12  ;;  %v3027_v52 = vmax.f32 %v3025_v26, %v3026_v37 }
 0x703   : > { %v3002_v34 = vadd.f32 %v3001_v31, %v3000_v50  ;;  %v3034_v11 = vmax.f32 %v3032_v39, %v3033_v63  ;;  %v10906_v63 = vld [vmem:[#allocation5_spill] sm:$0xff]  ;;  %v8219_v39 = vpop.permute.xlu1 %5235  ;;  %v8227_v18 = vpop.permute.xlu0 %3859 }
 0x704   : > { %v2996_v51 = vrot.slane %v2995_v8, 1  ;;  %v3028_v48 = vrot.slane %v3027_v52, 1  ;;  %v3051_v50 = vsub.s32 %v3048_v36, %v10906_v63 }
 0x705   : > { %v3003_v55 = vrot.slane %v3002_v34, 1  ;;  %v3035_v29 = vrot.slane %v3034_v11, 1 }
 0x706   : > { %v2997_v38 = vadd.f32 %v2996_v51, %v2995_v8  ;;  %v3029_v43 = vmax.f32 %v3027_v52, %v3028_v48 }
 0x707   : > { %v3004_v44 = vadd.f32 %v3003_v55, %v3002_v34  ;;  %v3036_v12 = vmax.f32 %v3034_v11, %v3035_v29  ;;  %v8221_v23 = vpop.permute.xlu1 %4947  ;;  %v8231_v8 = vpop.permute.xlu0 %4160 }
 0x708   : > { %v3005_v37 = vadd.f32 %v2997_v38, %v2983_v30  ;;  %v3037_v54 = vmax.f32 %v3015_v4, %v3029_v43  ;;  %10907 = vst [vmem:[#allocation42_spill] sm:$0xff] %v8221_v23  ;;  %10910 = vst [vmem:[#allocation17_spill] sm:$0xff] %v8231_v8 }
 0x709   : > { %v3006_v26 = vadd.f32 %v3004_v44, %v2990_v49  ;;  %v3038_v31 = vmax.f32 %v3022_v7, %v3036_v12 }
 0x70a   : > { %v3007_v24 = vmul.f32 0.25, %v3005_v37 }
 0x70b   : > { %v3008_v32 = vmul.f32 0.25, %v3006_v26  ;;  %v3073_v6 = vcombine.low %v3037_v54, %v3038_v31  ;;  %v8225_v1 = vpop.permute.xlu1 %5259  ;;  %v8235_v52 = vpop.permute.xlu0 %4194 }
 0x70c   : > { %10909 = vst [vmem:[#allocation43_spill] sm:$0xff] %v8225_v1 }
 0x70d   : > { %v3080_v21 = vrot.slane %v3073_v6, %v3051_v50  ;;  %v3045_v62 = vcombine.low %v3007_v24, %v3008_v32 }
 0x70f   : > { %v3087_v14 = vrot.slane %v3080_v21, %v3051_v50  ;;  %v3052_v59 = vrot.slane %v3045_v62, %v3051_v50  ;;  %v8229_v34 = vpop.permute.xlu1 %4971  ;;  %v8237_v11 = vpop.permute.xlu0 %4517 }
 0x711   : > { %3088 = vrot.lane.b32.xlu0 %v3087_v14, %s6055_s29  ;;  %v3059_v53 = vrot.slane %v3052_v59, %v3051_v50 }
 0x713   : > { %3060 = vrot.lane.b32.xlu1 %v3059_v53, %s6055_s29  ;;  %v8233_v6 = vpop.permute.xlu1 %4362  ;;  %v8241_v51 = vpop.permute.xlu0 %4851 }
 0x717   : > { %v8239_v32 = vpop.permute.xlu1 %4685  ;;  %v8245_v55 = vpop.permute.xlu0 %4875 }
 0x71b   : > { %v8243_v48 = vpop.permute.xlu1 %5307  ;;  %v8249_v36 = vpop.permute.xlu0 %4899 }
 0x71f   : > { %v8247_v29 = vpop.permute.xlu1 %4386  ;;  %v8253_v4 = vpop.permute.xlu0 %4613 }
 0x720   : > { %10911 = vst [vmem:[#allocation44_spill] sm:$0xff] %v8247_v29 }
 0x723   : > { %v8251_v30 = vpop.permute.xlu1 %5019  ;;  %v8257_v43 = vpop.permute.xlu0 %4637 }
 0x724   : > { %10912 = vst [vmem:[#allocation30_spill] sm:$0xff] %v8251_v30 }
 0x727   : > { %v8255_v38 = vpop.permute.xlu1 %5331  ;;  %v8261_v7 = vpop.permute.xlu0 %4661 }
 0x728   : > { %10913 = vst [vmem:[#allocation38_spill] sm:$0xff] %v8255_v38 }
 0x72b   : > { %v8259_v49 = vpop.permute.xlu1 %4733  ;;  %v8265_v12 = vpop.permute.xlu0 %5283 }
 0x72c   : > { %10914 = vst [vmem:[#allocation21_spill] sm:$0xff] %v8259_v49 }
 0x72f   : > { %v8263_v44 = vpop.permute.xlu1 %5043  ;;  %v8269_v54 = vpop.permute.xlu0 %4995 }
 0x730   : > { %10915 = vst [vmem:[#allocation45_spill] sm:$0xff] %v8263_v44 }
 0x733   : > { %v8267_v37 = vpop.permute.xlu1 %4434  ;;  %v8273_v31 = vpop.permute.xlu0 %4709 }
 0x734   : > { %10916 = vst [vmem:[#allocation62_spill] sm:$0xff] %v8267_v37  ;;  %10918 = vst [vmem:[#allocation64_spill] sm:$0xff] %v8273_v31 }
 0x737   : > { %v8271_v26 = vpop.permute.xlu1 %4757  ;;  %v8277_v24 = vpop.permute.xlu0 %4410 }
 0x738   : > { %10917 = vst [vmem:[#allocation63_spill] sm:$0xff] %v8271_v26  ;;  %10920 = vst [vmem:[#allocation66_spill] sm:$0xff] %v8277_v24 }
 0x73b   : > { %v8275_v50 = vpop.permute.xlu1 %5379  ;;  %v8281_v62 = vpop.permute.xlu0 %5355 }
 0x73c   : > { %10919 = vst [vmem:[#allocation65_spill] sm:$0xff] %v8275_v50  ;;  %10922 = vst [vmem:[#allocation68_spill] sm:$0xff] %v8281_v62 }
 0x73f   : > { %v8279_v21 = vpop.permute.xlu1 %5091  ;;  %v8285_v59 = vpop.permute.xlu0 %5067 }
 0x740   : > { %10921 = vst [vmem:[#allocation67_spill] sm:$0xff] %v8279_v21  ;;  %10924 = vst [vmem:[#allocation70_spill] sm:$0xff] %v8285_v59  ;;  %v10932_v21 = vlaneseq }
 0x742   : > { %vm3067_vm11 = vcmp.ge.s32.totalorder %v10932_v21, 51  ;;  %vm3068_vm13 = vcmp.lt.s32.totalorder %v10932_v21, 307 }
 0x743   : > { %v8283_v14 = vpop.permute.xlu1 %5427  ;;  %v8289_v8 = vpop.permute.xlu0 %5403  ;;  %vm3069_vm10 = vmand %vm3067_vm11, %vm3068_vm13  ;;  %vm3401_vm11 = vcmask 392192   ;;  %vm4126_vm13 = vcmask 15360  }
 0x744   : > { %10923 = vst [vmem:[#allocation69_spill] sm:$0xff] %v8283_v14  ;;  %10926 = vst [vmem:[#allocation72_spill] sm:$0xff] %v8289_v8 }
 0x747   : > { %v8287_v53 = vpop.permute.xlu1 %4473  ;;  %v8293_v26 = vpop.permute.xlu0 %4483 }
 0x748   : > { %10925 = vst [vmem:[#allocation71_spill] sm:$0xff] %v8287_v53  ;;  %10928 = vst [vmem:[#allocation74_spill] sm:$0xff] %v8293_v26 }
 0x74b   : > { %v8291_v37 = vpop.permute.xlu1 %4807  ;;  %v8297_v50 = vpop.permute.xlu0 %5143 }
 0x74c   : > { %10927 = vst [vmem:[#allocation73_spill] sm:$0xff] %v8291_v37  ;;  %10930 = vst [vmem:[#allocation76_spill] sm:$0xff] %v8297_v50  ;;  %v10534_v50 = vsub.s32 3, %v10906_v63 }
 0x74f   : > { %v8295_v44 = vpop.permute.xlu1 %4817 }
 0x750   : > { %10929 = vst [vmem:[#allocation75_spill] sm:$0xff] %v8295_v44  ;;  %v10533_v44 = vsub.s32 2, %v10906_v63 }
 0x753   : > { %v8299_v49 = vpop.permute.xlu1 %5153 }
 0x754   : > { %10931 = vst [vmem:[#allocation77_spill] sm:$0xff] %v8299_v49  ;;  %v3165_v49 = vsub.s32 4, %v10906_v63 }
 0x783   : > { %v3089_v14 = vpop.permute.xlu0 %3088 }
 0x784   : > { %v3090_v53 = vrot.slane %v3089_v14, 7 }
 0x785   : > { %v3061_v59 = vpop.permute.xlu1 %3060 }
 0x786   : > { %v3091_v8 = vsel %vm3063_vm3, %v3090_v53, %v3089_v14  ;;  %v3062_v62 = vrot.slane %v3061_v59, 7 }
 0x787   : > { %3094 = vst.msk [vmem:[#allocation4 + $0x1] ss:$2 sm:$0x7] %vm3069_vm10, %v3091_v8 }
 0x788   : > { %v3064_v37 = vsel %vm3063_vm3, %v3062_v62, %v3061_v59 }
 0x789   : > { %3070 = vst.msk [vmem:[#allocation4] ss:$2 sm:$0x7] %vm3069_vm10, %v3064_v37 }
 0x790   : > { %v3153_v26 = vld [vmem:[#allocation4] sm:$0x3f] }
 0x791   : > { %v3158_v24 = vrot.slane %v3153_v26, %v10859_v27  ;;  %v3162_v21 = vrot.slane %v3153_v26, %v10533_v44  ;;  %v3166_v2 = vrot.slane %v3153_v26, %v3165_v49  ;;  %v3211_v14 = vrot.slane %v3153_v26, %v10534_v50 }
 0x792   : > { %v3214_v49 = vsub.s32 5, %v10906_v63 }
 0x793   : > { %v8312_v8 = vrot.slane %v3158_v24, %v10859_v27  ;;  %v8315_v37 = vrot.slane %v3162_v21, %v10859_v27  ;;  %v8318_v62 = vrot.slane %v3211_v14, %v10860_v5  ;;  %v8326_v44 = vrot.slane %v3166_v2, %v10859_v27 }
 0x794   : > { %v3207_v24 = vrot.slane %v3153_v26, %v10860_v5  ;;  %v3215_v14 = vrot.slane %v3153_v26, %v3214_v49 }
 0x795   : > { %v3186_v59 = vmul.f32 %v7866_v3, %v8312_v8  ;;  %v3187_v53 = vmul.f32 %v7866_v3, %v8315_v37  ;;  %v3236_v21 = vmul.f32 %v7871_v17, %v8318_v62  ;;  %v3188_v38 = vmul.f32 %v7866_v3, %v8326_v44 }
 0x796   : > { %v8334_v50 = vrot.slane %v3207_v24, %v10860_v5  ;;  %v3258_v2 = vmul.f32 %v7877_v58, %v8315_v37  ;;  %v3280_v3 = vmul.f32 %v7882_v61, %v8318_v62  ;;  %v3257_v49 = vmul.f32 %v7877_v58, %v8312_v8 }
 0x797   : > { %3194 = vrot.lane.b32.xlu1 %v3187_v53, %s6003_s30  ;;  %3192 = vrot.lane.b32.xlu0 %v3186_v59, %s6003_s30  ;;  %v8343_v53 = vrot.slane %v3215_v14, %v10860_v5  ;;  %v3324_v24 = vmul.f32 %v7895_v15, %v8318_v62 }
 0x798   : > { %v3235_v59 = vmul.f32 %v7871_v17, %v8334_v50  ;;  %v3279_v14 = vmul.f32 %v7882_v61, %v8334_v50 }
 0x799   : > { %v3237_v26 = vmul.f32 %v7871_v17, %v8343_v53  ;;  %v3259_v17 = vmul.f32 %v7877_v58, %v8326_v44  ;;  %v3281_v58 = vmul.f32 %v7882_v61, %v8343_v53  ;;  %v3303_v61 = vmul.f32 %v7888_v10, %v8326_v44 }
 0x79b   : > { %3243 = vrot.lane.b32.xlu1 %v3236_v21, %s6003_s30  ;;  %3196 = vrot.lane.b32.xlu0 %v3188_v38, %s6003_s30  ;;  %v3302_v38 = vmul.f32 %v7888_v10, %v8315_v37  ;;  %v3346_v21 = vmul.f32 %v7902_v20, %v8315_v37 }
 0x79f   : > { %3265 = vrot.lane.b32.xlu1 %v3258_v2, %s6005_s16  ;;  %3241 = vrot.lane.b32.xlu0 %v3235_v59, %s6003_s30  ;;  %v3368_v2 = vmul.f32 %v7906_v40, %v8318_v62  ;;  %v3390_v59 = vmul.f32 %v7912_v46, %v8315_v37 }
 0x7a3   : > { %3287 = vrot.lane.b32.xlu1 %v3280_v3, %s6005_s16  ;;  %3245 = vrot.lane.b32.xlu0 %v3237_v26, %s6003_s30  ;;  %v3301_v3 = vmul.f32 %v7888_v10, %v8312_v8  ;;  %v3413_v26 = vmul.f32 %v7916_v60, %v8318_v62  ;;  %v3325_v10 = vmul.f32 %v7895_v15, %v8343_v53 }
 0x7a7   : > { %3309 = vrot.lane.b32.xlu1 %v3302_v38, %s6006_s17  ;;  %3263 = vrot.lane.b32.xlu0 %v3257_v49, %s6005_s16  ;;  %v3435_v38 = vmul.f32 %v7922_v33, %v8315_v37  ;;  %v3323_v49 = vmul.f32 %v7895_v15, %v8334_v50  ;;  %v3347_v15 = vmul.f32 %v7902_v20, %v8326_v44 }
 0x7ab   : > { %3331 = vrot.lane.b32.xlu1 %v3324_v24, %s6006_s17  ;;  %3267 = vrot.lane.b32.xlu0 %v3259_v17, %s6005_s16  ;;  %v3457_v24 = vmul.f32 %v7926_v19, %v8318_v62  ;;  %v3504_v17 = vmul.f32 %v7938_v13, %v8312_v8 }
 0x7af   : > { %3353 = vrot.lane.b32.xlu1 %v3346_v21, %s10933_s20  ;;  %3285 = vrot.lane.b32.xlu0 %v3279_v14, %s6005_s16  ;;  %v3345_v21 = vmul.f32 %v7902_v20, %v8312_v8  ;;  %v3506_v14 = vmul.f32 %v7938_v13, %v8326_v44  ;;  %v3369_v20 = vmul.f32 %v7906_v40, %v8343_v53 }
 0x7b3   : > { %3375 = vrot.lane.b32.xlu1 %v3368_v2, %s10933_s20  ;;  %3289 = vrot.lane.b32.xlu0 %v3281_v58, %s6005_s16  ;;  %v3528_v2 = vmul.f32 %v7967_v25, %v8334_v50  ;;  %v3367_v58 = vmul.f32 %v7906_v40, %v8334_v50  ;;  %v3391_v40 = vmul.f32 %v7912_v46, %v8326_v44 }
 0x7b7   : > { %3397 = vrot.lane.b32.xlu1 %v3390_v59, %s6056_s23  ;;  %3307 = vrot.lane.b32.xlu0 %v3301_v3, %s6006_s17  ;;  %v3529_v59 = vmul.f32 %v7967_v25, %v8318_v62  ;;  %v3553_v3 = vmul.f32 %v7944_v9, %v8315_v37 }
 0x7bb   : > { %3420 = vrot.lane.b32.xlu1 %v3413_v26, %s6056_s23  ;;  %3311 = vrot.lane.b32.xlu0 %v3303_v61, %s6006_s17  ;;  %v3389_v26 = vmul.f32 %v7912_v46, %v8312_v8  ;;  %v3577_v61 = vmul.f32 %v7948_v42, %v8318_v62  ;;  %v3414_v46 = vmul.f32 %v7916_v60, %v8343_v53 }
 0x7bf   : > { %3442 = vrot.lane.b32.xlu1 %v3435_v38, %s10934_s26  ;;  %3329 = vrot.lane.b32.xlu0 %v3323_v49, %s6006_s17  ;;  %v10935_v38 = vld [vmem:[#allocation54_spill] sm:$0xff] }
 0x7c0   : > { %v3601_v49 = vmul.f32 %v10935_v38, %v8315_v37 }
 0x7c3   : > { %3464 = vrot.lane.b32.xlu1 %v3457_v24, %s10934_s26  ;;  %3333 = vrot.lane.b32.xlu0 %v3325_v10, %s6006_s17  ;;  %v3412_v24 = vmul.f32 %v7916_v60, %v8334_v50  ;;  %v10936_v10 = vld [vmem:[#allocation59_spill] sm:$0xff]  ;;  %v3436_v60 = vmul.f32 %v7922_v33, %v8326_v44 }
 0x7c7   : > { %3510 = vrot.lane.b32.xlu1 %v3504_v17, %s6003_s30  ;;  %3351 = vrot.lane.b32.xlu0 %v3345_v21, %s10933_s20  ;;  %v3625_v17 = vmul.f32 %v10936_v10, %v8318_v62  ;;  %v3649_v21 = vmul.f32 %v8060_v28, %v8315_v37 }
 0x7cb   : > { %3514 = vrot.lane.b32.xlu1 %v3506_v14, %s6003_s30  ;;  %3355 = vrot.lane.b32.xlu0 %v3347_v15, %s10933_s20  ;;  %v3434_v14 = vmul.f32 %v7922_v33, %v8312_v8  ;;  %v3673_v15 = vmul.f32 %v8064_v45, %v8318_v62  ;;  %v3458_v33 = vmul.f32 %v7926_v19, %v8343_v53 }
 0x7cf   : > { %3534 = vrot.lane.b32.xlu1 %v3528_v2, %s6003_s30  ;;  %3373 = vrot.lane.b32.xlu0 %v3367_v58, %s10933_s20  ;;  %v3697_v2 = vmul.f32 %v8068_v16, %v8315_v37  ;;  %v3456_v58 = vmul.f32 %v7926_v19, %v8334_v50  ;;  %v3530_v19 = vmul.f32 %v7967_v25, %v8343_v53 }
 0x7d0   : > { %v3554_v25 = vmul.f32 %v7944_v9, %v8326_v44 }
 0x7d3   : > { %3536 = vrot.lane.b32.xlu1 %v3529_v59, %s6003_s30  ;;  %3377 = vrot.lane.b32.xlu0 %v3369_v20, %s10933_s20  ;;  %v3721_v59 = vmul.f32 %v8072_v0, %v8318_v62  ;;  %v3745_v20 = vmul.f32 %v8077_v35, %v8315_v37 }
 0x7d7   : > { %3560 = vrot.lane.b32.xlu1 %v3553_v3, %s6005_s16  ;;  %3395 = vrot.lane.b32.xlu0 %v3389_v26, %s6056_s23  ;;  %v3505_v3 = vmul.f32 %v7938_v13, %v8315_v37  ;;  %v3769_v26 = vmul.f32 %v8082_v41, %v8318_v62  ;;  %v3552_v13 = vmul.f32 %v7944_v9, %v8312_v8 }
 0x7d8   : > { %v3578_v9 = vmul.f32 %v7948_v42, %v8343_v53 }
 0x7db   : > { %3584 = vrot.lane.b32.xlu1 %v3577_v61, %s6005_s16  ;;  %3399 = vrot.lane.b32.xlu0 %v3391_v40, %s6056_s23  ;;  %v3838_v61 = vmul.f32 %v8094_v57, %v8312_v8  ;;  %v3840_v40 = vmul.f32 %v8094_v57, %v8326_v44 }
 0x7df   : > { %3608 = vrot.lane.b32.xlu1 %v3601_v49, %s6006_s17  ;;  %3418 = vrot.lane.b32.xlu0 %v3412_v24, %s6056_s23  ;;  %v3862_v49 = vmul.f32 %v8227_v18, %v8334_v50  ;;  %v3576_v24 = vmul.f32 %v7948_v42, %v8334_v50  ;;  %v3911_v42 = vmul.f32 %v8102_v56, %v8318_v62 }
 0x7e3   : > { %3632 = vrot.lane.b32.xlu1 %v3625_v17, %s6006_s17  ;;  %3422 = vrot.lane.b32.xlu0 %v3414_v46, %s6056_s23  ;;  %v3863_v17 = vmul.f32 %v8227_v18, %v8318_v62 }
 0x7e7   : > { %3656 = vrot.lane.b32.xlu1 %v3649_v21, %s10933_s20  ;;  %3440 = vrot.lane.b32.xlu0 %v3434_v14, %s10934_s26  ;;  %v3887_v14 = vmul.f32 %v8098_v47, %v8315_v37 }
 0x7eb   : > { %3680 = vrot.lane.b32.xlu1 %v3673_v15, %s10933_s20  ;;  %3444 = vrot.lane.b32.xlu0 %v3436_v60, %s10934_s26  ;;  %v3600_v60 = vmul.f32 %v10935_v38, %v8312_v8 }
 0x7ef   : > { %3704 = vrot.lane.b32.xlu1 %v3697_v2, %s6056_s23  ;;  %3462 = vrot.lane.b32.xlu0 %v3456_v58, %s10934_s26 }
 0x7f3   : > { %3728 = vrot.lane.b32.xlu1 %v3721_v59, %s6056_s23  ;;  %3466 = vrot.lane.b32.xlu0 %v3458_v33, %s10934_s26  ;;  %v3602_v59 = vmul.f32 %v10935_v38, %v8326_v44  ;;  %v10945_v38 = vld [vmem:[#allocation58_spill] sm:$0xff] }
 0x7f7   : > { %3752 = vrot.lane.b32.xlu1 %v3745_v20, %s10934_s26  ;;  %3512 = vrot.lane.b32.xlu0 %v3505_v3, %s6003_s30  ;;  %v3935_v20 = vmul.f32 %v8107_v22, %v8315_v37 }
 0x7fb   : > { %3776 = vrot.lane.b32.xlu1 %v3769_v26, %s10934_s26  ;;  %3538 = vrot.lane.b32.xlu0 %v3530_v19, %s6003_s30  ;;  %v3624_v26 = vmul.f32 %v10936_v10, %v8334_v50 }
 0x7ff   : > { %3844 = vrot.lane.b32.xlu1 %v3838_v61, %s6003_s30  ;;  %3558 = vrot.lane.b32.xlu0 %v3552_v13, %s6005_s16  ;;  %v3959_v61 = vmul.f32 %v10945_v38, %v8318_v62 }
 0x803   : > { %3848 = vrot.lane.b32.xlu1 %v3840_v40, %s6003_s30  ;;  %3562 = vrot.lane.b32.xlu0 %v3554_v25, %s6005_s16  ;;  %v3626_v40 = vmul.f32 %v10936_v10, %v8343_v53  ;;  %v10951_v10 = vld [vmem:[#allocation31_spill] sm:$0xff] }
 0x807   : > { %3868 = vrot.lane.b32.xlu1 %v3862_v49, %s6003_s30  ;;  %3582 = vrot.lane.b32.xlu0 %v3576_v24, %s6005_s16  ;;  %v10948_v49 = vld [vmem:[#allocation56_spill] sm:$0xff] }
 0x808   : > { %v3983_v24 = vmul.f32 %v10948_v49, %v8315_v37 }
 0x809   : > { %v8507_v46 = vpop.permute.xlu1 %3194  ;;  %v8511_v21 = vpop.permute.xlu0 %3192 }
 0x80a   : > { %10937 = vst [vmem:[#allocation54_spill] sm:$0xff] %v8507_v46  ;;  %10938 = vst [vmem:[#allocation59_spill] sm:$0xff] %v8511_v21 }
 0x80b   : > { %3870 = vrot.lane.b32.xlu1 %v3863_v17, %s6003_s30  ;;  %3586 = vrot.lane.b32.xlu0 %v3578_v9, %s6005_s16  ;;  %v3648_v9 = vmul.f32 %v8060_v28, %v8312_v8 }
 0x80d   : > { %v8517_v15 = vpop.permute.xlu1 %3243  ;;  %v8521_v2 = vpop.permute.xlu0 %3196 }
 0x80e   : > { %10939 = vst [vmem:[#allocation78_spill] sm:$0xff] %v8517_v15  ;;  %10940 = vst [vmem:[#allocation79_spill] sm:$0xff] %v8521_v2 }
 0x80f   : > { %3894 = vrot.lane.b32.xlu1 %v3887_v14, %s6005_s16  ;;  %3606 = vrot.lane.b32.xlu0 %v3600_v60, %s6006_s17  ;;  %v4007_v60 = vmul.f32 %v10951_v10, %v8318_v62 }
 0x811   : > { %v8527_v58 = vpop.permute.xlu1 %3265  ;;  %v8531_v33 = vpop.permute.xlu0 %3241 }
 0x812   : > { %10941 = vst [vmem:[#allocation80_spill] sm:$0xff] %v8527_v58  ;;  %10942 = vst [vmem:[#allocation81_spill] sm:$0xff] %v8531_v33 }
 0x813   : > { %3918 = vrot.lane.b32.xlu1 %v3911_v42, %s6005_s16  ;;  %3610 = vrot.lane.b32.xlu0 %v3602_v59, %s6006_s17  ;;  %v3650_v59 = vmul.f32 %v8060_v28, %v8326_v44  ;;  %v10957_v28 = vld [vmem:[#allocation25_spill] sm:$0xff] }
 0x815   : > { %v8537_v3 = vpop.permute.xlu1 %3287  ;;  %v8541_v19 = vpop.permute.xlu0 %3245 }
 0x816   : > { %10943 = vst [vmem:[#allocation82_spill] sm:$0xff] %v8537_v3  ;;  %10944 = vst [vmem:[#allocation83_spill] sm:$0xff] %v8541_v19 }
 0x817   : > { %3942 = vrot.lane.b32.xlu1 %v3935_v20, %s6006_s17  ;;  %3630 = vrot.lane.b32.xlu0 %v3624_v26, %s6006_s17  ;;  %v10954_v26 = vld [vmem:[#allocation61_spill] sm:$0xff] }
 0x819   : > { %v8547_v13 = vpop.permute.xlu1 %3309  ;;  %v8551_v25 = vpop.permute.xlu0 %3263 }
 0x81a   : > { %10946 = vst [vmem:[#allocation58_spill] sm:$0xff] %v8547_v13  ;;  %10947 = vst [vmem:[#allocation84_spill] sm:$0xff] %v8551_v25 }
 0x81b   : > { %3966 = vrot.lane.b32.xlu1 %v3959_v61, %s6006_s17  ;;  %3634 = vrot.lane.b32.xlu0 %v3626_v40, %s6006_s17  ;;  %v4031_v61 = vmul.f32 %v10954_v26, %v8315_v37 }
 0x81d   : > { %v8557_v17 = vpop.permute.xlu1 %3331  ;;  %v8561_v14 = vpop.permute.xlu0 %3267 }
 0x81e   : > { %10949 = vst [vmem:[#allocation56_spill] sm:$0xff] %v8557_v17  ;;  %10950 = vst [vmem:[#allocation85_spill] sm:$0xff] %v8561_v14 }
 0x81f   : > { %3990 = vrot.lane.b32.xlu1 %v3983_v24, %s10933_s20  ;;  %3654 = vrot.lane.b32.xlu0 %v3648_v9, %s10933_s20  ;;  %v3672_v24 = vmul.f32 %v8064_v45, %v8334_v50 }
 0x821   : > { %v8567_v42 = vpop.permute.xlu1 %3353  ;;  %v8571_v20 = vpop.permute.xlu0 %3285 }
 0x822   : > { %10952 = vst [vmem:[#allocation31_spill] sm:$0xff] %v8567_v42  ;;  %10953 = vst [vmem:[#allocation86_spill] sm:$0xff] %v8571_v20  ;;  %v4055_v20 = vmul.f32 %v10957_v28, %v8318_v62 }
 0x823   : > { %4014 = vrot.lane.b32.xlu1 %v4007_v60, %s10933_s20  ;;  %3658 = vrot.lane.b32.xlu0 %v3650_v59, %s10933_s20  ;;  %v3674_v59 = vmul.f32 %v8064_v45, %v8343_v53  ;;  %v10963_v45 = vld [vmem:[#allocation10_spill] sm:$0xff] }
 0x825   : > { %v8577_v40 = vpop.permute.xlu1 %3375  ;;  %v8581_v9 = vpop.permute.xlu0 %3289 }
 0x826   : > { %10955 = vst [vmem:[#allocation61_spill] sm:$0xff] %v8577_v40  ;;  %10956 = vst [vmem:[#allocation87_spill] sm:$0xff] %v8581_v9  ;;  %v10960_v40 = vld [vmem:[#allocation36_spill] sm:$0xff] }
 0x827   : > { %4038 = vrot.lane.b32.xlu1 %v4031_v61, %s6056_s23  ;;  %3678 = vrot.lane.b32.xlu0 %v3672_v24, %s10933_s20  ;;  %v4079_v25 = vmul.f32 %v10960_v40, %v8315_v37  ;;  %v3696_v24 = vmul.f32 %v8068_v16, %v8312_v8 }
 0x829   : > { %v8587_v60 = vpop.permute.xlu1 %3397  ;;  %v8591_v42 = vpop.permute.xlu0 %3307 }
 0x82a   : > { %10958 = vst [vmem:[#allocation25_spill] sm:$0xff] %v8587_v60  ;;  %10959 = vst [vmem:[#allocation88_spill] sm:$0xff] %v8591_v42  ;;  %v4103_v60 = vmul.f32 %v10963_v45, %v8318_v62 }
 0x82b   : > { %4062 = vrot.lane.b32.xlu1 %v4055_v20, %s6056_s23  ;;  %3682 = vrot.lane.b32.xlu0 %v3674_v59, %s10933_s20  ;;  %v3698_v59 = vmul.f32 %v8068_v16, %v8326_v44 }
 0x82d   : > { %v8597_v61 = vpop.permute.xlu1 %3420  ;;  %v8601_v17 = vpop.permute.xlu0 %3311 }
 0x82e   : > { %10961 = vst [vmem:[#allocation36_spill] sm:$0xff] %v8597_v61  ;;  %10962 = vst [vmem:[#allocation89_spill] sm:$0xff] %v8601_v17  ;;  %v10966_v61 = vld [vmem:[#allocation46_spill] sm:$0xff] }
 0x82f   : > { %4086 = vrot.lane.b32.xlu1 %v4079_v25, %s10934_s26  ;;  %3702 = vrot.lane.b32.xlu0 %v3696_v24, %s6056_s23  ;;  %v4173_v33 = vmul.f32 %v10966_v61, %v8312_v8  ;;  %v3720_v24 = vmul.f32 %v8072_v0, %v8334_v50  ;;  %v4175_v16 = vmul.f32 %v10966_v61, %v8326_v44 }
 0x831   : > { %v8607_v20 = vpop.permute.xlu1 %3442  ;;  %v8611_v42 = vpop.permute.xlu0 %3329 }
 0x832   : > { %10964 = vst [vmem:[#allocation10_spill] sm:$0xff] %v8607_v20  ;;  %10965 = vst [vmem:[#allocation90_spill] sm:$0xff] %v8611_v42 }
 0x833   : > { %4110 = vrot.lane.b32.xlu1 %v4103_v60, %s10934_s26  ;;  %3706 = vrot.lane.b32.xlu0 %v3698_v59, %s6056_s23  ;;  %v3722_v59 = vmul.f32 %v8072_v0, %v8343_v53  ;;  %v4198_v0 = vmul.f32 %v8235_v52, %v8318_v62 }
 0x835   : > { %v8617_v25 = vpop.permute.xlu1 %3464  ;;  %v8621_v13 = vpop.permute.xlu0 %3333 }
 0x836   : > { %10967 = vst [vmem:[#allocation46_spill] sm:$0xff] %v8617_v25  ;;  %10968 = vst [vmem:[#allocation91_spill] sm:$0xff] %v8621_v13  ;;  %v4197_v25 = vmul.f32 %v8235_v52, %v8334_v50 }
 0x837   : > { %4179 = vrot.lane.b32.xlu1 %v4173_v33, %s6003_s30  ;;  %3726 = vrot.lane.b32.xlu0 %v3720_v24, %s6056_s23  ;;  %v3744_v24 = vmul.f32 %v8077_v35, %v8312_v8 }
 0x839   : > { %v8627_v60 = vpop.permute.xlu1 %3510  ;;  %v8631_v20 = vpop.permute.xlu0 %3351 }
 0x83a   : > { %10969 = vst [vmem:[#allocation92_spill] sm:$0xff] %v8627_v60  ;;  %10970 = vst [vmem:[#allocation93_spill] sm:$0xff] %v8631_v20 }
 0x83b   : > { %4183 = vrot.lane.b32.xlu1 %v4175_v16, %s6003_s30  ;;  %3730 = vrot.lane.b32.xlu0 %v3722_v59, %s6056_s23  ;;  %v3746_v59 = vmul.f32 %v8077_v35, %v8326_v44  ;;  %v10978_v35 = vld [vmem:[#allocation50_spill] sm:$0xff] }
 0x83d   : > { %v8637_v33 = vpop.permute.xlu1 %3514  ;;  %v8641_v42 = vpop.permute.xlu0 %3355 }
 0x83e   : > { %10971 = vst [vmem:[#allocation94_spill] sm:$0xff] %v8637_v33  ;;  %10972 = vst [vmem:[#allocation95_spill] sm:$0xff] %v8641_v42  ;;  %v10975_v42 = vld [vmem:[#allocation23_spill] sm:$0xff] }
 0x83f   : > { %4203 = vrot.lane.b32.xlu1 %v4197_v25, %s6003_s30  ;;  %3750 = vrot.lane.b32.xlu0 %v3744_v24, %s10934_s26  ;;  %v4222_v13 = vmul.f32 %v10975_v42, %v8315_v37  ;;  %v3768_v24 = vmul.f32 %v8082_v41, %v8334_v50 }
 0x841   : > { %v8647_v16 = vpop.permute.xlu1 %3534  ;;  %v8651_v20 = vpop.permute.xlu0 %3373 }
 0x842   : > { %10973 = vst [vmem:[#allocation96_spill] sm:$0xff] %v8647_v16  ;;  %10974 = vst [vmem:[#allocation97_spill] sm:$0xff] %v8651_v20  ;;  %v4246_v20 = vmul.f32 %v10978_v35, %v8318_v62  ;;  %v11006_v16 = vld [vmem:[#allocation33_spill] sm:$0xff] }
 0x843   : > { %4205 = vrot.lane.b32.xlu1 %v4198_v0, %s6003_s30  ;;  %3754 = vrot.lane.b32.xlu0 %v3746_v59, %s10934_s26  ;;  %v3770_v59 = vmul.f32 %v8082_v41, %v8343_v53  ;;  %v10983_v41 = vld [vmem:[#allocation60_spill] sm:$0xff]  ;;  %v5168_v60 = vmul.f32 %v11006_v16, %v8326_v44 }
 0x845   : > { %v8657_v25 = vpop.permute.xlu1 %3536  ;;  %v8661_v17 = vpop.permute.xlu0 %3377 }
 0x846   : > { %10976 = vst [vmem:[#allocation23_spill] sm:$0xff] %v8657_v25  ;;  %10977 = vst [vmem:[#allocation98_spill] sm:$0xff] %v8661_v17  ;;  %v10981_v17 = vld [vmem:[#allocation49_spill] sm:$0xff] }
 0x847   : > { %4229 = vrot.lane.b32.xlu1 %v4222_v13, %s6005_s16  ;;  %3774 = vrot.lane.b32.xlu0 %v3768_v24, %s10934_s26  ;;  %v4270_v3 = vmul.f32 %v10981_v17, %v8315_v37  ;;  %v3839_v24 = vmul.f32 %v8094_v57, %v8315_v37  ;;  %v10986_v57 = vld [vmem:[#allocation51_spill] sm:$0xff] }
 0x849   : > { %v8667_v0 = vpop.permute.xlu1 %3560  ;;  %v8671_v21 = vpop.permute.xlu0 %3395 }
 0x84a   : > { %10979 = vst [vmem:[#allocation50_spill] sm:$0xff] %v8667_v0  ;;  %10980 = vst [vmem:[#allocation99_spill] sm:$0xff] %v8671_v21  ;;  %v4294_v21 = vmul.f32 %v10983_v41, %v8318_v62 }
 0x84b   : > { %4253 = vrot.lane.b32.xlu1 %v4246_v20, %s6005_s16  ;;  %3778 = vrot.lane.b32.xlu0 %v3770_v59, %s10934_s26  ;;  %v3864_v59 = vmul.f32 %v8227_v18, %v8343_v53  ;;  %v10989_v18 = vld [vmem:[#allocation53_spill] sm:$0xff] }
 0x84d   : > { %v8677_v13 = vpop.permute.xlu1 %3584  ;;  %v8681_v9 = vpop.permute.xlu0 %3399 }
 0x84e   : > { %10982 = vst [vmem:[#allocation49_spill] sm:$0xff] %v8681_v9  ;;  %v4318_v9 = vmul.f32 %v10986_v57, %v8315_v37 }
 0x84f   : > { %4277 = vrot.lane.b32.xlu1 %v4270_v3, %s6006_s17  ;;  %3846 = vrot.lane.b32.xlu0 %v3839_v24, %s6003_s30  ;;  %v3886_v24 = vmul.f32 %v8098_v47, %v8312_v8 }
 0x851   : > { %v8687_v20 = vpop.permute.xlu1 %3608  ;;  %v8691_v58 = vpop.permute.xlu0 %3418 }
 0x852   : > { %10984 = vst [vmem:[#allocation60_spill] sm:$0xff] %v8687_v20  ;;  %10985 = vst [vmem:[#allocation100_spill] sm:$0xff] %v8691_v58  ;;  %v4497_v58 = vmul.f32 %v10989_v18, %v8315_v37 }
 0x853   : > { %4301 = vrot.lane.b32.xlu1 %v4294_v21, %s6006_s17  ;;  %3872 = vrot.lane.b32.xlu0 %v3864_v59, %s6003_s30  ;;  %v3888_v59 = vmul.f32 %v8098_v47, %v8326_v44  ;;  %v4522_v47 = vmul.f32 %v8237_v11, %v8343_v53 }
 0x855   : > { %v8697_v3 = vpop.permute.xlu1 %3632  ;;  %v8701_v14 = vpop.permute.xlu0 %3422 }
 0x856   : > { %10987 = vst [vmem:[#allocation51_spill] sm:$0xff] %v8697_v3  ;;  %10988 = vst [vmem:[#allocation101_spill] sm:$0xff] %v8701_v14  ;;  %v4496_v14 = vmul.f32 %v10989_v18, %v8312_v8 }
 0x857   : > { %4325 = vrot.lane.b32.xlu1 %v4318_v9, %s10933_s20  ;;  %3892 = vrot.lane.b32.xlu0 %v3886_v24, %s6005_s16  ;;  %v3910_v24 = vmul.f32 %v8102_v56, %v8334_v50 }
 0x859   : > { %v8707_v21 = vpop.permute.xlu1 %3656  ;;  %v8711_v15 = vpop.permute.xlu0 %3440 }
 0x85a   : > { %10990 = vst [vmem:[#allocation53_spill] sm:$0xff] %v8707_v21  ;;  %10991 = vst [vmem:[#allocation102_spill] sm:$0xff] %v8711_v15 }
 0x85b   : > { %4504 = vrot.lane.b32.xlu1 %v4497_v58, %s6003_s30  ;;  %3896 = vrot.lane.b32.xlu0 %v3888_v59, %s6005_s16  ;;  %v3912_v59 = vmul.f32 %v8102_v56, %v8343_v53 }
 0x85d   : > { %v8717_v9 = vpop.permute.xlu1 %3680  ;;  %v8721_v19 = vpop.permute.xlu0 %3444 }
 0x85e   : > { %10992 = vst [vmem:[#allocation103_spill] sm:$0xff] %v8717_v9  ;;  %10993 = vst [vmem:[#allocation104_spill] sm:$0xff] %v8721_v19  ;;  %v10996_v19 = vld [vmem:[#allocation27_spill] sm:$0xff] }
 0x85f   : > { %4502 = vrot.lane.b32.xlu1 %v4496_v14, %s6003_s30  ;;  %3916 = vrot.lane.b32.xlu0 %v3910_v24, %s6005_s16  ;;  %v4832_v46 = vmul.f32 %v10996_v19, %v8326_v44  ;;  %v3934_v24 = vmul.f32 %v8107_v22, %v8312_v8  ;;  %v4830_v56 = vmul.f32 %v10996_v19, %v8312_v8 }
 0x861   : > { %v8727_v58 = vpop.permute.xlu1 %3704  ;;  %v8731_v15 = vpop.permute.xlu0 %3462 }
 0x862   : > { %10994 = vst [vmem:[#allocation105_spill] sm:$0xff] %v8727_v58  ;;  %10995 = vst [vmem:[#allocation106_spill] sm:$0xff] %v8731_v15 }
 0x863   : > { %4530 = vrot.lane.b32.xlu1 %v4522_v47, %s6003_s30  ;;  %3920 = vrot.lane.b32.xlu0 %v3912_v59, %s6005_s16  ;;  %v3936_v59 = vmul.f32 %v8107_v22, %v8326_v44  ;;  %v4856_v22 = vmul.f32 %v8241_v51, %v8343_v53 }
 0x865   : > { %v8737_v14 = vpop.permute.xlu1 %3728  ;;  %v8741_v2 = vpop.permute.xlu0 %3466 }
 0x866   : > { %10997 = vst [vmem:[#allocation27_spill] sm:$0xff] %v8737_v14  ;;  %10998 = vst [vmem:[#allocation107_spill] sm:$0xff] %v8741_v2  ;;  %v11001_v2 = vld [vmem:[#allocation32_spill] sm:$0xff] }
 0x867   : > { %4840 = vrot.lane.b32.xlu1 %v4832_v46, %s6003_s30  ;;  %3940 = vrot.lane.b32.xlu0 %v3934_v24, %s6006_s17  ;;  %v4546_v5 = vmul.f32 %v11001_v2, %v8326_v44  ;;  %v3958_v24 = vmul.f32 %v10945_v38, %v8334_v50 }
 0x869   : > { %v8747_v47 = vpop.permute.xlu1 %3752  ;;  %v8751_v15 = vpop.permute.xlu0 %3512 }
 0x86a   : > { %10999 = vst [vmem:[#allocation108_spill] sm:$0xff] %v8747_v47  ;;  %11000 = vst [vmem:[#allocation109_spill] sm:$0xff] %v8751_v15 }
 0x86b   : > { %4836 = vrot.lane.b32.xlu1 %v4830_v56, %s6003_s30  ;;  %3944 = vrot.lane.b32.xlu0 %v3936_v59, %s6006_s17  ;;  %v3960_v59 = vmul.f32 %v10945_v38, %v8343_v53  ;;  %v4854_v38 = vmul.f32 %v8241_v51, %v8334_v50 }
 0x86d   : > { %v8757_v46 = vpop.permute.xlu1 %3776  ;;  %v8761_v27 = vpop.permute.xlu0 %3538 }
 0x86e   : > { %11002 = vst [vmem:[#allocation32_spill] sm:$0xff] %v8757_v46  ;;  %11003 = vst [vmem:[#allocation110_spill] sm:$0xff] %v8761_v27 }
 0x86f   : > { %4554 = vrot.lane.b32.xlu1 %v4546_v5, %s6005_s16  ;;  %3964 = vrot.lane.b32.xlu0 %v3958_v24, %s6006_s17  ;;  %v3982_v24 = vmul.f32 %v10948_v49, %v8312_v8 }
 0x871   : > { %v8767_v56 = vpop.permute.xlu1 %3844  ;;  %v8771_v63 = vpop.permute.xlu0 %3558 }
 0x872   : > { %11004 = vst [vmem:[#allocation111_spill] sm:$0xff] %v8767_v56  ;;  %11005 = vst [vmem:[#allocation112_spill] sm:$0xff] %v8771_v63  ;;  %v11009_v56 = vld [vmem:[#allocation9_spill] sm:$0xff] }
 0x873   : > { %4864 = vrot.lane.b32.xlu1 %v4856_v22, %s6003_s30  ;;  %3968 = vrot.lane.b32.xlu0 %v3960_v59, %s6006_s17  ;;  %v3984_v59 = vmul.f32 %v10948_v49, %v8326_v44  ;;  %v4569_v47 = vmul.f32 %v11009_v56, %v8318_v62  ;;  %v4879_v49 = vmul.f32 %v8245_v55, %v8315_v37 }
 0x875   : > { %v8777_v5 = vpop.permute.xlu1 %3848  ;;  %v8781_v46 = vpop.permute.xlu0 %3562 }
 0x877   : > { %5176 = vrot.lane.b32.xlu1 %v5168_v60, %s6003_s30  ;;  %3988 = vrot.lane.b32.xlu0 %v3982_v24, %s10933_s20  ;;  %v4006_v24 = vmul.f32 %v10951_v10, %v8334_v50 }
 0x879   : > { %v8787_v22 = vpop.permute.xlu1 %3868  ;;  %v8791_v63 = vpop.permute.xlu0 %3582 }
 0x87a   : > { %11007 = vst [vmem:[#allocation33_spill] sm:$0xff] %v8787_v22  ;;  %11008 = vst [vmem:[#allocation113_spill] sm:$0xff] %v8791_v63  ;;  %v11013_v63 = vld [vmem:[#allocation24_spill] sm:$0xff] }
 0x87b   : > { %4860 = vrot.lane.b32.xlu1 %v4854_v38, %s6003_s30  ;;  %3992 = vrot.lane.b32.xlu0 %v3984_v59, %s10933_s20  ;;  %v4008_v59 = vmul.f32 %v10951_v10, %v8343_v53  ;;  %v5191_v58 = vmul.f32 %v11013_v63, %v8318_v62  ;;  %v4568_v10 = vmul.f32 %v11009_v56, %v8334_v50 }
 0x87c   : > { %v5190_v21 = vmul.f32 %v11013_v63, %v8334_v50 }
 0x87d   : > { %v8797_v60 = vpop.permute.xlu1 %3870  ;;  %v8801_v14 = vpop.permute.xlu0 %3586 }
 0x87e   : > { %11010 = vst [vmem:[#allocation9_spill] sm:$0xff] %v8797_v60 }
 0x87f   : > { %4576 = vrot.lane.b32.xlu1 %v4569_v47, %s6005_s16  ;;  %4012 = vrot.lane.b32.xlu0 %v4006_v24, %s10933_s20  ;;  %v4030_v24 = vmul.f32 %v10954_v26, %v8312_v8 }
 0x881   : > { %v8807_v38 = vpop.permute.xlu1 %3894  ;;  %v8811_v22 = vpop.permute.xlu0 %3606 }
 0x882   : > { %11011 = vst [vmem:[#allocation114_spill] sm:$0xff] %v8807_v38  ;;  %11012 = vst [vmem:[#allocation115_spill] sm:$0xff] %v8811_v22 }
 0x883   : > { %4886 = vrot.lane.b32.xlu1 %v4879_v49, %s6005_s16  ;;  %4016 = vrot.lane.b32.xlu0 %v4008_v59, %s10933_s20  ;;  %v4032_v59 = vmul.f32 %v10954_v26, %v8326_v44  ;;  %v11019_v26 = vld [vmem:[#allocation39_spill] sm:$0xff] }
 0x885   : > { %v8817_v47 = vpop.permute.xlu1 %3918  ;;  %v8821_v9 = vpop.permute.xlu0 %3610 }
 0x886   : > { %11014 = vst [vmem:[#allocation24_spill] sm:$0xff] %v8817_v47 }
 0x887   : > { %5198 = vrot.lane.b32.xlu1 %v5191_v58, %s6003_s30  ;;  %4036 = vrot.lane.b32.xlu0 %v4030_v24, %s6056_s23  ;;  %v4054_v24 = vmul.f32 %v10957_v28, %v8334_v50 }
 0x889   : > { %v8827_v49 = vpop.permute.xlu1 %3942  ;;  %v8831_v22 = vpop.permute.xlu0 %3630 }
 0x88a   : > { %11015 = vst [vmem:[#allocation116_spill] sm:$0xff] %v8827_v49  ;;  %11016 = vst [vmem:[#allocation117_spill] sm:$0xff] %v8831_v22  ;;  %v4594_v22 = vmul.f32 %v11019_v26, %v8326_v44 }
 0x88b   : > { %4574 = vrot.lane.b32.xlu1 %v4568_v10, %s6005_s16  ;;  %4040 = vrot.lane.b32.xlu0 %v4032_v59, %s6056_s23  ;;  %v4056_v59 = vmul.f32 %v10957_v28, %v8343_v53  ;;  %v11024_v28 = vld [vmem:[#allocation29_spill] sm:$0xff] }
 0x88d   : > { %v8837_v58 = vpop.permute.xlu1 %3966  ;;  %v8841_v47 = vpop.permute.xlu0 %3634 }
 0x88e   : > { %11017 = vst [vmem:[#allocation118_spill] sm:$0xff] %v8837_v58  ;;  %11018 = vst [vmem:[#allocation119_spill] sm:$0xff] %v8841_v47  ;;  %v4904_v58 = vmul.f32 %v8249_v36, %v8343_v53 }
 0x88f   : > { %5196 = vrot.lane.b32.xlu1 %v5190_v21, %s6003_s30  ;;  %4060 = vrot.lane.b32.xlu0 %v4054_v24, %s6056_s23  ;;  %v4078_v24 = vmul.f32 %v10960_v40, %v8312_v8 }
 0x891   : > { %v8847_v10 = vpop.permute.xlu1 %3990  ;;  %v8851_v49 = vpop.permute.xlu0 %3654 }
 0x892   : > { %11020 = vst [vmem:[#allocation39_spill] sm:$0xff] %v8847_v10  ;;  %11021 = vst [vmem:[#allocation120_spill] sm:$0xff] %v8851_v49  ;;  %v5216_v49 = vmul.f32 %v11024_v28, %v8326_v44 }
 0x893   : > { %4602 = vrot.lane.b32.xlu1 %v4594_v22, %s6006_s17  ;;  %4064 = vrot.lane.b32.xlu0 %v4056_v59, %s6056_s23  ;;  %v4080_v59 = vmul.f32 %v10960_v40, %v8326_v44  ;;  %v4617_v40 = vmul.f32 %v8253_v4, %v8318_v62 }
 0x895   : > { %v8857_v21 = vpop.permute.xlu1 %4014  ;;  %v8861_v3 = vpop.permute.xlu0 %3658 }
 0x896   : > { %11022 = vst [vmem:[#allocation121_spill] sm:$0xff] %v8857_v21  ;;  %11023 = vst [vmem:[#allocation122_spill] sm:$0xff] %v8861_v3  ;;  %v4902_v21 = vmul.f32 %v8249_v36, %v8334_v50 }
 0x897   : > { %4912 = vrot.lane.b32.xlu1 %v4904_v58, %s6005_s16  ;;  %4084 = vrot.lane.b32.xlu0 %v4078_v24, %s10934_s26  ;;  %v4102_v24 = vmul.f32 %v10963_v45, %v8334_v50 }
 0x899   : > { %v8867_v22 = vpop.permute.xlu1 %4038  ;;  %v8871_v10 = vpop.permute.xlu0 %3678 }
 0x89a   : > { %11025 = vst [vmem:[#allocation29_spill] sm:$0xff] %v8867_v22  ;;  %11026 = vst [vmem:[#allocation123_spill] sm:$0xff] %v8871_v10 }
 0x89b   : > { %5224 = vrot.lane.b32.xlu1 %v5216_v49, %s6005_s16  ;;  %4088 = vrot.lane.b32.xlu0 %v4080_v59, %s10934_s26  ;;  %v4104_v59 = vmul.f32 %v10963_v45, %v8343_v53  ;;  %v5239_v45 = vmul.f32 %v8219_v39, %v8318_v62 }
 0x89d   : > { %v8877_v58 = vpop.permute.xlu1 %4062  ;;  %v8881_v3 = vpop.permute.xlu0 %3682 }
 0x89e   : > { %11027 = vst [vmem:[#allocation124_spill] sm:$0xff] %v8877_v58  ;;  %11028 = vst [vmem:[#allocation125_spill] sm:$0xff] %v8881_v3  ;;  %v11030_v58 = vld [vmem:[#allocation15_spill] sm:$0xff] }
 0x89f   : > { %4908 = vrot.lane.b32.xlu1 %v4902_v21, %s6005_s16  ;;  %4108 = vrot.lane.b32.xlu0 %v4102_v24, %s10934_s26  ;;  %v4927_v22 = vmul.f32 %v11030_v58, %v8315_v37  ;;  %v4174_v24 = vmul.f32 %v10966_v61, %v8315_v37  ;;  %v4616_v61 = vmul.f32 %v8253_v4, %v8334_v50 }
 0x8a1   : > { %v8887_v49 = vpop.permute.xlu1 %4086  ;;  %v8891_v10 = vpop.permute.xlu0 %3702 }
 0x8a2   : > { %11029 = vst [vmem:[#allocation126_spill] sm:$0xff] %v8891_v10 }
 0x8a3   : > { %4624 = vrot.lane.b32.xlu1 %v4617_v40, %s6006_s17  ;;  %4112 = vrot.lane.b32.xlu0 %v4104_v59, %s10934_s26  ;;  %v4199_v59 = vmul.f32 %v8235_v52, %v8343_v53  ;;  %v5238_v52 = vmul.f32 %v8219_v39, %v8334_v50 }
 0x8a5   : > { %v8897_v21 = vpop.permute.xlu1 %4110  ;;  %v8901_v3 = vpop.permute.xlu0 %3706 }
 0x8a6   : > { %11031 = vst [vmem:[#allocation15_spill] sm:$0xff] %v8897_v21 }
 0x8a7   : > { %4934 = vrot.lane.b32.xlu1 %v4927_v22, %s6006_s17  ;;  %4181 = vrot.lane.b32.xlu0 %v4174_v24, %s6003_s30  ;;  %v4221_v24 = vmul.f32 %v10975_v42, %v8312_v8 }
 0x8a9   : > { %v8907_v40 = vpop.permute.xlu1 %4179  ;;  %v8911_v10 = vpop.permute.xlu0 %3726 }
 0x8aa   : > { %11032 = vst [vmem:[#allocation127_spill] sm:$0xff] %v8907_v40  ;;  %11033 = vst [vmem:[#allocation128_spill] sm:$0xff] %v8911_v10 }
 0x8ab   : > { %5246 = vrot.lane.b32.xlu1 %v5239_v45, %s6005_s16  ;;  %4207 = vrot.lane.b32.xlu0 %v4199_v59, %s6003_s30  ;;  %v4223_v59 = vmul.f32 %v10975_v42, %v8326_v44  ;;  %v4952_v42 = vmul.f32 %v8221_v23, %v8343_v53 }
 0x8ad   : > { %v8917_v22 = vpop.permute.xlu1 %4183  ;;  %v8921_v21 = vpop.permute.xlu0 %3730 }
 0x8ae   : > { %11034 = vst [vmem:[#allocation129_spill] sm:$0xff] %v8917_v22  ;;  %v4642_v22 = vmul.f32 %v8257_v43, %v8326_v44 }
 0x8af   : > { %4622 = vrot.lane.b32.xlu1 %v4616_v61, %s6006_s17  ;;  %4227 = vrot.lane.b32.xlu0 %v4221_v24, %s6005_s16  ;;  %v4245_v24 = vmul.f32 %v10978_v35, %v8334_v50 }
 0x8b1   : > { %v8927_v45 = vpop.permute.xlu1 %4203  ;;  %v8931_v40 = vpop.permute.xlu0 %3750 }
 0x8b2   : > { %11035 = vst [vmem:[#allocation130_spill] sm:$0xff] %v8927_v45  ;;  %11036 = vst [vmem:[#allocation131_spill] sm:$0xff] %v8931_v40 }
 0x8b3   : > { %5244 = vrot.lane.b32.xlu1 %v5238_v52, %s6005_s16  ;;  %4231 = vrot.lane.b32.xlu0 %v4223_v59, %s6005_s16  ;;  %v4247_v59 = vmul.f32 %v10978_v35, %v8343_v53  ;;  %v4950_v35 = vmul.f32 %v8221_v23, %v8334_v50 }
 0x8b5   : > { %v8937_v61 = vpop.permute.xlu1 %4205  ;;  %v8941_v10 = vpop.permute.xlu0 %3754 }
 0x8b6   : > { %11037 = vst [vmem:[#allocation132_spill] sm:$0xff] %v8937_v61  ;;  %v5264_v61 = vmul.f32 %v8225_v1, %v8326_v44 }
 0x8b7   : > { %4650 = vrot.lane.b32.xlu1 %v4642_v22, %s10933_s20  ;;  %4251 = vrot.lane.b32.xlu0 %v4245_v24, %s6005_s16  ;;  %v4269_v24 = vmul.f32 %v10981_v17, %v8312_v8 }
 0x8b9   : > { %v8947_v52 = vpop.permute.xlu1 %4229  ;;  %v8951_v45 = vpop.permute.xlu0 %3774 }
 0x8ba   : > { %11038 = vst [vmem:[#allocation133_spill] sm:$0xff] %v8947_v52  ;;  %11039 = vst [vmem:[#allocation134_spill] sm:$0xff] %v8951_v45 }
 0x8bb   : > { %4960 = vrot.lane.b32.xlu1 %v4952_v42, %s6006_s17  ;;  %4255 = vrot.lane.b32.xlu0 %v4247_v59, %s6005_s16  ;;  %v4271_v59 = vmul.f32 %v10981_v17, %v8326_v44  ;;  %v4665_v17 = vmul.f32 %v8261_v7, %v8318_v62 }
 0x8bd   : > { %v8957_v22 = vpop.permute.xlu1 %4253  ;;  %v8961_v40 = vpop.permute.xlu0 %3778 }
 0x8be   : > { %11040 = vst [vmem:[#allocation135_spill] sm:$0xff] %v8957_v22  ;;  %v11043_v22 = vld [vmem:[#allocation52_spill] sm:$0xff] }
 0x8bf   : > { %5272 = vrot.lane.b32.xlu1 %v5264_v61, %s6006_s17  ;;  %4275 = vrot.lane.b32.xlu0 %v4269_v24, %s6006_s17  ;;  %v4342_v45 = vmul.f32 %v11043_v22, %v8318_v62  ;;  %v4293_v24 = vmul.f32 %v10983_v41, %v8334_v50 }
 0x8c1   : > { %v8967_v42 = vpop.permute.xlu1 %4277  ;;  %v8971_v52 = vpop.permute.xlu0 %3846 }
 0x8c2   : > { %11041 = vst [vmem:[#allocation136_spill] sm:$0xff] %v8967_v42  ;;  %11042 = vst [vmem:[#allocation137_spill] sm:$0xff] %v8971_v52 }
 0x8c3   : > { %4956 = vrot.lane.b32.xlu1 %v4950_v35, %s6006_s17  ;;  %4279 = vrot.lane.b32.xlu0 %v4271_v59, %s6006_s17  ;;  %v4295_v59 = vmul.f32 %v10983_v41, %v8343_v53  ;;  %v5287_v41 = vmul.f32 %v8265_v12, %v8318_v62 }
 0x8c5   : > { %v8977_v61 = vpop.permute.xlu1 %4301  ;;  %v8981_v1 = vpop.permute.xlu0 %3872 }
 0x8c6   : > { %11044 = vst [vmem:[#allocation52_spill] sm:$0xff] %v8977_v61  ;;  %v4975_v61 = vmul.f32 %v8229_v34, %v8315_v37 }
 0x8c7   : > { %4349 = vrot.lane.b32.xlu1 %v4342_v45, %s10933_s20  ;;  %4299 = vrot.lane.b32.xlu0 %v4293_v24, %s6006_s17  ;;  %v4317_v24 = vmul.f32 %v10986_v57, %v8312_v8 }
 0x8c9   : > { %v8987_v35 = vpop.permute.xlu1 %4325  ;;  %v8991_v42 = vpop.permute.xlu0 %3892 }
 0x8ca   : > { %11045 = vst [vmem:[#allocation138_spill] sm:$0xff] %v8987_v35  ;;  %11046 = vst [vmem:[#allocation139_spill] sm:$0xff] %v8991_v42 }
 0x8cb   : > { %4672 = vrot.lane.b32.xlu1 %v4665_v17, %s10933_s20  ;;  %4303 = vrot.lane.b32.xlu0 %v4295_v59, %s6006_s17  ;;  %v4319_v59 = vmul.f32 %v10986_v57, %v8326_v44  ;;  %v5286_v57 = vmul.f32 %v8265_v12, %v8334_v50 }
 0x8cd   : > { %v8997_v45 = vpop.permute.xlu1 %4504  ;;  %v9001_v23 = vpop.permute.xlu0 %3896 }
 0x8ce   : > { %11047 = vst [vmem:[#allocation140_spill] sm:$0xff] %v8997_v45  ;;  %v4664_v45 = vmul.f32 %v8261_v7, %v8334_v50 }
 0x8cf   : > { %4982 = vrot.lane.b32.xlu1 %v4975_v61, %s10933_s20  ;;  %4323 = vrot.lane.b32.xlu0 %v4317_v24, %s10933_s20  ;;  %v4341_v24 = vmul.f32 %v11043_v22, %v8334_v50 }
 0x8d1   : > { %v9007_v17 = vpop.permute.xlu1 %4502  ;;  %v9011_v35 = vpop.permute.xlu0 %3916 }
 0x8d2   : > { %11048 = vst [vmem:[#allocation141_spill] sm:$0xff] %v9007_v17  ;;  %11049 = vst [vmem:[#allocation142_spill] sm:$0xff] %v9011_v35 }
 0x8d3   : > { %5294 = vrot.lane.b32.xlu1 %v5287_v41, %s6006_s17  ;;  %4327 = vrot.lane.b32.xlu0 %v4319_v59, %s10933_s20  ;;  %v4498_v59 = vmul.f32 %v10989_v18, %v8326_v44  ;;  %v4690_v18 = vmul.f32 %v8239_v32, %v8326_v44 }
 0x8d5   : > { %v9017_v61 = vpop.permute.xlu1 %4530  ;;  %v9021_v42 = vpop.permute.xlu0 %3920 }
 0x8d6   : > { %11050 = vst [vmem:[#allocation143_spill] sm:$0xff] %v9017_v61  ;;  %11051 = vst [vmem:[#allocation144_spill] sm:$0xff] %v9021_v42  ;;  %v4367_v61 = vmul.f32 %v8233_v6, %v8326_v44 }
 0x8d7   : > { %4670 = vrot.lane.b32.xlu1 %v4664_v45, %s10933_s20  ;;  %4347 = vrot.lane.b32.xlu0 %v4341_v24, %s10933_s20  ;;  %v4521_v24 = vmul.f32 %v8237_v11, %v8318_v62 }
 0x8d9   : > { %v9027_v41 = vpop.permute.xlu1 %4840  ;;  %v9031_v17 = vpop.permute.xlu0 %3940 }
 0x8da   : > { %11052 = vst [vmem:[#allocation145_spill] sm:$0xff] %v9027_v41  ;;  %11053 = vst [vmem:[#allocation146_spill] sm:$0xff] %v9031_v17 }
 0x8db   : > { %5292 = vrot.lane.b32.xlu1 %v5286_v57, %s6006_s17  ;;  %4506 = vrot.lane.b32.xlu0 %v4498_v59, %s6003_s30  ;;  %v4831_v59 = vmul.f32 %v10996_v19, %v8315_v37  ;;  %v5312_v19 = vmul.f32 %v8243_v48, %v8326_v44 }
 0x8dd   : > { %v9037_v45 = vpop.permute.xlu1 %4836  ;;  %v9041_v35 = vpop.permute.xlu0 %3944 }
 0x8de   : > { %11054 = vst [vmem:[#allocation147_spill] sm:$0xff] %v9037_v45  ;;  %11055 = vst [vmem:[#allocation148_spill] sm:$0xff] %v9041_v35  ;;  %v5000_v45 = vmul.f32 %v8269_v54, %v8343_v53 }
 0x8df   : > { %4375 = vrot.lane.b32.xlu1 %v4367_v61, %s6056_s23  ;;  %4528 = vrot.lane.b32.xlu0 %v4521_v24, %s6003_s30  ;;  %v4520_v24 = vmul.f32 %v8237_v11, %v8334_v50  ;;  %v4688_v11 = vmul.f32 %v8239_v32, %v8312_v8 }
 0x8e1   : > { %v9047_v57 = vpop.permute.xlu1 %4554  ;;  %v9051_v41 = vpop.permute.xlu0 %3964 }
 0x8e2   : > { %11056 = vst [vmem:[#allocation149_spill] sm:$0xff] %v9047_v57  ;;  %11057 = vst [vmem:[#allocation150_spill] sm:$0xff] %v9051_v41 }
 0x8e3   : > { %4698 = vrot.lane.b32.xlu1 %v4690_v18, %s6056_s23  ;;  %4838 = vrot.lane.b32.xlu0 %v4831_v59, %s6003_s30  ;;  %v4545_v59 = vmul.f32 %v11001_v2, %v8315_v37 }
 0x8e5   : > { %v9057_v61 = vpop.permute.xlu1 %4864  ;;  %v9061_v17 = vpop.permute.xlu0 %3968 }
 0x8e6   : > { %11058 = vst [vmem:[#allocation151_spill] sm:$0xff] %v9057_v61 }
 0x8e7   : > { %5008 = vrot.lane.b32.xlu1 %v5000_v45, %s10933_s20  ;;  %4526 = vrot.lane.b32.xlu0 %v4520_v24, %s6003_s30  ;;  %v4855_v24 = vmul.f32 %v8241_v51, %v8318_v62  ;;  %v4391_v51 = vmul.f32 %v8247_v29, %v8343_v53 }
 0x8e9   : > { %v9067_v18 = vpop.permute.xlu1 %5176  ;;  %v9071_v57 = vpop.permute.xlu0 %3988 }
 0x8ea   : > { %11059 = vst [vmem:[#allocation152_spill] sm:$0xff] %v9067_v18  ;;  %11060 = vst [vmem:[#allocation153_spill] sm:$0xff] %v9071_v57  ;;  %v5310_v18 = vmul.f32 %v8243_v48, %v8312_v8 }
 0x8eb   : > { %5320 = vrot.lane.b32.xlu1 %v5312_v19, %s10933_s20  ;;  %4552 = vrot.lane.b32.xlu0 %v4545_v59, %s6005_s16  ;;  %v5167_v59 = vmul.f32 %v11006_v16, %v8315_v37 }
 0x8ed   : > { %v9077_v45 = vpop.permute.xlu1 %4860  ;;  %v9081_v61 = vpop.permute.xlu0 %3992 }
 0x8ee   : > { %11061 = vst [vmem:[#allocation154_spill] sm:$0xff] %v9077_v45 }
 0x8ef   : > { %4694 = vrot.lane.b32.xlu1 %v4688_v11, %s6056_s23  ;;  %4862 = vrot.lane.b32.xlu0 %v4855_v24, %s6003_s30  ;;  %v4544_v24 = vmul.f32 %v11001_v2, %v8312_v8  ;;  %v5024_v2 = vmul.f32 %v8251_v30, %v8326_v44 }
 0x8f1   : > { %v9087_v19 = vpop.permute.xlu1 %4576  ;;  %v9091_v57 = vpop.permute.xlu0 %4012 }
 0x8f2   : > { %11062 = vst [vmem:[#allocation155_spill] sm:$0xff] %v9087_v19  ;;  %11063 = vst [vmem:[#allocation156_spill] sm:$0xff] %v9091_v57  ;;  %v4714_v19 = vmul.f32 %v8273_v31, %v8343_v53 }
 0x8f3   : > { %5316 = vrot.lane.b32.xlu1 %v5310_v18, %s10933_s20  ;;  %5174 = vrot.lane.b32.xlu0 %v5167_v59, %s6003_s30  ;;  %v5166_v59 = vmul.f32 %v11006_v16, %v8312_v8  ;;  %v11068_v16 = vld [vmem:[#allocation38_spill] sm:$0xff] }
 0x8f4   : > { %v5334_v41 = vmul.f32 %v11068_v16, %v8334_v50 }
 0x8f5   : > { %v9097_v11 = vpop.permute.xlu1 %4886  ;;  %v9101_v45 = vpop.permute.xlu0 %4016 }
 0x8f6   : > { %11064 = vst [vmem:[#allocation157_spill] sm:$0xff] %v9097_v11 }
 0x8f7   : > { %4399 = vrot.lane.b32.xlu1 %v4391_v51, %s6056_s23  ;;  %4550 = vrot.lane.b32.xlu0 %v4544_v24, %s6005_s16  ;;  %v4570_v24 = vmul.f32 %v11009_v56, %v8343_v53  ;;  %v4712_v56 = vmul.f32 %v8273_v31, %v8334_v50 }
 0x8f9   : > { %v9107_v18 = vpop.permute.xlu1 %5198  ;;  %v9111_v57 = vpop.permute.xlu0 %4036 }
 0x8fa   : > { %11065 = vst [vmem:[#allocation158_spill] sm:$0xff] %v9107_v18  ;;  %11066 = vst [vmem:[#allocation159_spill] sm:$0xff] %v9111_v57  ;;  %v5336_v18 = vmul.f32 %v11068_v16, %v8343_v53 }
 0x8fb   : > { %4722 = vrot.lane.b32.xlu1 %v4714_v19, %s6056_s23  ;;  %5172 = vrot.lane.b32.xlu0 %v5166_v59, %s6003_s30  ;;  %v4880_v59 = vmul.f32 %v8245_v55, %v8326_v44 }
 0x8fd   : > { %v9117_v51 = vpop.permute.xlu1 %4574  ;;  %v9121_v11 = vpop.permute.xlu0 %4040 }
 0x8fe   : > { %11067 = vst [vmem:[#allocation160_spill] sm:$0xff] %v9117_v51 }
 0x8ff   : > { %5032 = vrot.lane.b32.xlu1 %v5024_v2, %s6056_s23  ;;  %4578 = vrot.lane.b32.xlu0 %v4570_v24, %s6005_s16  ;;  %v5192_v24 = vmul.f32 %v11013_v63, %v8343_v53  ;;  %v4878_v63 = vmul.f32 %v8245_v55, %v8312_v8 }
 0x901   : > { %v9127_v19 = vpop.permute.xlu1 %5196  ;;  %v9131_v57 = vpop.permute.xlu0 %4060 }
 0x902   : > { %11069 = vst [vmem:[#allocation161_spill] sm:$0xff] %v9127_v19  ;;  %11070 = vst [vmem:[#allocation162_spill] sm:$0xff] %v9131_v57  ;;  %v11072_v19 = vld [vmem:[#allocation47_spill] sm:$0xff] }
 0x903   : > { %5344 = vrot.lane.b32.xlu1 %v5336_v18, %s10933_s20  ;;  %4888 = vrot.lane.b32.xlu0 %v4880_v59, %s6005_s16  ;;  %v3485_v57 = vmul.f32 %v11072_v19, %v8315_v37  ;;  %v11073_v18 = vld [vmem:[#allocation57_spill] sm:$0xff]  ;;  %v11077_v19 = vld [vmem:[#allocation16_spill] sm:$0xff] }
 0x904   : > { %v3495_v59 = vmul.f32 %v11073_v18, %v8318_v62  ;;  %v3829_v16 = vmul.f32 %v11077_v19, %v8318_v62 }
 0x905   : > { %v9137_v2 = vpop.permute.xlu1 %4602  ;;  %v9141_v51 = vpop.permute.xlu0 %4064 }
 0x906   : > { %11071 = vst [vmem:[#allocation163_spill] sm:$0xff] %v9137_v2  ;;  %v3498_v55 = vadd.f32 %v3495_v59, %v3485_v57  ;;  %v3851_v57 = vsel %vm555_vm4, %v8971_v52, %v8777_v5  ;;  %v11080_v59 = vld [vmem:[#allocation21_spill] sm:$0xff] }
 0x907   : > { %4718 = vrot.lane.b32.xlu1 %v4712_v56, %s6056_s23  ;;  %5200 = vrot.lane.b32.xlu0 %v5192_v24, %s6003_s30  ;;  %v3517_v56 = vsel %vm555_vm4, %v8751_v15, %v8637_v33  ;;  %v11076_v24 = vld [vmem:[#allocation55_spill] sm:$0xff]  ;;  %v3565_v33 = vsel %vm581_vm5, %v8667_v0, %v8781_v46  ;;  %s11118_s30 = smov 127  }
 0x908   : > { %v3819_v18 = vmul.f32 %v11076_v24, %v8315_v37  ;;  %v3522_v15 = vadd.f32 %v3517_v56, %v3498_v55  ;;  %v3589_v56 = vsel %vm581_vm5, %v8677_v13, %v8801_v14  ;;  %v3875_v55 = vsel %vm555_vm4, %v8797_v60, %v8981_v1 }
 0x909   : > { %v9151_v30 = vpop.permute.xlu1 %4912  ;;  %v9155_v2 = vpop.permute.xlu0 %4084 }
 0x90a   : > { %11074 = vst [vmem:[#allocation164_spill] sm:$0xff] %v9151_v30  ;;  %11075 = vst [vmem:[#allocation165_spill] sm:$0xff] %v9155_v2  ;;  %v11078_v30 = vld [vmem:[#allocation66_spill] sm:$0xff]  ;;  %v3541_v2 = vsel %vm555_vm4, %v8657_v25, %v8761_v27  ;;  %v3832_v25 = vadd.f32 %v3829_v16, %v3819_v18  ;;  %v11083_v16 = vld [vmem:[#allocation45_spill] sm:$0xff] }
 0x90b   : > { %5340 = vrot.lane.b32.xlu1 %v5334_v41, %s10933_s20  ;;  %4884 = vrot.lane.b32.xlu0 %v4878_v63, %s6005_s16  ;;  %v4415_v31 = vmul.f32 %v11078_v30, %v8326_v44  ;;  %v4593_v41 = vmul.f32 %v11019_v26, %v8315_v37  ;;  %v3546_v30 = vadd.f32 %v3541_v2, %v3522_v15 }
 0x90c   : > { %v3856_v52 = vadd.f32 %v3851_v57, %v3832_v25  ;;  %v3613_v15 = vsel %vm607_vm7, %v8687_v20, %v8821_v9  ;;  %v5048_v2 = vmul.f32 %v11083_v16, %v8343_v53  ;;  %v11086_v25 = vld [vmem:[#allocation24_spill] sm:$0xff] }
 0x90d   : > { %v9168_v29 = vpop.permute.xlu1 %5224  ;;  %v9175_v63 = vpop.permute.xlu0 %4088  ;;  %v3923_v57 = vsel %vm581_vm5, %v11086_v25, %v9021_v42 }
 0x90e   : > { %11079 = vst [vmem:[#allocation55_spill] sm:$0xff] %v9168_v29  ;;  %v4738_v29 = vmul.f32 %v11080_v59, %v8326_v44 }
 0x90f   : > { %4423 = vrot.lane.b32.xlu1 %v4415_v31, %s10934_s26  ;;  %4600 = vrot.lane.b32.xlu0 %v4593_v41, %s6006_s17  ;;  %v4903_v31 = vmul.f32 %v8249_v36, %v8318_v62  ;;  %v3570_v41 = vadd.f32 %v3565_v33, %v3546_v30  ;;  %v3899_v36 = vsel %vm581_vm5, %v8807_v38, %v9001_v23  ;;  %v11085_v30 = vld [vmem:[#allocation51_spill] sm:$0xff] }
 0x910   : > { %v3637_v33 = vsel %vm607_vm7, %v11085_v30, %v8841_v47  ;;  %v11090_v30 = vld [vmem:[#allocation68_spill] sm:$0xff] }
 0x911   : > { %v9187_v27 = vpop.permute.xlu1 %4908  ;;  %v9197_v0 = vpop.permute.xlu0 %4108  ;;  %v3594_v18 = vadd.f32 %v3589_v56, %v3570_v41  ;;  %v11088_v56 = vld [vmem:[#allocation53_spill] sm:$0xff]  ;;  %v11089_v41 = vld [vmem:[#allocation116_spill] sm:$0xff]  ;;  %v5360_v20 = vmul.f32 %v11090_v30, %v8326_v44 }
 0x912   : > { %11081 = vst [vmem:[#allocation16_spill] sm:$0xff] %v9187_v27  ;;  %11082 = vst [vmem:[#allocation21_spill] sm:$0xff] %v9197_v0  ;;  %v3880_v27 = vadd.f32 %v3875_v55, %v3856_v52  ;;  %v11087_v52 = vld [vmem:[#allocation122_spill] sm:$0xff] }
 0x913   : > { %4746 = vrot.lane.b32.xlu1 %v4738_v29, %s10934_s26  ;;  %4910 = vrot.lane.b32.xlu0 %v4903_v31, %s6005_s16  ;;  %v5215_v29 = vmul.f32 %v11024_v28, %v8315_v37  ;;  %v3618_v31 = vadd.f32 %v3613_v15, %v3594_v18  ;;  %v3661_v55 = vsel %vm633_vm9, %v11088_v56, %v11087_v52  ;;  %v11092_v15 = vld [vmem:[#allocation125_spill] sm:$0xff]  ;;  %v11094_v18 = vld [vmem:[#allocation118_spill] sm:$0xff] }
 0x914   : > { %v3904_v60 = vadd.f32 %v3899_v36, %v3880_v27  ;;  %v4592_v27 = vmul.f32 %v11019_v26, %v8312_v8  ;;  %v11093_v36 = vld [vmem:[#allocation103_spill] sm:$0xff] }
 0x915   : > { %v9209_v0 = vpop.permute.xlu1 %4624  ;;  %v9219_v38 = vpop.permute.xlu0 %4112  ;;  %v3642_v25 = vadd.f32 %v3637_v33, %v3618_v31  ;;  %v11097_v26 = vld [vmem:[#allocation39_spill] sm:$0xff]  ;;  %v4736_v31 = vmul.f32 %v11080_v59, %v8312_v8 }
 0x916   : > { %11084 = vst [vmem:[#allocation45_spill] sm:$0xff] %v9209_v0  ;;  %v3947_v0 = vsel %vm607_vm7, %v11089_v41, %v9041_v35  ;;  %v3928_v42 = vadd.f32 %v3923_v57, %v3904_v60  ;;  %v3971_v41 = vsel %vm607_vm7, %v11094_v18, %v9061_v17  ;;  %v11096_v60 = vld [vmem:[#allocation105_spill] sm:$0xff]  ;;  %v3995_v57 = vsel %vm633_vm9, %v11097_v26, %v9081_v61 }
 0x917   : > { %5056 = vrot.lane.b32.xlu1 %v5048_v2, %s6056_s23  ;;  %5222 = vrot.lane.b32.xlu0 %v5215_v29, %s6005_s16  ;;  %v3685_v2 = vsel %vm633_vm9, %v11093_v36, %v11092_v15  ;;  %v3666_v29 = vadd.f32 %v3661_v55, %v3642_v25  ;;  %v3709_v33 = vsel %vm3401_vm11, %v11096_v60, %v8901_v3  ;;  %v11100_v25 = vld [vmem:[#allocation121_spill] sm:$0xff] }
 0x918   : > { %v3952_v35 = vadd.f32 %v3947_v0, %v3928_v42  ;;  %v5214_v0 = vmul.f32 %v11024_v28, %v8312_v8  ;;  %v4019_v55 = vsel %vm633_vm9, %v11100_v25, %v9101_v45  ;;  %v11103_v28 = vld [vmem:[#allocation29_spill] sm:$0xff] }
 0x919   : > { %v9231_v47 = vpop.permute.xlu1 %4934  ;;  %v9241_v56 = vpop.permute.xlu0 %4181 }
 0x91a   : > { %11091 = vst [vmem:[#allocation122_spill] sm:$0xff] %v9231_v47  ;;  %11095 = vst [vmem:[#allocation68_spill] sm:$0xff] %v9241_v56  ;;  %v3690_v47 = vadd.f32 %v3685_v2, %v3666_v29  ;;  %v3976_v56 = vadd.f32 %v3971_v41, %v3952_v35  ;;  %v11102_v35 = vld [vmem:[#allocation108_spill] sm:$0xff]  ;;  %v4043_v2 = vsel %vm3401_vm11, %v11103_v28, %v9121_v11 }
 0x91b   : > { %5368 = vrot.lane.b32.xlu1 %v5360_v20, %s6056_s23  ;;  %4598 = vrot.lane.b32.xlu0 %v4592_v27, %s6006_s17  ;;  %v11099_v20 = vld [vmem:[#allocation27_spill] sm:$0xff]  ;;  %v3757_v41 = vsel %vm1375_vm8, %v11102_v35, %v8941_v10  ;;  %v5358_v29 = vmul.f32 %v11090_v30, %v8312_v8 }
 0x91c   : > { %v3733_v42 = vsel %vm3401_vm11, %v11099_v20, %v8921_v21  ;;  %v3714_v27 = vadd.f32 %v3709_v33, %v3690_v47  ;;  %v4000_v60 = vadd.f32 %v3995_v57, %v3976_v56  ;;  %v4618_v47 = vmul.f32 %v8253_v4, %v8343_v53  ;;  %v11105_v56 = vld [vmem:[#allocation32_spill] sm:$0xff] }
 0x91d   : > { %v9253_v18 = vpop.permute.xlu1 %5246  ;;  %v9263_v26 = vpop.permute.xlu0 %4207  ;;  %v3781_v33 = vsel %vm1375_vm8, %v11105_v56, %v8961_v40  ;;  %v11106_v57 = vld [vmem:[#allocation124_spill] sm:$0xff]  ;;  %v4091_v4 = vsel %vm1375_vm8, %v8887_v49, %v9175_v63 }
 0x91e   : > { %11098 = vst [vmem:[#allocation125_spill] sm:$0xff] %v9253_v18  ;;  %11101 = vst [vmem:[#allocation103_spill] sm:$0xff] %v9263_v26  ;;  %v3738_v18 = vadd.f32 %v3733_v42, %v3714_v27  ;;  %v4024_v25 = vadd.f32 %v4019_v55, %v4000_v60  ;;  %v11108_v60 = vld [vmem:[#allocation22_spill] sm:$0xff] }
 0x91f   : > { %4742 = vrot.lane.b32.xlu1 %v4736_v31, %s10934_s26  ;;  %5220 = vrot.lane.b32.xlu0 %v5214_v0, %s6005_s16  ;;  %v4067_v31 = vsel %vm3401_vm11, %v11106_v57, %v9141_v51  ;;  %v11109_v27 = vld [vmem:[#allocation62_spill] sm:$0xff] }
 0x920   : > { %v3762_v0 = vadd.f32 %v3757_v41, %v3738_v18  ;;  %v4048_v35 = vadd.f32 %v4043_v2, %v4024_v25  ;;  %v4928_v18 = vmul.f32 %v11030_v58, %v8326_v44  ;;  %v11111_v25 = vld [vmem:[#allocation15_spill] sm:$0xff] }
 0x921   : > { %v9275_v26 = vpop.permute.xlu1 %4622  ;;  %v9285_v28 = vpop.permute.xlu0 %4227  ;;  %v4115_v41 = vsel %vm1375_vm8, %v11111_v25, %v9219_v38 }
 0x922   : > { %11104 = vst [vmem:[#allocation27_spill] sm:$0xff] %v9275_v26  ;;  %11107 = vst [vmem:[#allocation166_spill] sm:$0xff] %v9285_v28  ;;  %v4439_v26 = vmul.f32 %v11109_v27, %v8343_v53  ;;  %v3786_v57 = vadd.f32 %v3781_v33, %v3762_v0  ;;  %v4072_v56 = vadd.f32 %v4067_v31, %v4048_v35  ;;  %v11114_v35 = vunpack.i.h.bf16 %v11108_v60 }
 0x923   : > { %5364 = vrot.lane.b32.xlu1 %v5358_v29, %s6056_s23  ;;  %4626 = vrot.lane.b32.xlu0 %v4618_v47, %s6006_s17  ;;  %v11113_v47 = vld [vmem:[#allocation28_spill] sm:$0xff]  ;;  %v11115_v33 = vunpack.i.l.bf16 %v11108_v60 }
 0x924   : > { %v4096_v29 = vadd.f32 %v4091_v4, %v4072_v56  ;;  %v10614_v55 = vunpack.i.h.bf16 %v11113_v47  ;;  %v10613_v42 = vunpack.i.l.bf16 %v11113_v47 }
 0x925   : > { %v9296_v28 = vpop.permute.xlu1 %5244  ;;  %v9303_v2 = vpop.permute.xlu0 %4231  ;;  %v3792_v31 = vsel %vm798_vm0, %v11115_v33, %v11114_v35  ;;  %vm11402_vm0 = vcmask 998400  }
 0x926   : > { %11110 = vst [vmem:[#allocation22_spill] sm:$0xff] %v9296_v28  ;;  %11112 = vst [vmem:[#allocation62_spill] sm:$0xff] %v9303_v2  ;;  %v3797_v0 = vmul.f32 %v3792_v31, %v3786_v57  ;;  %v4120_v28 = vadd.f32 %v4115_v41, %v4096_v29  ;;  %v4127_v4 = vsel %vm4126_vm13, %v10613_v42, %v10614_v55  ;;  %v11129_v42 = vld [vmem:[#allocation65_spill] sm:$0xff] }
 0x927   : > { %4447 = vrot.lane.b32.xlu1 %v4439_v26, %s10934_s26  ;;  %4936 = vrot.lane.b32.xlu0 %v4928_v18, %s6006_s17  ;;  %v5240_v26 = vmul.f32 %v8219_v39, %v8343_v53  ;;  %v4926_v41 = vmul.f32 %v11030_v58, %v8312_v8  ;;  %v11122_v39 = vld [vmem:[#allocation63_spill] sm:$0xff]  ;;  %v4641_v31 = vmul.f32 %v8257_v43, %v8315_v37  ;;  %v11125_v58 = vld [vmem:[#allocation70_spill] sm:$0xff] }
 0x928   : > { %v4132_v57 = vmul.f32 %v4127_v4, %v4120_v28  ;;  %v4762_v35 = vmul.f32 %v11122_v39, %v8343_v53  ;;  %v11127_v4 = vld [vmem:[#allocation42_spill] sm:$0xff]  ;;  %v5384_v55 = vmul.f32 %v11129_v42, %v8343_v53 }
 0x929   : > { %v9314_v25 = vpop.permute.xlu1 %4650  ;;  %v9318_v56 = vpop.permute.xlu0 %4251 }
 0x92a   : > { %11116 = vst [vmem:[#allocation28_spill] sm:$0xff] %v9314_v25  ;;  %11117 = vst [vmem:[#allocation167_spill] sm:$0xff] %v9318_v56 }
 0x92b   : > { %3804 = vrot.lane.b32.xlu1 %v3797_v0, %s11118_s30  ;;  %5248 = vrot.lane.b32.xlu0 %v5240_v26, %s6005_s16  ;;  %v5072_v0 = vmul.f32 %v11125_v58, %v8326_v44  ;;  %s6057_s16 = smov 5  }
 0x92d   : > { %v9327_v18 = vpop.permute.xlu1 %4960  ;;  %v9331_v29 = vpop.permute.xlu0 %4255 }
 0x92e   : > { %11119 = vst [vmem:[#allocation168_spill] sm:$0xff] %v9327_v18  ;;  %11120 = vst [vmem:[#allocation169_spill] sm:$0xff] %v9331_v29 }
 0x92f   : > { %4139 = vrot.lane.b32.xlu1 %v4132_v57, %s11121_s24  ;;  %4932 = vrot.lane.b32.xlu0 %v4926_v41, %s6006_s17  ;;  %v4951_v57 = vmul.f32 %v11127_v4, %v8318_v62  ;;  %v4760_v4 = vmul.f32 %v11122_v39, %v8334_v50 }
 0x931   : > { %v9337_v33 = vpop.permute.xlu1 %5272  ;;  %v9341_v28 = vpop.permute.xlu0 %4275 }
 0x932   : > { %11123 = vst [vmem:[#allocation170_spill] sm:$0xff] %v9337_v33  ;;  %11124 = vst [vmem:[#allocation171_spill] sm:$0xff] %v9341_v28 }
 0x933   : > { %4770 = vrot.lane.b32.xlu1 %v4762_v35, %s10934_s26  ;;  %4648 = vrot.lane.b32.xlu0 %v4641_v31, %s10933_s20  ;;  %v11131_v31 = vld [vmem:[#allocation43_spill] sm:$0xff] }
 0x934   : > { %v5263_v28 = vmul.f32 %v11131_v31, %v8315_v37 }
 0x935   : > { %v9347_v26 = vpop.permute.xlu1 %4956  ;;  %v9351_v41 = vpop.permute.xlu0 %4279 }
 0x936   : > { %11126 = vst [vmem:[#allocation172_spill] sm:$0xff] %v9347_v26  ;;  %11128 = vst [vmem:[#allocation42_spill] sm:$0xff] %v9351_v41  ;;  %v11177_v41 = vld [vmem:[#allocation92_spill] sm:$0xff] }
 0x937   : > { %5080 = vrot.lane.b32.xlu1 %v5072_v0, %s10934_s26  ;;  %4958 = vrot.lane.b32.xlu0 %v4951_v57, %s6006_s17  ;;  %v4640_v57 = vmul.f32 %v8257_v43, %v8312_v8  ;;  %v11137_v43 = vld [vmem:[#allocation67_spill] sm:$0xff] }
 0x938   : > { %v5095_v25 = vmul.f32 %v11137_v43, %v8318_v62 }
 0x939   : > { %v9357_v35 = vpop.permute.xlu1 %4349  ;;  %v9361_v56 = vpop.permute.xlu0 %4299 }
 0x93a   : > { %11130 = vst [vmem:[#allocation173_spill] sm:$0xff] %v9357_v35  ;;  %11132 = vst [vmem:[#allocation43_spill] sm:$0xff] %v9361_v56  ;;  %v5382_v56 = vmul.f32 %v11129_v42, %v8334_v50 }
 0x93b   : > { %5392 = vrot.lane.b32.xlu1 %v5384_v55, %s6056_s23  ;;  %5270 = vrot.lane.b32.xlu0 %v5263_v28, %s6006_s17  ;;  %v5262_v28 = vmul.f32 %v11131_v31, %v8312_v8  ;;  %v11140_v31 = vld [vmem:[#allocation72_spill] sm:$0xff] }
 0x93d   : > { %v9367_v0 = vpop.permute.xlu1 %4672  ;;  %v9371_v26 = vpop.permute.xlu0 %4303 }
 0x93e   : > { %11133 = vst [vmem:[#allocation174_spill] sm:$0xff] %v9367_v0  ;;  %11134 = vst [vmem:[#allocation175_spill] sm:$0xff] %v9371_v26  ;;  %v11176_v0 = vld [vmem:[#allocation109_spill] sm:$0xff] }
 0x93f   : > { %4766 = vrot.lane.b32.xlu1 %v4760_v4, %s10934_s26  ;;  %4646 = vrot.lane.b32.xlu0 %v4640_v57, %s10933_s20  ;;  %v4343_v57 = vmul.f32 %v11043_v22, %v8343_v53  ;;  %v5094_v22 = vmul.f32 %v11137_v43, %v8334_v50 }
 0x941   : > { %v9377_v55 = vpop.permute.xlu1 %4982  ;;  %v9381_v18 = vpop.permute.xlu0 %4323 }
 0x942   : > { %11135 = vst [vmem:[#allocation176_spill] sm:$0xff] %v9377_v55  ;;  %11136 = vst [vmem:[#allocation177_spill] sm:$0xff] %v9381_v18  ;;  %v5407_v18 = vmul.f32 %v11140_v31, %v8315_v37  ;;  %v11144_v31 = vld [vmem:[#allocation13_spill] sm:$0xff] }
 0x943   : > { %5388 = vrot.lane.b32.xlu1 %v5382_v56, %s6056_s23  ;;  %5268 = vrot.lane.b32.xlu0 %v5262_v28, %s6006_s17  ;;  %v4666_v56 = vmul.f32 %v8261_v7, %v8343_v53  ;;  %v11145_v7 = vld [vmem:[#allocation14_spill] sm:$0xff] }
 0x944   : > { %v5943_v33 = vpack.i.bf16 %v11145_v7, %v11144_v31 }
 0x945   : > { %v9387_v4 = vpop.permute.xlu1 %5294  ;;  %v9391_v35 = vpop.permute.xlu0 %4327 }
 0x946   : > { %11138 = vst [vmem:[#allocation178_spill] sm:$0xff] %v9387_v4  ;;  %11139 = vst [vmem:[#allocation179_spill] sm:$0xff] %v9391_v35 }
 0x947   : > { %5102 = vrot.lane.b32.xlu1 %v5095_v25, %s10934_s26  ;;  %4351 = vrot.lane.b32.xlu0 %v4343_v57, %s10933_s20  ;;  %v4976_v25 = vmul.f32 %v8229_v34, %v8326_v44 }
 0x949   : > { %v9399_v28 = vpop.permute.xlu1 %4670  ;;  %v9401_v55 = vpop.permute.xlu0 %4347 }
 0x94a   : > { %11141 = vst [vmem:[#allocation180_spill] sm:$0xff] %v9399_v28  ;;  %11142 = vst [vmem:[#allocation181_spill] sm:$0xff] %v9401_v55  ;;  %v11147_v55 = vld [vmem:[#allocation69_spill] sm:$0xff]  ;;  %v4737_v28 = vmul.f32 %v11080_v59, %v8315_v37 }
 0x94b   : > { %5414 = vrot.lane.b32.xlu1 %v5407_v18, %s10934_s26  ;;  %4674 = vrot.lane.b32.xlu0 %v4666_v56, %s10933_s20  ;;  %v5288_v18 = vmul.f32 %v8265_v12, %v8343_v53  ;;  %v5432_v43 = vmul.f32 %v11147_v55, %v8343_v53  ;;  %v11151_v12 = vld [vmem:[#allocation35_spill] sm:$0xff] }
 0x94d   : > { %v9409_v57 = vpop.permute.xlu0 %4506  ;;  %v9414_v42 = vpop.permute.xlu1 %5292 }
 0x94e   : > { %11143 = vst [vmem:[#allocation182_spill] sm:$0xff] %v9409_v57  ;;  %11146 = vst [vmem:[#allocation13_spill] sm:$0xff] %v9414_v42 }
 0x94f   : > { %5100 = vrot.lane.b32.xlu1 %v5094_v22, %s10934_s26  ;;  %4984 = vrot.lane.b32.xlu0 %v4976_v25, %s10933_s20  ;;  %v4974_v22 = vmul.f32 %v8229_v34, %v8312_v8  ;;  %v11150_v25 = vld [vmem:[#allocation34_spill] sm:$0xff]  ;;  %v4689_v34 = vmul.f32 %v8239_v32, %v8315_v37  ;;  %v4365_v32 = vmul.f32 %v8233_v6, %v8312_v8 }
 0x950   : > { %v5948_v57 = vpack.i.bf16 %v11151_v12, %v11150_v25 }
 0x951   : > { %v9419_v56 = vpop.permute.xlu0 %4528  ;;  %v9426_v31 = vpop.permute.xlu1 %4375 }
 0x952   : > { %11148 = vst [vmem:[#allocation14_spill] sm:$0xff] %v9426_v31 }
 0x953   : > { %5944 = vrot.lane.b32.xlu1 %v5943_v33, %s6057_s16  ;;  %5296 = vrot.lane.b32.xlu0 %v5288_v18, %s6006_s17  ;;  %v4366_v33 = vmul.f32 %v8233_v6, %v8315_v37  ;;  %s11152_s17 = smov 6   ;;  %v11161_v6 = vld [vmem:[#allocation64_spill] sm:$0xff] }
 0x955   : > { %v9428_v7 = vpop.permute.xlu0 %4838  ;;  %v9439_v55 = vpop.permute.xlu1 %4698 }
 0x956   : > { %11149 = vst [vmem:[#allocation183_spill] sm:$0xff] %v9428_v7  ;;  %11153 = vst [vmem:[#allocation34_spill] sm:$0xff] %v9439_v55 }
 0x957   : > { %5440 = vrot.lane.b32.xlu1 %v5432_v43, %s10934_s26  ;;  %4980 = vrot.lane.b32.xlu0 %v4974_v22, %s10933_s20  ;;  %v4999_v22 = vmul.f32 %v8269_v54, %v8318_v62 }
 0x959   : > { %v9436_v18 = vpop.permute.xlu0 %4526  ;;  %v9449_v25 = vpop.permute.xlu1 %5008 }
 0x95a   : > { %11154 = vst [vmem:[#allocation35_spill] sm:$0xff] %v9449_v25  ;;  %v4998_v25 = vmul.f32 %v8269_v54, %v8334_v50  ;;  %v11163_v54 = vld [vmem:[#allocation30_spill] sm:$0xff] }
 0x95b   : > { %5949 = vrot.lane.b32.xlu1 %v5948_v57, %s11152_s17  ;;  %4373 = vrot.lane.b32.xlu0 %v4366_v33, %s6056_s23  ;;  %v5311_v57 = vmul.f32 %v8243_v48, %v8315_v37  ;;  %v11158_v48 = vld [vmem:[#allocation44_spill] sm:$0xff] }
 0x95d   : > { %v9444_v43 = vpop.permute.xlu0 %4552  ;;  %v9458_v55 = vpop.permute.xlu1 %5320 }
 0x95e   : > { %11156 = vst [vmem:[#allocation185_spill] sm:$0xff] %v9458_v55  ;;  %v4390_v55 = vmul.f32 %v11158_v48, %v8318_v62 }
 0x95f   : > { %4696 = vrot.lane.b32.xlu0 %v4689_v34, %s6056_s23 }
 0x961   : > { %v9451_v12 = vpop.permute.xlu0 %4862 }
 0x962   : > { %11155 = vst [vmem:[#allocation184_spill] sm:$0xff] %v9451_v12 }
 0x963   : > { %5006 = vrot.lane.b32.xlu0 %v4999_v22, %s10933_s20  ;;  %v9468_v22 = vpop.permute.xlu1 %4694 }
 0x964   : > { %11157 = vst [vmem:[#allocation186_spill] sm:$0xff] %v9468_v22  ;;  %v5023_v22 = vmul.f32 %v11163_v54, %v8315_v37 }
 0x965   : > { %v9456_v33 = vpop.permute.xlu0 %5174 }
 0x967   : > { %5318 = vrot.lane.b32.xlu0 %v5311_v57, %s10933_s20  ;;  %v9477_v7 = vpop.permute.xlu1 %5316 }
 0x968   : > { %11160 = vst [vmem:[#allocation187_spill] sm:$0xff] %v9477_v7  ;;  %v11166_v7 = vld [vmem:[#allocation38_spill] sm:$0xff] }
 0x969   : > { %v9463_v34 = vpop.permute.xlu0 %4550 }
 0x96b   : > { %4371 = vrot.lane.b32.xlu0 %v4365_v32, %s6056_s23  ;;  %v4713_v32 = vmul.f32 %v11161_v6, %v8318_v62  ;;  %v4389_v6 = vmul.f32 %v11158_v48, %v8334_v50  ;;  %v3820_v48 = vmul.f32 %v11076_v24, %v8326_v44 }
 0x96d   : > { %v9470_v12 = vpop.permute.xlu0 %5172 }
 0x96f   : > { %5004 = vrot.lane.b32.xlu0 %v4998_v25, %s10933_s20  ;;  %v9487_v25 = vpop.permute.xlu1 %4399 }
 0x970   : > { %11164 = vst [vmem:[#allocation30_spill] sm:$0xff] %v9487_v25 }
 0x971   : > { %v9475_v57 = vpop.permute.xlu0 %4578 }
 0x972   : > { %11159 = vst [vmem:[#allocation44_spill] sm:$0xff] %v9475_v57  ;;  %v5335_v57 = vmul.f32 %v11166_v7, %v8318_v62  ;;  %v5022_v7 = vmul.f32 %v11163_v54, %v8312_v8 }
 0x973   : > { %4397 = vrot.lane.b32.xlu0 %v4390_v55, %s6056_s23  ;;  %v9496_v42 = vpop.permute.xlu1 %4722 }
 0x974   : > { %11168 = vst [vmem:[#allocation189_spill] sm:$0xff] %v9496_v42 }
 0x975   : > { %v9482_v31 = vpop.permute.xlu0 %4888 }
 0x976   : > { %11162 = vst [vmem:[#allocation64_spill] sm:$0xff] %v9482_v31  ;;  %v11169_v31 = vld [vmem:[#allocation47_spill] sm:$0xff] }
 0x977   : > { %4720 = vrot.lane.b32.xlu0 %v4713_v32, %s6056_s23  ;;  %v3486_v25 = vmul.f32 %v11169_v31, %v8326_v44  ;;  %v3484_v54 = vmul.f32 %v11169_v31, %v8312_v8 }
 0x979   : > { %v9489_v58 = vpop.permute.xlu0 %5200 }
 0x97a   : > { %11165 = vst [vmem:[#allocation188_spill] sm:$0xff] %v9489_v58 }
 0x97b   : > { %5030 = vrot.lane.b32.xlu0 %v5023_v22, %s6056_s23  ;;  %v11170_v22 = vld [vmem:[#allocation57_spill] sm:$0xff] }
 0x97c   : > { %v3496_v58 = vmul.f32 %v11170_v22, %v8343_v53 }
 0x97d   : > { %v9494_v55 = vpop.permute.xlu0 %4884 }
 0x97e   : > { %11167 = vst [vmem:[#allocation38_spill] sm:$0xff] %v9494_v55  ;;  %v9510_v55 = vpop.permute.xlu1 %5032  ;;  %v3499_v35 = vadd.f32 %v3496_v58, %v3486_v25  ;;  %v3516_v58 = vsel %vm555_vm4, %v11177_v41, %v11176_v0  ;;  %v11178_v25 = vld [vmem:[#allocation110_spill] sm:$0xff]  ;;  %v5047_v41 = vmul.f32 %v11083_v16, %v8318_v62 }
 0x97f   : > { %5342 = vrot.lane.b32.xlu0 %v5335_v57, %s10933_s20  ;;  %11171 = vst [vmem:[#allocation47_spill] sm:$0xff] %v9510_v55  ;;  %v3830_v57 = vmul.f32 %v11077_v19, %v8343_v53  ;;  %v3494_v55 = vmul.f32 %v11170_v22, %v8334_v50  ;;  %v3818_v22 = vmul.f32 %v11076_v24, %v8312_v8  ;;  %s6058_s20 = smov 123  }
 0x981   : > { %v9501_v32 = vpop.permute.xlu0 %4600  ;;  %v3833_v2 = vadd.f32 %v3830_v57, %v3820_v48 }
 0x982   : > { %v9528_v39 = vpop.permute.xlu1 %5344 }
 0x983   : > { %4395 = vrot.lane.b32.xlu0 %v4389_v6, %s6056_s23  ;;  %v11173_v6 = vld [vmem:[#allocation66_spill] sm:$0xff] }
 0x984   : > { %v4414_v4 = vmul.f32 %v11173_v6, %v8315_v37  ;;  %11175 = vst [vmem:[#allocation66_spill] sm:$0xff] %v9528_v39 }
 0x985   : > { %v9512_v42 = vpop.permute.xlu0 %4910 }
 0x986   : > { %11172 = vst [vmem:[#allocation57_spill] sm:$0xff] %v9512_v42  ;;  %v11174_v42 = vld [vmem:[#allocation94_spill] sm:$0xff]  ;;  %v9550_v57 = vpop.permute.xlu1 %4718 }
 0x987   : > { %5028 = vrot.lane.b32.xlu0 %v5022_v7, %s6056_s23  ;;  %v3523_v7 = vadd.f32 %v11174_v42, %v3499_v35  ;;  %v3828_v42 = vmul.f32 %v11077_v19, %v8334_v50  ;;  %v3497_v35 = vadd.f32 %v3494_v55, %v3484_v54  ;;  %v11179_v55 = vld [vmem:[#allocation137_spill] sm:$0xff]  ;;  %v11180_v54 = vld [vmem:[#allocation111_spill] sm:$0xff] }
 0x989   : > { %v9521_v26 = vpop.permute.xlu0 %5222  ;;  %v3547_v29 = vadd.f32 %v11178_v25, %v3523_v7  ;;  %v3521_v39 = vadd.f32 %v3516_v58, %v3497_v35  ;;  %v3831_v19 = vadd.f32 %v3828_v42, %v3818_v22  ;;  %v11184_v7 = vld [vmem:[#allocation112_spill] sm:$0xff]  ;;  %v5359_v25 = vmul.f32 %v11090_v30, %v8315_v37  ;;  %v11185_v42 = vld [vmem:[#allocation113_spill] sm:$0xff] }
 0x98a   : > { %v3588_v35 = vsel %vm581_vm5, %v11185_v42, %v8677_v13  ;;  %v11191_v30 = vld [vmem:[#allocation148_spill] sm:$0xff]  ;;  %v4413_v13 = vmul.f32 %v11173_v6, %v8312_v8  ;;  %v11199_v6 = vld [vmem:[#allocation71_spill] sm:$0xff] }
 0x98b   : > { %4421 = vrot.lane.b32.xlu0 %v4414_v4, %s10934_s26  ;;  %v3857_v4 = vadd.f32 %v8777_v5, %v3833_v2  ;;  %v3571_v59 = vadd.f32 %v8781_v46, %v3547_v29  ;;  %v3850_v5 = vsel %vm555_vm4, %v11180_v54, %v11179_v55  ;;  %v11181_v46 = vld [vmem:[#allocation23_spill] sm:$0xff]  ;;  %v11182_v2 = vld [vmem:[#allocation96_spill] sm:$0xff] }
 0x98c   : > { %v3540_v29 = vsel %vm555_vm4, %v11182_v2, %v11181_v46  ;;  %v3855_v55 = vadd.f32 %v3850_v5, %v3831_v19  ;;  %v11187_v54 = vld [vmem:[#allocation144_spill] sm:$0xff]  ;;  %v11192_v5 = vld [vmem:[#allocation9_spill] sm:$0xff] }
 0x98d   : > { %v9537_v31 = vpop.permute.xlu0 %4598  ;;  %v3595_v0 = vadd.f32 %v8801_v14, %v3571_v59  ;;  %v3881_v48 = vadd.f32 %v8981_v1, %v3857_v4  ;;  %v3545_v22 = vadd.f32 %v3540_v29, %v3521_v39  ;;  %v11186_v4 = vld [vmem:[#allocation119_spill] sm:$0xff]  ;;  %v9580_v29 = vpop.permute.xlu1 %5340 }
 0x98f   : > { %4744 = vrot.lane.b32.xlu0 %v4737_v28, %s10934_s26  ;;  %v11183_v28 = vld [vmem:[#allocation50_spill] sm:$0xff]  ;;  %v3619_v14 = vadd.f32 %v8821_v9, %v3595_v0  ;;  %v3905_v1 = vadd.f32 %v9001_v23, %v3881_v48  ;;  %v11189_v0 = vld [vmem:[#allocation60_spill] sm:$0xff]  ;;  %v11190_v23 = vld [vmem:[#allocation115_spill] sm:$0xff] }
 0x990   : > { %v3564_v58 = vsel %vm581_vm5, %v11184_v7, %v11183_v28  ;;  %v11193_v28 = vld [vmem:[#allocation33_spill] sm:$0xff] }
 0x991   : > { %v9552_v24 = vpop.permute.xlu0 %5220  ;;  %v3643_v59 = vadd.f32 %v11186_v4, %v3619_v14  ;;  %v3929_v46 = vadd.f32 %v11187_v54, %v3905_v1  ;;  %v3569_v9 = vadd.f32 %v3564_v58, %v3545_v22  ;;  %v3874_v7 = vsel %vm555_vm4, %v11193_v28, %v11192_v5  ;;  %v11194_v58 = vld [vmem:[#allocation114_spill] sm:$0xff]  ;;  %v11195_v14 = vld [vmem:[#allocation139_spill] sm:$0xff]  ;;  %v11203_v5 = vld [vmem:[#allocation120_spill] sm:$0xff] }
 0x992   : > { %v3898_v1 = vsel %vm581_vm5, %v11195_v14, %v11194_v58  ;;  %v11196_v22 = vld [vmem:[#allocation51_spill] sm:$0xff] }
 0x993   : > { %5054 = vrot.lane.b32.xlu0 %v5047_v41, %s6056_s23  ;;  %v3612_v41 = vsel %vm607_vm7, %v11190_v23, %v11189_v0  ;;  %v3667_v48 = vadd.f32 %v11087_v52, %v3643_v59  ;;  %v3953_v39 = vadd.f32 %v11191_v30, %v3929_v46  ;;  %v3593_v19 = vadd.f32 %v3588_v35, %v3569_v9  ;;  %v11197_v52 = vld [vmem:[#allocation117_spill] sm:$0xff]  ;;  %v11200_v9 = vld [vmem:[#allocation24_spill] sm:$0xff]  ;;  %v11201_v0 = vld [vmem:[#allocation142_spill] sm:$0xff] }
 0x994   : > { %v3636_v42 = vsel %vm607_vm7, %v11197_v52, %v11196_v22  ;;  %v3879_v59 = vadd.f32 %v3874_v7, %v3855_v55  ;;  %v4476_v35 = vmul.f32 %v11199_v6, %v8312_v8  ;;  %v3922_v23 = vsel %vm581_vm5, %v11201_v0, %v11200_v9  ;;  %v11202_v30 = vld [vmem:[#allocation53_spill] sm:$0xff]  ;;  %v11206_v7 = vld [vmem:[#allocation146_spill] sm:$0xff]  ;;  %v11207_v22 = vld [vmem:[#allocation123_spill] sm:$0xff]  ;;  %v9621_v52 = vpop.permute.xlu1 %4423 }
 0x995   : > { %v9573_v2 = vpop.permute.xlu0 %4626  ;;  %v3691_v4 = vadd.f32 %v11092_v15, %v3667_v48  ;;  %v3617_v46 = vadd.f32 %v3612_v41, %v3593_v19  ;;  %v3660_v28 = vsel %vm633_vm9, %v11203_v5, %v11202_v30  ;;  %v5046_v41 = vmul.f32 %v11083_v16, %v8334_v50  ;;  %v11205_v19 = vld [vmem:[#allocation116_spill] sm:$0xff]  ;;  %11208 = vst [vmem:[#allocation92_spill] sm:$0xff] %v9621_v52  ;;  %v11212_v9 = vld [vmem:[#allocation105_spill] sm:$0xff]  ;;  %v11213_v0 = vld [vmem:[#allocation126_spill] sm:$0xff] }
 0x996   : > { %11188 = vst [vmem:[#allocation94_spill] sm:$0xff] %v9573_v2  ;;  %v3903_v15 = vadd.f32 %v3898_v1, %v3879_v59  ;;  %v3946_v14 = vsel %vm607_vm7, %v11206_v7, %v11205_v19  ;;  %v4438_v16 = vmul.f32 %v11109_v27, %v8318_v62  ;;  %v11210_v59 = vld [vmem:[#allocation118_spill] sm:$0xff]  ;;  %v11218_v7 = vld [vmem:[#allocation128_spill] sm:$0xff] }
 0x997   : > { %5366 = vrot.lane.b32.xlu0 %v5359_v25, %s6056_s23  ;;  %v3977_v25 = vadd.f32 %v9061_v17, %v3953_v39  ;;  %v3715_v58 = vadd.f32 %v8901_v3, %v3691_v4  ;;  %v11204_v17 = vld [vmem:[#allocation74_spill] sm:$0xff]  ;;  %v3641_v39 = vadd.f32 %v3636_v42, %v3617_v46  ;;  %v3684_v3 = vsel %vm633_vm9, %v11207_v22, %v11093_v36 }
 0x998   : > { %v4486_v48 = vmul.f32 %v11204_v17, %v8334_v50  ;;  %v3708_v36 = vsel %vm3401_vm11, %v11213_v0, %v11212_v9  ;;  %v3732_v22 = vsel %vm3401_vm11, %v11218_v7, %v11099_v20  ;;  %v11222_v20 = vld [vmem:[#allocation77_spill] sm:$0xff]  ;;  %v11224_v0 = vld [vmem:[#allocation108_spill] sm:$0xff] }
 0x999   : > { %v9596_v54 = vpop.permute.xlu0 %4936  ;;  %v4001_v55 = vadd.f32 %v9081_v61, %v3977_v25  ;;  %v3739_v1 = vadd.f32 %v8921_v21, %v3715_v58  ;;  %v3927_v61 = vadd.f32 %v3922_v23, %v3903_v15  ;;  %v3665_v42 = vadd.f32 %v3660_v28, %v3641_v39  ;;  %v11211_v25 = vld [vmem:[#allocation150_spill] sm:$0xff]  ;;  %v11214_v58 = vld [vmem:[#allocation140_spill] sm:$0xff]  ;;  %v11215_v15 = vld [vmem:[#allocation141_spill] sm:$0xff] }
 0x99a   : > { %11198 = vst [vmem:[#allocation109_spill] sm:$0xff] %v9596_v54  ;;  %v3970_v46 = vsel %vm607_vm7, %v11211_v25, %v11210_v59  ;;  %v4489_v5 = vadd.f32 %v4486_v48, %v4476_v35  ;;  %v4508_v28 = vsel %vm555_vm4, %v11215_v15, %v11214_v58  ;;  %v11217_v39 = vld [vmem:[#allocation153_spill] sm:$0xff]  ;;  %v11219_v35 = vld [vmem:[#allocation76_spill] sm:$0xff] }
 0x99b   : > { %4419 = vrot.lane.b32.xlu0 %v4413_v13, %s10934_s26  ;;  %v4025_v13 = vadd.f32 %v9101_v45, %v4001_v55  ;;  %v3763_v21 = vadd.f32 %v8941_v10, %v3739_v1  ;;  %v3951_v23 = vadd.f32 %v3946_v14, %v3927_v61  ;;  %v3689_v30 = vadd.f32 %v3684_v3, %v3665_v42  ;;  %v11216_v55 = vld [vmem:[#allocation39_spill] sm:$0xff]  ;;  %v11220_v1 = vld [vmem:[#allocation121_spill] sm:$0xff]  ;;  %v11221_v61 = vld [vmem:[#allocation156_spill] sm:$0xff] }
 0x99c   : > { %v3994_v19 = vsel %vm633_vm9, %v11217_v39, %v11216_v55  ;;  %v5146_v48 = vmul.f32 %v11219_v35, %v8312_v8  ;;  %v4532_v42 = vsel %vm555_vm4, %v9436_v18, %v9419_v56  ;;  %v4513_v59 = vadd.f32 %v4508_v28, %v4489_v5  ;;  %v11229_v39 = vld [vmem:[#allocation48_spill] sm:$0xff]  ;;  %v11230_v7 = vld [vmem:[#allocation17_spill] sm:$0xff] }
 0x99d   : > { %v9623_v4 = vpop.permute.xlu0 %5248  ;;  %v4049_v45 = vadd.f32 %v9121_v11, %v4025_v13  ;;  %v3787_v10 = vadd.f32 %v8961_v40, %v3763_v21  ;;  %v3975_v14 = vadd.f32 %v3970_v46, %v3951_v23  ;;  %v3713_v3 = vadd.f32 %v3708_v36, %v3689_v30  ;;  %v9660_v46 = vpop.permute.xlu1 %4746  ;;  %v11225_v36 = vld [vmem:[#allocation131_spill] sm:$0xff]  ;;  %v11226_v23 = vld [vmem:[#allocation29_spill] sm:$0xff] }
 0x99e   : > { %11209 = vst [vmem:[#allocation110_spill] sm:$0xff] %v9623_v4  ;;  %v4018_v13 = vsel %vm633_vm9, %v11221_v61, %v11220_v1  ;;  %v5156_v40 = vmul.f32 %v11222_v20, %v8334_v50  ;;  %11223 = vst [vmem:[#allocation137_spill] sm:$0xff] %v9660_v46  ;;  %v3756_v21 = vsel %vm1375_vm8, %v11225_v36, %v11224_v0  ;;  %v11228_v5 = vunpack.i.h.bf16 %v11108_v60  ;;  %v11234_v1 = vld [vmem:[#allocation162_spill] sm:$0xff] }
 0x99f   : > { %5052 = vrot.lane.b32.xlu0 %v5046_v41, %s6056_s23  ;;  %v4073_v11 = vadd.f32 %v9141_v51, %v4049_v45  ;;  %v3999_v25 = vadd.f32 %v3994_v19, %v3975_v14  ;;  %v3737_v9 = vadd.f32 %v3732_v22, %v3713_v3  ;;  %v11227_v45 = vld [vmem:[#allocation159_spill] sm:$0xff]  ;;  %v4556_v30 = vsel %vm581_vm5, %v9463_v34, %v9444_v43  ;;  %v11231_v14 = vld [vmem:[#allocation32_spill] sm:$0xff] }
 0x9a0   : > { %v4042_v18 = vsel %vm3401_vm11, %v11227_v45, %v11226_v23  ;;  %v4155_v19 = vmul.f32 %v11229_v39, %v8326_v44  ;;  %v4165_v22 = vmul.f32 %v11230_v7, %v8343_v53  ;;  %v11233_v34 = vld [vmem:[#allocation124_spill] sm:$0xff]  ;;  %v11236_v36 = vunpack.i.h.bf16 %v11113_v47 }
 0x9a1   : > { %v9647_v41 = vpop.permute.xlu0 %4932  ;;  %v4097_v51 = vadd.f32 %v9175_v63, %v4073_v11  ;;  %v3798_v63 = vmul.f32 %v11228_v5, %v3787_v10  ;;  %v4023_v15 = vadd.f32 %v4018_v13, %v3999_v25  ;;  %v11232_v11 = vld [vmem:[#allocation134_spill] sm:$0xff]  ;;  %v4066_v10 = vsel %vm3401_vm11, %v11234_v1, %v11233_v34  ;;  %v9696_v5 = vpop.permute.xlu1 %5056 }
 0x9a2   : > { %v3780_v3 = vsel %vm1375_vm8, %v11232_v11, %v11231_v14  ;;  %v3761_v61 = vadd.f32 %v3756_v21, %v3737_v9  ;;  %v5178_v25 = vsel %vm555_vm4, %v9470_v12, %v9456_v33  ;;  %v5159_v45 = vadd.f32 %v5156_v40, %v5146_v48  ;;  %11237 = vst [vmem:[#allocation111_spill] sm:$0xff] %v9696_v5  ;;  %v11242_v40 = vld [vmem:[#allocation129_spill] sm:$0xff] }
 0x9a3   : > { %4445 = vrot.lane.b32.xlu0 %v4438_v16, %s10934_s26  ;;  %v4121_v28 = vadd.f32 %v9219_v38, %v4097_v51  ;;  %v4537_v16 = vadd.f32 %v4532_v42, %v4513_v59  ;;  %v4047_v13 = vadd.f32 %v4042_v18, %v4023_v15  ;;  %v11235_v42 = vld [vmem:[#allocation165_spill] sm:$0xff]  ;;  %v4168_v21 = vadd.f32 %v4165_v22, %v4155_v19  ;;  %v11238_v18 = vld [vmem:[#allocation155_spill] sm:$0xff] }
 0x9a4   : > { %v4090_v59 = vsel %vm1375_vm8, %v11235_v42, %v8887_v49  ;;  %v3785_v51 = vadd.f32 %v3780_v3, %v3761_v61  ;;  %v11240_v49 = vld [vmem:[#allocation15_spill] sm:$0xff]  ;;  %v11241_v15 = vld [vmem:[#allocation21_spill] sm:$0xff]  ;;  %v4604_v12 = vsel %vm607_vm7, %v9537_v31, %v9501_v32  ;;  %v11243_v19 = vunpack.i.l.bf16 %v11108_v60 }
 0x9a5   : > { %v9675_v55 = vpop.permute.xlu0 %4648  ;;  %v4561_v38 = vadd.f32 %v4556_v30, %v4537_v16  ;;  %v4071_v0 = vadd.f32 %v4066_v10, %v4047_v13  ;;  %v4133_v23 = vmul.f32 %v11236_v36, %v4121_v28  ;;  %v11239_v30 = vld [vmem:[#allocation160_spill] sm:$0xff]  ;;  %v4114_v16 = vsel %vm1375_vm8, %v11241_v15, %v11240_v49  ;;  %v11244_v10 = vld [vmem:[#allocation158_spill] sm:$0xff]  ;;  %v11245_v61 = vld [vmem:[#allocation161_spill] sm:$0xff] }
 0x9a6   : > { %v5183_v28 = vadd.f32 %v5178_v25, %v5159_v45  ;;  %v4192_v11 = vadd.f32 %v11242_v40, %v4168_v21  ;;  %v3796_v22 = vmul.f32 %v11243_v19, %v3785_v51  ;;  %v5202_v13 = vsel %vm555_vm4, %v11245_v61, %v11244_v10  ;;  %v11246_v42 = vld [vmem:[#allocation103_spill] sm:$0xff]  ;;  %v11248_v60 = vld [vmem:[#allocation45_spill] sm:$0xff]  ;;  %v11250_v36 = vld [vmem:[#allocation62_spill] sm:$0xff] }
 0x9a7   : > { %3806 = vrot.lane.b32.xlu0 %v3798_v63, %s11118_s30  ;;  %v4580_v63 = vsel %vm581_vm5, %v11239_v30, %v11238_v18  ;;  %v4095_v14 = vadd.f32 %v4090_v59, %v4071_v0  ;;  %v9722_v59 = vpop.permute.xlu1 %5368  ;;  %v11249_v51 = vld [vmem:[#allocation27_spill] sm:$0xff]  ;;  %v11251_v45 = vunpack.i.l.bf16 %v11113_v47  ;;  %v11252_v15 = vld [vmem:[#allocation169_spill] sm:$0xff]  ;;  %v11257_v47 = vld [vmem:[#allocation180_spill] sm:$0xff] }
 0x9a8   : > { %v4585_v48 = vadd.f32 %v4580_v63, %v4561_v38  ;;  %v4216_v31 = vadd.f32 %v11246_v42, %v4192_v11  ;;  %v5226_v38 = vsel %vm581_vm5, %v9552_v24, %v9521_v26  ;;  %11247 = vst [vmem:[#allocation23_spill] sm:$0xff] %v9722_v59  ;;  %v5207_v25 = vadd.f32 %v5202_v13, %v5183_v28  ;;  %v11254_v28 = vld [vmem:[#allocation22_spill] sm:$0xff]  ;;  %v11266_v59 = vld [vmem:[#allocation68_spill] sm:$0xff] }
 0x9a9   : > { %v9698_v9 = vpop.permute.xlu0 %4958  ;;  %v4119_v3 = vadd.f32 %v4114_v16, %v4095_v14  ;;  %v4628_v0 = vsel %vm607_vm7, %v11249_v51, %v11248_v60  ;;  %v11253_v14 = vld [vmem:[#allocation125_spill] sm:$0xff]  ;;  %v11255_v11 = vld [vmem:[#allocation42_spill] sm:$0xff]  ;;  %v11260_v51 = vld [vmem:[#allocation175_spill] sm:$0xff]  ;;  %v4186_v5 = vsel %vm555_vm4, %v11266_v59, %v11242_v40 }
 0x9aa   : > { %v4609_v34 = vadd.f32 %v4604_v12, %v4585_v48  ;;  %v5231_v30 = vadd.f32 %v5226_v38, %v5207_v25  ;;  %v5250_v48 = vsel %vm581_vm5, %v11254_v28, %v11253_v14  ;;  %v4154_v28 = vmul.f32 %v11229_v39, %v8315_v37 }
 0x9ab   : > { %4141 = vrot.lane.b32.xlu0 %v4133_v23, %s11121_s24  ;;  %v4240_v23 = vadd.f32 %v11250_v36, %v4216_v31  ;;  %v4131_v21 = vmul.f32 %v11251_v45, %v4119_v3  ;;  %v9744_v13 = vpop.permute.xlu1 %4742  ;;  %v5147_v45 = vmul.f32 %v11219_v35, %v8315_v37  ;;  %v11272_v35 = vld [vmem:[#allocation55_spill] sm:$0xff] }
 0x9ac   : > { %v4633_v63 = vadd.f32 %v4628_v0, %v4609_v34  ;;  %v11258_v34 = vld [vmem:[#allocation63_spill] sm:$0xff]  ;;  %11259 = vst [vmem:[#allocation96_spill] sm:$0xff] %v9744_v13  ;;  %v5255_v31 = vadd.f32 %v5250_v48, %v5231_v30  ;;  %v11262_v30 = vld [vmem:[#allocation178_spill] sm:$0xff]  ;;  %v4164_v48 = vmul.f32 %v11230_v7, %v8318_v62 }
 0x9ad   : > { %v9713_v1 = vpop.permute.xlu0 %5270  ;;  %v4264_v16 = vadd.f32 %v11252_v15, %v4240_v23  ;;  %v4761_v61 = vmul.f32 %v11258_v34, %v8318_v62  ;;  %v11268_v13 = vld [vmem:[#allocation14_spill] sm:$0xff] }
 0x9af   : > { %3802 = vrot.lane.b32.xlu0 %v3796_v22, %s11118_s30  ;;  %v4288_v19 = vadd.f32 %v11255_v11, %v4264_v16  ;;  %v11256_v22 = vld [vmem:[#allocation174_spill] sm:$0xff] }
 0x9b0   : > { %v4676_v3 = vsel %vm633_vm9, %v11257_v47, %v11256_v22 }
 0x9b1   : > { %v4647_v49 = vpop.permute.xlu0 %4646  ;;  %v4312_v0 = vadd.f32 %v11260_v51, %v4288_v19  ;;  %v11264_v19 = vld [vmem:[#allocation70_spill] sm:$0xff] }
 0x9b2   : > { %v4652_v24 = vsel %vm633_vm9, %v4647_v49, %v9675_v55  ;;  %v11261_v49 = vld [vmem:[#allocation179_spill] sm:$0xff]  ;;  %v5071_v47 = vmul.f32 %v11264_v19, %v8315_v37 }
 0x9b3   : > { %v4657_v12 = vadd.f32 %v4652_v24, %v4633_v63  ;;  %4137 = vrot.lane.b32.xlu0 %v4131_v21, %s11121_s24  ;;  %v5157_v21 = vmul.f32 %v11222_v20, %v8318_v62  ;;  %v4336_v16 = vadd.f32 %v11261_v49, %v4312_v0  ;;  %v11263_v24 = vld [vmem:[#allocation13_spill] sm:$0xff]  ;;  %v11271_v20 = vld [vmem:[#allocation132_spill] sm:$0xff]  ;;  %s11408_s24 = sshll.u32 %s11410_s19, 3 }
 0x9b4   : > { %v4210_v40 = vsel %vm555_vm4, %v11271_v20, %v11246_v42 }
 0x9b5   : > { %v5269_v38 = vpop.permute.xlu0 %5268  ;;  %v9746_v25 = vadd.f32 %v4676_v3, %v4657_v12  ;;  %v5298_v12 = vsel %vm607_vm7, %v11263_v24, %v11262_v30  ;;  %v5160_v0 = vadd.f32 %v5157_v21, %v5147_v45  ;;  %v4477_v24 = vmul.f32 %v11199_v6, %v8315_v37  ;;  %v11269_v21 = vld [vmem:[#allocation65_spill] sm:$0xff] }
 0x9b6   : > { %v5274_v23 = vsel %vm607_vm7, %v5269_v38, %v9713_v1  ;;  %v4487_v45 = vmul.f32 %v11204_v17, %v8318_v62  ;;  %v4437_v17 = vmul.f32 %v11109_v27, %v8334_v50  ;;  %v11274_v6 = vld [vmem:[#allocation73_spill] sm:$0xff] }
 0x9b7   : > { %v5279_v63 = vadd.f32 %v5274_v23, %v5255_v31  ;;  %4768 = vrot.lane.b32.xlu0 %v4761_v61, %s10934_s26  ;;  %v11265_v61 = vld [vmem:[#allocation152_spill] sm:$0xff]  ;;  %v9774_v23 = vpop.permute.xlu1 %5364 }
 0x9b8   : > { %v5179_v31 = vsel %vm555_vm4, %v9456_v33, %v11265_v61 }
 0x9b9   : > { %v9766_v3 = vpop.permute.xlu0 %4351  ;;  %v9768_v34 = vadd.f32 %v5298_v12, %v5279_v63  ;;  %v11267_v63 = vld [vmem:[#allocation188_spill] sm:$0xff]  ;;  %v5184_v46 = vadd.f32 %v5179_v31, %v5160_v0  ;;  %v11275_v31 = vld [vmem:[#allocation133_spill] sm:$0xff]  ;;  %v11276_v0 = vld [vmem:[#allocation182_spill] sm:$0xff] }
 0x9ba   : > { %v4360_v38 = vadd.f32 %v9766_v3, %v4336_v16  ;;  %v5203_v12 = vsel %vm555_vm4, %v11244_v10, %v11267_v63  ;;  %v5383_v16 = vmul.f32 %v11269_v21, %v8318_v62  ;;  %v5227_v10 = vsel %vm581_vm5, %v9521_v26, %v11272_v35  ;;  %v11273_v63 = vld [vmem:[#allocation30_spill] sm:$0xff] }
 0x9bb   : > { %5078 = vrot.lane.b32.xlu0 %v5071_v47, %s10934_s26  ;;  %v4167_v47 = vadd.f32 %v4164_v48, %v4154_v28  ;;  %v4811_v21 = vmul.f32 %v11274_v6, %v8315_v37  ;;  %v5208_v48 = vadd.f32 %v5203_v12, %v5184_v46  ;;  %v4234_v42 = vsel %vm581_vm5, %v11275_v31, %v11250_v36  ;;  %v11277_v37 = vld [vmem:[#allocation75_spill] sm:$0xff] }
 0x9bc   : > { %v4384_v33 = vadd.f32 %v11268_v13, %v4360_v38  ;;  %v4509_v26 = vsel %vm555_vm4, %v11214_v58, %v11276_v0  ;;  %v4490_v12 = vadd.f32 %v4487_v45, %v4477_v24  ;;  %v11279_v36 = vld [vmem:[#allocation135_spill] sm:$0xff] }
 0x9bd   : > { %v9790_v61 = vpop.permute.xlu0 %4674  ;;  %v4191_v28 = vadd.f32 %v4186_v5, %v4167_v47  ;;  %v4821_v5 = vmul.f32 %v11277_v37, %v8318_v62  ;;  %v9816_v47 = vpop.permute.xlu1 %4447  ;;  %v4258_v58 = vsel %vm581_vm5, %v11279_v36, %v11252_v15  ;;  %v11280_v0 = vld [vmem:[#allocation143_spill] sm:$0xff]  ;;  %v11282_v15 = vld [vmem:[#allocation136_spill] sm:$0xff] }
 0x9be   : > { %11270 = vst [vmem:[#allocation50_spill] sm:$0xff] %v9790_v61  ;;  %v4408_v38 = vadd.f32 %v11273_v63, %v4384_v33  ;;  %v5251_v33 = vsel %vm581_vm5, %v11253_v14, %v9623_v4  ;;  %v4533_v14 = vsel %vm555_vm4, %v9419_v56, %v11280_v0  ;;  %v11281_v4 = vld [vmem:[#allocation170_spill] sm:$0xff]  ;;  %v4514_v45 = vadd.f32 %v4509_v26, %v4490_v12  ;;  %v11287_v12 = vld [vmem:[#allocation183_spill] sm:$0xff] }
 0x9bf   : > { %5390 = vrot.lane.b32.xlu0 %v5383_v16, %s6056_s23  ;;  %v4215_v46 = vadd.f32 %v4210_v40, %v4191_v28  ;;  %v5232_v16 = vadd.f32 %v5227_v10, %v5208_v48  ;;  %v5070_v28 = vmul.f32 %v11264_v19, %v8312_v8  ;;  %v4282_v48 = vsel %vm607_vm7, %v11282_v15, %v11255_v11 }
 0x9c0   : > { %v4432_v27 = vadd.f32 %v9621_v52, %v4408_v38  ;;  %v5275_v38 = vsel %vm607_vm7, %v9713_v1, %v11281_v4  ;;  %v11283_v52 = vld [vmem:[#allocation149_spill] sm:$0xff]  ;;  %v11293_v4 = vld [vmem:[#allocation184_spill] sm:$0xff] }
 0x9c1   : > { %v9818_v35 = vpop.permute.xlu0 %4984  ;;  %v4239_v24 = vadd.f32 %v4234_v42, %v4215_v46  ;;  %v5256_v10 = vadd.f32 %v5251_v33, %v5232_v16  ;;  %v4557_v56 = vsel %vm581_vm5, %v9444_v43, %v11283_v52  ;;  %v4824_v42 = vadd.f32 %v4821_v5, %v4811_v21  ;;  %v11286_v46 = vld [vmem:[#allocation145_spill] sm:$0xff]  ;;  %v11288_v16 = vld [vmem:[#allocation44_spill] sm:$0xff] }
 0x9c2   : > { %11278 = vst [vmem:[#allocation112_spill] sm:$0xff] %v9818_v35  ;;  %v4456_v40 = vadd.f32 %v9816_v47, %v4432_v27  ;;  %v4538_v27 = vadd.f32 %v4533_v14, %v4514_v45  ;;  %v4843_v11 = vsel %vm555_vm4, %v11287_v12, %v11286_v46  ;;  %v4581_v43 = vsel %vm581_vm5, %v11238_v18, %v11288_v16  ;;  %v11294_v46 = vld [vmem:[#allocation163_spill] sm:$0xff] }
 0x9c3   : > { %4443 = vrot.lane.b32.xlu0 %v4437_v17, %s10934_s26  ;;  %v4263_v1 = vadd.f32 %v4258_v58, %v4239_v24  ;;  %v5280_v26 = vadd.f32 %v5275_v38, %v5256_v10  ;;  %v11285_v17 = vld [vmem:[#allocation52_spill] sm:$0xff]  ;;  %v11289_v38 = vld [vmem:[#allocation11_spill] sm:$0xff]  ;;  %v11291_v24 = vld [vmem:[#allocation138_spill] sm:$0xff] }
 0x9c4   : > { %4464 = vrot.lane.b32.xlu1 %v4456_v40, %s6020_s28  ;;  %v4306_v19 = vsel %vm607_vm7, %v11285_v17, %v11260_v51  ;;  %v4562_v5 = vadd.f32 %v4557_v56, %v4538_v27  ;;  %v11290_v51 = vld [vmem:[#allocation12_spill] sm:$0xff]  ;;  %v4330_v45 = vsel %vm633_vm9, %v11291_v24, %v11261_v49  ;;  %v11292_v10 = vld [vmem:[#allocation151_spill] sm:$0xff]  ;;  %v4848_v56 = vadd.f32 %v4843_v11, %v4824_v42 }
 0x9c5   : > { %v9840_v33 = vpop.permute.xlu0 %5296  ;;  %v4287_v21 = vadd.f32 %v4282_v48, %v4263_v1  ;;  %v5938_v40 = vpack.i.bf16 %v11290_v51, %v11289_v38  ;;  %v4867_v18 = vsel %vm555_vm4, %v11293_v4, %v11292_v10  ;;  %v4629_v49 = vsel %vm607_vm7, %v11248_v60, %v9573_v2  ;;  %v11297_v38 = vld [vmem:[#allocation173_spill] sm:$0xff]  ;;  %v11299_v42 = vld [vmem:[#allocation164_spill] sm:$0xff] }
 0x9c6   : > { %11284 = vst [vmem:[#allocation113_spill] sm:$0xff] %v9840_v33  ;;  %v5299_v58 = vsel %vm607_vm7, %v11262_v30, %v9840_v33  ;;  %v4605_v30 = vsel %vm607_vm7, %v9501_v32, %v11294_v46  ;;  %v4586_v1 = vadd.f32 %v4581_v43, %v4562_v5  ;;  %v4354_v51 = vsel %vm633_vm9, %v11297_v38, %v9766_v3  ;;  %v11301_v43 = vld [vmem:[#allocation28_spill] sm:$0xff]  ;;  %v11302_v5 = vld [vmem:[#allocation67_spill] sm:$0xff] }
 0x9c7   : > { %v9854_v14 = vadd.f32 %v5299_v58, %v5280_v26  ;;  %5076 = vrot.lane.b32.xlu0 %v5070_v28, %s10934_s26  ;;  %v4311_v48 = vadd.f32 %v4306_v19, %v4287_v21  ;;  %v11295_v28 = vld [vmem:[#allocation64_spill] sm:$0xff]  ;;  %v11296_v26 = vld [vmem:[#allocation157_spill] sm:$0xff]  ;;  %v4872_v10 = vadd.f32 %v4867_v18, %v4848_v56  ;;  %v4653_v21 = vsel %vm633_vm9, %v9675_v55, %v11301_v43 }
 0x9c8   : > { %v4891_v58 = vsel %vm581_vm5, %v11296_v26, %v11295_v28  ;;  %v4610_v32 = vadd.f32 %v4605_v30, %v4586_v1  ;;  %v11300_v19 = vld [vmem:[#allocation57_spill] sm:$0xff]  ;;  %v5096_v60 = vmul.f32 %v11302_v5, %v8343_v53  ;;  %v4677_v30 = vsel %vm633_vm9, %v11256_v22, %v9790_v61  ;;  %v11304_v1 = vld [vmem:[#allocation168_spill] sm:$0xff] }
 0x9c9   : > { %v9868_v27 = vpop.permute.xlu0 %4980  ;;  %v4335_v33 = vadd.f32 %v4330_v45, %v4311_v48  ;;  %v4915_v11 = vsel %vm581_vm5, %v11300_v19, %v11299_v42  ;;  %v4896_v2 = vadd.f32 %v4891_v58, %v4872_v10  ;;  %v4810_v45 = vmul.f32 %v11274_v6, %v8312_v8 }
 0x9ca   : > { %v4634_v28 = vadd.f32 %v4629_v49, %v4610_v32  ;;  %v4820_v10 = vmul.f32 %v11277_v37, %v8334_v50  ;;  %v4963_v58 = vsel %vm607_vm7, %v9698_v9, %v11304_v1  ;;  %v11305_v49 = vld [vmem:[#allocation72_spill] sm:$0xff] }
 0x9cb   : > { %5939 = vrot.lane.b32.xlu0 %v5938_v40, %s11298_s27  ;;  %v4359_v46 = vadd.f32 %v4354_v51, %v4335_v33  ;;  %v11303_v40 = vld [vmem:[#allocation122_spill] sm:$0xff]  ;;  %v4920_v48 = vadd.f32 %v4915_v11, %v4896_v2  ;;  %v5408_v51 = vmul.f32 %v11305_v49, %v8326_v44  ;;  %v11307_v2 = vld [vmem:[#allocation176_spill] sm:$0xff]  ;;  %s494_s27 = scalar_lea.vmem %s10312_s15, %s11408_s24 }
 0x9cc   : > { %v4939_v18 = vsel %vm607_vm7, %v11303_v40, %v9596_v54  ;;  %v4658_v33 = vadd.f32 %v4653_v21, %v4634_v28  ;;  %v11308_v28 = vld [vmem:[#allocation186_spill] sm:$0xff] }
 0x9cd   : > { %v4374_v3 = vpop.permute.xlu0 %4373  ;;  %v4944_v22 = vadd.f32 %v4939_v18, %v4920_v48  ;;  %v11309_v21 = vld [vmem:[#allocation34_spill] sm:$0xff] }
 0x9ce   : > { %v4378_v55 = vsel %vm3401_vm11, %v4374_v3, %v11268_v13  ;;  %v4682_v32 = vadd.f32 %v4677_v30, %v4658_v33  ;;  %v11306_v13 = vld [vmem:[#allocation147_spill] sm:$0xff]  ;;  %v11310_v48 = vld [vmem:[#allocation154_spill] sm:$0xff]  ;;  %v5406_v33 = vmul.f32 %v11305_v49, %v8312_v8  ;;  %v11314_v49 = vld [vmem:[#allocation69_spill] sm:$0xff] }
 0x9cf   : > { %v9900_v56 = vadd.f32 %v4378_v55, %v4359_v46  ;;  %5104 = vrot.lane.b32.xlu0 %v5096_v60, %s10934_s26  ;;  %v4842_v61 = vsel %vm555_vm4, %v11306_v13, %v11287_v12  ;;  %v4987_v46 = vsel %vm633_vm9, %v11307_v2, %v9818_v35  ;;  %v4823_v55 = vadd.f32 %v4820_v10, %v4810_v45  ;;  %v11311_v54 = vld [vmem:[#allocation38_spill] sm:$0xff]  ;;  %v11312_v10 = vld [vmem:[#allocation35_spill] sm:$0xff] }
 0x9d0   : > { %v4968_v1 = vadd.f32 %v4963_v58, %v4944_v22  ;;  %v4866_v12 = vsel %vm555_vm4, %v11310_v48, %v11293_v4  ;;  %v4890_v45 = vsel %vm581_vm5, %v11311_v54, %v11296_v26  ;;  %v4938_v54 = vsel %vm607_vm7, %v9647_v41, %v11303_v40  ;;  %v11315_v26 = vld [vmem:[#allocation187_spill] sm:$0xff] }
 0x9d1   : > { %v4697_v5 = vpop.permute.xlu0 %4696  ;;  %v4847_v13 = vadd.f32 %v4842_v61, %v4823_v55  ;;  %v5431_v61 = vmul.f32 %v11314_v49, %v8318_v62  ;;  %v11317_v62 = vld [vmem:[#allocation172_spill] sm:$0xff]  ;;  %v4153_v41 = vmul.f32 %v11229_v39, %v8312_v8  ;;  %v4163_v40 = vmul.f32 %v11230_v7, %v8334_v50 }
 0x9d2   : > { %v4700_v11 = vsel %vm3401_vm11, %v11308_v28, %v4697_v5  ;;  %v4701_v60 = vsel %vm3401_vm11, %v4697_v5, %v11309_v21  ;;  %v4992_v35 = vadd.f32 %v4987_v46, %v4968_v1  ;;  %v11316_v46 = vld [vmem:[#allocation185_spill] sm:$0xff]  ;;  %v4962_v55 = vsel %vm607_vm7, %v11317_v62, %v9698_v9  ;;  %v11318_v9 = vld [vmem:[#allocation127_spill] sm:$0xff] }
 0x9d3   : > { %v4705_v18 = vadd.f32 %v4700_v11, %v9746_v25  ;;  %v4706_v30 = vadd.f32 %v4701_v60, %v4682_v32  ;;  %5416 = vrot.lane.b32.xlu0 %v5408_v51, %s10934_s26  ;;  %v4871_v58 = vadd.f32 %v4866_v12, %v4847_v13  ;;  %v11313_v51 = vld [vmem:[#allocation16_spill] sm:$0xff]  ;;  %v5430_v48 = vmul.f32 %v11314_v49, %v8334_v50  ;;  %v11324_v62 = vld [vmem:[#allocation43_spill] sm:$0xff] }
 0x9d4   : > { %v4914_v4 = vsel %vm581_vm5, %v11313_v51, %v11300_v19  ;;  %v4185_v8 = vsel %vm555_vm4, %v11318_v9, %v11266_v59  ;;  %v4166_v39 = vadd.f32 %v4163_v40, %v4153_v41  ;;  %v11321_v59 = vld [vmem:[#allocation167_spill] sm:$0xff]  ;;  %v11325_v40 = vld [vmem:[#allocation177_spill] sm:$0xff] }
 0x9d5   : > { %v5007_v28 = vpop.permute.xlu0 %5006  ;;  %v4895_v1 = vadd.f32 %v4890_v45, %v4871_v58 }
 0x9d6   : > { %v5011_v25 = vsel %vm633_vm9, %v5007_v28, %v11312_v10 }
 0x9d7   : > { %v5016_v22 = vadd.f32 %v5011_v25, %v4992_v35  ;;  %5412 = vrot.lane.b32.xlu0 %v5406_v33, %s10934_s26  ;;  %v4919_v11 = vadd.f32 %v4914_v4, %v4895_v1  ;;  %v4190_v25 = vadd.f32 %v4185_v8, %v4166_v39 }
 0x9d9   : > { %v5319_v32 = vpop.permute.xlu0 %5318  ;;  %v4943_v12 = vadd.f32 %v4938_v54, %v4919_v11 }
 0x9da   : > { %v5322_v5 = vsel %vm633_vm9, %v11315_v26, %v5319_v32  ;;  %v5323_v35 = vsel %vm633_vm9, %v5319_v32, %v11316_v46 }
 0x9db   : > { %v5327_v60 = vadd.f32 %v5322_v5, %v9768_v34  ;;  %v5328_v19 = vadd.f32 %v5323_v35, %v9854_v14  ;;  %5438 = vrot.lane.b32.xlu0 %v5431_v61, %s10934_s26  ;;  %v4986_v34 = vsel %vm633_vm9, %v9868_v27, %v11307_v2  ;;  %v4967_v13 = vadd.f32 %v4962_v55, %v4943_v12  ;;  %v11319_v27 = vld [vmem:[#allocation130_spill] sm:$0xff]  ;;  %v11323_v5 = vld [vmem:[#allocation189_spill] sm:$0xff]  ;;  %v3097_v12 = vld [vmem:[#allocation4] sm:$0xf] }
 0x9dc   : > { %v11320_v2 = vld [vmem:[#allocation166_spill] sm:$0xff]  ;;  %v4257_v61 = vsel %vm581_vm5, %v11321_v59, %v11279_v36  ;;  %v4305_v36 = vsel %vm607_vm7, %v11324_v62, %v11285_v17  ;;  %v11328_v17 = vld [vmem:[#allocation5_spill] sm:$0xff] }
 0x9dd   : > { %v4372_v33 = vpop.permute.xlu0 %4371  ;;  %v4991_v7 = vadd.f32 %v4986_v34, %v4967_v13  ;;  %v4233_v4 = vsel %vm581_vm5, %v11320_v2, %v11275_v31  ;;  %v11329_v8 = vsub.s32 2, %v11328_v17 }
 0x9de   : > { %v4377_v14 = vsel %vm3401_vm11, %v4372_v33, %v4374_v3  ;;  %v4209_v3 = vsel %vm555_vm4, %v11319_v27, %v11271_v20 }
 0x9df   : > { %5436 = vrot.lane.b32.xlu0 %v5430_v48, %s10934_s26  ;;  %v4214_v49 = vadd.f32 %v4209_v3, %v4190_v25  ;;  %v11326_v48 = vld [vmem:[#allocation47_spill] sm:$0xff]  ;;  %v3106_v39 = vrot.slane %v3097_v12, %v11329_v8 }
 0x9e1   : > { %v5005_v45 = vpop.permute.xlu0 %5004  ;;  %v4238_v1 = vadd.f32 %v4233_v4, %v4214_v49  ;;  %v11332_v49 = vld [vmem:[#allocation6_spill] sm:$0xff] }
 0x9e2   : > { %v5010_v50 = vsel %vm633_vm9, %v5005_v45, %v5007_v28  ;;  %v11322_v28 = vld [vmem:[#allocation171_spill] sm:$0xff]  ;;  %v3116_v59 = vrot.slane %v3106_v39, %v11332_v49 }
 0x9e3   : > { %v5015_v58 = vadd.f32 %v5010_v50, %v4991_v7  ;;  %v4281_v54 = vsel %vm607_vm7, %v11322_v28, %v11282_v15  ;;  %v4262_v35 = vadd.f32 %v4257_v61, %v4238_v1  ;;  %v4329_v15 = vsel %vm633_vm9, %v11325_v40, %v11291_v24  ;;  %v11330_v24 = vld [vmem:[#allocation66_spill] sm:$0xff]  ;;  %v11333_v61 = vld [vmem:[#allocation7_spill] sm:$0xff] }
 0x9e4   : > { %v11331_v50 = vsub.s32 3, %v11328_v17  ;;  %v3102_v28 = vrot.slane %v3097_v12, %v11332_v49 }
 0x9e5   : > { %v9964_v51 = vpop.permute.xlu0 %4397  ;;  %v4286_v55 = vadd.f32 %v4281_v54, %v4262_v35 }
 0x9e6   : > { %v3133_v25 = vrot.slane %v3097_v12, %v11331_v50  ;;  %v11342_v50 = vld [vmem:[#allocation87_spill] sm:$0xff] }
 0x9e7   : > { %v4310_v33 = vadd.f32 %v4305_v36, %v4286_v55  ;;  %v11336_v36 = vld [vmem:[#allocation79_spill] sm:$0xff]  ;;  %v11337_v55 = vld [vmem:[#allocation54_spill] sm:$0xff] }
 0x9e8   : > { %v3143_v1 = vrot.slane %v3133_v25, %v11333_v61  ;;  %v3199_v40 = vsel %vm555_vm4, %v11337_v55, %v11336_v36  ;;  %v11343_v25 = vld [vmem:[#allocation82_spill] sm:$0xff] }
 0x9e9   : > { %v4721_v32 = vpop.permute.xlu0 %4720  ;;  %v4334_v13 = vadd.f32 %v4329_v15, %v4310_v33  ;;  %v3112_v15 = vrot.slane %v3102_v28, %v11332_v49 }
 0x9ea   : > { %v4724_v26 = vsel %vm3401_vm11, %v9550_v57, %v4721_v32  ;;  %v4725_v20 = vsel %vm3401_vm11, %v4721_v32, %v11323_v5 }
 0x9eb   : > { %v9982_v11 = vadd.f32 %v4724_v26, %v4705_v18  ;;  %v9984_v31 = vadd.f32 %v4725_v20, %v4706_v30  ;;  %v11327_v18 = vld [vmem:[#allocation181_spill] sm:$0xff] }
 0x9ec   : > { %v4353_v30 = vsel %vm633_vm9, %v11327_v18, %v11297_v38  ;;  %v11338_v18 = vld [vmem:[#allocation83_spill] sm:$0xff] }
 0x9ed   : > { %v5031_v41 = vpop.permute.xlu0 %5030 }
 0x9ee   : > { %v5035_v57 = vsel %vm3401_vm11, %v5031_v41, %v11326_v48 }
 0x9ef   : > { %v9994_v34 = vadd.f32 %v5035_v57, %v5016_v22  ;;  %v4358_v22 = vadd.f32 %v4353_v30, %v4334_v13 }
 0x9f1   : > { %v5343_v9 = vpop.permute.xlu0 %5342  ;;  %v4382_v2 = vadd.f32 %v4377_v14, %v4358_v22  ;;  %v11335_v14 = vld [vmem:[#allocation41_spill] sm:$0xff]  ;;  %v3292_v22 = vsel %vm581_vm5, %v11343_v25, %v11342_v50 }
 0x9f2   : > { %v5346_v7 = vsel %vm633_vm9, %v9580_v29, %v5343_v9  ;;  %v5347_v45 = vsel %vm633_vm9, %v5343_v9, %v11330_v24  ;;  %v3150_v20 = vmul.f32 %v11335_v14, %v3143_v1  ;;  %v11340_v9 = vld [vmem:[#allocation85_spill] sm:$0xff] }
 0x9f3   : > { %v5351_v27 = vadd.f32 %v5346_v7, %v5327_v60  ;;  %v10007_v3 = vadd.f32 %v5347_v45, %v5328_v19  ;;  %v3129_v60 = vrot.slane %v3097_v12, %v11333_v61  ;;  %v11334_v19 = vld [vmem:[#allocation20_spill] sm:$0xff]  ;;  %v10037_v45 = vpop.permute.xlu1 %3804  ;;  %v11345_v1 = vld [vmem:[#allocation89_spill] sm:$0xff] }
 0x9f4   : > { %v3123_v26 = vmul.f32 %v11334_v19, %v3116_v59  ;;  %v3122_v8 = vmul.f32 %v11334_v19, %v3112_v15  ;;  %v11347_v19 = vld [vmem:[#allocation81_spill] sm:$0xff] }
 0x9f5   : > { %v4396_v38 = vpop.permute.xlu0 %4395  ;;  %v3139_v57 = vrot.slane %v3129_v60, %v11333_v61 }
 0x9f6   : > { %v4401_v4 = vsel %vm3401_vm11, %v4396_v38, %v9964_v51  ;;  %v3152_v33 = vadd.f32 %v3150_v20, %v3123_v26  ;;  %v11349_v20 = vld [vmem:[#allocation56_spill] sm:$0xff] }
 0x9f7   : > { %v10013_v29 = vadd.f32 %v4401_v4, %v4382_v2  ;;  %v3149_v39 = vmul.f32 %v11335_v14, %v3139_v57  ;;  %v11344_v4 = vld [vmem:[#allocation59_spill] sm:$0xff]  ;;  %v10056_v57 = vpop.permute.xlu1 %4139 }
 0x9f8   : > { %v3203_v30 = vadd.f32 %v3199_v40, %v3152_v33  ;;  %v3198_v59 = vsel %vm555_vm4, %v11344_v4, %v11337_v55  ;;  %v11348_v14 = vld [vmem:[#allocation91_spill] sm:$0xff]  ;;  %v11350_v55 = vld [vmem:[#allocation84_spill] sm:$0xff] }
 0x9f9   : > { %v5029_v32 = vpop.permute.xlu0 %5028  ;;  %v3336_v36 = vsel %vm607_vm7, %v11349_v20, %v11348_v14 }
 0x9fa   : > { %v5034_v54 = vsel %vm3401_vm11, %v5029_v32, %v5031_v41  ;;  %v11339_v41 = vld [vmem:[#allocation78_spill] sm:$0xff] }
 0x9fb   : > { %v5039_v35 = vadd.f32 %v5034_v54, %v5015_v58  ;;  %v3248_v12 = vsel %vm555_vm4, %v11339_v41, %v11338_v18  ;;  %v11341_v58 = vld [vmem:[#allocation80_spill] sm:$0xff]  ;;  %v11346_v32 = vld [vmem:[#allocation58_spill] sm:$0xff]  ;;  %v3151_v54 = vadd.f32 %v3149_v39, %v3122_v8  ;;  %v3247_v26 = vsel %vm555_vm4, %v11347_v19, %v11339_v41  ;;  %v10085_v14 = vpop.permute.xlu1 %4770 }
 0x9fc   : > { %v3270_v17 = vsel %vm581_vm5, %v11341_v58, %v11340_v9  ;;  %v3252_v7 = vadd.f32 %v3248_v12, %v3203_v30  ;;  %v3314_v28 = vsel %vm607_vm7, %v11346_v32, %v11345_v1  ;;  %v3269_v18 = vsel %vm581_vm5, %v11350_v55, %v11341_v58  ;;  %v11351_v12 = vld [vmem:[#allocation95_spill] sm:$0xff] }
 0x9fd   : > { %v10020_v62 = vpop.permute.xlu0 %4421  ;;  %v3202_v40 = vadd.f32 %v3198_v59, %v3151_v54  ;;  %v11352_v30 = vld [vmem:[#allocation31_spill] sm:$0xff]  ;;  %v11357_v54 = vld [vmem:[#allocation49_spill] sm:$0xff]  ;;  %vm5118_vm4 = vcmask 39936  }
 0x9fe   : > { %v3274_v2 = vadd.f32 %v3270_v17, %v3252_v7  ;;  %v3358_v9 = vsel %vm633_vm9, %v11352_v30, %v11351_v12  ;;  %v11353_v7 = vld [vmem:[#allocation86_spill] sm:$0xff] }
 0x9ff   : > { %v3251_v17 = vadd.f32 %v3247_v26, %v3202_v40  ;;  %v3291_v50 = vsel %vm581_vm5, %v11353_v7, %v11343_v25  ;;  %v11359_v25 = vld [vmem:[#allocation90_spill] sm:$0xff]  ;;  %v11360_v40 = vld [vmem:[#allocation101_spill] sm:$0xff]  ;;  %vm11400_vm5 = vcmask 1014784  }
 0xa00   : > { %v3296_v60 = vadd.f32 %v3292_v22, %v3274_v2  ;;  %v11354_v22 = vld [vmem:[#allocation98_spill] sm:$0xff]  ;;  %v11355_v2 = vld [vmem:[#allocation61_spill] sm:$0xff] }
 0xa01   : > { %v10030_v13 = vpop.permute.xlu0 %4744  ;;  %v3380_v58 = vsel %vm633_vm9, %v11355_v2, %v11354_v22  ;;  %v3273_v4 = vadd.f32 %v3269_v18, %v3251_v17  ;;  %v11362_v18 = vld [vmem:[#allocation71_spill] sm:$0xff]  ;;  %v11365_v22 = vld [vmem:[#allocation104_spill] sm:$0xff] }
 0xa02   : > { %v3318_v15 = vadd.f32 %v3314_v28, %v3296_v60  ;;  %v11356_v28 = vld [vmem:[#allocation88_spill] sm:$0xff]  ;;  %v11358_v60 = vld [vmem:[#allocation25_spill] sm:$0xff]  ;;  %v4478_v12 = vmul.f32 %v11362_v18, %v8326_v44 }
 0xa03   : > { %v3295_v19 = vadd.f32 %v3291_v50, %v3273_v4  ;;  %v11364_v50 = vld [vmem:[#allocation93_spill] sm:$0xff] }
 0xa04   : > { %v3340_v8 = vadd.f32 %v3336_v36, %v3318_v15  ;;  %v3335_v36 = vsel %vm607_vm7, %v11359_v25, %v11349_v20  ;;  %v11361_v15 = vld [vmem:[#allocation36_spill] sm:$0xff]  ;;  %v3357_v20 = vsel %vm633_vm9, %v11364_v50, %v11352_v30  ;;  %v11370_v25 = vld [vmem:[#allocation46_spill] sm:$0xff] }
 0xa05   : > { %v10042_v38 = vpop.permute.xlu0 %5054  ;;  %v3425_v55 = vsel %vm3401_vm11, %v11361_v15, %v11360_v40 }
 0xa06   : > { %v3362_v59 = vadd.f32 %v3358_v9, %v3340_v8  ;;  %v11363_v9 = vld [vmem:[#allocation74_spill] sm:$0xff] }
 0xa08   : > { %v3384_v26 = vadd.f32 %v3380_v58, %v3362_v59  ;;  %v11366_v58 = vld [vmem:[#allocation10_spill] sm:$0xff]  ;;  %v11367_v59 = vld [vmem:[#allocation92_spill] sm:$0xff] }
 0xa09   : > { %v10058_v33 = vpop.permute.xlu0 %5366  ;;  %v3447_v4 = vsel %vm1375_vm8, %v11366_v58, %v11365_v22  ;;  %v10120_v22 = vpop.permute.xlu1 %5080 }
 0xa0a   : > { %v5370_v41 = vsel %vm3401_vm11, %v9774_v23, %v10058_v33  ;;  %v3313_v23 = vsel %vm607_vm7, %v11356_v28, %v11346_v32  ;;  %v4402_v32 = vsel %vm3401_vm11, %v9964_v51, %v11273_v63  ;;  %v4426_v63 = vsel %vm1375_vm8, %v10020_v62, %v11367_v59 }
 0xa0b   : > { %v10069_v39 = vadd.f32 %v5370_v41, %v5351_v27  ;;  %v3403_v27 = vsel %vm3401_vm11, %v11358_v60, %v11357_v54  ;;  %v4488_v41 = vmul.f32 %v11363_v9, %v8343_v53  ;;  %v3317_v17 = vadd.f32 %v3313_v23, %v3295_v19  ;;  %v11368_v19 = vld [vmem:[#allocation97_spill] sm:$0xff] }
 0xa0c   : > { %v3407_v8 = vadd.f32 %v3403_v27, %v3384_v26  ;;  %v4407_v23 = vadd.f32 %v4402_v32, %v9900_v56  ;;  %v3379_v30 = vsel %vm633_vm9, %v11368_v19, %v11355_v2  ;;  %v11369_v26 = vld [vmem:[#allocation107_spill] sm:$0xff]  ;;  %vm5135_vm7 = vcmask 1006592   ;;  %vm11401_vm9 = vmmov %vm11400_vm5 }
 0xa0d   : > { %v10077_v1 = vpop.permute.xlu0 %4419  ;;  %v3339_v28 = vadd.f32 %v3335_v36, %v3317_v17  ;;  %v3469_v40 = vsel %vm1375_vm8, %v11370_v25, %v11369_v26  ;;  %v4491_v50 = vadd.f32 %v4488_v41, %v4478_v12  ;;  %v11371_v56 = vld [vmem:[#allocation99_spill] sm:$0xff]  ;;  %v11372_v17 = vld [vmem:[#allocation182_spill] sm:$0xff]  ;;  %v11373_v12 = vld [vmem:[#allocation100_spill] sm:$0xff] }
 0xa0e   : > { %v3429_v54 = vadd.f32 %v3425_v55, %v3407_v8  ;;  %v3424_v41 = vsel %vm3401_vm11, %v11373_v12, %v11361_v15  ;;  %v4812_v15 = vmul.f32 %v11274_v6, %v8326_v44  ;;  %v11376_v26 = vld [vmem:[#allocation106_spill] sm:$0xff] }
 0xa0f   : > { %v3361_v18 = vadd.f32 %v3357_v20, %v3339_v28  ;;  %v4515_v8 = vadd.f32 %v11372_v17, %v4491_v50  ;;  %v11378_v17 = vld [vmem:[#allocation76_spill] sm:$0xff] }
 0xa10   : > { %v3451_v9 = vadd.f32 %v3447_v4, %v3429_v54  ;;  %v10141_v54 = vpop.permute.xlu1 %5392 }
 0xa11   : > { %v5053_v7 = vpop.permute.xlu0 %5052  ;;  %v3383_v55 = vadd.f32 %v3379_v30, %v3361_v18  ;;  %v4539_v28 = vadd.f32 %v11280_v0, %v4515_v8  ;;  %v4822_v30 = vmul.f32 %v11277_v37, %v8343_v53  ;;  %v5148_v8 = vmul.f32 %v11378_v17, %v8326_v44 }
 0xa12   : > { %v5058_v51 = vsel %vm3401_vm11, %v5053_v7, %v10042_v38  ;;  %v4431_v7 = vadd.f32 %v4426_v63, %v4407_v23  ;;  %v3473_v32 = vadd.f32 %v3469_v40, %v3451_v9  ;;  %v11374_v63 = vld [vmem:[#allocation102_spill] sm:$0xff]  ;;  %v11375_v23 = vld [vmem:[#allocation19_spill] sm:$0xff] }
 0xa13   : > { %v10112_v27 = vadd.f32 %v5058_v51, %v5039_v35  ;;  %v3402_v35 = vsel %vm3401_vm11, %v11371_v56, %v11358_v60  ;;  %v3446_v60 = vsel %vm1375_vm8, %v11374_v63, %v11366_v58  ;;  %v3468_v58 = vsel %vm1375_vm8, %v11376_v26, %v11370_v25  ;;  %v11382_v63 = vld [vmem:[#allocation163_spill] sm:$0xff] }
 0xa14   : > { %v3406_v4 = vadd.f32 %v3402_v35, %v3383_v55  ;;  %v3477_v19 = vmul.f32 %v3473_v32, %v11375_v23  ;;  %v4825_v35 = vadd.f32 %v4822_v30, %v4812_v15  ;;  %v11377_v55 = vld [vmem:[#allocation145_spill] sm:$0xff] }
 0xa15   : > { %v10122_v36 = vpop.permute.xlu0 %4445 }
 0xa16   : > { %v4450_v2 = vsel %vm1375_vm8, %v10122_v36, %v9816_v47  ;;  %v3428_v51 = vadd.f32 %v3424_v41, %v3406_v4  ;;  %v4849_v32 = vadd.f32 %v11377_v55, %v4825_v35  ;;  %v11380_v41 = vld [vmem:[#allocation18_spill] sm:$0xff]  ;;  %v11381_v4 = vld [vmem:[#allocation151_spill] sm:$0xff] }
 0xa17   : > { %v4455_v20 = vadd.f32 %v4450_v2, %v4431_v7  ;;  %v4563_v7 = vadd.f32 %v11283_v52, %v4539_v28  ;;  %v4767_v2 = vpop.permute.xlu1 %4766  ;;  %v11389_v55 = vld [vmem:[#allocation55_spill] sm:$0xff] }
 0xa18   : > { %v3450_v40 = vadd.f32 %v3446_v60, %v3428_v51  ;;  %v11383_v51 = vld [vmem:[#allocation64_spill] sm:$0xff] }
 0xa19   : > { %4462 = vrot.lane.b32.xlu0 %v4455_v20, %s6020_s28  ;;  %v3807_v59 = vpop.permute.xlu0 %3806  ;;  %v4587_v6 = vadd.f32 %v11288_v16, %v4563_v7  ;;  %v11379_v20 = vld [vmem:[#allocation77_spill] sm:$0xff] }
 0xa1a   : > { %v3809_v47 = vsel %vm813_vm14, %v10037_v45, %v3807_v59  ;;  %v3472_v50 = vadd.f32 %v3468_v58, %v3450_v40  ;;  %v5158_v12 = vmul.f32 %v11379_v20, %v8343_v53  ;;  %v4873_v59 = vadd.f32 %v11381_v4, %v4849_v32  ;;  %v11385_v53 = vld [vmem:[#allocation152_spill] sm:$0xff] }
 0xa1b   : > { %v3813_v18 = vadd.f32 %v3809_v47, %v3477_v19  ;;  %v4611_v60 = vadd.f32 %v11382_v63, %v4587_v6  ;;  %v11384_v19 = vld [vmem:[#allocation94_spill] sm:$0xff]  ;;  %v10171_v44 = vpop.permute.xlu1 %5388 }
 0xa1c   : > { %v3476_v52 = vmul.f32 %v3472_v50, %v11380_v41  ;;  %v4897_v28 = vadd.f32 %v11383_v51, %v4873_v59  ;;  %v11387_v50 = vld [vmem:[#allocation109_spill] sm:$0xff]  ;;  %v11392_v41 = vld [vmem:[#allocation112_spill] sm:$0xff]  ;;  %v11393_v63 = vld [vmem:[#allocation170_spill] sm:$0xff] }
 0xa1d   : > { %v4142_v9 = vpop.permute.xlu0 %4141  ;;  %v4635_v15 = vadd.f32 %v11384_v19, %v4611_v60 }
 0xa1e   : > { %v4144_v0 = vsel %vm951_vm15, %v10056_v57, %v4142_v9  ;;  %v4921_v40 = vadd.f32 %v11299_v42, %v4897_v28  ;;  %v11394_v28 = vld [vmem:[#allocation113_spill] sm:$0xff] }
 0xa1f   : > { %v10154_v56 = vadd.f32 %v4144_v0, %v3813_v18  ;;  %v11386_v18 = vld [vmem:[#allocation188_spill] sm:$0xff]  ;;  %v4659_v0 = vadd.f32 %v11301_v43, %v4635_v15  ;;  %v10180_v35 = vpop.permute.xlu1 %5102  ;;  %v4425_v43 = vsel %vm1375_vm8, %v10077_v1, %v10020_v62  ;;  %v11395_v1 = vld [vmem:[#allocation137_spill] sm:$0xff] }
 0xa20   : > { %v4945_v7 = vadd.f32 %v11387_v50, %v4921_v40 }
 0xa21   : > { %v3803_v37 = vpop.permute.xlu0 %3802 }
 0xa22   : > { %v3808_v25 = vsel %vm813_vm14, %v3803_v37, %v10037_v45  ;;  %v5161_v45 = vadd.f32 %v5158_v12, %v5148_v8  ;;  %v11391_v8 = vld [vmem:[#allocation110_spill] sm:$0xff] }
 0xa23   : > { %v3812_v16 = vadd.f32 %v3808_v25, %v3476_v52  ;;  %v11390_v25 = vld [vmem:[#allocation168_spill] sm:$0xff]  ;;  %v10193_v4 = vpop.permute.xlu1 %5414 }
 0xa24   : > { %v5185_v26 = vadd.f32 %v11385_v53, %v5161_v45  ;;  %v4969_v17 = vadd.f32 %v11390_v25, %v4945_v7  ;;  %v11396_v53 = vld [vmem:[#allocation96_spill] sm:$0xff] }
 0xa25   : > { %v4138_v47 = vpop.permute.xlu0 %4137 }
 0xa26   : > { %v4143_v23 = vsel %vm951_vm15, %v4138_v47, %v10056_v57  ;;  %v5209_v9 = vadd.f32 %v11386_v18, %v5185_v26  ;;  %v11388_v57 = vld [vmem:[#allocation50_spill] sm:$0xff]  ;;  %v4993_v52 = vadd.f32 %v11392_v41, %v4969_v17  ;;  %v4748_v26 = vsel %vm1375_vm8, %v11396_v53, %v10030_v13 }
 0xa27   : > { %v10173_v30 = vadd.f32 %v4143_v23, %v3812_v16  ;;  %v4683_v6 = vadd.f32 %v11388_v57, %v4659_v0  ;;  %v4430_v16 = vadd.f32 %v4425_v43, %v10013_v29  ;;  %v5101_v19 = vpop.permute.xlu1 %5100  ;;  %v4749_v29 = vsel %vm1375_vm8, %v10030_v13, %v11395_v1  ;;  %v11397_v0 = vld [vmem:[#allocation111_spill] sm:$0xff] }
 0xa28   : > { %v5233_v32 = vadd.f32 %v11389_v55, %v5209_v9  ;;  %v5017_v51 = vadd.f32 %v11312_v10, %v4993_v52  ;;  %v4754_v40 = vadd.f32 %v4749_v29, %v9984_v31  ;;  %v4753_v13 = vadd.f32 %v4748_v26, %v9982_v11 }
 0xa29   : > { %v4769_v58 = vpop.permute.xlu0 %4768  ;;  %v4707_v12 = vadd.f32 %v11309_v21, %v4683_v6 }
 0xa2a   : > { %v5257_v20 = vadd.f32 %v11391_v8, %v5233_v32  ;;  %v4772_v55 = vsel %vm1375_vm8, %v4767_v2, %v4769_v58 }
 0xa2b   : > { %v4731_v59 = vadd.f32 %v11323_v5, %v4707_v12  ;;  %v5041_v5 = vadd.f32 %v11326_v48, %v5017_v51  ;;  %v5059_v48 = vsel %vm3401_vm11, %v10042_v38, %v11397_v0  ;;  %v5945_v57 = vpop.permute.xlu1 %5944  ;;  %v4777_v12 = vadd.f32 %v4772_v55, %v4753_v13 }
 0xa2c   : > { %v5281_v60 = vadd.f32 %v11393_v63, %v5257_v20  ;;  %v5947_v17 = vunpack.i.h.bf16 %v5945_v57  ;;  %v5064_v38 = vadd.f32 %v5059_v48, %v9994_v34  ;;  %v5946_v43 = vunpack.i.l.bf16 %v5945_v57 }
 0xa2d   : > { %v5079_v37 = vpop.permute.xlu0 %5078  ;;  %v4755_v15 = vadd.f32 %v11395_v1, %v4731_v59 }
 0xa2e   : > { %v5305_v23 = vadd.f32 %v11394_v28, %v5281_v60  ;;  %v5083_v31 = vsel %vm1375_vm8, %v5079_v37, %v10120_v22  ;;  %v5119_v51 = vsel %vm5118_vm4, %v5946_v43, %v5947_v17  ;;  %v5106_v28 = vsel %vm1375_vm8, %v5101_v19, %v10180_v35 }
 0xa2f   : > { %v4779_v18 = vadd.f32 %v10085_v14, %v4755_v15  ;;  %v5088_v11 = vadd.f32 %v5083_v31, %v5064_v38  ;;  %v5441_v63 = vpop.permute.xlu1 %5440 }
 0xa30   : > { %v5329_v10 = vadd.f32 %v11316_v46, %v5305_v23  ;;  %v5065_v46 = vadd.f32 %v11397_v0, %v5041_v5 }
 0xa31   : > { %v10187_v42 = vpop.permute.xlu0 %5390 }
 0xa32   : > { %v5353_v6 = vadd.f32 %v11330_v24, %v5329_v10  ;;  %v5089_v24 = vadd.f32 %v10120_v22, %v5065_v46  ;;  %v5395_v23 = vsel %vm3401_vm11, %v10187_v42, %v10141_v54 }
 0xa35   : > { %v4444_v47 = vpop.permute.xlu0 %4443 }
 0xa36   : > { %v4449_v21 = vsel %vm1375_vm8, %v4444_v47, %v10122_v36  ;;  %v4773_v36 = vsel %vm1375_vm8, %v4769_v58, %v10085_v14  ;;  %v11399_v58 = vld [vmem:[#allocation23_spill] sm:$0xff] }
 0xa37   : > { %v4454_v45 = vadd.f32 %v4449_v21, %v4430_v16  ;;  %v4778_v32 = vadd.f32 %v4773_v36, %v4754_v40  ;;  %v5377_v52 = vadd.f32 %v11399_v58, %v5353_v6  ;;  %v5371_v47 = vsel %vm3401_vm11, %v10058_v33, %v11399_v58 }
 0xa39   : > { %4460 = vrot.lane.b32.xlu0 %v4454_v45, %s6020_s28  ;;  %v5077_v62 = vpop.permute.xlu0 %5076  ;;  %s11398_s28 = smov 124   ;;  %v5401_v21 = vadd.f32 %v10141_v54, %v5377_v52  ;;  %v5376_v45 = vadd.f32 %v5371_v47, %v10007_v3  ;;  %v5394_v54 = vsel %vm3401_vm11, %v10171_v44, %v10187_v42 }
 0xa3a   : > { %v5082_v41 = vsel %vm1375_vm8, %v5077_v62, %v5079_v37  ;;  %v5476_v37 = vld [vmem:[%s10309_s12] sm:$0x3]  ;;  %v5950_v62 = vpop.permute.xlu1 %5949  ;;  %v5399_v0 = vadd.f32 %v5394_v54, %v10069_v39 }
 0xa3b   : > { %v5087_v22 = vadd.f32 %v5082_v41, %v10112_v27  ;;  %v5951_v29 = vunpack.i.l.bf16 %v5950_v62  ;;  %v5400_v36 = vadd.f32 %v5395_v23, %v5376_v45  ;;  %v11404_v54 = vld [vmem:[#allocation8_spill] sm:$0xff] }
 0xa3d   : > { %v5940_v9 = vpop.permute.xlu0 %5939  ;;  %v5111_v1 = vadd.f32 %v5106_v28, %v5087_v22 }
 0xa3e   : > { %v5942_v50 = vunpack.i.h.bf16 %v5940_v9  ;;  %v5941_v7 = vunpack.i.l.bf16 %v5940_v9  ;;  %v4465_v13 = vpop.permute.xlu1 %4464 }
 0xa3f   : > { %v5123_v19 = vmul.f32 %v5946_v43, %v5111_v1 }
 0xa40   : > { %v4790_v14 = vmul.f32 %v5942_v50, %v4779_v18  ;;  %v4784_v25 = vsel %vm1258_vm1, %v5941_v7, %v5942_v50  ;;  %v4788_v34 = vmul.f32 %v5941_v7, %v4777_v12  ;;  %vm11403_vm1 = vmmov %vm11402_vm0 }
 0xa41   : > { %v4789_v8 = vmul.f32 %v4784_v25, %v4778_v32  ;;  %v5105_v20 = vpop.permute.xlu0 %5104 }
 0xa42   : > { %v5107_v2 = vsel %vm1375_vm8, %v10180_v35, %v5105_v20  ;;  %4798 = vrot.lane.b32.xlu0 %v4790_v14, %s11398_s28  ;;  %v5113_v59 = vadd.f32 %v5105_v20, %v5089_v24  ;;  %v5952_v35 = vunpack.i.h.bf16 %v5950_v62 }
 0xa43   : > { %4796 = vrot.lane.b32.xlu1 %v4789_v8, %s11398_s28  ;;  %v5112_v60 = vadd.f32 %v5107_v2, %v5088_v11 }
 0xa44   : > { %v5125_v27 = vmul.f32 %v5947_v17, %v5113_v59  ;;  %v5454_v18 = vsel %vm1921_vm6, %v5951_v29, %v5952_v35 }
 0xa45   : > { %v5417_v16 = vpop.permute.xlu0 %5416  ;;  %v5124_v15 = vmul.f32 %v5119_v51, %v5112_v60 }
 0xa46   : > { %4794 = vrot.lane.b32.xlu0 %v4788_v34, %s11398_s28  ;;  %v5425_v33 = vadd.f32 %v5417_v16, %v5401_v21  ;;  %v5419_v10 = vsel %vm1375_vm8, %v10193_v4, %v5417_v16 }
 0xa47   : > { %5479 = vperm.xlu1 %5953, %v5476_v37   ;;  %v5424_v3 = vadd.f32 %v5419_v10, %v5400_v36 }
 0xa48   : > { %v5449_v53 = vadd.f32 %v5441_v63, %v5425_v33 }
 0xa49   : > { %v5413_v5 = vpop.permute.xlu0 %5412 }
 0xa4a   : > { %5133 = vrot.lane.b32.xlu0 %v5125_v27, %s6058_s20  ;;  %v5418_v40 = vsel %vm1375_vm8, %v5413_v5, %v10193_v4  ;;  %v5460_v50 = vmul.f32 %v5952_v35, %v5449_v53  ;;  %v5519_v4 = vld [vmem:[%s10311_s14] sm:$0xf]  ;;  %v11406_v53 = vld [vmem:[#allocation26_spill] sm:$0xff] }
 0xa4b   : > { %5131 = vrot.lane.b32.xlu1 %v5124_v15, %s6058_s20  ;;  %v5423_v7 = vadd.f32 %v5418_v40, %v5399_v0  ;;  %v11407_v40 = vld [vmem:[#allocation40_spill] sm:$0xff] }
 0xa4d   : > { %v5439_v26 = vpop.permute.xlu0 %5438 }
 0xa4e   : > { %v5443_v9 = vsel %vm1375_vm8, %v5439_v26, %v5441_v63 }
 0xa4f   : > { %v5448_v48 = vadd.f32 %v5443_v9, %v5424_v3  ;;  %5129 = vrot.lane.b32.xlu1 %v5123_v19, %s6058_s20  ;;  %v11405_v19 = vld [vmem:[#allocation37_spill] sm:$0xff] }
 0xa51   : > { %v5459_v46 = vmul.f32 %v5454_v18, %v5448_v48  ;;  %v5437_v44 = vpop.permute.xlu0 %5436  ;;  %v5518_v48 = vld [vmem:[%s10310_s13] sm:$0xf] }
 0xa52   : > { %v5442_v42 = vsel %vm1375_vm8, %v5437_v44, %v5439_v26 }
 0xa53   : > { %v5447_v57 = vadd.f32 %v5442_v42, %v5423_v7  ;;  %5466 = vrot.lane.b32.xlu0 %v5459_v46, %s6048_s22  ;;  %5468 = vrot.lane.b32.xlu1 %v5460_v50, %s6048_s22  ;;  %v5969_v42 = vld [vmem:[%s6165_s25] sm:$0xff] }
 0xa55   : > { %v5458_v6 = vmul.f32 %v5951_v29, %v5447_v57 }
 0xa57   : > { %5464 = vrot.lane.b32.xlu0 %v5458_v6, %s6048_s22  ;;  %5522 = vperm.xlu1 %5953, %v5519_v4  }
 0xa8b   : > { %v4463_v39 = vpop.permute.xlu0 %4462 }
 0xa8c   : > { %v4467_v12 = vsel %vm1111_vm2, %v4463_v39, %v4465_v13 }
 0xa8d   : > { %v4471_v11 = vadd.f32 %v4467_v12, %v10154_v56 }
 0xaab   : > { %v4461_v55 = vpop.permute.xlu0 %4460 }
 0xaac   : > { %v4466_v8 = vsel %vm1111_vm2, %v4461_v55, %v4463_v39 }
 0xaad   : > { %v4470_v24 = vadd.f32 %v4466_v8, %v10173_v30 }
 0xab4   : > { %v4799_v32 = vpop.permute.xlu0 %4798 }
 0xab5   : > { %v4797_v14 = vpop.permute.xlu1 %4796 }
 0xab6   : > { %v4801_v2 = vsel %vm11401_vm9, %v4797_v14, %v4799_v32 }
 0xab7   : > { %v4805_v37 = vadd.f32 %v4801_v2, %v4471_v11 }
 0xab8   : > { %v4795_v31 = vpop.permute.xlu0 %4794 }
 0xab9   : > { %v4800_v41 = vsel %vm11400_vm5, %v4795_v31, %v4797_v14 }
 0xaba   : > { %v4804_v58 = vadd.f32 %v4800_v41, %v4470_v24 }
 0xabc   : > { %v5134_v25 = vpop.permute.xlu0 %5133 }
 0xac5   : > { %v5467_v38 = vpop.permute.xlu0 %5466 }
 0xac6   : > { %v5480_v17 = vpop.permute.xlu1 %5479 }
 0xac9   : > { %v5465_v52 = vpop.permute.xlu0 %5464 }
 0xaca   : > { %v5132_v20 = vpop.permute.xlu1 %5131  ;;  %v5470_v22 = vsel %vm11402_vm0, %v5465_v52, %v5467_v38 }
 0xacb   : > { %v5137_v34 = vsel %vm5135_vm7, %v5132_v20, %v5134_v25 }
 0xacc   : > { %v5141_v60 = vadd.f32 %v5137_v34, %v4805_v37 }
 0xace   : > { %v5130_v43 = vpop.permute.xlu1 %5129 }
 0xacf   : > { %v5136_v59 = vsel %vm5135_vm7, %v5130_v43, %v5132_v20 }
 0xad0   : > { %v5140_v63 = vadd.f32 %v5136_v59, %v4804_v58 }
 0xad2   : > { %v5474_v16 = vadd.f32 %v5470_v22, %v5140_v63  ;;  %v5469_v47 = vpop.permute.xlu1 %5468 }
 0xad3   : > { %v5471_v51 = vsel %vm11403_vm1, %v5467_v38, %v5469_v47 }
 0xad4   : > { %v5482_v30 = vadd.f32 %v5480_v17, %v5474_v16  ;;  %v5475_v21 = vadd.f32 %v5471_v51, %v5141_v60 }
 0xad6   : > { %v5681_v28 = vmul.f32 -1.442695, %v5482_v30  ;;  %v5483_v23 = vadd.f32 %v5480_v17, %v5475_v21 }
 0xad8   : > { %5955 = vpow2.f32 %v5681_v28  ;;  %v5682_v56 = vmul.f32 -1.442695, %v5483_v23 }
 0xada   : > { %5957 = vpow2.f32 %v5682_v56 }
 0xae2   : > { %v5956_v27 = vpop.eup %5955 }
 0xae3   : > { %v5490_v45 = vadd.f32 1.0, %v5956_v27 }
 0xae4   : > { %v5958_v62 = vpop.eup %5957 }
 0xae5   : > { %5959 = vrcp.f32 %v5490_v45  ;;  %v5491_v1 = vadd.f32 1.0, %v5958_v62 }
 0xae7   : > { %5961 = vrcp.f32 %v5491_v1 }
 0xaef   : > { %v5960_v15 = vpop.eup %5959 }
 0xaf0   : > { %v5499_v33 = vrot.slane %v5960_v15, %v11332_v49  ;;  %v5509_v5 = vrot.slane %v5960_v15, %v11333_v61 }
 0xaf1   : > { %v5962_v29 = vpop.eup %5961 }
 0xaf2   : > { %v5503_v10 = vrot.slane %v5962_v29, %v11332_v49  ;;  %v5513_v36 = vrot.slane %v5962_v29, %v11333_v61  ;;  %v5504_v35 = vmul.f32 %v5499_v33, %v11404_v54  ;;  %v5514_v3 = vmul.f32 %v5509_v5, %v11405_v19  ;;  %v5523_v49 = vpop.permute.xlu1 %5522 }
 0xaf4   : > { %v5505_v26 = vmul.f32 %v5503_v10, %v11406_v53  ;;  %v5515_v18 = vmul.f32 %v5513_v36, %v11407_v40  ;;  %v5516_v0 = vadd.f32 %v5514_v3, %v5504_v35 }
 0xaf6   : > { %v5517_v9 = vadd.f32 %v5515_v18, %v5505_v26 }
 0xaf8   : > { %5683 = vmatprep.subr.msk.mxu0 %vm2976_vm12, %v5517_v9 }
 0xaf9   : > { %5684 = vmatpush1.msk.msra.mxu0 %vm2976_vm12, %v5516_v0 }
 0xafa   : > { %5685 = vmatmul.mubr.msk.f32.vlgmr.msra.gmra.mrb[2].mxu0 %vm4126_vm13, %v5518_v48 }
 0xbcd   : > { %v5600_v61 = vpop.f32.mrb[2].mxu0 }
 0xbce   : > { %v5601_v50 = vadd.f32 %v5600_v61, %v5523_v49  ;;  %v5602_v7 = vpop.f32.mrb[3].mxu0 }
 0xbcf   : > { %v5603_v46 = vadd.f32 %v5602_v7, %v5523_v49 }
 0xbd1   : > { %v5607_v44 = vcombine.low %v5601_v50, %v5603_v46 }
 0xbd3   : > { %v5609_v57 = vmul.f32 %v5969_v42, %v5607_v44 }
 0xbd5   : > { %5610 = vst [vmem:[%s494_s27] sm:$0xff] %v5609_v57 }
 0xbd6 PF: > { %s25_s18 = sadd.s32 1, %s5976_s18  }
 0xbd7   : > { %p22_p4 = scmp.ge.s32.totalorder %s25_s18, 4  }
 0xbd9   :  { %24 = sbr.rel (!%p22_p4) target bundleno = 1 (0x1), region = 111 }

</bundles_post_ra>
